<compile_context>
chip_gen: v5e
topology: v5e:2x2
jax: 0.10.0
libtpu: 0.0.40
codegen_flags: <defaults>
</compile_context>

<pallas_src>
import functools

import jax
import jax.numpy as jnp
from jax import lax
from jax.experimental import pallas as pl
from jax.experimental.pallas import tpu as pltpu

_EPS = 1e-5                      # nn.BatchNorm2d default eps
_VMEM_LIMIT = 64 * 1024 * 1024   # raise scoped VMEM above the 16/32 MiB default


def _ceil_to(x, m):
    return -(-x // m) * m


# ------------------------------ Pallas kernels --------------------------------

def _head_kernel(lat_ref, lab_ref, pw_ref, pb_ref, wa_ref, wb_ref, g_ref, bt_ref,
                 o_ref, y_scr, *, count):
    """Label projection + ConvTranspose2d(k=4, s=1, p=0 on a 1x1 input) fused
    with train-mode BatchNorm + ReLU.  Output layout (16, B, Cout), t = oh*4+ow.
    The conv bias is omitted: it is exactly cancelled by the BN mean."""
    emb = (jnp.dot(lab_ref[...], pw_ref[...], preferred_element_type=jnp.float32)
           + pb_ref[...]).astype(lat_ref.dtype)
    lat = lat_ref[...]
    n_out = g_ref.shape[-1]

    s = jnp.zeros((1, n_out), jnp.float32)
    for t in range(16):                                   # 16 output positions
        y = (jnp.dot(lat, wa_ref[t], preferred_element_type=jnp.float32)
             + jnp.dot(emb, wb_ref[t], preferred_element_type=jnp.float32))
        y_scr[t] = y
        s = s + jnp.sum(y, axis=0, keepdims=True)
    mean = s * (1.0 / count)

    v = jnp.zeros((1, n_out), jnp.float32)
    for t in range(16):
        d = y_scr[t] - mean
        v = v + jnp.sum(d * d, axis=0, keepdims=True)
    inv = lax.rsqrt(v * (1.0 / count) + _EPS)             # biased var (train BN)

    scale = g_ref[...] * inv
    shift = bt_ref[...] - mean * scale
    for t in range(16):
        o_ref[t] = jnp.maximum(y_scr[t] * scale + shift, 0.0).astype(o_ref.dtype)


def _poly_bn_relu_kernel(x_ref, w_ref, g_ref, bt_ref, o_ref, y_scr, *, count):
    """ConvTranspose2d(k=4, s=2, p=1) as 4 polyphase stride-1 sub-conv matmuls,
    fused with train-mode BatchNorm (stats over all 4 phases) + ReLU."""
    n_out = g_ref.shape[-1]

    s = jnp.zeros((1, n_out), jnp.float32)
    for p in range(4):
        y = jnp.dot(x_ref[p], w_ref[p], preferred_element_type=jnp.float32)
        y_scr[p] = y
        s = s + jnp.sum(y, axis=0, keepdims=True)
    mean = s * (1.0 / count)

    v = jnp.zeros((1, n_out), jnp.float32)
    for p in range(4):
        d = y_scr[p] - mean
        v = v + jnp.sum(d * d, axis=0, keepdims=True)
    inv = lax.rsqrt(v * (1.0 / count) + _EPS)

    scale = g_ref[...] * inv
    shift = bt_ref[...] - mean * scale
    for p in range(4):
        o_ref[p] = jnp.maximum(y_scr[p] * scale + shift, 0.0).astype(o_ref.dtype)


def _final_tanh_kernel(x_ref, w_ref, b_ref, o_ref):
    """Final ConvTranspose2d + bias + tanh.  Transposed (lane-dense) output:
    o[p] = tanh(W_p @ X_p^T + b) of shape (Cout_pad, tile_M)."""
    for p in range(4):
        y = lax.dot_general(w_ref[p], x_ref[p],
                            dimension_numbers=(((1,), (1,)), ((), ())),
                            preferred_element_type=jnp.float32)
        o_ref[p] = jnp.tanh(y + b_ref[...]).astype(o_ref.dtype)


# ------------------------------ layer wrappers ---------------------------------

def _vmem_specs(n):
    return [pl.BlockSpec(memory_space=pltpu.MemorySpace.VMEM) for _ in range(n)]


def _phase_patches(x):
    """NHWC x -> (4, B*H*W, C*4) polyphase patch matrices for
    ConvTranspose2d(k=4, s=2, p=1).  phase = rh*2+rw, column = c*4 + dh*2 + dw."""
    B, H, W, C = x.shape
    xp = jnp.pad(x, ((0, 0), (1, 1), (1, 1), (0, 0)))
    phases = []
    for rh in range(2):
        for rw in range(2):
            taps = [xp[:, rh + dh:rh + dh + H, rw + dw:rw + dw + W, :]
                    for dh in range(2) for dw in range(2)]
            phases.append(jnp.stack(taps, axis=-1).reshape(B * H * W, C * 4))
    return jnp.stack(phases, axis=0)


def head_layer(latent, label, hp):
    """label proj + first ConvTranspose2d + BN + ReLU -> NHWC (B, 4, 4, C0)."""
    B = latent.shape[0]
    cout = hp["gamma"].shape[-1]
    out = pl.pallas_call(
        functools.partial(_head_kernel, count=16 * B),
        out_shape=jax.ShapeDtypeStruct((16, B, cout), jnp.bfloat16),
        in_specs=_vmem_specs(8),
        out_specs=pl.BlockSpec(memory_space=pltpu.MemorySpace.VMEM),
        scratch_shapes=[pltpu.VMEM((16, B, cout), jnp.float32)],
        compiler_params=pltpu.CompilerParams(vmem_limit_bytes=_VMEM_LIMIT),
    )(latent.astype(jnp.bfloat16), label.astype(jnp.bfloat16),
      hp["proj_w"], hp["proj_b"], hp["wa"], hp["wb"], hp["gamma"], hp["beta"])
    return out.reshape(4, 4, B, cout).transpose(2, 0, 1, 3)      # (B, 4, 4, C0)


def mid_layer(x, lp):
    """ConvTranspose2d(k=4,s=2,p=1) + BN + ReLU, NHWC in -> NHWC out (2x up)."""
    B, H, W, _ = x.shape
    cout = lp["gamma"].shape[-1]
    M = B * H * W
    pat = _phase_patches(x)                                      # bf16 (4, M, C*4)
    out = pl.pallas_call(
        functools.partial(_poly_bn_relu_kernel, count=4 * M),
        out_shape=jax.ShapeDtypeStruct((4, M, cout), jnp.bfloat16),
        in_specs=_vmem_specs(4),
        out_specs=pl.BlockSpec(memory_space=pltpu.MemorySpace.VMEM),
        scratch_shapes=[pltpu.VMEM((4, M, cout), jnp.float32)],
        compiler_params=pltpu.CompilerParams(vmem_limit_bytes=_VMEM_LIMIT),
    )(pat, lp["w"], lp["gamma"], lp["beta"])
    out = out.reshape(2, 2, B, H, W, cout).transpose(2, 3, 0, 4, 1, 5)
    return out.reshape(B, 2 * H, 2 * W, cout)                    # NHWC


def final_layer(x, fp):
    """Final ConvTranspose2d(k=4,s=2,p=1) + Tanh, lane-dense output, gridded
    over M with parallel semantics.  NHWC in -> NCHW out."""
    B, H, W, C = x.shape
    cout, ncp, K = fp["cout"], fp["w"].shape[1], C * 4
    M = B * H * W
    pat = _phase_patches(x)                                      # (4, M, K) bf16

    tm = M
    for t in (2048, 1024, 512, 256, 128):
        if M % t == 0:
            tm = t
            break

    out = pl.pallas_call(
        _final_tanh_kernel,
        out_shape=jax.ShapeDtypeStruct((4, ncp, M), jnp.float32),
        grid=(M // tm,),
        in_specs=[
            pl.BlockSpec((4, tm, K), lambda i: (0, i, 0)),
            pl.BlockSpec((4, ncp, K), lambda i: (0, 0, 0)),
            pl.BlockSpec((ncp, 1), lambda i: (0, 0)),
        ],
        out_specs=pl.BlockSpec((4, ncp, tm), lambda i: (0, 0, i)),
        compiler_params=pltpu.CompilerParams(
            dimension_semantics=("parallel",), vmem_limit_bytes=_VMEM_LIMIT),
    )(pat, fp["w"], fp["b"])

    out = out[:, :cout, :].reshape(2, 2, cout, B, H, W).transpose(3, 2, 4, 0, 5, 1)
    return out.reshape(B, cout, 2 * H, 2 * W)                    # NCHW


# ------------------------------ parameters -------------------------------------

def init_raw_params(key, cfg):
    """Random parameters in the PyTorch ConvGenerator layout."""
    latent_dim, mid, out_ch = cfg["latent_dim"], cfg["mid_channels"], cfg["out_channel"]
    ncls, pdim = cfg["num_classes"], cfg["proj_dim"]
    # TODO(synk): img_size == 28 branch (kernel_size=3 layers) not implemented.
    assert cfg["img_size"] != 28
    ks = iter(jax.random.split(key, 64))

    def rnd(shape, fan_in):
        return jax.random.normal(next(ks), shape, jnp.float32) / jnp.sqrt(float(fan_in))

    raw = {"proj_w": rnd((ncls, pdim), ncls), "proj_b": rnd((pdim,), ncls), "layers": []}
    chans = [latent_dim + pdim] + list(mid) + [out_ch]
    for i in range(len(chans) - 1):
        cin, cout = chans[i], chans[i + 1]
        layer = {"w": rnd((cin, cout, 4, 4), cin * 16), "b": rnd((cout,), cin * 16)}
        if i < len(chans) - 2:
            layer["gamma"] = jnp.ones((cout,), jnp.float32)
            layer["beta"] = jnp.zeros((cout,), jnp.float32)
        raw["layers"].append(layer)
    return raw


def _phase_weight_mats(w):
    """ConvTranspose2d weight (Cin, Cout, 4, 4) -> (4, Cin*4, Cout) polyphase
    sub-conv matrices; phase = rh*2+rw, row = ci*4 + dh*2 + dw,
    tap (dh, dw) uses kernel element (3 - rh - 2*dh, 3 - rw - 2*dw)."""
    cin, cout = w.shape[:2]
    mats = []
    for rh in range(2):
        for rw in range(2):
            sub = w[:, :, 3 - rh::-2, 3 - rw::-2]           # (Cin, Cout, 2, 2)
            mats.append(sub.transpose(0, 2, 3, 1).reshape(cin * 4, cout))
    return jnp.stack(mats, axis=0)


def prepare_params(raw, cfg):
    """One-time re-layout of parameters into kernel-ready (bf16) form."""
    latent_dim = cfg["latent_dim"]
    layers = raw["layers"]

    w0 = layers[0]["w"]                                      # (Cin0, Cout0, 4, 4)
    cin0, cout0 = w0.shape[:2]
    w0m = w0.transpose(2, 3, 0, 1).reshape(16, cin0, cout0)  # t = oh*4 + ow
    head = {
        "proj_w": raw["proj_w"].astype(jnp.bfloat16),
        "proj_b": raw["proj_b"].reshape(1, -1).astype(jnp.float32),
        "wa": w0m[:, :latent_dim, :].astype(jnp.bfloat16),   # latent part
        "wb": w0m[:, latent_dim:, :].astype(jnp.bfloat16),   # label-embedding part
        "gamma": layers[0]["gamma"].reshape(1, -1),
        "beta": layers[0]["beta"].reshape(1, -1),
        # conv bias dropped: cancelled exactly by train-mode BN mean subtraction
    }

    mid = []
    for layer in layers[1:-1]:
        mid.append({
            "w": _phase_weight_mats(layer["w"]).astype(jnp.bfloat16),
            "gamma": layer["gamma"].reshape(1, -1),
            "beta": layer["beta"].reshape(1, -1),
        })

    wl, bl = layers[-1]["w"], layers[-1]["b"]
    cout = wl.shape[1]
    ncp = _ceil_to(cout, 8)
    wt = _phase_weight_mats(wl).transpose(0, 2, 1)           # (4, Cout, Cin*4)
    wt = jnp.pad(wt, ((0, 0), (0, ncp - cout), (0, 0))).astype(jnp.bfloat16)
    bt = jnp.pad(bl, (0, ncp - cout)).reshape(ncp, 1).astype(jnp.float32)
    final = {"w": wt, "b": bt, "cout": cout}

    return {"head": head, "mid": mid, "final": final}


# ------------------------------ forward -----------------------------------------

def conv_generator_forward(params, latent, label):
    """latent: (B, latent_dim) or (B, latent_dim, 1, 1); label: (B, num_classes).
    Returns NCHW (B, out_channel, img_size, img_size)."""
    if latent.ndim == 4:
        latent = latent.reshape(latent.shape[0], latent.shape[1])
    x = head_layer(latent, label, params["head"])            # NHWC (B, 4, 4, C0)
    for lp in params["mid"]:
        x = mid_layer(x, lp)                                 # NHWC, spatial x2
    return final_layer(x, params["final"])                   # NCHW


# ------------------------------ pure-JAX reference -------------------------------

def _convt_ref(x, w, b, s, p):
    k = w.shape[2]
    y = lax.conv_general_dilated(
        x.astype(jnp.bfloat16),
        jnp.flip(w, (2, 3)).transpose(1, 0, 2, 3).astype(jnp.bfloat16),
        window_strides=(1, 1), padding=[(k - 1 - p,) * 2] * 2,
        lhs_dilation=(s, s), dimension_numbers=("NCHW", "OIHW", "NCHW"),
        preferred_element_type=jnp.float32)
    return y + b[None, :, None, None]


def _bn_relu_ref(x, gamma, beta):
    mean = jnp.mean(x, axis=(0, 2, 3), keepdims=True)
    var = jnp.mean((x - mean) ** 2, axis=(0, 2, 3), keepdims=True)
    y = (x - mean) * lax.rsqrt(var + _EPS)
    return jnp.maximum(y * gamma[None, :, None, None] + beta[None, :, None, None], 0.0)


def reference_forward(raw, latent, label):
    if latent.ndim != 4:
        latent = latent[:, :, None, None]
    emb = (jnp.dot(label.astype(jnp.bfloat16), raw["proj_w"].astype(jnp.bfloat16),
                   preferred_element_type=jnp.float32) + raw["proj_b"])
    x = jnp.concatenate([latent, emb[:, :, None, None]], axis=1)
    layers = raw["layers"]
    x = _bn_relu_ref(_convt_ref(x, layers[0]["w"], layers[0]["b"], 1, 0),
                     layers[0]["gamma"], layers[0]["beta"])
    for layer in layers[1:-1]:
        x = _bn_relu_ref(_convt_ref(x, layer["w"], layer["b"], 2, 1),
                         layer["gamma"], layer["beta"])
    return jnp.tanh(_convt_ref(x, layers[-1]["w"], layers[-1]["b"], 2, 1))


# ------------------------------ demo ---------------------------------------------

if __name__ == "__main__":
    cfg = dict(latent_dim=16, mid_channels=[32, 16, 8], out_channel=3,
               num_classes=10, proj_dim=8, img_size=32)
    key = jax.random.PRNGKey(0)
    kp, kl, ky = jax.random.split(key, 3)
    raw = init_raw_params(kp, cfg)
    params = prepare_params(raw, cfg)

    B = 2
    latent = jax.random.normal(kl, (B, cfg["latent_dim"]), jnp.float32)
    label = jax.nn.one_hot(
        jax.random.randint(ky, (B,), 0, cfg["num_classes"]), cfg["num_classes"]
    ).astype(jnp.float32)

    fwd = jax.jit(functools.partial(conv_generator_forward, params))
    out = jax.block_until_ready(fwd(latent, label))

    assert out.shape == (B, cfg["out_channel"], cfg["img_size"], cfg["img_size"]), out.shape
    assert bool(jnp.all(jnp.isfinite(out)))
    assert bool(jnp.all(jnp.abs(out) <= 1.0))        # tanh output range

    # Pure-JAX reference (same bf16 quantization points); catches any polyphase /
    # layout / BN error, which would show up as O(0.5) mismatches.
    ref = jax.block_until_ready(
        jax.jit(functools.partial(reference_forward, raw))(latent, label))
    max_err = float(jnp.max(jnp.abs(out - ref)))
    mean_err = float(jnp.mean(jnp.abs(out - ref)))
    assert max_err < 0.15 and mean_err < 0.02, (max_err, mean_err)

    print("KERNEL_OK")
</pallas_src>

<mosaic_0001>
module attributes {stable_mosaic.version = 11 : i64} {
  func.func @_head_kernel(%arg0: memref<2x16xbf16, #tpu.memory_space<vmem>>, %arg1: memref<2x10xbf16, #tpu.memory_space<vmem>>, %arg2: memref<10x8xbf16, #tpu.memory_space<vmem>>, %arg3: memref<1x8xf32, #tpu.memory_space<vmem>>, %arg4: memref<16x16x32xbf16, #tpu.memory_space<vmem>>, %arg5: memref<16x8x32xbf16, #tpu.memory_space<vmem>>, %arg6: memref<1x32xf32, #tpu.memory_space<vmem>>, %arg7: memref<1x32xf32, #tpu.memory_space<vmem>>, %arg8: memref<16x2x32xbf16, #tpu.memory_space<vmem>>, %arg9: memref<16x2x32xf32, #tpu.memory_space<vmem>>) attributes {dimension_semantics = [], scalar_prefetch = 0 : i64, scratch_operands = 1 : i64, tpu.core_type = #tpu.core_type<tc>} {
    %c0 = arith.constant 0 : index
    %c0_0 = arith.constant 0 : index
    %0 = vector.load %arg1[%c0, %c0_0] : memref<2x10xbf16, #tpu.memory_space<vmem>>, vector<2x10xbf16>
    %c0_1 = arith.constant 0 : index
    %c0_2 = arith.constant 0 : index
    %1 = vector.load %arg2[%c0_1, %c0_2] : memref<10x8xbf16, #tpu.memory_space<vmem>>, vector<10x8xbf16>
    %cst = arith.constant dense<0.000000e+00> : vector<2x8xf32>
    %2 = tpu.matmul %0, %1, %cst {dimension_numbers = #tpu.dot_dimension_numbers<[1], [0], [0], [1], [0, 0, 1, 1], [], []>} : vector<2x10xbf16>, vector<10x8xbf16>, vector<2x8xf32> -> vector<2x8xf32>
    %c0_3 = arith.constant 0 : index
    %c0_4 = arith.constant 0 : index
    %3 = vector.load %arg3[%c0_3, %c0_4] : memref<1x8xf32, #tpu.memory_space<vmem>>, vector<1x8xf32>
    %4 = vector.broadcast %3 : vector<1x8xf32> to vector<2x8xf32>
    %5 = arith.addf %2, %4 : vector<2x8xf32>
    %6 = arith.truncf %5 : vector<2x8xf32> to vector<2x8xbf16>
    %c0_5 = arith.constant 0 : index
    %c0_6 = arith.constant 0 : index
    %7 = vector.load %arg0[%c0_5, %c0_6] : memref<2x16xbf16, #tpu.memory_space<vmem>>, vector<2x16xbf16>
    %cst_7 = arith.constant 0.000000e+00 : f32
    %8 = vector.broadcast %cst_7 : f32 to vector<1x32xf32>
    %c0_8 = arith.constant 0 : index
    %c0_9 = arith.constant 0 : index
    %c0_10 = arith.constant 0 : index
    %9 = vector.load %arg4[%c0_8, %c0_9, %c0_10] : memref<16x16x32xbf16, #tpu.memory_space<vmem>>, vector<1x16x32xbf16>
    %10 = vector.shape_cast %9 : vector<1x16x32xbf16> to vector<16x32xbf16>
    %cst_11 = arith.constant dense<0.000000e+00> : vector<2x32xf32>
    %11 = tpu.matmul %7, %10, %cst_11 {dimension_numbers = #tpu.dot_dimension_numbers<[1], [0], [0], [1], [0, 0, 1, 1], [], []>} : vector<2x16xbf16>, vector<16x32xbf16>, vector<2x32xf32> -> vector<2x32xf32>
    %c0_12 = arith.constant 0 : index
    %c0_13 = arith.constant 0 : index
    %c0_14 = arith.constant 0 : index
    %12 = vector.load %arg5[%c0_12, %c0_13, %c0_14] : memref<16x8x32xbf16, #tpu.memory_space<vmem>>, vector<1x8x32xbf16>
    %13 = vector.shape_cast %12 : vector<1x8x32xbf16> to vector<8x32xbf16>
    %cst_15 = arith.constant dense<0.000000e+00> : vector<2x32xf32>
    %14 = tpu.matmul %6, %13, %cst_15 {dimension_numbers = #tpu.dot_dimension_numbers<[1], [0], [0], [1], [0, 0, 1, 1], [], []>} : vector<2x8xbf16>, vector<8x32xbf16>, vector<2x32xf32> -> vector<2x32xf32>
    %15 = arith.addf %11, %14 : vector<2x32xf32>
    %c0_16 = arith.constant 0 : index
    %c0_17 = arith.constant 0 : index
    %c0_18 = arith.constant 0 : index
    %16 = vector.load %arg9[%c0_16, %c0_17, %c0_18] : memref<16x2x32xf32, #tpu.memory_space<vmem>>, vector<1x2x32xf32>
    %17 = vector.shape_cast %16 : vector<1x2x32xf32> to vector<2x32xf32>
    %18 = vector.shape_cast %15 : vector<2x32xf32> to vector<1x2x32xf32>
    tpu.vector_store %arg9[%c0_16, %c0_17, %c0_18], %18 {strides = array<i32>} : memref<16x2x32xf32, #tpu.memory_space<vmem>>, vector<1x2x32xf32>,
    %cst_19 = arith.constant dense<0.000000e+00> : vector<32xf32>
    %19 = vector.multi_reduction <add>, %15, %cst_19 [0] : vector<2x32xf32> to vector<32xf32>
    %20 = vector.shape_cast %19 : vector<32xf32> to vector<1x32xf32>
    %21 = arith.addf %8, %20 : vector<1x32xf32>
    %c1 = arith.constant 1 : index
    %c0_20 = arith.constant 0 : index
    %c0_21 = arith.constant 0 : index
    %22 = vector.load %arg4[%c1, %c0_20, %c0_21] : memref<16x16x32xbf16, #tpu.memory_space<vmem>>, vector<1x16x32xbf16>
    %23 = vector.shape_cast %22 : vector<1x16x32xbf16> to vector<16x32xbf16>
    %cst_22 = arith.constant dense<0.000000e+00> : vector<2x32xf32>
    %24 = tpu.matmul %7, %23, %cst_22 {dimension_numbers = #tpu.dot_dimension_numbers<[1], [0], [0], [1], [0, 0, 1, 1], [], []>} : vector<2x16xbf16>, vector<16x32xbf16>, vector<2x32xf32> -> vector<2x32xf32>
    %c1_23 = arith.constant 1 : index
    %c0_24 = arith.constant 0 : index
    %c0_25 = arith.constant 0 : index
    %25 = vector.load %arg5[%c1_23, %c0_24, %c0_25] : memref<16x8x32xbf16, #tpu.memory_space<vmem>>, vector<1x8x32xbf16>
    %26 = vector.shape_cast %25 : vector<1x8x32xbf16> to vector<8x32xbf16>
    %cst_26 = arith.constant dense<0.000000e+00> : vector<2x32xf32>
    %27 = tpu.matmul %6, %26, %cst_26 {dimension_numbers = #tpu.dot_dimension_numbers<[1], [0], [0], [1], [0, 0, 1, 1], [], []>} : vector<2x8xbf16>, vector<8x32xbf16>, vector<2x32xf32> -> vector<2x32xf32>
    %28 = arith.addf %24, %27 : vector<2x32xf32>
    %c1_27 = arith.constant 1 : index
    %c0_28 = arith.constant 0 : index
    %c0_29 = arith.constant 0 : index
    %29 = vector.load %arg9[%c1_27, %c0_28, %c0_29] : memref<16x2x32xf32, #tpu.memory_space<vmem>>, vector<1x2x32xf32>
    %30 = vector.shape_cast %29 : vector<1x2x32xf32> to vector<2x32xf32>
    %31 = vector.shape_cast %28 : vector<2x32xf32> to vector<1x2x32xf32>
    tpu.vector_store %arg9[%c1_27, %c0_28, %c0_29], %31 {strides = array<i32>} : memref<16x2x32xf32, #tpu.memory_space<vmem>>, vector<1x2x32xf32>,
    %cst_30 = arith.constant dense<0.000000e+00> : vector<32xf32>
    %32 = vector.multi_reduction <add>, %28, %cst_30 [0] : vector<2x32xf32> to vector<32xf32>
    %33 = vector.shape_cast %32 : vector<32xf32> to vector<1x32xf32>
    %34 = arith.addf %21, %33 : vector<1x32xf32>
    %c2 = arith.constant 2 : index
    %c0_31 = arith.constant 0 : index
    %c0_32 = arith.constant 0 : index
    %35 = vector.load %arg4[%c2, %c0_31, %c0_32] : memref<16x16x32xbf16, #tpu.memory_space<vmem>>, vector<1x16x32xbf16>
    %36 = vector.shape_cast %35 : vector<1x16x32xbf16> to vector<16x32xbf16>
    %cst_33 = arith.constant dense<0.000000e+00> : vector<2x32xf32>
    %37 = tpu.matmul %7, %36, %cst_33 {dimension_numbers = #tpu.dot_dimension_numbers<[1], [0], [0], [1], [0, 0, 1, 1], [], []>} : vector<2x16xbf16>, vector<16x32xbf16>, vector<2x32xf32> -> vector<2x32xf32>
    %c2_34 = arith.constant 2 : index
    %c0_35 = arith.constant 0 : index
    %c0_36 = arith.constant 0 : index
    %38 = vector.load %arg5[%c2_34, %c0_35, %c0_36] : memref<16x8x32xbf16, #tpu.memory_space<vmem>>, vector<1x8x32xbf16>
    %39 = vector.shape_cast %38 : vector<1x8x32xbf16> to vector<8x32xbf16>
    %cst_37 = arith.constant dense<0.000000e+00> : vector<2x32xf32>
    %40 = tpu.matmul %6, %39, %cst_37 {dimension_numbers = #tpu.dot_dimension_numbers<[1], [0], [0], [1], [0, 0, 1, 1], [], []>} : vector<2x8xbf16>, vector<8x32xbf16>, vector<2x32xf32> -> vector<2x32xf32>
    %41 = arith.addf %37, %40 : vector<2x32xf32>
    %c2_38 = arith.constant 2 : index
    %c0_39 = arith.constant 0 : index
    %c0_40 = arith.constant 0 : index
    %42 = vector.load %arg9[%c2_38, %c0_39, %c0_40] : memref<16x2x32xf32, #tpu.memory_space<vmem>>, vector<1x2x32xf32>
    %43 = vector.shape_cast %42 : vector<1x2x32xf32> to vector<2x32xf32>
    %44 = vector.shape_cast %41 : vector<2x32xf32> to vector<1x2x32xf32>
    tpu.vector_store %arg9[%c2_38, %c0_39, %c0_40], %44 {strides = array<i32>} : memref<16x2x32xf32, #tpu.memory_space<vmem>>, vector<1x2x32xf32>,
    %cst_41 = arith.constant dense<0.000000e+00> : vector<32xf32>
    %45 = vector.multi_reduction <add>, %41, %cst_41 [0] : vector<2x32xf32> to vector<32xf32>
    %46 = vector.shape_cast %45 : vector<32xf32> to vector<1x32xf32>
    %47 = arith.addf %34, %46 : vector<1x32xf32>
    %c3 = arith.constant 3 : index
    %c0_42 = arith.constant 0 : index
    %c0_43 = arith.constant 0 : index
    %48 = vector.load %arg4[%c3, %c0_42, %c0_43] : memref<16x16x32xbf16, #tpu.memory_space<vmem>>, vector<1x16x32xbf16>
    %49 = vector.shape_cast %48 : vector<1x16x32xbf16> to vector<16x32xbf16>
    %cst_44 = arith.constant dense<0.000000e+00> : vector<2x32xf32>
    %50 = tpu.matmul %7, %49, %cst_44 {dimension_numbers = #tpu.dot_dimension_numbers<[1], [0], [0], [1], [0, 0, 1, 1], [], []>} : vector<2x16xbf16>, vector<16x32xbf16>, vector<2x32xf32> -> vector<2x32xf32>
    %c3_45 = arith.constant 3 : index
    %c0_46 = arith.constant 0 : index
    %c0_47 = arith.constant 0 : index
    %51 = vector.load %arg5[%c3_45, %c0_46, %c0_47] : memref<16x8x32xbf16, #tpu.memory_space<vmem>>, vector<1x8x32xbf16>
    %52 = vector.shape_cast %51 : vector<1x8x32xbf16> to vector<8x32xbf16>
    %cst_48 = arith.constant dense<0.000000e+00> : vector<2x32xf32>
    %53 = tpu.matmul %6, %52, %cst_48 {dimension_numbers = #tpu.dot_dimension_numbers<[1], [0], [0], [1], [0, 0, 1, 1], [], []>} : vector<2x8xbf16>, vector<8x32xbf16>, vector<2x32xf32> -> vector<2x32xf32>
    %54 = arith.addf %50, %53 : vector<2x32xf32>
    %c3_49 = arith.constant 3 : index
    %c0_50 = arith.constant 0 : index
    %c0_51 = arith.constant 0 : index
    %55 = vector.load %arg9[%c3_49, %c0_50, %c0_51] : memref<16x2x32xf32, #tpu.memory_space<vmem>>, vector<1x2x32xf32>
    %56 = vector.shape_cast %55 : vector<1x2x32xf32> to vector<2x32xf32>
    %57 = vector.shape_cast %54 : vector<2x32xf32> to vector<1x2x32xf32>
    tpu.vector_store %arg9[%c3_49, %c0_50, %c0_51], %57 {strides = array<i32>} : memref<16x2x32xf32, #tpu.memory_space<vmem>>, vector<1x2x32xf32>,
    %cst_52 = arith.constant dense<0.000000e+00> : vector<32xf32>
    %58 = vector.multi_reduction <add>, %54, %cst_52 [0] : vector<2x32xf32> to vector<32xf32>
    %59 = vector.shape_cast %58 : vector<32xf32> to vector<1x32xf32>
    %60 = arith.addf %47, %59 : vector<1x32xf32>
    %c4 = arith.constant 4 : index
    %c0_53 = arith.constant 0 : index
    %c0_54 = arith.constant 0 : index
    %61 = vector.load %arg4[%c4, %c0_53, %c0_54] : memref<16x16x32xbf16, #tpu.memory_space<vmem>>, vector<1x16x32xbf16>
    %62 = vector.shape_cast %61 : vector<1x16x32xbf16> to vector<16x32xbf16>
    %cst_55 = arith.constant dense<0.000000e+00> : vector<2x32xf32>
    %63 = tpu.matmul %7, %62, %cst_55 {dimension_numbers = #tpu.dot_dimension_numbers<[1], [0], [0], [1], [0, 0, 1, 1], [], []>} : vector<2x16xbf16>, vector<16x32xbf16>, vector<2x32xf32> -> vector<2x32xf32>
    %c4_56 = arith.constant 4 : index
    %c0_57 = arith.constant 0 : index
    %c0_58 = arith.constant 0 : index
    %64 = vector.load %arg5[%c4_56, %c0_57, %c0_58] : memref<16x8x32xbf16, #tpu.memory_space<vmem>>, vector<1x8x32xbf16>
    %65 = vector.shape_cast %64 : vector<1x8x32xbf16> to vector<8x32xbf16>
    %cst_59 = arith.constant dense<0.000000e+00> : vector<2x32xf32>
    %66 = tpu.matmul %6, %65, %cst_59 {dimension_numbers = #tpu.dot_dimension_numbers<[1], [0], [0], [1], [0, 0, 1, 1], [], []>} : vector<2x8xbf16>, vector<8x32xbf16>, vector<2x32xf32> -> vector<2x32xf32>
    %67 = arith.addf %63, %66 : vector<2x32xf32>
    %c4_60 = arith.constant 4 : index
    %c0_61 = arith.constant 0 : index
    %c0_62 = arith.constant 0 : index
    %68 = vector.load %arg9[%c4_60, %c0_61, %c0_62] : memref<16x2x32xf32, #tpu.memory_space<vmem>>, vector<1x2x32xf32>
    %69 = vector.shape_cast %68 : vector<1x2x32xf32> to vector<2x32xf32>
    %70 = vector.shape_cast %67 : vector<2x32xf32> to vector<1x2x32xf32>
    tpu.vector_store %arg9[%c4_60, %c0_61, %c0_62], %70 {strides = array<i32>} : memref<16x2x32xf32, #tpu.memory_space<vmem>>, vector<1x2x32xf32>,
    %cst_63 = arith.constant dense<0.000000e+00> : vector<32xf32>
    %71 = vector.multi_reduction <add>, %67, %cst_63 [0] : vector<2x32xf32> to vector<32xf32>
    %72 = vector.shape_cast %71 : vector<32xf32> to vector<1x32xf32>
    %73 = arith.addf %60, %72 : vector<1x32xf32>
    %c5 = arith.constant 5 : index
    %c0_64 = arith.constant 0 : index
    %c0_65 = arith.constant 0 : index
    %74 = vector.load %arg4[%c5, %c0_64, %c0_65] : memref<16x16x32xbf16, #tpu.memory_space<vmem>>, vector<1x16x32xbf16>
    %75 = vector.shape_cast %74 : vector<1x16x32xbf16> to vector<16x32xbf16>
    %cst_66 = arith.constant dense<0.000000e+00> : vector<2x32xf32>
    %76 = tpu.matmul %7, %75, %cst_66 {dimension_numbers = #tpu.dot_dimension_numbers<[1], [0], [0], [1], [0, 0, 1, 1], [], []>} : vector<2x16xbf16>, vector<16x32xbf16>, vector<2x32xf32> -> vector<2x32xf32>
    %c5_67 = arith.constant 5 : index
    %c0_68 = arith.constant 0 : index
    %c0_69 = arith.constant 0 : index
    %77 = vector.load %arg5[%c5_67, %c0_68, %c0_69] : memref<16x8x32xbf16, #tpu.memory_space<vmem>>, vector<1x8x32xbf16>
    %78 = vector.shape_cast %77 : vector<1x8x32xbf16> to vector<8x32xbf16>
    %cst_70 = arith.constant dense<0.000000e+00> : vector<2x32xf32>
    %79 = tpu.matmul %6, %78, %cst_70 {dimension_numbers = #tpu.dot_dimension_numbers<[1], [0], [0], [1], [0, 0, 1, 1], [], []>} : vector<2x8xbf16>, vector<8x32xbf16>, vector<2x32xf32> -> vector<2x32xf32>
    %80 = arith.addf %76, %79 : vector<2x32xf32>
    %c5_71 = arith.constant 5 : index
    %c0_72 = arith.constant 0 : index
    %c0_73 = arith.constant 0 : index
    %81 = vector.load %arg9[%c5_71, %c0_72, %c0_73] : memref<16x2x32xf32, #tpu.memory_space<vmem>>, vector<1x2x32xf32>
    %82 = vector.shape_cast %81 : vector<1x2x32xf32> to vector<2x32xf32>
    %83 = vector.shape_cast %80 : vector<2x32xf32> to vector<1x2x32xf32>
    tpu.vector_store %arg9[%c5_71, %c0_72, %c0_73], %83 {strides = array<i32>} : memref<16x2x32xf32, #tpu.memory_space<vmem>>, vector<1x2x32xf32>,
    %cst_74 = arith.constant dense<0.000000e+00> : vector<32xf32>
    %84 = vector.multi_reduction <add>, %80, %cst_74 [0] : vector<2x32xf32> to vector<32xf32>
    %85 = vector.shape_cast %84 : vector<32xf32> to vector<1x32xf32>
    %86 = arith.addf %73, %85 : vector<1x32xf32>
    %c6 = arith.constant 6 : index
    %c0_75 = arith.constant 0 : index
    %c0_76 = arith.constant 0 : index
    %87 = vector.load %arg4[%c6, %c0_75, %c0_76] : memref<16x16x32xbf16, #tpu.memory_space<vmem>>, vector<1x16x32xbf16>
    %88 = vector.shape_cast %87 : vector<1x16x32xbf16> to vector<16x32xbf16>
    %cst_77 = arith.constant dense<0.000000e+00> : vector<2x32xf32>
    %89 = tpu.matmul %7, %88, %cst_77 {dimension_numbers = #tpu.dot_dimension_numbers<[1], [0], [0], [1], [0, 0, 1, 1], [], []>} : vector<2x16xbf16>, vector<16x32xbf16>, vector<2x32xf32> -> vector<2x32xf32>
    %c6_78 = arith.constant 6 : index
    %c0_79 = arith.constant 0 : index
    %c0_80 = arith.constant 0 : index
    %90 = vector.load %arg5[%c6_78, %c0_79, %c0_80] : memref<16x8x32xbf16, #tpu.memory_space<vmem>>, vector<1x8x32xbf16>
    %91 = vector.shape_cast %90 : vector<1x8x32xbf16> to vector<8x32xbf16>
    %cst_81 = arith.constant dense<0.000000e+00> : vector<2x32xf32>
    %92 = tpu.matmul %6, %91, %cst_81 {dimension_numbers = #tpu.dot_dimension_numbers<[1], [0], [0], [1], [0, 0, 1, 1], [], []>} : vector<2x8xbf16>, vector<8x32xbf16>, vector<2x32xf32> -> vector<2x32xf32>
    %93 = arith.addf %89, %92 : vector<2x32xf32>
    %c6_82 = arith.constant 6 : index
    %c0_83 = arith.constant 0 : index
    %c0_84 = arith.constant 0 : index
    %94 = vector.load %arg9[%c6_82, %c0_83, %c0_84] : memref<16x2x32xf32, #tpu.memory_space<vmem>>, vector<1x2x32xf32>
    %95 = vector.shape_cast %94 : vector<1x2x32xf32> to vector<2x32xf32>
    %96 = vector.shape_cast %93 : vector<2x32xf32> to vector<1x2x32xf32>
    tpu.vector_store %arg9[%c6_82, %c0_83, %c0_84], %96 {strides = array<i32>} : memref<16x2x32xf32, #tpu.memory_space<vmem>>, vector<1x2x32xf32>,
    %cst_85 = arith.constant dense<0.000000e+00> : vector<32xf32>
    %97 = vector.multi_reduction <add>, %93, %cst_85 [0] : vector<2x32xf32> to vector<32xf32>
    %98 = vector.shape_cast %97 : vector<32xf32> to vector<1x32xf32>
    %99 = arith.addf %86, %98 : vector<1x32xf32>
    %c7 = arith.constant 7 : index
    %c0_86 = arith.constant 0 : index
    %c0_87 = arith.constant 0 : index
    %100 = vector.load %arg4[%c7, %c0_86, %c0_87] : memref<16x16x32xbf16, #tpu.memory_space<vmem>>, vector<1x16x32xbf16>
    %101 = vector.shape_cast %100 : vector<1x16x32xbf16> to vector<16x32xbf16>
    %cst_88 = arith.constant dense<0.000000e+00> : vector<2x32xf32>
    %102 = tpu.matmul %7, %101, %cst_88 {dimension_numbers = #tpu.dot_dimension_numbers<[1], [0], [0], [1], [0, 0, 1, 1], [], []>} : vector<2x16xbf16>, vector<16x32xbf16>, vector<2x32xf32> -> vector<2x32xf32>
    %c7_89 = arith.constant 7 : index
    %c0_90 = arith.constant 0 : index
    %c0_91 = arith.constant 0 : index
    %103 = vector.load %arg5[%c7_89, %c0_90, %c0_91] : memref<16x8x32xbf16, #tpu.memory_space<vmem>>, vector<1x8x32xbf16>
    %104 = vector.shape_cast %103 : vector<1x8x32xbf16> to vector<8x32xbf16>
    %cst_92 = arith.constant dense<0.000000e+00> : vector<2x32xf32>
    %105 = tpu.matmul %6, %104, %cst_92 {dimension_numbers = #tpu.dot_dimension_numbers<[1], [0], [0], [1], [0, 0, 1, 1], [], []>} : vector<2x8xbf16>, vector<8x32xbf16>, vector<2x32xf32> -> vector<2x32xf32>
    %106 = arith.addf %102, %105 : vector<2x32xf32>
    %c7_93 = arith.constant 7 : index
    %c0_94 = arith.constant 0 : index
    %c0_95 = arith.constant 0 : index
    %107 = vector.load %arg9[%c7_93, %c0_94, %c0_95] : memref<16x2x32xf32, #tpu.memory_space<vmem>>, vector<1x2x32xf32>
    %108 = vector.shape_cast %107 : vector<1x2x32xf32> to vector<2x32xf32>
    %109 = vector.shape_cast %106 : vector<2x32xf32> to vector<1x2x32xf32>
    tpu.vector_store %arg9[%c7_93, %c0_94, %c0_95], %109 {strides = array<i32>} : memref<16x2x32xf32, #tpu.memory_space<vmem>>, vector<1x2x32xf32>,
    %cst_96 = arith.constant dense<0.000000e+00> : vector<32xf32>
    %110 = vector.multi_reduction <add>, %106, %cst_96 [0] : vector<2x32xf32> to vector<32xf32>
    %111 = vector.shape_cast %110 : vector<32xf32> to vector<1x32xf32>
    %112 = arith.addf %99, %111 : vector<1x32xf32>
    %c8 = arith.constant 8 : index
    %c0_97 = arith.constant 0 : index
    %c0_98 = arith.constant 0 : index
    %113 = vector.load %arg4[%c8, %c0_97, %c0_98] : memref<16x16x32xbf16, #tpu.memory_space<vmem>>, vector<1x16x32xbf16>
    %114 = vector.shape_cast %113 : vector<1x16x32xbf16> to vector<16x32xbf16>
    %cst_99 = arith.constant dense<0.000000e+00> : vector<2x32xf32>
    %115 = tpu.matmul %7, %114, %cst_99 {dimension_numbers = #tpu.dot_dimension_numbers<[1], [0], [0], [1], [0, 0, 1, 1], [], []>} : vector<2x16xbf16>, vector<16x32xbf16>, vector<2x32xf32> -> vector<2x32xf32>
    %c8_100 = arith.constant 8 : index
    %c0_101 = arith.constant 0 : index
    %c0_102 = arith.constant 0 : index
    %116 = vector.load %arg5[%c8_100, %c0_101, %c0_102] : memref<16x8x32xbf16, #tpu.memory_space<vmem>>, vector<1x8x32xbf16>
    %117 = vector.shape_cast %116 : vector<1x8x32xbf16> to vector<8x32xbf16>
    %cst_103 = arith.constant dense<0.000000e+00> : vector<2x32xf32>
    %118 = tpu.matmul %6, %117, %cst_103 {dimension_numbers = #tpu.dot_dimension_numbers<[1], [0], [0], [1], [0, 0, 1, 1], [], []>} : vector<2x8xbf16>, vector<8x32xbf16>, vector<2x32xf32> -> vector<2x32xf32>
    %119 = arith.addf %115, %118 : vector<2x32xf32>
    %c8_104 = arith.constant 8 : index
    %c0_105 = arith.constant 0 : index
    %c0_106 = arith.constant 0 : index
    %120 = vector.load %arg9[%c8_104, %c0_105, %c0_106] : memref<16x2x32xf32, #tpu.memory_space<vmem>>, vector<1x2x32xf32>
    %121 = vector.shape_cast %120 : vector<1x2x32xf32> to vector<2x32xf32>
    %122 = vector.shape_cast %119 : vector<2x32xf32> to vector<1x2x32xf32>
    tpu.vector_store %arg9[%c8_104, %c0_105, %c0_106], %122 {strides = array<i32>} : memref<16x2x32xf32, #tpu.memory_space<vmem>>, vector<1x2x32xf32>,
    %cst_107 = arith.constant dense<0.000000e+00> : vector<32xf32>
    %123 = vector.multi_reduction <add>, %119, %cst_107 [0] : vector<2x32xf32> to vector<32xf32>
    %124 = vector.shape_cast %123 : vector<32xf32> to vector<1x32xf32>
    %125 = arith.addf %112, %124 : vector<1x32xf32>
    %c9 = arith.constant 9 : index
    %c0_108 = arith.constant 0 : index
    %c0_109 = arith.constant 0 : index
    %126 = vector.load %arg4[%c9, %c0_108, %c0_109] : memref<16x16x32xbf16, #tpu.memory_space<vmem>>, vector<1x16x32xbf16>
    %127 = vector.shape_cast %126 : vector<1x16x32xbf16> to vector<16x32xbf16>
    %cst_110 = arith.constant dense<0.000000e+00> : vector<2x32xf32>
    %128 = tpu.matmul %7, %127, %cst_110 {dimension_numbers = #tpu.dot_dimension_numbers<[1], [0], [0], [1], [0, 0, 1, 1], [], []>} : vector<2x16xbf16>, vector<16x32xbf16>, vector<2x32xf32> -> vector<2x32xf32>
    %c9_111 = arith.constant 9 : index
    %c0_112 = arith.constant 0 : index
    %c0_113 = arith.constant 0 : index
    %129 = vector.load %arg5[%c9_111, %c0_112, %c0_113] : memref<16x8x32xbf16, #tpu.memory_space<vmem>>, vector<1x8x32xbf16>
    %130 = vector.shape_cast %129 : vector<1x8x32xbf16> to vector<8x32xbf16>
    %cst_114 = arith.constant dense<0.000000e+00> : vector<2x32xf32>
    %131 = tpu.matmul %6, %130, %cst_114 {dimension_numbers = #tpu.dot_dimension_numbers<[1], [0], [0], [1], [0, 0, 1, 1], [], []>} : vector<2x8xbf16>, vector<8x32xbf16>, vector<2x32xf32> -> vector<2x32xf32>
    %132 = arith.addf %128, %131 : vector<2x32xf32>
    %c9_115 = arith.constant 9 : index
    %c0_116 = arith.constant 0 : index
    %c0_117 = arith.constant 0 : index
    %133 = vector.load %arg9[%c9_115, %c0_116, %c0_117] : memref<16x2x32xf32, #tpu.memory_space<vmem>>, vector<1x2x32xf32>
    %134 = vector.shape_cast %133 : vector<1x2x32xf32> to vector<2x32xf32>
    %135 = vector.shape_cast %132 : vector<2x32xf32> to vector<1x2x32xf32>
    tpu.vector_store %arg9[%c9_115, %c0_116, %c0_117], %135 {strides = array<i32>} : memref<16x2x32xf32, #tpu.memory_space<vmem>>, vector<1x2x32xf32>,
    %cst_118 = arith.constant dense<0.000000e+00> : vector<32xf32>
    %136 = vector.multi_reduction <add>, %132, %cst_118 [0] : vector<2x32xf32> to vector<32xf32>
    %137 = vector.shape_cast %136 : vector<32xf32> to vector<1x32xf32>
    %138 = arith.addf %125, %137 : vector<1x32xf32>
    %c10 = arith.constant 10 : index
    %c0_119 = arith.constant 0 : index
    %c0_120 = arith.constant 0 : index
    %139 = vector.load %arg4[%c10, %c0_119, %c0_120] : memref<16x16x32xbf16, #tpu.memory_space<vmem>>, vector<1x16x32xbf16>
    %140 = vector.shape_cast %139 : vector<1x16x32xbf16> to vector<16x32xbf16>
    %cst_121 = arith.constant dense<0.000000e+00> : vector<2x32xf32>
    %141 = tpu.matmul %7, %140, %cst_121 {dimension_numbers = #tpu.dot_dimension_numbers<[1], [0], [0], [1], [0, 0, 1, 1], [], []>} : vector<2x16xbf16>, vector<16x32xbf16>, vector<2x32xf32> -> vector<2x32xf32>
    %c10_122 = arith.constant 10 : index
    %c0_123 = arith.constant 0 : index
    %c0_124 = arith.constant 0 : index
    %142 = vector.load %arg5[%c10_122, %c0_123, %c0_124] : memref<16x8x32xbf16, #tpu.memory_space<vmem>>, vector<1x8x32xbf16>
    %143 = vector.shape_cast %142 : vector<1x8x32xbf16> to vector<8x32xbf16>
    %cst_125 = arith.constant dense<0.000000e+00> : vector<2x32xf32>
    %144 = tpu.matmul %6, %143, %cst_125 {dimension_numbers = #tpu.dot_dimension_numbers<[1], [0], [0], [1], [0, 0, 1, 1], [], []>} : vector<2x8xbf16>, vector<8x32xbf16>, vector<2x32xf32> -> vector<2x32xf32>
    %145 = arith.addf %141, %144 : vector<2x32xf32>
    %c10_126 = arith.constant 10 : index
    %c0_127 = arith.constant 0 : index
    %c0_128 = arith.constant 0 : index
    %146 = vector.load %arg9[%c10_126, %c0_127, %c0_128] : memref<16x2x32xf32, #tpu.memory_space<vmem>>, vector<1x2x32xf32>
    %147 = vector.shape_cast %146 : vector<1x2x32xf32> to vector<2x32xf32>
    %148 = vector.shape_cast %145 : vector<2x32xf32> to vector<1x2x32xf32>
    tpu.vector_store %arg9[%c10_126, %c0_127, %c0_128], %148 {strides = array<i32>} : memref<16x2x32xf32, #tpu.memory_space<vmem>>, vector<1x2x32xf32>,
    %cst_129 = arith.constant dense<0.000000e+00> : vector<32xf32>
    %149 = vector.multi_reduction <add>, %145, %cst_129 [0] : vector<2x32xf32> to vector<32xf32>
    %150 = vector.shape_cast %149 : vector<32xf32> to vector<1x32xf32>
    %151 = arith.addf %138, %150 : vector<1x32xf32>
    %c11 = arith.constant 11 : index
    %c0_130 = arith.constant 0 : index
    %c0_131 = arith.constant 0 : index
    %152 = vector.load %arg4[%c11, %c0_130, %c0_131] : memref<16x16x32xbf16, #tpu.memory_space<vmem>>, vector<1x16x32xbf16>
    %153 = vector.shape_cast %152 : vector<1x16x32xbf16> to vector<16x32xbf16>
    %cst_132 = arith.constant dense<0.000000e+00> : vector<2x32xf32>
    %154 = tpu.matmul %7, %153, %cst_132 {dimension_numbers = #tpu.dot_dimension_numbers<[1], [0], [0], [1], [0, 0, 1, 1], [], []>} : vector<2x16xbf16>, vector<16x32xbf16>, vector<2x32xf32> -> vector<2x32xf32>
    %c11_133 = arith.constant 11 : index
    %c0_134 = arith.constant 0 : index
    %c0_135 = arith.constant 0 : index
    %155 = vector.load %arg5[%c11_133, %c0_134, %c0_135] : memref<16x8x32xbf16, #tpu.memory_space<vmem>>, vector<1x8x32xbf16>
    %156 = vector.shape_cast %155 : vector<1x8x32xbf16> to vector<8x32xbf16>
    %cst_136 = arith.constant dense<0.000000e+00> : vector<2x32xf32>
    %157 = tpu.matmul %6, %156, %cst_136 {dimension_numbers = #tpu.dot_dimension_numbers<[1], [0], [0], [1], [0, 0, 1, 1], [], []>} : vector<2x8xbf16>, vector<8x32xbf16>, vector<2x32xf32> -> vector<2x32xf32>
    %158 = arith.addf %154, %157 : vector<2x32xf32>
    %c11_137 = arith.constant 11 : index
    %c0_138 = arith.constant 0 : index
    %c0_139 = arith.constant 0 : index
    %159 = vector.load %arg9[%c11_137, %c0_138, %c0_139] : memref<16x2x32xf32, #tpu.memory_space<vmem>>, vector<1x2x32xf32>
    %160 = vector.shape_cast %159 : vector<1x2x32xf32> to vector<2x32xf32>
    %161 = vector.shape_cast %158 : vector<2x32xf32> to vector<1x2x32xf32>
    tpu.vector_store %arg9[%c11_137, %c0_138, %c0_139], %161 {strides = array<i32>} : memref<16x2x32xf32, #tpu.memory_space<vmem>>, vector<1x2x32xf32>,
    %cst_140 = arith.constant dense<0.000000e+00> : vector<32xf32>
    %162 = vector.multi_reduction <add>, %158, %cst_140 [0] : vector<2x32xf32> to vector<32xf32>
    %163 = vector.shape_cast %162 : vector<32xf32> to vector<1x32xf32>
    %164 = arith.addf %151, %163 : vector<1x32xf32>
    %c12 = arith.constant 12 : index
    %c0_141 = arith.constant 0 : index
    %c0_142 = arith.constant 0 : index
    %165 = vector.load %arg4[%c12, %c0_141, %c0_142] : memref<16x16x32xbf16, #tpu.memory_space<vmem>>, vector<1x16x32xbf16>
    %166 = vector.shape_cast %165 : vector<1x16x32xbf16> to vector<16x32xbf16>
    %cst_143 = arith.constant dense<0.000000e+00> : vector<2x32xf32>
    %167 = tpu.matmul %7, %166, %cst_143 {dimension_numbers = #tpu.dot_dimension_numbers<[1], [0], [0], [1], [0, 0, 1, 1], [], []>} : vector<2x16xbf16>, vector<16x32xbf16>, vector<2x32xf32> -> vector<2x32xf32>
    %c12_144 = arith.constant 12 : index
    %c0_145 = arith.constant 0 : index
    %c0_146 = arith.constant 0 : index
    %168 = vector.load %arg5[%c12_144, %c0_145, %c0_146] : memref<16x8x32xbf16, #tpu.memory_space<vmem>>, vector<1x8x32xbf16>
    %169 = vector.shape_cast %168 : vector<1x8x32xbf16> to vector<8x32xbf16>
    %cst_147 = arith.constant dense<0.000000e+00> : vector<2x32xf32>
    %170 = tpu.matmul %6, %169, %cst_147 {dimension_numbers = #tpu.dot_dimension_numbers<[1], [0], [0], [1], [0, 0, 1, 1], [], []>} : vector<2x8xbf16>, vector<8x32xbf16>, vector<2x32xf32> -> vector<2x32xf32>
    %171 = arith.addf %167, %170 : vector<2x32xf32>
    %c12_148 = arith.constant 12 : index
    %c0_149 = arith.constant 0 : index
    %c0_150 = arith.constant 0 : index
    %172 = vector.load %arg9[%c12_148, %c0_149, %c0_150] : memref<16x2x32xf32, #tpu.memory_space<vmem>>, vector<1x2x32xf32>
    %173 = vector.shape_cast %172 : vector<1x2x32xf32> to vector<2x32xf32>
    %174 = vector.shape_cast %171 : vector<2x32xf32> to vector<1x2x32xf32>
    tpu.vector_store %arg9[%c12_148, %c0_149, %c0_150], %174 {strides = array<i32>} : memref<16x2x32xf32, #tpu.memory_space<vmem>>, vector<1x2x32xf32>,
    %cst_151 = arith.constant dense<0.000000e+00> : vector<32xf32>
    %175 = vector.multi_reduction <add>, %171, %cst_151 [0] : vector<2x32xf32> to vector<32xf32>
    %176 = vector.shape_cast %175 : vector<32xf32> to vector<1x32xf32>
    %177 = arith.addf %164, %176 : vector<1x32xf32>
    %c13 = arith.constant 13 : index
    %c0_152 = arith.constant 0 : index
    %c0_153 = arith.constant 0 : index
    %178 = vector.load %arg4[%c13, %c0_152, %c0_153] : memref<16x16x32xbf16, #tpu.memory_space<vmem>>, vector<1x16x32xbf16>
    %179 = vector.shape_cast %178 : vector<1x16x32xbf16> to vector<16x32xbf16>
    %cst_154 = arith.constant dense<0.000000e+00> : vector<2x32xf32>
    %180 = tpu.matmul %7, %179, %cst_154 {dimension_numbers = #tpu.dot_dimension_numbers<[1], [0], [0], [1], [0, 0, 1, 1], [], []>} : vector<2x16xbf16>, vector<16x32xbf16>, vector<2x32xf32> -> vector<2x32xf32>
    %c13_155 = arith.constant 13 : index
    %c0_156 = arith.constant 0 : index
    %c0_157 = arith.constant 0 : index
    %181 = vector.load %arg5[%c13_155, %c0_156, %c0_157] : memref<16x8x32xbf16, #tpu.memory_space<vmem>>, vector<1x8x32xbf16>
    %182 = vector.shape_cast %181 : vector<1x8x32xbf16> to vector<8x32xbf16>
    %cst_158 = arith.constant dense<0.000000e+00> : vector<2x32xf32>
    %183 = tpu.matmul %6, %182, %cst_158 {dimension_numbers = #tpu.dot_dimension_numbers<[1], [0], [0], [1], [0, 0, 1, 1], [], []>} : vector<2x8xbf16>, vector<8x32xbf16>, vector<2x32xf32> -> vector<2x32xf32>
    %184 = arith.addf %180, %183 : vector<2x32xf32>
    %c13_159 = arith.constant 13 : index
    %c0_160 = arith.constant 0 : index
    %c0_161 = arith.constant 0 : index
    %185 = vector.load %arg9[%c13_159, %c0_160, %c0_161] : memref<16x2x32xf32, #tpu.memory_space<vmem>>, vector<1x2x32xf32>
    %186 = vector.shape_cast %185 : vector<1x2x32xf32> to vector<2x32xf32>
    %187 = vector.shape_cast %184 : vector<2x32xf32> to vector<1x2x32xf32>
    tpu.vector_store %arg9[%c13_159, %c0_160, %c0_161], %187 {strides = array<i32>} : memref<16x2x32xf32, #tpu.memory_space<vmem>>, vector<1x2x32xf32>,
    %cst_162 = arith.constant dense<0.000000e+00> : vector<32xf32>
    %188 = vector.multi_reduction <add>, %184, %cst_162 [0] : vector<2x32xf32> to vector<32xf32>
    %189 = vector.shape_cast %188 : vector<32xf32> to vector<1x32xf32>
    %190 = arith.addf %177, %189 : vector<1x32xf32>
    %c14 = arith.constant 14 : index
    %c0_163 = arith.constant 0 : index
    %c0_164 = arith.constant 0 : index
    %191 = vector.load %arg4[%c14, %c0_163, %c0_164] : memref<16x16x32xbf16, #tpu.memory_space<vmem>>, vector<1x16x32xbf16>
    %192 = vector.shape_cast %191 : vector<1x16x32xbf16> to vector<16x32xbf16>
    %cst_165 = arith.constant dense<0.000000e+00> : vector<2x32xf32>
    %193 = tpu.matmul %7, %192, %cst_165 {dimension_numbers = #tpu.dot_dimension_numbers<[1], [0], [0], [1], [0, 0, 1, 1], [], []>} : vector<2x16xbf16>, vector<16x32xbf16>, vector<2x32xf32> -> vector<2x32xf32>
    %c14_166 = arith.constant 14 : index
    %c0_167 = arith.constant 0 : index
    %c0_168 = arith.constant 0 : index
    %194 = vector.load %arg5[%c14_166, %c0_167, %c0_168] : memref<16x8x32xbf16, #tpu.memory_space<vmem>>, vector<1x8x32xbf16>
    %195 = vector.shape_cast %194 : vector<1x8x32xbf16> to vector<8x32xbf16>
    %cst_169 = arith.constant dense<0.000000e+00> : vector<2x32xf32>
    %196 = tpu.matmul %6, %195, %cst_169 {dimension_numbers = #tpu.dot_dimension_numbers<[1], [0], [0], [1], [0, 0, 1, 1], [], []>} : vector<2x8xbf16>, vector<8x32xbf16>, vector<2x32xf32> -> vector<2x32xf32>
    %197 = arith.addf %193, %196 : vector<2x32xf32>
    %c14_170 = arith.constant 14 : index
    %c0_171 = arith.constant 0 : index
    %c0_172 = arith.constant 0 : index
    %198 = vector.load %arg9[%c14_170, %c0_171, %c0_172] : memref<16x2x32xf32, #tpu.memory_space<vmem>>, vector<1x2x32xf32>
    %199 = vector.shape_cast %198 : vector<1x2x32xf32> to vector<2x32xf32>
    %200 = vector.shape_cast %197 : vector<2x32xf32> to vector<1x2x32xf32>
    tpu.vector_store %arg9[%c14_170, %c0_171, %c0_172], %200 {strides = array<i32>} : memref<16x2x32xf32, #tpu.memory_space<vmem>>, vector<1x2x32xf32>,
    %cst_173 = arith.constant dense<0.000000e+00> : vector<32xf32>
    %201 = vector.multi_reduction <add>, %197, %cst_173 [0] : vector<2x32xf32> to vector<32xf32>
    %202 = vector.shape_cast %201 : vector<32xf32> to vector<1x32xf32>
    %203 = arith.addf %190, %202 : vector<1x32xf32>
    %c15 = arith.constant 15 : index
    %c0_174 = arith.constant 0 : index
    %c0_175 = arith.constant 0 : index
    %204 = vector.load %arg4[%c15, %c0_174, %c0_175] : memref<16x16x32xbf16, #tpu.memory_space<vmem>>, vector<1x16x32xbf16>
    %205 = vector.shape_cast %204 : vector<1x16x32xbf16> to vector<16x32xbf16>
    %cst_176 = arith.constant dense<0.000000e+00> : vector<2x32xf32>
    %206 = tpu.matmul %7, %205, %cst_176 {dimension_numbers = #tpu.dot_dimension_numbers<[1], [0], [0], [1], [0, 0, 1, 1], [], []>} : vector<2x16xbf16>, vector<16x32xbf16>, vector<2x32xf32> -> vector<2x32xf32>
    %c15_177 = arith.constant 15 : index
    %c0_178 = arith.constant 0 : index
    %c0_179 = arith.constant 0 : index
    %207 = vector.load %arg5[%c15_177, %c0_178, %c0_179] : memref<16x8x32xbf16, #tpu.memory_space<vmem>>, vector<1x8x32xbf16>
    %208 = vector.shape_cast %207 : vector<1x8x32xbf16> to vector<8x32xbf16>
    %cst_180 = arith.constant dense<0.000000e+00> : vector<2x32xf32>
    %209 = tpu.matmul %6, %208, %cst_180 {dimension_numbers = #tpu.dot_dimension_numbers<[1], [0], [0], [1], [0, 0, 1, 1], [], []>} : vector<2x8xbf16>, vector<8x32xbf16>, vector<2x32xf32> -> vector<2x32xf32>
    %210 = arith.addf %206, %209 : vector<2x32xf32>
    %c15_181 = arith.constant 15 : index
    %c0_182 = arith.constant 0 : index
    %c0_183 = arith.constant 0 : index
    %211 = vector.load %arg9[%c15_181, %c0_182, %c0_183] : memref<16x2x32xf32, #tpu.memory_space<vmem>>, vector<1x2x32xf32>
    %212 = vector.shape_cast %211 : vector<1x2x32xf32> to vector<2x32xf32>
    %213 = vector.shape_cast %210 : vector<2x32xf32> to vector<1x2x32xf32>
    tpu.vector_store %arg9[%c15_181, %c0_182, %c0_183], %213 {strides = array<i32>} : memref<16x2x32xf32, #tpu.memory_space<vmem>>, vector<1x2x32xf32>,
    %cst_184 = arith.constant dense<0.000000e+00> : vector<32xf32>
    %214 = vector.multi_reduction <add>, %210, %cst_184 [0] : vector<2x32xf32> to vector<32xf32>
    %215 = vector.shape_cast %214 : vector<32xf32> to vector<1x32xf32>
    %216 = arith.addf %203, %215 : vector<1x32xf32>
    %cst_185 = arith.constant 3.125000e-02 : f32
    %217 = vector.broadcast %cst_185 : f32 to vector<1x32xf32>
    %218 = arith.mulf %216, %217 : vector<1x32xf32>
    %cst_186 = arith.constant 0.000000e+00 : f32
    %219 = vector.broadcast %cst_186 : f32 to vector<1x32xf32>
    %c0_187 = arith.constant 0 : index
    %c0_188 = arith.constant 0 : index
    %c0_189 = arith.constant 0 : index
    %220 = vector.load %arg9[%c0_187, %c0_188, %c0_189] : memref<16x2x32xf32, #tpu.memory_space<vmem>>, vector<1x2x32xf32>
    %221 = vector.shape_cast %220 : vector<1x2x32xf32> to vector<2x32xf32>
    %222 = vector.broadcast %218 : vector<1x32xf32> to vector<2x32xf32>
    %223 = arith.subf %221, %222 : vector<2x32xf32>
    %224 = arith.mulf %223, %223 : vector<2x32xf32>
    %cst_190 = arith.constant dense<0.000000e+00> : vector<32xf32>
    %225 = vector.multi_reduction <add>, %224, %cst_190 [0] : vector<2x32xf32> to vector<32xf32>
    %226 = vector.shape_cast %225 : vector<32xf32> to vector<1x32xf32>
    %227 = arith.addf %219, %226 : vector<1x32xf32>
    %c1_191 = arith.constant 1 : index
    %c0_192 = arith.constant 0 : index
    %c0_193 = arith.constant 0 : index
    %228 = vector.load %arg9[%c1_191, %c0_192, %c0_193] : memref<16x2x32xf32, #tpu.memory_space<vmem>>, vector<1x2x32xf32>
    %229 = vector.shape_cast %228 : vector<1x2x32xf32> to vector<2x32xf32>
    %230 = vector.broadcast %218 : vector<1x32xf32> to vector<2x32xf32>
    %231 = arith.subf %229, %230 : vector<2x32xf32>
    %232 = arith.mulf %231, %231 : vector<2x32xf32>
    %cst_194 = arith.constant dense<0.000000e+00> : vector<32xf32>
    %233 = vector.multi_reduction <add>, %232, %cst_194 [0] : vector<2x32xf32> to vector<32xf32>
    %234 = vector.shape_cast %233 : vector<32xf32> to vector<1x32xf32>
    %235 = arith.addf %227, %234 : vector<1x32xf32>
    %c2_195 = arith.constant 2 : index
    %c0_196 = arith.constant 0 : index
    %c0_197 = arith.constant 0 : index
    %236 = vector.load %arg9[%c2_195, %c0_196, %c0_197] : memref<16x2x32xf32, #tpu.memory_space<vmem>>, vector<1x2x32xf32>
    %237 = vector.shape_cast %236 : vector<1x2x32xf32> to vector<2x32xf32>
    %238 = vector.broadcast %218 : vector<1x32xf32> to vector<2x32xf32>
    %239 = arith.subf %237, %238 : vector<2x32xf32>
    %240 = arith.mulf %239, %239 : vector<2x32xf32>
    %cst_198 = arith.constant dense<0.000000e+00> : vector<32xf32>
    %241 = vector.multi_reduction <add>, %240, %cst_198 [0] : vector<2x32xf32> to vector<32xf32>
    %242 = vector.shape_cast %241 : vector<32xf32> to vector<1x32xf32>
    %243 = arith.addf %235, %242 : vector<1x32xf32>
    %c3_199 = arith.constant 3 : index
    %c0_200 = arith.constant 0 : index
    %c0_201 = arith.constant 0 : index
    %244 = vector.load %arg9[%c3_199, %c0_200, %c0_201] : memref<16x2x32xf32, #tpu.memory_space<vmem>>, vector<1x2x32xf32>
    %245 = vector.shape_cast %244 : vector<1x2x32xf32> to vector<2x32xf32>
    %246 = vector.broadcast %218 : vector<1x32xf32> to vector<2x32xf32>
    %247 = arith.subf %245, %246 : vector<2x32xf32>
    %248 = arith.mulf %247, %247 : vector<2x32xf32>
    %cst_202 = arith.constant dense<0.000000e+00> : vector<32xf32>
    %249 = vector.multi_reduction <add>, %248, %cst_202 [0] : vector<2x32xf32> to vector<32xf32>
    %250 = vector.shape_cast %249 : vector<32xf32> to vector<1x32xf32>
    %251 = arith.addf %243, %250 : vector<1x32xf32>
    %c4_203 = arith.constant 4 : index
    %c0_204 = arith.constant 0 : index
    %c0_205 = arith.constant 0 : index
    %252 = vector.load %arg9[%c4_203, %c0_204, %c0_205] : memref<16x2x32xf32, #tpu.memory_space<vmem>>, vector<1x2x32xf32>
    %253 = vector.shape_cast %252 : vector<1x2x32xf32> to vector<2x32xf32>
    %254 = vector.broadcast %218 : vector<1x32xf32> to vector<2x32xf32>
    %255 = arith.subf %253, %254 : vector<2x32xf32>
    %256 = arith.mulf %255, %255 : vector<2x32xf32>
    %cst_206 = arith.constant dense<0.000000e+00> : vector<32xf32>
    %257 = vector.multi_reduction <add>, %256, %cst_206 [0] : vector<2x32xf32> to vector<32xf32>
    %258 = vector.shape_cast %257 : vector<32xf32> to vector<1x32xf32>
    %259 = arith.addf %251, %258 : vector<1x32xf32>
    %c5_207 = arith.constant 5 : index
    %c0_208 = arith.constant 0 : index
    %c0_209 = arith.constant 0 : index
    %260 = vector.load %arg9[%c5_207, %c0_208, %c0_209] : memref<16x2x32xf32, #tpu.memory_space<vmem>>, vector<1x2x32xf32>
    %261 = vector.shape_cast %260 : vector<1x2x32xf32> to vector<2x32xf32>
    %262 = vector.broadcast %218 : vector<1x32xf32> to vector<2x32xf32>
    %263 = arith.subf %261, %262 : vector<2x32xf32>
    %264 = arith.mulf %263, %263 : vector<2x32xf32>
    %cst_210 = arith.constant dense<0.000000e+00> : vector<32xf32>
    %265 = vector.multi_reduction <add>, %264, %cst_210 [0] : vector<2x32xf32> to vector<32xf32>
    %266 = vector.shape_cast %265 : vector<32xf32> to vector<1x32xf32>
    %267 = arith.addf %259, %266 : vector<1x32xf32>
    %c6_211 = arith.constant 6 : index
    %c0_212 = arith.constant 0 : index
    %c0_213 = arith.constant 0 : index
    %268 = vector.load %arg9[%c6_211, %c0_212, %c0_213] : memref<16x2x32xf32, #tpu.memory_space<vmem>>, vector<1x2x32xf32>
    %269 = vector.shape_cast %268 : vector<1x2x32xf32> to vector<2x32xf32>
    %270 = vector.broadcast %218 : vector<1x32xf32> to vector<2x32xf32>
    %271 = arith.subf %269, %270 : vector<2x32xf32>
    %272 = arith.mulf %271, %271 : vector<2x32xf32>
    %cst_214 = arith.constant dense<0.000000e+00> : vector<32xf32>
    %273 = vector.multi_reduction <add>, %272, %cst_214 [0] : vector<2x32xf32> to vector<32xf32>
    %274 = vector.shape_cast %273 : vector<32xf32> to vector<1x32xf32>
    %275 = arith.addf %267, %274 : vector<1x32xf32>
    %c7_215 = arith.constant 7 : index
    %c0_216 = arith.constant 0 : index
    %c0_217 = arith.constant 0 : index
    %276 = vector.load %arg9[%c7_215, %c0_216, %c0_217] : memref<16x2x32xf32, #tpu.memory_space<vmem>>, vector<1x2x32xf32>
    %277 = vector.shape_cast %276 : vector<1x2x32xf32> to vector<2x32xf32>
    %278 = vector.broadcast %218 : vector<1x32xf32> to vector<2x32xf32>
    %279 = arith.subf %277, %278 : vector<2x32xf32>
    %280 = arith.mulf %279, %279 : vector<2x32xf32>
    %cst_218 = arith.constant dense<0.000000e+00> : vector<32xf32>
    %281 = vector.multi_reduction <add>, %280, %cst_218 [0] : vector<2x32xf32> to vector<32xf32>
    %282 = vector.shape_cast %281 : vector<32xf32> to vector<1x32xf32>
    %283 = arith.addf %275, %282 : vector<1x32xf32>
    %c8_219 = arith.constant 8 : index
    %c0_220 = arith.constant 0 : index
    %c0_221 = arith.constant 0 : index
    %284 = vector.load %arg9[%c8_219, %c0_220, %c0_221] : memref<16x2x32xf32, #tpu.memory_space<vmem>>, vector<1x2x32xf32>
    %285 = vector.shape_cast %284 : vector<1x2x32xf32> to vector<2x32xf32>
    %286 = vector.broadcast %218 : vector<1x32xf32> to vector<2x32xf32>
    %287 = arith.subf %285, %286 : vector<2x32xf32>
    %288 = arith.mulf %287, %287 : vector<2x32xf32>
    %cst_222 = arith.constant dense<0.000000e+00> : vector<32xf32>
    %289 = vector.multi_reduction <add>, %288, %cst_222 [0] : vector<2x32xf32> to vector<32xf32>
    %290 = vector.shape_cast %289 : vector<32xf32> to vector<1x32xf32>
    %291 = arith.addf %283, %290 : vector<1x32xf32>
    %c9_223 = arith.constant 9 : index
    %c0_224 = arith.constant 0 : index
    %c0_225 = arith.constant 0 : index
    %292 = vector.load %arg9[%c9_223, %c0_224, %c0_225] : memref<16x2x32xf32, #tpu.memory_space<vmem>>, vector<1x2x32xf32>
    %293 = vector.shape_cast %292 : vector<1x2x32xf32> to vector<2x32xf32>
    %294 = vector.broadcast %218 : vector<1x32xf32> to vector<2x32xf32>
    %295 = arith.subf %293, %294 : vector<2x32xf32>
    %296 = arith.mulf %295, %295 : vector<2x32xf32>
    %cst_226 = arith.constant dense<0.000000e+00> : vector<32xf32>
    %297 = vector.multi_reduction <add>, %296, %cst_226 [0] : vector<2x32xf32> to vector<32xf32>
    %298 = vector.shape_cast %297 : vector<32xf32> to vector<1x32xf32>
    %299 = arith.addf %291, %298 : vector<1x32xf32>
    %c10_227 = arith.constant 10 : index
    %c0_228 = arith.constant 0 : index
    %c0_229 = arith.constant 0 : index
    %300 = vector.load %arg9[%c10_227, %c0_228, %c0_229] : memref<16x2x32xf32, #tpu.memory_space<vmem>>, vector<1x2x32xf32>
    %301 = vector.shape_cast %300 : vector<1x2x32xf32> to vector<2x32xf32>
    %302 = vector.broadcast %218 : vector<1x32xf32> to vector<2x32xf32>
    %303 = arith.subf %301, %302 : vector<2x32xf32>
    %304 = arith.mulf %303, %303 : vector<2x32xf32>
    %cst_230 = arith.constant dense<0.000000e+00> : vector<32xf32>
    %305 = vector.multi_reduction <add>, %304, %cst_230 [0] : vector<2x32xf32> to vector<32xf32>
    %306 = vector.shape_cast %305 : vector<32xf32> to vector<1x32xf32>
    %307 = arith.addf %299, %306 : vector<1x32xf32>
    %c11_231 = arith.constant 11 : index
    %c0_232 = arith.constant 0 : index
    %c0_233 = arith.constant 0 : index
    %308 = vector.load %arg9[%c11_231, %c0_232, %c0_233] : memref<16x2x32xf32, #tpu.memory_space<vmem>>, vector<1x2x32xf32>
    %309 = vector.shape_cast %308 : vector<1x2x32xf32> to vector<2x32xf32>
    %310 = vector.broadcast %218 : vector<1x32xf32> to vector<2x32xf32>
    %311 = arith.subf %309, %310 : vector<2x32xf32>
    %312 = arith.mulf %311, %311 : vector<2x32xf32>
    %cst_234 = arith.constant dense<0.000000e+00> : vector<32xf32>
    %313 = vector.multi_reduction <add>, %312, %cst_234 [0] : vector<2x32xf32> to vector<32xf32>
    %314 = vector.shape_cast %313 : vector<32xf32> to vector<1x32xf32>
    %315 = arith.addf %307, %314 : vector<1x32xf32>
    %c12_235 = arith.constant 12 : index
    %c0_236 = arith.constant 0 : index
    %c0_237 = arith.constant 0 : index
    %316 = vector.load %arg9[%c12_235, %c0_236, %c0_237] : memref<16x2x32xf32, #tpu.memory_space<vmem>>, vector<1x2x32xf32>
    %317 = vector.shape_cast %316 : vector<1x2x32xf32> to vector<2x32xf32>
    %318 = vector.broadcast %218 : vector<1x32xf32> to vector<2x32xf32>
    %319 = arith.subf %317, %318 : vector<2x32xf32>
    %320 = arith.mulf %319, %319 : vector<2x32xf32>
    %cst_238 = arith.constant dense<0.000000e+00> : vector<32xf32>
    %321 = vector.multi_reduction <add>, %320, %cst_238 [0] : vector<2x32xf32> to vector<32xf32>
    %322 = vector.shape_cast %321 : vector<32xf32> to vector<1x32xf32>
    %323 = arith.addf %315, %322 : vector<1x32xf32>
    %c13_239 = arith.constant 13 : index
    %c0_240 = arith.constant 0 : index
    %c0_241 = arith.constant 0 : index
    %324 = vector.load %arg9[%c13_239, %c0_240, %c0_241] : memref<16x2x32xf32, #tpu.memory_space<vmem>>, vector<1x2x32xf32>
    %325 = vector.shape_cast %324 : vector<1x2x32xf32> to vector<2x32xf32>
    %326 = vector.broadcast %218 : vector<1x32xf32> to vector<2x32xf32>
    %327 = arith.subf %325, %326 : vector<2x32xf32>
    %328 = arith.mulf %327, %327 : vector<2x32xf32>
    %cst_242 = arith.constant dense<0.000000e+00> : vector<32xf32>
    %329 = vector.multi_reduction <add>, %328, %cst_242 [0] : vector<2x32xf32> to vector<32xf32>
    %330 = vector.shape_cast %329 : vector<32xf32> to vector<1x32xf32>
    %331 = arith.addf %323, %330 : vector<1x32xf32>
    %c14_243 = arith.constant 14 : index
    %c0_244 = arith.constant 0 : index
    %c0_245 = arith.constant 0 : index
    %332 = vector.load %arg9[%c14_243, %c0_244, %c0_245] : memref<16x2x32xf32, #tpu.memory_space<vmem>>, vector<1x2x32xf32>
    %333 = vector.shape_cast %332 : vector<1x2x32xf32> to vector<2x32xf32>
    %334 = vector.broadcast %218 : vector<1x32xf32> to vector<2x32xf32>
    %335 = arith.subf %333, %334 : vector<2x32xf32>
    %336 = arith.mulf %335, %335 : vector<2x32xf32>
    %cst_246 = arith.constant dense<0.000000e+00> : vector<32xf32>
    %337 = vector.multi_reduction <add>, %336, %cst_246 [0] : vector<2x32xf32> to vector<32xf32>
    %338 = vector.shape_cast %337 : vector<32xf32> to vector<1x32xf32>
    %339 = arith.addf %331, %338 : vector<1x32xf32>
    %c15_247 = arith.constant 15 : index
    %c0_248 = arith.constant 0 : index
    %c0_249 = arith.constant 0 : index
    %340 = vector.load %arg9[%c15_247, %c0_248, %c0_249] : memref<16x2x32xf32, #tpu.memory_space<vmem>>, vector<1x2x32xf32>
    %341 = vector.shape_cast %340 : vector<1x2x32xf32> to vector<2x32xf32>
    %342 = vector.broadcast %218 : vector<1x32xf32> to vector<2x32xf32>
    %343 = arith.subf %341, %342 : vector<2x32xf32>
    %344 = arith.mulf %343, %343 : vector<2x32xf32>
    %cst_250 = arith.constant dense<0.000000e+00> : vector<32xf32>
    %345 = vector.multi_reduction <add>, %344, %cst_250 [0] : vector<2x32xf32> to vector<32xf32>
    %346 = vector.shape_cast %345 : vector<32xf32> to vector<1x32xf32>
    %347 = arith.addf %339, %346 : vector<1x32xf32>
    %cst_251 = arith.constant 3.125000e-02 : f32
    %348 = vector.broadcast %cst_251 : f32 to vector<1x32xf32>
    %349 = arith.mulf %347, %348 : vector<1x32xf32>
    %cst_252 = arith.constant 9.99999974E-6 : f32
    %350 = vector.broadcast %cst_252 : f32 to vector<1x32xf32>
    %351 = arith.addf %349, %350 : vector<1x32xf32>
    %352 = math.rsqrt %351 : vector<1x32xf32>
    %c0_253 = arith.constant 0 : index
    %c0_254 = arith.constant 0 : index
    %353 = vector.load %arg6[%c0_253, %c0_254] : memref<1x32xf32, #tpu.memory_space<vmem>>, vector<1x32xf32>
    %354 = arith.mulf %353, %352 : vector<1x32xf32>
    %c0_255 = arith.constant 0 : index
    %c0_256 = arith.constant 0 : index
    %355 = vector.load %arg7[%c0_255, %c0_256] : memref<1x32xf32, #tpu.memory_space<vmem>>, vector<1x32xf32>
    %356 = arith.mulf %218, %354 : vector<1x32xf32>
    %357 = arith.subf %355, %356 : vector<1x32xf32>
    %c0_257 = arith.constant 0 : index
    %c0_258 = arith.constant 0 : index
    %c0_259 = arith.constant 0 : index
    %358 = vector.load %arg9[%c0_257, %c0_258, %c0_259] : memref<16x2x32xf32, #tpu.memory_space<vmem>>, vector<1x2x32xf32>
    %359 = vector.shape_cast %358 : vector<1x2x32xf32> to vector<2x32xf32>
    %360 = vector.broadcast %354 : vector<1x32xf32> to vector<2x32xf32>
    %361 = arith.mulf %359, %360 : vector<2x32xf32>
    %362 = vector.broadcast %357 : vector<1x32xf32> to vector<2x32xf32>
    %363 = arith.addf %361, %362 : vector<2x32xf32>
    %cst_260 = arith.constant 0.000000e+00 : f32
    %364 = vector.broadcast %cst_260 : f32 to vector<2x32xf32>
    %365 = arith.maximumf %363, %364 : vector<2x32xf32>
    %366 = arith.truncf %365 : vector<2x32xf32> to vector<2x32xbf16>
    %c0_261 = arith.constant 0 : index
    %c0_262 = arith.constant 0 : index
    %c0_263 = arith.constant 0 : index
    %367 = vector.load %arg8[%c0_261, %c0_262, %c0_263] : memref<16x2x32xbf16, #tpu.memory_space<vmem>>, vector<1x2x32xbf16>
    %368 = vector.shape_cast %367 : vector<1x2x32xbf16> to vector<2x32xbf16>
    %369 = vector.shape_cast %366 : vector<2x32xbf16> to vector<1x2x32xbf16>
    tpu.vector_store %arg8[%c0_261, %c0_262, %c0_263], %369 {strides = array<i32>} : memref<16x2x32xbf16, #tpu.memory_space<vmem>>, vector<1x2x32xbf16>,
    %c1_264 = arith.constant 1 : index
    %c0_265 = arith.constant 0 : index
    %c0_266 = arith.constant 0 : index
    %370 = vector.load %arg9[%c1_264, %c0_265, %c0_266] : memref<16x2x32xf32, #tpu.memory_space<vmem>>, vector<1x2x32xf32>
    %371 = vector.shape_cast %370 : vector<1x2x32xf32> to vector<2x32xf32>
    %372 = vector.broadcast %354 : vector<1x32xf32> to vector<2x32xf32>
    %373 = arith.mulf %371, %372 : vector<2x32xf32>
    %374 = vector.broadcast %357 : vector<1x32xf32> to vector<2x32xf32>
    %375 = arith.addf %373, %374 : vector<2x32xf32>
    %cst_267 = arith.constant 0.000000e+00 : f32
    %376 = vector.broadcast %cst_267 : f32 to vector<2x32xf32>
    %377 = arith.maximumf %375, %376 : vector<2x32xf32>
    %378 = arith.truncf %377 : vector<2x32xf32> to vector<2x32xbf16>
    %c1_268 = arith.constant 1 : index
    %c0_269 = arith.constant 0 : index
    %c0_270 = arith.constant 0 : index
    %379 = vector.load %arg8[%c1_268, %c0_269, %c0_270] : memref<16x2x32xbf16, #tpu.memory_space<vmem>>, vector<1x2x32xbf16>
    %380 = vector.shape_cast %379 : vector<1x2x32xbf16> to vector<2x32xbf16>
    %381 = vector.shape_cast %378 : vector<2x32xbf16> to vector<1x2x32xbf16>
    tpu.vector_store %arg8[%c1_268, %c0_269, %c0_270], %381 {strides = array<i32>} : memref<16x2x32xbf16, #tpu.memory_space<vmem>>, vector<1x2x32xbf16>,
    %c2_271 = arith.constant 2 : index
    %c0_272 = arith.constant 0 : index
    %c0_273 = arith.constant 0 : index
    %382 = vector.load %arg9[%c2_271, %c0_272, %c0_273] : memref<16x2x32xf32, #tpu.memory_space<vmem>>, vector<1x2x32xf32>
    %383 = vector.shape_cast %382 : vector<1x2x32xf32> to vector<2x32xf32>
    %384 = vector.broadcast %354 : vector<1x32xf32> to vector<2x32xf32>
    %385 = arith.mulf %383, %384 : vector<2x32xf32>
    %386 = vector.broadcast %357 : vector<1x32xf32> to vector<2x32xf32>
    %387 = arith.addf %385, %386 : vector<2x32xf32>
    %cst_274 = arith.constant 0.000000e+00 : f32
    %388 = vector.broadcast %cst_274 : f32 to vector<2x32xf32>
    %389 = arith.maximumf %387, %388 : vector<2x32xf32>
    %390 = arith.truncf %389 : vector<2x32xf32> to vector<2x32xbf16>
    %c2_275 = arith.constant 2 : index
    %c0_276 = arith.constant 0 : index
    %c0_277 = arith.constant 0 : index
    %391 = vector.load %arg8[%c2_275, %c0_276, %c0_277] : memref<16x2x32xbf16, #tpu.memory_space<vmem>>, vector<1x2x32xbf16>
    %392 = vector.shape_cast %391 : vector<1x2x32xbf16> to vector<2x32xbf16>
    %393 = vector.shape_cast %390 : vector<2x32xbf16> to vector<1x2x32xbf16>
    tpu.vector_store %arg8[%c2_275, %c0_276, %c0_277], %393 {strides = array<i32>} : memref<16x2x32xbf16, #tpu.memory_space<vmem>>, vector<1x2x32xbf16>,
    %c3_278 = arith.constant 3 : index
    %c0_279 = arith.constant 0 : index
    %c0_280 = arith.constant 0 : index
    %394 = vector.load %arg9[%c3_278, %c0_279, %c0_280] : memref<16x2x32xf32, #tpu.memory_space<vmem>>, vector<1x2x32xf32>
    %395 = vector.shape_cast %394 : vector<1x2x32xf32> to vector<2x32xf32>
    %396 = vector.broadcast %354 : vector<1x32xf32> to vector<2x32xf32>
    %397 = arith.mulf %395, %396 : vector<2x32xf32>
    %398 = vector.broadcast %357 : vector<1x32xf32> to vector<2x32xf32>
    %399 = arith.addf %397, %398 : vector<2x32xf32>
    %cst_281 = arith.constant 0.000000e+00 : f32
    %400 = vector.broadcast %cst_281 : f32 to vector<2x32xf32>
    %401 = arith.maximumf %399, %400 : vector<2x32xf32>
    %402 = arith.truncf %401 : vector<2x32xf32> to vector<2x32xbf16>
    %c3_282 = arith.constant 3 : index
    %c0_283 = arith.constant 0 : index
    %c0_284 = arith.constant 0 : index
    %403 = vector.load %arg8[%c3_282, %c0_283, %c0_284] : memref<16x2x32xbf16, #tpu.memory_space<vmem>>, vector<1x2x32xbf16>
    %404 = vector.shape_cast %403 : vector<1x2x32xbf16> to vector<2x32xbf16>
    %405 = vector.shape_cast %402 : vector<2x32xbf16> to vector<1x2x32xbf16>
    tpu.vector_store %arg8[%c3_282, %c0_283, %c0_284], %405 {strides = array<i32>} : memref<16x2x32xbf16, #tpu.memory_space<vmem>>, vector<1x2x32xbf16>,
    %c4_285 = arith.constant 4 : index
    %c0_286 = arith.constant 0 : index
    %c0_287 = arith.constant 0 : index
    %406 = vector.load %arg9[%c4_285, %c0_286, %c0_287] : memref<16x2x32xf32, #tpu.memory_space<vmem>>, vector<1x2x32xf32>
    %407 = vector.shape_cast %406 : vector<1x2x32xf32> to vector<2x32xf32>
    %408 = vector.broadcast %354 : vector<1x32xf32> to vector<2x32xf32>
    %409 = arith.mulf %407, %408 : vector<2x32xf32>
    %410 = vector.broadcast %357 : vector<1x32xf32> to vector<2x32xf32>
    %411 = arith.addf %409, %410 : vector<2x32xf32>
    %cst_288 = arith.constant 0.000000e+00 : f32
    %412 = vector.broadcast %cst_288 : f32 to vector<2x32xf32>
    %413 = arith.maximumf %411, %412 : vector<2x32xf32>
    %414 = arith.truncf %413 : vector<2x32xf32> to vector<2x32xbf16>
    %c4_289 = arith.constant 4 : index
    %c0_290 = arith.constant 0 : index
    %c0_291 = arith.constant 0 : index
    %415 = vector.load %arg8[%c4_289, %c0_290, %c0_291] : memref<16x2x32xbf16, #tpu.memory_space<vmem>>, vector<1x2x32xbf16>
    %416 = vector.shape_cast %415 : vector<1x2x32xbf16> to vector<2x32xbf16>
    %417 = vector.shape_cast %414 : vector<2x32xbf16> to vector<1x2x32xbf16>
    tpu.vector_store %arg8[%c4_289, %c0_290, %c0_291], %417 {strides = array<i32>} : memref<16x2x32xbf16, #tpu.memory_space<vmem>>, vector<1x2x32xbf16>,
    %c5_292 = arith.constant 5 : index
    %c0_293 = arith.constant 0 : index
    %c0_294 = arith.constant 0 : index
    %418 = vector.load %arg9[%c5_292, %c0_293, %c0_294] : memref<16x2x32xf32, #tpu.memory_space<vmem>>, vector<1x2x32xf32>
    %419 = vector.shape_cast %418 : vector<1x2x32xf32> to vector<2x32xf32>
    %420 = vector.broadcast %354 : vector<1x32xf32> to vector<2x32xf32>
    %421 = arith.mulf %419, %420 : vector<2x32xf32>
    %422 = vector.broadcast %357 : vector<1x32xf32> to vector<2x32xf32>
    %423 = arith.addf %421, %422 : vector<2x32xf32>
    %cst_295 = arith.constant 0.000000e+00 : f32
    %424 = vector.broadcast %cst_295 : f32 to vector<2x32xf32>
    %425 = arith.maximumf %423, %424 : vector<2x32xf32>
    %426 = arith.truncf %425 : vector<2x32xf32> to vector<2x32xbf16>
    %c5_296 = arith.constant 5 : index
    %c0_297 = arith.constant 0 : index
    %c0_298 = arith.constant 0 : index
    %427 = vector.load %arg8[%c5_296, %c0_297, %c0_298] : memref<16x2x32xbf16, #tpu.memory_space<vmem>>, vector<1x2x32xbf16>
    %428 = vector.shape_cast %427 : vector<1x2x32xbf16> to vector<2x32xbf16>
    %429 = vector.shape_cast %426 : vector<2x32xbf16> to vector<1x2x32xbf16>
    tpu.vector_store %arg8[%c5_296, %c0_297, %c0_298], %429 {strides = array<i32>} : memref<16x2x32xbf16, #tpu.memory_space<vmem>>, vector<1x2x32xbf16>,
    %c6_299 = arith.constant 6 : index
    %c0_300 = arith.constant 0 : index
    %c0_301 = arith.constant 0 : index
    %430 = vector.load %arg9[%c6_299, %c0_300, %c0_301] : memref<16x2x32xf32, #tpu.memory_space<vmem>>, vector<1x2x32xf32>
    %431 = vector.shape_cast %430 : vector<1x2x32xf32> to vector<2x32xf32>
    %432 = vector.broadcast %354 : vector<1x32xf32> to vector<2x32xf32>
    %433 = arith.mulf %431, %432 : vector<2x32xf32>
    %434 = vector.broadcast %357 : vector<1x32xf32> to vector<2x32xf32>
    %435 = arith.addf %433, %434 : vector<2x32xf32>
    %cst_302 = arith.constant 0.000000e+00 : f32
    %436 = vector.broadcast %cst_302 : f32 to vector<2x32xf32>
    %437 = arith.maximumf %435, %436 : vector<2x32xf32>
    %438 = arith.truncf %437 : vector<2x32xf32> to vector<2x32xbf16>
    %c6_303 = arith.constant 6 : index
    %c0_304 = arith.constant 0 : index
    %c0_305 = arith.constant 0 : index
    %439 = vector.load %arg8[%c6_303, %c0_304, %c0_305] : memref<16x2x32xbf16, #tpu.memory_space<vmem>>, vector<1x2x32xbf16>
    %440 = vector.shape_cast %439 : vector<1x2x32xbf16> to vector<2x32xbf16>
    %441 = vector.shape_cast %438 : vector<2x32xbf16> to vector<1x2x32xbf16>
    tpu.vector_store %arg8[%c6_303, %c0_304, %c0_305], %441 {strides = array<i32>} : memref<16x2x32xbf16, #tpu.memory_space<vmem>>, vector<1x2x32xbf16>,
    %c7_306 = arith.constant 7 : index
    %c0_307 = arith.constant 0 : index
    %c0_308 = arith.constant 0 : index
    %442 = vector.load %arg9[%c7_306, %c0_307, %c0_308] : memref<16x2x32xf32, #tpu.memory_space<vmem>>, vector<1x2x32xf32>
    %443 = vector.shape_cast %442 : vector<1x2x32xf32> to vector<2x32xf32>
    %444 = vector.broadcast %354 : vector<1x32xf32> to vector<2x32xf32>
    %445 = arith.mulf %443, %444 : vector<2x32xf32>
    %446 = vector.broadcast %357 : vector<1x32xf32> to vector<2x32xf32>
    %447 = arith.addf %445, %446 : vector<2x32xf32>
    %cst_309 = arith.constant 0.000000e+00 : f32
    %448 = vector.broadcast %cst_309 : f32 to vector<2x32xf32>
    %449 = arith.maximumf %447, %448 : vector<2x32xf32>
    %450 = arith.truncf %449 : vector<2x32xf32> to vector<2x32xbf16>
    %c7_310 = arith.constant 7 : index
    %c0_311 = arith.constant 0 : index
    %c0_312 = arith.constant 0 : index
    %451 = vector.load %arg8[%c7_310, %c0_311, %c0_312] : memref<16x2x32xbf16, #tpu.memory_space<vmem>>, vector<1x2x32xbf16>
    %452 = vector.shape_cast %451 : vector<1x2x32xbf16> to vector<2x32xbf16>
    %453 = vector.shape_cast %450 : vector<2x32xbf16> to vector<1x2x32xbf16>
    tpu.vector_store %arg8[%c7_310, %c0_311, %c0_312], %453 {strides = array<i32>} : memref<16x2x32xbf16, #tpu.memory_space<vmem>>, vector<1x2x32xbf16>,
    %c8_313 = arith.constant 8 : index
    %c0_314 = arith.constant 0 : index
    %c0_315 = arith.constant 0 : index
    %454 = vector.load %arg9[%c8_313, %c0_314, %c0_315] : memref<16x2x32xf32, #tpu.memory_space<vmem>>, vector<1x2x32xf32>
    %455 = vector.shape_cast %454 : vector<1x2x32xf32> to vector<2x32xf32>
    %456 = vector.broadcast %354 : vector<1x32xf32> to vector<2x32xf32>
    %457 = arith.mulf %455, %456 : vector<2x32xf32>
    %458 = vector.broadcast %357 : vector<1x32xf32> to vector<2x32xf32>
    %459 = arith.addf %457, %458 : vector<2x32xf32>
    %cst_316 = arith.constant 0.000000e+00 : f32
    %460 = vector.broadcast %cst_316 : f32 to vector<2x32xf32>
    %461 = arith.maximumf %459, %460 : vector<2x32xf32>
    %462 = arith.truncf %461 : vector<2x32xf32> to vector<2x32xbf16>
    %c8_317 = arith.constant 8 : index
    %c0_318 = arith.constant 0 : index
    %c0_319 = arith.constant 0 : index
    %463 = vector.load %arg8[%c8_317, %c0_318, %c0_319] : memref<16x2x32xbf16, #tpu.memory_space<vmem>>, vector<1x2x32xbf16>
    %464 = vector.shape_cast %463 : vector<1x2x32xbf16> to vector<2x32xbf16>
    %465 = vector.shape_cast %462 : vector<2x32xbf16> to vector<1x2x32xbf16>
    tpu.vector_store %arg8[%c8_317, %c0_318, %c0_319], %465 {strides = array<i32>} : memref<16x2x32xbf16, #tpu.memory_space<vmem>>, vector<1x2x32xbf16>,
    %c9_320 = arith.constant 9 : index
    %c0_321 = arith.constant 0 : index
    %c0_322 = arith.constant 0 : index
    %466 = vector.load %arg9[%c9_320, %c0_321, %c0_322] : memref<16x2x32xf32, #tpu.memory_space<vmem>>, vector<1x2x32xf32>
    %467 = vector.shape_cast %466 : vector<1x2x32xf32> to vector<2x32xf32>
    %468 = vector.broadcast %354 : vector<1x32xf32> to vector<2x32xf32>
    %469 = arith.mulf %467, %468 : vector<2x32xf32>
    %470 = vector.broadcast %357 : vector<1x32xf32> to vector<2x32xf32>
    %471 = arith.addf %469, %470 : vector<2x32xf32>
    %cst_323 = arith.constant 0.000000e+00 : f32
    %472 = vector.broadcast %cst_323 : f32 to vector<2x32xf32>
    %473 = arith.maximumf %471, %472 : vector<2x32xf32>
    %474 = arith.truncf %473 : vector<2x32xf32> to vector<2x32xbf16>
    %c9_324 = arith.constant 9 : index
    %c0_325 = arith.constant 0 : index
    %c0_326 = arith.constant 0 : index
    %475 = vector.load %arg8[%c9_324, %c0_325, %c0_326] : memref<16x2x32xbf16, #tpu.memory_space<vmem>>, vector<1x2x32xbf16>
    %476 = vector.shape_cast %475 : vector<1x2x32xbf16> to vector<2x32xbf16>
    %477 = vector.shape_cast %474 : vector<2x32xbf16> to vector<1x2x32xbf16>
    tpu.vector_store %arg8[%c9_324, %c0_325, %c0_326], %477 {strides = array<i32>} : memref<16x2x32xbf16, #tpu.memory_space<vmem>>, vector<1x2x32xbf16>,
    %c10_327 = arith.constant 10 : index
    %c0_328 = arith.constant 0 : index
    %c0_329 = arith.constant 0 : index
    %478 = vector.load %arg9[%c10_327, %c0_328, %c0_329] : memref<16x2x32xf32, #tpu.memory_space<vmem>>, vector<1x2x32xf32>
    %479 = vector.shape_cast %478 : vector<1x2x32xf32> to vector<2x32xf32>
    %480 = vector.broadcast %354 : vector<1x32xf32> to vector<2x32xf32>
    %481 = arith.mulf %479, %480 : vector<2x32xf32>
    %482 = vector.broadcast %357 : vector<1x32xf32> to vector<2x32xf32>
    %483 = arith.addf %481, %482 : vector<2x32xf32>
    %cst_330 = arith.constant 0.000000e+00 : f32
    %484 = vector.broadcast %cst_330 : f32 to vector<2x32xf32>
    %485 = arith.maximumf %483, %484 : vector<2x32xf32>
    %486 = arith.truncf %485 : vector<2x32xf32> to vector<2x32xbf16>
    %c10_331 = arith.constant 10 : index
    %c0_332 = arith.constant 0 : index
    %c0_333 = arith.constant 0 : index
    %487 = vector.load %arg8[%c10_331, %c0_332, %c0_333] : memref<16x2x32xbf16, #tpu.memory_space<vmem>>, vector<1x2x32xbf16>
    %488 = vector.shape_cast %487 : vector<1x2x32xbf16> to vector<2x32xbf16>
    %489 = vector.shape_cast %486 : vector<2x32xbf16> to vector<1x2x32xbf16>
    tpu.vector_store %arg8[%c10_331, %c0_332, %c0_333], %489 {strides = array<i32>} : memref<16x2x32xbf16, #tpu.memory_space<vmem>>, vector<1x2x32xbf16>,
    %c11_334 = arith.constant 11 : index
    %c0_335 = arith.constant 0 : index
    %c0_336 = arith.constant 0 : index
    %490 = vector.load %arg9[%c11_334, %c0_335, %c0_336] : memref<16x2x32xf32, #tpu.memory_space<vmem>>, vector<1x2x32xf32>
    %491 = vector.shape_cast %490 : vector<1x2x32xf32> to vector<2x32xf32>
    %492 = vector.broadcast %354 : vector<1x32xf32> to vector<2x32xf32>
    %493 = arith.mulf %491, %492 : vector<2x32xf32>
    %494 = vector.broadcast %357 : vector<1x32xf32> to vector<2x32xf32>
    %495 = arith.addf %493, %494 : vector<2x32xf32>
    %cst_337 = arith.constant 0.000000e+00 : f32
    %496 = vector.broadcast %cst_337 : f32 to vector<2x32xf32>
    %497 = arith.maximumf %495, %496 : vector<2x32xf32>
    %498 = arith.truncf %497 : vector<2x32xf32> to vector<2x32xbf16>
    %c11_338 = arith.constant 11 : index
    %c0_339 = arith.constant 0 : index
    %c0_340 = arith.constant 0 : index
    %499 = vector.load %arg8[%c11_338, %c0_339, %c0_340] : memref<16x2x32xbf16, #tpu.memory_space<vmem>>, vector<1x2x32xbf16>
    %500 = vector.shape_cast %499 : vector<1x2x32xbf16> to vector<2x32xbf16>
    %501 = vector.shape_cast %498 : vector<2x32xbf16> to vector<1x2x32xbf16>
    tpu.vector_store %arg8[%c11_338, %c0_339, %c0_340], %501 {strides = array<i32>} : memref<16x2x32xbf16, #tpu.memory_space<vmem>>, vector<1x2x32xbf16>,
    %c12_341 = arith.constant 12 : index
    %c0_342 = arith.constant 0 : index
    %c0_343 = arith.constant 0 : index
    %502 = vector.load %arg9[%c12_341, %c0_342, %c0_343] : memref<16x2x32xf32, #tpu.memory_space<vmem>>, vector<1x2x32xf32>
    %503 = vector.shape_cast %502 : vector<1x2x32xf32> to vector<2x32xf32>
    %504 = vector.broadcast %354 : vector<1x32xf32> to vector<2x32xf32>
    %505 = arith.mulf %503, %504 : vector<2x32xf32>
    %506 = vector.broadcast %357 : vector<1x32xf32> to vector<2x32xf32>
    %507 = arith.addf %505, %506 : vector<2x32xf32>
    %cst_344 = arith.constant 0.000000e+00 : f32
    %508 = vector.broadcast %cst_344 : f32 to vector<2x32xf32>
    %509 = arith.maximumf %507, %508 : vector<2x32xf32>
    %510 = arith.truncf %509 : vector<2x32xf32> to vector<2x32xbf16>
    %c12_345 = arith.constant 12 : index
    %c0_346 = arith.constant 0 : index
    %c0_347 = arith.constant 0 : index
    %511 = vector.load %arg8[%c12_345, %c0_346, %c0_347] : memref<16x2x32xbf16, #tpu.memory_space<vmem>>, vector<1x2x32xbf16>
    %512 = vector.shape_cast %511 : vector<1x2x32xbf16> to vector<2x32xbf16>
    %513 = vector.shape_cast %510 : vector<2x32xbf16> to vector<1x2x32xbf16>
    tpu.vector_store %arg8[%c12_345, %c0_346, %c0_347], %513 {strides = array<i32>} : memref<16x2x32xbf16, #tpu.memory_space<vmem>>, vector<1x2x32xbf16>,
    %c13_348 = arith.constant 13 : index
    %c0_349 = arith.constant 0 : index
    %c0_350 = arith.constant 0 : index
    %514 = vector.load %arg9[%c13_348, %c0_349, %c0_350] : memref<16x2x32xf32, #tpu.memory_space<vmem>>, vector<1x2x32xf32>
    %515 = vector.shape_cast %514 : vector<1x2x32xf32> to vector<2x32xf32>
    %516 = vector.broadcast %354 : vector<1x32xf32> to vector<2x32xf32>
    %517 = arith.mulf %515, %516 : vector<2x32xf32>
    %518 = vector.broadcast %357 : vector<1x32xf32> to vector<2x32xf32>
    %519 = arith.addf %517, %518 : vector<2x32xf32>
    %cst_351 = arith.constant 0.000000e+00 : f32
    %520 = vector.broadcast %cst_351 : f32 to vector<2x32xf32>
    %521 = arith.maximumf %519, %520 : vector<2x32xf32>
    %522 = arith.truncf %521 : vector<2x32xf32> to vector<2x32xbf16>
    %c13_352 = arith.constant 13 : index
    %c0_353 = arith.constant 0 : index
    %c0_354 = arith.constant 0 : index
    %523 = vector.load %arg8[%c13_352, %c0_353, %c0_354] : memref<16x2x32xbf16, #tpu.memory_space<vmem>>, vector<1x2x32xbf16>
    %524 = vector.shape_cast %523 : vector<1x2x32xbf16> to vector<2x32xbf16>
    %525 = vector.shape_cast %522 : vector<2x32xbf16> to vector<1x2x32xbf16>
    tpu.vector_store %arg8[%c13_352, %c0_353, %c0_354], %525 {strides = array<i32>} : memref<16x2x32xbf16, #tpu.memory_space<vmem>>, vector<1x2x32xbf16>,
    %c14_355 = arith.constant 14 : index
    %c0_356 = arith.constant 0 : index
    %c0_357 = arith.constant 0 : index
    %526 = vector.load %arg9[%c14_355, %c0_356, %c0_357] : memref<16x2x32xf32, #tpu.memory_space<vmem>>, vector<1x2x32xf32>
    %527 = vector.shape_cast %526 : vector<1x2x32xf32> to vector<2x32xf32>
    %528 = vector.broadcast %354 : vector<1x32xf32> to vector<2x32xf32>
    %529 = arith.mulf %527, %528 : vector<2x32xf32>
    %530 = vector.broadcast %357 : vector<1x32xf32> to vector<2x32xf32>
    %531 = arith.addf %529, %530 : vector<2x32xf32>
    %cst_358 = arith.constant 0.000000e+00 : f32
    %532 = vector.broadcast %cst_358 : f32 to vector<2x32xf32>
    %533 = arith.maximumf %531, %532 : vector<2x32xf32>
    %534 = arith.truncf %533 : vector<2x32xf32> to vector<2x32xbf16>
    %c14_359 = arith.constant 14 : index
    %c0_360 = arith.constant 0 : index
    %c0_361 = arith.constant 0 : index
    %535 = vector.load %arg8[%c14_359, %c0_360, %c0_361] : memref<16x2x32xbf16, #tpu.memory_space<vmem>>, vector<1x2x32xbf16>
    %536 = vector.shape_cast %535 : vector<1x2x32xbf16> to vector<2x32xbf16>
    %537 = vector.shape_cast %534 : vector<2x32xbf16> to vector<1x2x32xbf16>
    tpu.vector_store %arg8[%c14_359, %c0_360, %c0_361], %537 {strides = array<i32>} : memref<16x2x32xbf16, #tpu.memory_space<vmem>>, vector<1x2x32xbf16>,
    %c15_362 = arith.constant 15 : index
    %c0_363 = arith.constant 0 : index
    %c0_364 = arith.constant 0 : index
    %538 = vector.load %arg9[%c15_362, %c0_363, %c0_364] : memref<16x2x32xf32, #tpu.memory_space<vmem>>, vector<1x2x32xf32>
    %539 = vector.shape_cast %538 : vector<1x2x32xf32> to vector<2x32xf32>
    %540 = vector.broadcast %354 : vector<1x32xf32> to vector<2x32xf32>
    %541 = arith.mulf %539, %540 : vector<2x32xf32>
    %542 = vector.broadcast %357 : vector<1x32xf32> to vector<2x32xf32>
    %543 = arith.addf %541, %542 : vector<2x32xf32>
    %cst_365 = arith.constant 0.000000e+00 : f32
    %544 = vector.broadcast %cst_365 : f32 to vector<2x32xf32>
    %545 = arith.maximumf %543, %544 : vector<2x32xf32>
    %546 = arith.truncf %545 : vector<2x32xf32> to vector<2x32xbf16>
    %c15_366 = arith.constant 15 : index
    %c0_367 = arith.constant 0 : index
    %c0_368 = arith.constant 0 : index
    %547 = vector.load %arg8[%c15_366, %c0_367, %c0_368] : memref<16x2x32xbf16, #tpu.memory_space<vmem>>, vector<1x2x32xbf16>
    %548 = vector.shape_cast %547 : vector<1x2x32xbf16> to vector<2x32xbf16>
    %549 = vector.shape_cast %546 : vector<2x32xbf16> to vector<1x2x32xbf16>
    tpu.vector_store %arg8[%c15_366, %c0_367, %c0_368], %549 {strides = array<i32>} : memref<16x2x32xbf16, #tpu.memory_space<vmem>>, vector<1x2x32xbf16>,
    return
  }
}

module attributes {stable_mosaic.version = 11 : i64} {
  func.func @_poly_bn_relu_kernel(%arg0: memref<4x32x128xbf16, #tpu.memory_space<vmem>>, %arg1: memref<4x128x16xbf16, #tpu.memory_space<vmem>>, %arg2: memref<1x16xf32, #tpu.memory_space<vmem>>, %arg3: memref<1x16xf32, #tpu.memory_space<vmem>>, %arg4: memref<4x32x16xbf16, #tpu.memory_space<vmem>>, %arg5: memref<4x32x16xf32, #tpu.memory_space<vmem>>) attributes {dimension_semantics = [], scalar_prefetch = 0 : i64, scratch_operands = 1 : i64, tpu.core_type = #tpu.core_type<tc>} {
    %cst = arith.constant 0.000000e+00 : f32
    %0 = vector.broadcast %cst : f32 to vector<1x16xf32>
    %c0 = arith.constant 0 : index
    %c0_0 = arith.constant 0 : index
    %c0_1 = arith.constant 0 : index
    %1 = vector.load %arg0[%c0, %c0_0, %c0_1] : memref<4x32x128xbf16, #tpu.memory_space<vmem>>, vector<1x32x128xbf16>
    %2 = vector.shape_cast %1 : vector<1x32x128xbf16> to vector<32x128xbf16>
    %c0_2 = arith.constant 0 : index
    %c0_3 = arith.constant 0 : index
    %c0_4 = arith.constant 0 : index
    %3 = vector.load %arg1[%c0_2, %c0_3, %c0_4] : memref<4x128x16xbf16, #tpu.memory_space<vmem>>, vector<1x128x16xbf16>
    %4 = vector.shape_cast %3 : vector<1x128x16xbf16> to vector<128x16xbf16>
    %cst_5 = arith.constant dense<0.000000e+00> : vector<32x16xf32>
    %5 = tpu.matmul %2, %4, %cst_5 {dimension_numbers = #tpu.dot_dimension_numbers<[1], [0], [0], [1], [0, 0, 1, 1], [], []>} : vector<32x128xbf16>, vector<128x16xbf16>, vector<32x16xf32> -> vector<32x16xf32>
    %c0_6 = arith.constant 0 : index
    %c0_7 = arith.constant 0 : index
    %c0_8 = arith.constant 0 : index
    %6 = vector.load %arg5[%c0_6, %c0_7, %c0_8] : memref<4x32x16xf32, #tpu.memory_space<vmem>>, vector<1x32x16xf32>
    %7 = vector.shape_cast %6 : vector<1x32x16xf32> to vector<32x16xf32>
    %8 = vector.shape_cast %5 : vector<32x16xf32> to vector<1x32x16xf32>
    tpu.vector_store %arg5[%c0_6, %c0_7, %c0_8], %8 {strides = array<i32>} : memref<4x32x16xf32, #tpu.memory_space<vmem>>, vector<1x32x16xf32>,
    %cst_9 = arith.constant dense<0.000000e+00> : vector<16xf32>
    %9 = vector.multi_reduction <add>, %5, %cst_9 [0] : vector<32x16xf32> to vector<16xf32>
    %10 = vector.shape_cast %9 : vector<16xf32> to vector<1x16xf32>
    %11 = arith.addf %0, %10 : vector<1x16xf32>
    %c1 = arith.constant 1 : index
    %c0_10 = arith.constant 0 : index
    %c0_11 = arith.constant 0 : index
    %12 = vector.load %arg0[%c1, %c0_10, %c0_11] : memref<4x32x128xbf16, #tpu.memory_space<vmem>>, vector<1x32x128xbf16>
    %13 = vector.shape_cast %12 : vector<1x32x128xbf16> to vector<32x128xbf16>
    %c1_12 = arith.constant 1 : index
    %c0_13 = arith.constant 0 : index
    %c0_14 = arith.constant 0 : index
    %14 = vector.load %arg1[%c1_12, %c0_13, %c0_14] : memref<4x128x16xbf16, #tpu.memory_space<vmem>>, vector<1x128x16xbf16>
    %15 = vector.shape_cast %14 : vector<1x128x16xbf16> to vector<128x16xbf16>
    %cst_15 = arith.constant dense<0.000000e+00> : vector<32x16xf32>
    %16 = tpu.matmul %13, %15, %cst_15 {dimension_numbers = #tpu.dot_dimension_numbers<[1], [0], [0], [1], [0, 0, 1, 1], [], []>} : vector<32x128xbf16>, vector<128x16xbf16>, vector<32x16xf32> -> vector<32x16xf32>
    %c1_16 = arith.constant 1 : index
    %c0_17 = arith.constant 0 : index
    %c0_18 = arith.constant 0 : index
    %17 = vector.load %arg5[%c1_16, %c0_17, %c0_18] : memref<4x32x16xf32, #tpu.memory_space<vmem>>, vector<1x32x16xf32>
    %18 = vector.shape_cast %17 : vector<1x32x16xf32> to vector<32x16xf32>
    %19 = vector.shape_cast %16 : vector<32x16xf32> to vector<1x32x16xf32>
    tpu.vector_store %arg5[%c1_16, %c0_17, %c0_18], %19 {strides = array<i32>} : memref<4x32x16xf32, #tpu.memory_space<vmem>>, vector<1x32x16xf32>,
    %cst_19 = arith.constant dense<0.000000e+00> : vector<16xf32>
    %20 = vector.multi_reduction <add>, %16, %cst_19 [0] : vector<32x16xf32> to vector<16xf32>
    %21 = vector.shape_cast %20 : vector<16xf32> to vector<1x16xf32>
    %22 = arith.addf %11, %21 : vector<1x16xf32>
    %c2 = arith.constant 2 : index
    %c0_20 = arith.constant 0 : index
    %c0_21 = arith.constant 0 : index
    %23 = vector.load %arg0[%c2, %c0_20, %c0_21] : memref<4x32x128xbf16, #tpu.memory_space<vmem>>, vector<1x32x128xbf16>
    %24 = vector.shape_cast %23 : vector<1x32x128xbf16> to vector<32x128xbf16>
    %c2_22 = arith.constant 2 : index
    %c0_23 = arith.constant 0 : index
    %c0_24 = arith.constant 0 : index
    %25 = vector.load %arg1[%c2_22, %c0_23, %c0_24] : memref<4x128x16xbf16, #tpu.memory_space<vmem>>, vector<1x128x16xbf16>
    %26 = vector.shape_cast %25 : vector<1x128x16xbf16> to vector<128x16xbf16>
    %cst_25 = arith.constant dense<0.000000e+00> : vector<32x16xf32>
    %27 = tpu.matmul %24, %26, %cst_25 {dimension_numbers = #tpu.dot_dimension_numbers<[1], [0], [0], [1], [0, 0, 1, 1], [], []>} : vector<32x128xbf16>, vector<128x16xbf16>, vector<32x16xf32> -> vector<32x16xf32>
    %c2_26 = arith.constant 2 : index
    %c0_27 = arith.constant 0 : index
    %c0_28 = arith.constant 0 : index
    %28 = vector.load %arg5[%c2_26, %c0_27, %c0_28] : memref<4x32x16xf32, #tpu.memory_space<vmem>>, vector<1x32x16xf32>
    %29 = vector.shape_cast %28 : vector<1x32x16xf32> to vector<32x16xf32>
    %30 = vector.shape_cast %27 : vector<32x16xf32> to vector<1x32x16xf32>
    tpu.vector_store %arg5[%c2_26, %c0_27, %c0_28], %30 {strides = array<i32>} : memref<4x32x16xf32, #tpu.memory_space<vmem>>, vector<1x32x16xf32>,
    %cst_29 = arith.constant dense<0.000000e+00> : vector<16xf32>
    %31 = vector.multi_reduction <add>, %27, %cst_29 [0] : vector<32x16xf32> to vector<16xf32>
    %32 = vector.shape_cast %31 : vector<16xf32> to vector<1x16xf32>
    %33 = arith.addf %22, %32 : vector<1x16xf32>
    %c3 = arith.constant 3 : index
    %c0_30 = arith.constant 0 : index
    %c0_31 = arith.constant 0 : index
    %34 = vector.load %arg0[%c3, %c0_30, %c0_31] : memref<4x32x128xbf16, #tpu.memory_space<vmem>>, vector<1x32x128xbf16>
    %35 = vector.shape_cast %34 : vector<1x32x128xbf16> to vector<32x128xbf16>
    %c3_32 = arith.constant 3 : index
    %c0_33 = arith.constant 0 : index
    %c0_34 = arith.constant 0 : index
    %36 = vector.load %arg1[%c3_32, %c0_33, %c0_34] : memref<4x128x16xbf16, #tpu.memory_space<vmem>>, vector<1x128x16xbf16>
    %37 = vector.shape_cast %36 : vector<1x128x16xbf16> to vector<128x16xbf16>
    %cst_35 = arith.constant dense<0.000000e+00> : vector<32x16xf32>
    %38 = tpu.matmul %35, %37, %cst_35 {dimension_numbers = #tpu.dot_dimension_numbers<[1], [0], [0], [1], [0, 0, 1, 1], [], []>} : vector<32x128xbf16>, vector<128x16xbf16>, vector<32x16xf32> -> vector<32x16xf32>
    %c3_36 = arith.constant 3 : index
    %c0_37 = arith.constant 0 : index
    %c0_38 = arith.constant 0 : index
    %39 = vector.load %arg5[%c3_36, %c0_37, %c0_38] : memref<4x32x16xf32, #tpu.memory_space<vmem>>, vector<1x32x16xf32>
    %40 = vector.shape_cast %39 : vector<1x32x16xf32> to vector<32x16xf32>
    %41 = vector.shape_cast %38 : vector<32x16xf32> to vector<1x32x16xf32>
    tpu.vector_store %arg5[%c3_36, %c0_37, %c0_38], %41 {strides = array<i32>} : memref<4x32x16xf32, #tpu.memory_space<vmem>>, vector<1x32x16xf32>,
    %cst_39 = arith.constant dense<0.000000e+00> : vector<16xf32>
    %42 = vector.multi_reduction <add>, %38, %cst_39 [0] : vector<32x16xf32> to vector<16xf32>
    %43 = vector.shape_cast %42 : vector<16xf32> to vector<1x16xf32>
    %44 = arith.addf %33, %43 : vector<1x16xf32>
    %cst_40 = arith.constant 7.812500e-03 : f32
    %45 = vector.broadcast %cst_40 : f32 to vector<1x16xf32>
    %46 = arith.mulf %44, %45 : vector<1x16xf32>
    %cst_41 = arith.constant 0.000000e+00 : f32
    %47 = vector.broadcast %cst_41 : f32 to vector<1x16xf32>
    %c0_42 = arith.constant 0 : index
    %c0_43 = arith.constant 0 : index
    %c0_44 = arith.constant 0 : index
    %48 = vector.load %arg5[%c0_42, %c0_43, %c0_44] : memref<4x32x16xf32, #tpu.memory_space<vmem>>, vector<1x32x16xf32>
    %49 = vector.shape_cast %48 : vector<1x32x16xf32> to vector<32x16xf32>
    %50 = vector.broadcast %46 : vector<1x16xf32> to vector<32x16xf32>
    %51 = arith.subf %49, %50 : vector<32x16xf32>
    %52 = arith.mulf %51, %51 : vector<32x16xf32>
    %cst_45 = arith.constant dense<0.000000e+00> : vector<16xf32>
    %53 = vector.multi_reduction <add>, %52, %cst_45 [0] : vector<32x16xf32> to vector<16xf32>
    %54 = vector.shape_cast %53 : vector<16xf32> to vector<1x16xf32>
    %55 = arith.addf %47, %54 : vector<1x16xf32>
    %c1_46 = arith.constant 1 : index
    %c0_47 = arith.constant 0 : index
    %c0_48 = arith.constant 0 : index
    %56 = vector.load %arg5[%c1_46, %c0_47, %c0_48] : memref<4x32x16xf32, #tpu.memory_space<vmem>>, vector<1x32x16xf32>
    %57 = vector.shape_cast %56 : vector<1x32x16xf32> to vector<32x16xf32>
    %58 = vector.broadcast %46 : vector<1x16xf32> to vector<32x16xf32>
    %59 = arith.subf %57, %58 : vector<32x16xf32>
    %60 = arith.mulf %59, %59 : vector<32x16xf32>
    %cst_49 = arith.constant dense<0.000000e+00> : vector<16xf32>
    %61 = vector.multi_reduction <add>, %60, %cst_49 [0] : vector<32x16xf32> to vector<16xf32>
    %62 = vector.shape_cast %61 : vector<16xf32> to vector<1x16xf32>
    %63 = arith.addf %55, %62 : vector<1x16xf32>
    %c2_50 = arith.constant 2 : index
    %c0_51 = arith.constant 0 : index
    %c0_52 = arith.constant 0 : index
    %64 = vector.load %arg5[%c2_50, %c0_51, %c0_52] : memref<4x32x16xf32, #tpu.memory_space<vmem>>, vector<1x32x16xf32>
    %65 = vector.shape_cast %64 : vector<1x32x16xf32> to vector<32x16xf32>
    %66 = vector.broadcast %46 : vector<1x16xf32> to vector<32x16xf32>
    %67 = arith.subf %65, %66 : vector<32x16xf32>
    %68 = arith.mulf %67, %67 : vector<32x16xf32>
    %cst_53 = arith.constant dense<0.000000e+00> : vector<16xf32>
    %69 = vector.multi_reduction <add>, %68, %cst_53 [0] : vector<32x16xf32> to vector<16xf32>
    %70 = vector.shape_cast %69 : vector<16xf32> to vector<1x16xf32>
    %71 = arith.addf %63, %70 : vector<1x16xf32>
    %c3_54 = arith.constant 3 : index
    %c0_55 = arith.constant 0 : index
    %c0_56 = arith.constant 0 : index
    %72 = vector.load %arg5[%c3_54, %c0_55, %c0_56] : memref<4x32x16xf32, #tpu.memory_space<vmem>>, vector<1x32x16xf32>
    %73 = vector.shape_cast %72 : vector<1x32x16xf32> to vector<32x16xf32>
    %74 = vector.broadcast %46 : vector<1x16xf32> to vector<32x16xf32>
    %75 = arith.subf %73, %74 : vector<32x16xf32>
    %76 = arith.mulf %75, %75 : vector<32x16xf32>
    %cst_57 = arith.constant dense<0.000000e+00> : vector<16xf32>
    %77 = vector.multi_reduction <add>, %76, %cst_57 [0] : vector<32x16xf32> to vector<16xf32>
    %78 = vector.shape_cast %77 : vector<16xf32> to vector<1x16xf32>
    %79 = arith.addf %71, %78 : vector<1x16xf32>
    %cst_58 = arith.constant 7.812500e-03 : f32
    %80 = vector.broadcast %cst_58 : f32 to vector<1x16xf32>
    %81 = arith.mulf %79, %80 : vector<1x16xf32>
    %cst_59 = arith.constant 9.99999974E-6 : f32
    %82 = vector.broadcast %cst_59 : f32 to vector<1x16xf32>
    %83 = arith.addf %81, %82 : vector<1x16xf32>
    %84 = math.rsqrt %83 : vector<1x16xf32>
    %c0_60 = arith.constant 0 : index
    %c0_61 = arith.constant 0 : index
    %85 = vector.load %arg2[%c0_60, %c0_61] : memref<1x16xf32, #tpu.memory_space<vmem>>, vector<1x16xf32>
    %86 = arith.mulf %85, %84 : vector<1x16xf32>
    %c0_62 = arith.constant 0 : index
    %c0_63 = arith.constant 0 : index
    %87 = vector.load %arg3[%c0_62, %c0_63] : memref<1x16xf32, #tpu.memory_space<vmem>>, vector<1x16xf32>
    %88 = arith.mulf %46, %86 : vector<1x16xf32>
    %89 = arith.subf %87, %88 : vector<1x16xf32>
    %c0_64 = arith.constant 0 : index
    %c0_65 = arith.constant 0 : index
    %c0_66 = arith.constant 0 : index
    %90 = vector.load %arg5[%c0_64, %c0_65, %c0_66] : memref<4x32x16xf32, #tpu.memory_space<vmem>>, vector<1x32x16xf32>
    %91 = vector.shape_cast %90 : vector<1x32x16xf32> to vector<32x16xf32>
    %92 = vector.broadcast %86 : vector<1x16xf32> to vector<32x16xf32>
    %93 = arith.mulf %91, %92 : vector<32x16xf32>
    %94 = vector.broadcast %89 : vector<1x16xf32> to vector<32x16xf32>
    %95 = arith.addf %93, %94 : vector<32x16xf32>
    %cst_67 = arith.constant 0.000000e+00 : f32
    %96 = vector.broadcast %cst_67 : f32 to vector<32x16xf32>
    %97 = arith.maximumf %95, %96 : vector<32x16xf32>
    %98 = arith.truncf %97 : vector<32x16xf32> to vector<32x16xbf16>
    %c0_68 = arith.constant 0 : index
    %c0_69 = arith.constant 0 : index
    %c0_70 = arith.constant 0 : index
    %99 = vector.load %arg4[%c0_68, %c0_69, %c0_70] : memref<4x32x16xbf16, #tpu.memory_space<vmem>>, vector<1x32x16xbf16>
    %100 = vector.shape_cast %99 : vector<1x32x16xbf16> to vector<32x16xbf16>
    %101 = vector.shape_cast %98 : vector<32x16xbf16> to vector<1x32x16xbf16>
    tpu.vector_store %arg4[%c0_68, %c0_69, %c0_70], %101 {strides = array<i32>} : memref<4x32x16xbf16, #tpu.memory_space<vmem>>, vector<1x32x16xbf16>,
    %c1_71 = arith.constant 1 : index
    %c0_72 = arith.constant 0 : index
    %c0_73 = arith.constant 0 : index
    %102 = vector.load %arg5[%c1_71, %c0_72, %c0_73] : memref<4x32x16xf32, #tpu.memory_space<vmem>>, vector<1x32x16xf32>
    %103 = vector.shape_cast %102 : vector<1x32x16xf32> to vector<32x16xf32>
    %104 = vector.broadcast %86 : vector<1x16xf32> to vector<32x16xf32>
    %105 = arith.mulf %103, %104 : vector<32x16xf32>
    %106 = vector.broadcast %89 : vector<1x16xf32> to vector<32x16xf32>
    %107 = arith.addf %105, %106 : vector<32x16xf32>
    %cst_74 = arith.constant 0.000000e+00 : f32
    %108 = vector.broadcast %cst_74 : f32 to vector<32x16xf32>
    %109 = arith.maximumf %107, %108 : vector<32x16xf32>
    %110 = arith.truncf %109 : vector<32x16xf32> to vector<32x16xbf16>
    %c1_75 = arith.constant 1 : index
    %c0_76 = arith.constant 0 : index
    %c0_77 = arith.constant 0 : index
    %111 = vector.load %arg4[%c1_75, %c0_76, %c0_77] : memref<4x32x16xbf16, #tpu.memory_space<vmem>>, vector<1x32x16xbf16>
    %112 = vector.shape_cast %111 : vector<1x32x16xbf16> to vector<32x16xbf16>
    %113 = vector.shape_cast %110 : vector<32x16xbf16> to vector<1x32x16xbf16>
    tpu.vector_store %arg4[%c1_75, %c0_76, %c0_77], %113 {strides = array<i32>} : memref<4x32x16xbf16, #tpu.memory_space<vmem>>, vector<1x32x16xbf16>,
    %c2_78 = arith.constant 2 : index
    %c0_79 = arith.constant 0 : index
    %c0_80 = arith.constant 0 : index
    %114 = vector.load %arg5[%c2_78, %c0_79, %c0_80] : memref<4x32x16xf32, #tpu.memory_space<vmem>>, vector<1x32x16xf32>
    %115 = vector.shape_cast %114 : vector<1x32x16xf32> to vector<32x16xf32>
    %116 = vector.broadcast %86 : vector<1x16xf32> to vector<32x16xf32>
    %117 = arith.mulf %115, %116 : vector<32x16xf32>
    %118 = vector.broadcast %89 : vector<1x16xf32> to vector<32x16xf32>
    %119 = arith.addf %117, %118 : vector<32x16xf32>
    %cst_81 = arith.constant 0.000000e+00 : f32
    %120 = vector.broadcast %cst_81 : f32 to vector<32x16xf32>
    %121 = arith.maximumf %119, %120 : vector<32x16xf32>
    %122 = arith.truncf %121 : vector<32x16xf32> to vector<32x16xbf16>
    %c2_82 = arith.constant 2 : index
    %c0_83 = arith.constant 0 : index
    %c0_84 = arith.constant 0 : index
    %123 = vector.load %arg4[%c2_82, %c0_83, %c0_84] : memref<4x32x16xbf16, #tpu.memory_space<vmem>>, vector<1x32x16xbf16>
    %124 = vector.shape_cast %123 : vector<1x32x16xbf16> to vector<32x16xbf16>
    %125 = vector.shape_cast %122 : vector<32x16xbf16> to vector<1x32x16xbf16>
    tpu.vector_store %arg4[%c2_82, %c0_83, %c0_84], %125 {strides = array<i32>} : memref<4x32x16xbf16, #tpu.memory_space<vmem>>, vector<1x32x16xbf16>,
    %c3_85 = arith.constant 3 : index
    %c0_86 = arith.constant 0 : index
    %c0_87 = arith.constant 0 : index
    %126 = vector.load %arg5[%c3_85, %c0_86, %c0_87] : memref<4x32x16xf32, #tpu.memory_space<vmem>>, vector<1x32x16xf32>
    %127 = vector.shape_cast %126 : vector<1x32x16xf32> to vector<32x16xf32>
    %128 = vector.broadcast %86 : vector<1x16xf32> to vector<32x16xf32>
    %129 = arith.mulf %127, %128 : vector<32x16xf32>
    %130 = vector.broadcast %89 : vector<1x16xf32> to vector<32x16xf32>
    %131 = arith.addf %129, %130 : vector<32x16xf32>
    %cst_88 = arith.constant 0.000000e+00 : f32
    %132 = vector.broadcast %cst_88 : f32 to vector<32x16xf32>
    %133 = arith.maximumf %131, %132 : vector<32x16xf32>
    %134 = arith.truncf %133 : vector<32x16xf32> to vector<32x16xbf16>
    %c3_89 = arith.constant 3 : index
    %c0_90 = arith.constant 0 : index
    %c0_91 = arith.constant 0 : index
    %135 = vector.load %arg4[%c3_89, %c0_90, %c0_91] : memref<4x32x16xbf16, #tpu.memory_space<vmem>>, vector<1x32x16xbf16>
    %136 = vector.shape_cast %135 : vector<1x32x16xbf16> to vector<32x16xbf16>
    %137 = vector.shape_cast %134 : vector<32x16xbf16> to vector<1x32x16xbf16>
    tpu.vector_store %arg4[%c3_89, %c0_90, %c0_91], %137 {strides = array<i32>} : memref<4x32x16xbf16, #tpu.memory_space<vmem>>, vector<1x32x16xbf16>,
    return
  }
}

module attributes {stable_mosaic.version = 11 : i64} {
  func.func @_poly_bn_relu_kernel(%arg0: memref<4x128x64xbf16, #tpu.memory_space<vmem>>, %arg1: memref<4x64x8xbf16, #tpu.memory_space<vmem>>, %arg2: memref<1x8xf32, #tpu.memory_space<vmem>>, %arg3: memref<1x8xf32, #tpu.memory_space<vmem>>, %arg4: memref<4x128x8xbf16, #tpu.memory_space<vmem>>, %arg5: memref<4x128x8xf32, #tpu.memory_space<vmem>>) attributes {dimension_semantics = [], scalar_prefetch = 0 : i64, scratch_operands = 1 : i64, tpu.core_type = #tpu.core_type<tc>} {
    %cst = arith.constant 0.000000e+00 : f32
    %0 = vector.broadcast %cst : f32 to vector<1x8xf32>
    %c0 = arith.constant 0 : index
    %c0_0 = arith.constant 0 : index
    %c0_1 = arith.constant 0 : index
    %1 = vector.load %arg0[%c0, %c0_0, %c0_1] : memref<4x128x64xbf16, #tpu.memory_space<vmem>>, vector<1x128x64xbf16>
    %2 = vector.shape_cast %1 : vector<1x128x64xbf16> to vector<128x64xbf16>
    %c0_2 = arith.constant 0 : index
    %c0_3 = arith.constant 0 : index
    %c0_4 = arith.constant 0 : index
    %3 = vector.load %arg1[%c0_2, %c0_3, %c0_4] : memref<4x64x8xbf16, #tpu.memory_space<vmem>>, vector<1x64x8xbf16>
    %4 = vector.shape_cast %3 : vector<1x64x8xbf16> to vector<64x8xbf16>
    %cst_5 = arith.constant dense<0.000000e+00> : vector<128x8xf32>
    %5 = tpu.matmul %2, %4, %cst_5 {dimension_numbers = #tpu.dot_dimension_numbers<[1], [0], [0], [1], [0, 0, 1, 1], [], []>} : vector<128x64xbf16>, vector<64x8xbf16>, vector<128x8xf32> -> vector<128x8xf32>
    %c0_6 = arith.constant 0 : index
    %c0_7 = arith.constant 0 : index
    %c0_8 = arith.constant 0 : index
    %6 = vector.load %arg5[%c0_6, %c0_7, %c0_8] : memref<4x128x8xf32, #tpu.memory_space<vmem>>, vector<1x128x8xf32>
    %7 = vector.shape_cast %6 : vector<1x128x8xf32> to vector<128x8xf32>
    %8 = vector.shape_cast %5 : vector<128x8xf32> to vector<1x128x8xf32>
    tpu.vector_store %arg5[%c0_6, %c0_7, %c0_8], %8 {strides = array<i32>} : memref<4x128x8xf32, #tpu.memory_space<vmem>>, vector<1x128x8xf32>,
    %cst_9 = arith.constant dense<0.000000e+00> : vector<8xf32>
    %9 = vector.multi_reduction <add>, %5, %cst_9 [0] : vector<128x8xf32> to vector<8xf32>
    %10 = vector.shape_cast %9 : vector<8xf32> to vector<1x8xf32>
    %11 = arith.addf %0, %10 : vector<1x8xf32>
    %c1 = arith.constant 1 : index
    %c0_10 = arith.constant 0 : index
    %c0_11 = arith.constant 0 : index
    %12 = vector.load %arg0[%c1, %c0_10, %c0_11] : memref<4x128x64xbf16, #tpu.memory_space<vmem>>, vector<1x128x64xbf16>
    %13 = vector.shape_cast %12 : vector<1x128x64xbf16> to vector<128x64xbf16>
    %c1_12 = arith.constant 1 : index
    %c0_13 = arith.constant 0 : index
    %c0_14 = arith.constant 0 : index
    %14 = vector.load %arg1[%c1_12, %c0_13, %c0_14] : memref<4x64x8xbf16, #tpu.memory_space<vmem>>, vector<1x64x8xbf16>
    %15 = vector.shape_cast %14 : vector<1x64x8xbf16> to vector<64x8xbf16>
    %cst_15 = arith.constant dense<0.000000e+00> : vector<128x8xf32>
    %16 = tpu.matmul %13, %15, %cst_15 {dimension_numbers = #tpu.dot_dimension_numbers<[1], [0], [0], [1], [0, 0, 1, 1], [], []>} : vector<128x64xbf16>, vector<64x8xbf16>, vector<128x8xf32> -> vector<128x8xf32>
    %c1_16 = arith.constant 1 : index
    %c0_17 = arith.constant 0 : index
    %c0_18 = arith.constant 0 : index
    %17 = vector.load %arg5[%c1_16, %c0_17, %c0_18] : memref<4x128x8xf32, #tpu.memory_space<vmem>>, vector<1x128x8xf32>
    %18 = vector.shape_cast %17 : vector<1x128x8xf32> to vector<128x8xf32>
    %19 = vector.shape_cast %16 : vector<128x8xf32> to vector<1x128x8xf32>
    tpu.vector_store %arg5[%c1_16, %c0_17, %c0_18], %19 {strides = array<i32>} : memref<4x128x8xf32, #tpu.memory_space<vmem>>, vector<1x128x8xf32>,
    %cst_19 = arith.constant dense<0.000000e+00> : vector<8xf32>
    %20 = vector.multi_reduction <add>, %16, %cst_19 [0] : vector<128x8xf32> to vector<8xf32>
    %21 = vector.shape_cast %20 : vector<8xf32> to vector<1x8xf32>
    %22 = arith.addf %11, %21 : vector<1x8xf32>
    %c2 = arith.constant 2 : index
    %c0_20 = arith.constant 0 : index
    %c0_21 = arith.constant 0 : index
    %23 = vector.load %arg0[%c2, %c0_20, %c0_21] : memref<4x128x64xbf16, #tpu.memory_space<vmem>>, vector<1x128x64xbf16>
    %24 = vector.shape_cast %23 : vector<1x128x64xbf16> to vector<128x64xbf16>
    %c2_22 = arith.constant 2 : index
    %c0_23 = arith.constant 0 : index
    %c0_24 = arith.constant 0 : index
    %25 = vector.load %arg1[%c2_22, %c0_23, %c0_24] : memref<4x64x8xbf16, #tpu.memory_space<vmem>>, vector<1x64x8xbf16>
    %26 = vector.shape_cast %25 : vector<1x64x8xbf16> to vector<64x8xbf16>
    %cst_25 = arith.constant dense<0.000000e+00> : vector<128x8xf32>
    %27 = tpu.matmul %24, %26, %cst_25 {dimension_numbers = #tpu.dot_dimension_numbers<[1], [0], [0], [1], [0, 0, 1, 1], [], []>} : vector<128x64xbf16>, vector<64x8xbf16>, vector<128x8xf32> -> vector<128x8xf32>
    %c2_26 = arith.constant 2 : index
    %c0_27 = arith.constant 0 : index
    %c0_28 = arith.constant 0 : index
    %28 = vector.load %arg5[%c2_26, %c0_27, %c0_28] : memref<4x128x8xf32, #tpu.memory_space<vmem>>, vector<1x128x8xf32>
    %29 = vector.shape_cast %28 : vector<1x128x8xf32> to vector<128x8xf32>
    %30 = vector.shape_cast %27 : vector<128x8xf32> to vector<1x128x8xf32>
    tpu.vector_store %arg5[%c2_26, %c0_27, %c0_28], %30 {strides = array<i32>} : memref<4x128x8xf32, #tpu.memory_space<vmem>>, vector<1x128x8xf32>,
    %cst_29 = arith.constant dense<0.000000e+00> : vector<8xf32>
    %31 = vector.multi_reduction <add>, %27, %cst_29 [0] : vector<128x8xf32> to vector<8xf32>
    %32 = vector.shape_cast %31 : vector<8xf32> to vector<1x8xf32>
    %33 = arith.addf %22, %32 : vector<1x8xf32>
    %c3 = arith.constant 3 : index
    %c0_30 = arith.constant 0 : index
    %c0_31 = arith.constant 0 : index
    %34 = vector.load %arg0[%c3, %c0_30, %c0_31] : memref<4x128x64xbf16, #tpu.memory_space<vmem>>, vector<1x128x64xbf16>
    %35 = vector.shape_cast %34 : vector<1x128x64xbf16> to vector<128x64xbf16>
    %c3_32 = arith.constant 3 : index
    %c0_33 = arith.constant 0 : index
    %c0_34 = arith.constant 0 : index
    %36 = vector.load %arg1[%c3_32, %c0_33, %c0_34] : memref<4x64x8xbf16, #tpu.memory_space<vmem>>, vector<1x64x8xbf16>
    %37 = vector.shape_cast %36 : vector<1x64x8xbf16> to vector<64x8xbf16>
    %cst_35 = arith.constant dense<0.000000e+00> : vector<128x8xf32>
    %38 = tpu.matmul %35, %37, %cst_35 {dimension_numbers = #tpu.dot_dimension_numbers<[1], [0], [0], [1], [0, 0, 1, 1], [], []>} : vector<128x64xbf16>, vector<64x8xbf16>, vector<128x8xf32> -> vector<128x8xf32>
    %c3_36 = arith.constant 3 : index
    %c0_37 = arith.constant 0 : index
    %c0_38 = arith.constant 0 : index
    %39 = vector.load %arg5[%c3_36, %c0_37, %c0_38] : memref<4x128x8xf32, #tpu.memory_space<vmem>>, vector<1x128x8xf32>
    %40 = vector.shape_cast %39 : vector<1x128x8xf32> to vector<128x8xf32>
    %41 = vector.shape_cast %38 : vector<128x8xf32> to vector<1x128x8xf32>
    tpu.vector_store %arg5[%c3_36, %c0_37, %c0_38], %41 {strides = array<i32>} : memref<4x128x8xf32, #tpu.memory_space<vmem>>, vector<1x128x8xf32>,
    %cst_39 = arith.constant dense<0.000000e+00> : vector<8xf32>
    %42 = vector.multi_reduction <add>, %38, %cst_39 [0] : vector<128x8xf32> to vector<8xf32>
    %43 = vector.shape_cast %42 : vector<8xf32> to vector<1x8xf32>
    %44 = arith.addf %33, %43 : vector<1x8xf32>
    %cst_40 = arith.constant 0.001953125 : f32
    %45 = vector.broadcast %cst_40 : f32 to vector<1x8xf32>
    %46 = arith.mulf %44, %45 : vector<1x8xf32>
    %cst_41 = arith.constant 0.000000e+00 : f32
    %47 = vector.broadcast %cst_41 : f32 to vector<1x8xf32>
    %c0_42 = arith.constant 0 : index
    %c0_43 = arith.constant 0 : index
    %c0_44 = arith.constant 0 : index
    %48 = vector.load %arg5[%c0_42, %c0_43, %c0_44] : memref<4x128x8xf32, #tpu.memory_space<vmem>>, vector<1x128x8xf32>
    %49 = vector.shape_cast %48 : vector<1x128x8xf32> to vector<128x8xf32>
    %50 = vector.broadcast %46 : vector<1x8xf32> to vector<128x8xf32>
    %51 = arith.subf %49, %50 : vector<128x8xf32>
    %52 = arith.mulf %51, %51 : vector<128x8xf32>
    %cst_45 = arith.constant dense<0.000000e+00> : vector<8xf32>
    %53 = vector.multi_reduction <add>, %52, %cst_45 [0] : vector<128x8xf32> to vector<8xf32>
    %54 = vector.shape_cast %53 : vector<8xf32> to vector<1x8xf32>
    %55 = arith.addf %47, %54 : vector<1x8xf32>
    %c1_46 = arith.constant 1 : index
    %c0_47 = arith.constant 0 : index
    %c0_48 = arith.constant 0 : index
    %56 = vector.load %arg5[%c1_46, %c0_47, %c0_48] : memref<4x128x8xf32, #tpu.memory_space<vmem>>, vector<1x128x8xf32>
    %57 = vector.shape_cast %56 : vector<1x128x8xf32> to vector<128x8xf32>
    %58 = vector.broadcast %46 : vector<1x8xf32> to vector<128x8xf32>
    %59 = arith.subf %57, %58 : vector<128x8xf32>
    %60 = arith.mulf %59, %59 : vector<128x8xf32>
    %cst_49 = arith.constant dense<0.000000e+00> : vector<8xf32>
    %61 = vector.multi_reduction <add>, %60, %cst_49 [0] : vector<128x8xf32> to vector<8xf32>
    %62 = vector.shape_cast %61 : vector<8xf32> to vector<1x8xf32>
    %63 = arith.addf %55, %62 : vector<1x8xf32>
    %c2_50 = arith.constant 2 : index
    %c0_51 = arith.constant 0 : index
    %c0_52 = arith.constant 0 : index
    %64 = vector.load %arg5[%c2_50, %c0_51, %c0_52] : memref<4x128x8xf32, #tpu.memory_space<vmem>>, vector<1x128x8xf32>
    %65 = vector.shape_cast %64 : vector<1x128x8xf32> to vector<128x8xf32>
    %66 = vector.broadcast %46 : vector<1x8xf32> to vector<128x8xf32>
    %67 = arith.subf %65, %66 : vector<128x8xf32>
    %68 = arith.mulf %67, %67 : vector<128x8xf32>
    %cst_53 = arith.constant dense<0.000000e+00> : vector<8xf32>
    %69 = vector.multi_reduction <add>, %68, %cst_53 [0] : vector<128x8xf32> to vector<8xf32>
    %70 = vector.shape_cast %69 : vector<8xf32> to vector<1x8xf32>
    %71 = arith.addf %63, %70 : vector<1x8xf32>
    %c3_54 = arith.constant 3 : index
    %c0_55 = arith.constant 0 : index
    %c0_56 = arith.constant 0 : index
    %72 = vector.load %arg5[%c3_54, %c0_55, %c0_56] : memref<4x128x8xf32, #tpu.memory_space<vmem>>, vector<1x128x8xf32>
    %73 = vector.shape_cast %72 : vector<1x128x8xf32> to vector<128x8xf32>
    %74 = vector.broadcast %46 : vector<1x8xf32> to vector<128x8xf32>
    %75 = arith.subf %73, %74 : vector<128x8xf32>
    %76 = arith.mulf %75, %75 : vector<128x8xf32>
    %cst_57 = arith.constant dense<0.000000e+00> : vector<8xf32>
    %77 = vector.multi_reduction <add>, %76, %cst_57 [0] : vector<128x8xf32> to vector<8xf32>
    %78 = vector.shape_cast %77 : vector<8xf32> to vector<1x8xf32>
    %79 = arith.addf %71, %78 : vector<1x8xf32>
    %cst_58 = arith.constant 0.001953125 : f32
    %80 = vector.broadcast %cst_58 : f32 to vector<1x8xf32>
    %81 = arith.mulf %79, %80 : vector<1x8xf32>
    %cst_59 = arith.constant 9.99999974E-6 : f32
    %82 = vector.broadcast %cst_59 : f32 to vector<1x8xf32>
    %83 = arith.addf %81, %82 : vector<1x8xf32>
    %84 = math.rsqrt %83 : vector<1x8xf32>
    %c0_60 = arith.constant 0 : index
    %c0_61 = arith.constant 0 : index
    %85 = vector.load %arg2[%c0_60, %c0_61] : memref<1x8xf32, #tpu.memory_space<vmem>>, vector<1x8xf32>
    %86 = arith.mulf %85, %84 : vector<1x8xf32>
    %c0_62 = arith.constant 0 : index
    %c0_63 = arith.constant 0 : index
    %87 = vector.load %arg3[%c0_62, %c0_63] : memref<1x8xf32, #tpu.memory_space<vmem>>, vector<1x8xf32>
    %88 = arith.mulf %46, %86 : vector<1x8xf32>
    %89 = arith.subf %87, %88 : vector<1x8xf32>
    %c0_64 = arith.constant 0 : index
    %c0_65 = arith.constant 0 : index
    %c0_66 = arith.constant 0 : index
    %90 = vector.load %arg5[%c0_64, %c0_65, %c0_66] : memref<4x128x8xf32, #tpu.memory_space<vmem>>, vector<1x128x8xf32>
    %91 = vector.shape_cast %90 : vector<1x128x8xf32> to vector<128x8xf32>
    %92 = vector.broadcast %86 : vector<1x8xf32> to vector<128x8xf32>
    %93 = arith.mulf %91, %92 : vector<128x8xf32>
    %94 = vector.broadcast %89 : vector<1x8xf32> to vector<128x8xf32>
    %95 = arith.addf %93, %94 : vector<128x8xf32>
    %cst_67 = arith.constant 0.000000e+00 : f32
    %96 = vector.broadcast %cst_67 : f32 to vector<128x8xf32>
    %97 = arith.maximumf %95, %96 : vector<128x8xf32>
    %98 = arith.truncf %97 : vector<128x8xf32> to vector<128x8xbf16>
    %c0_68 = arith.constant 0 : index
    %c0_69 = arith.constant 0 : index
    %c0_70 = arith.constant 0 : index
    %99 = vector.load %arg4[%c0_68, %c0_69, %c0_70] : memref<4x128x8xbf16, #tpu.memory_space<vmem>>, vector<1x128x8xbf16>
    %100 = vector.shape_cast %99 : vector<1x128x8xbf16> to vector<128x8xbf16>
    %101 = vector.shape_cast %98 : vector<128x8xbf16> to vector<1x128x8xbf16>
    tpu.vector_store %arg4[%c0_68, %c0_69, %c0_70], %101 {strides = array<i32>} : memref<4x128x8xbf16, #tpu.memory_space<vmem>>, vector<1x128x8xbf16>,
    %c1_71 = arith.constant 1 : index
    %c0_72 = arith.constant 0 : index
    %c0_73 = arith.constant 0 : index
    %102 = vector.load %arg5[%c1_71, %c0_72, %c0_73] : memref<4x128x8xf32, #tpu.memory_space<vmem>>, vector<1x128x8xf32>
    %103 = vector.shape_cast %102 : vector<1x128x8xf32> to vector<128x8xf32>
    %104 = vector.broadcast %86 : vector<1x8xf32> to vector<128x8xf32>
    %105 = arith.mulf %103, %104 : vector<128x8xf32>
    %106 = vector.broadcast %89 : vector<1x8xf32> to vector<128x8xf32>
    %107 = arith.addf %105, %106 : vector<128x8xf32>
    %cst_74 = arith.constant 0.000000e+00 : f32
    %108 = vector.broadcast %cst_74 : f32 to vector<128x8xf32>
    %109 = arith.maximumf %107, %108 : vector<128x8xf32>
    %110 = arith.truncf %109 : vector<128x8xf32> to vector<128x8xbf16>
    %c1_75 = arith.constant 1 : index
    %c0_76 = arith.constant 0 : index
    %c0_77 = arith.constant 0 : index
    %111 = vector.load %arg4[%c1_75, %c0_76, %c0_77] : memref<4x128x8xbf16, #tpu.memory_space<vmem>>, vector<1x128x8xbf16>
    %112 = vector.shape_cast %111 : vector<1x128x8xbf16> to vector<128x8xbf16>
    %113 = vector.shape_cast %110 : vector<128x8xbf16> to vector<1x128x8xbf16>
    tpu.vector_store %arg4[%c1_75, %c0_76, %c0_77], %113 {strides = array<i32>} : memref<4x128x8xbf16, #tpu.memory_space<vmem>>, vector<1x128x8xbf16>,
    %c2_78 = arith.constant 2 : index
    %c0_79 = arith.constant 0 : index
    %c0_80 = arith.constant 0 : index
    %114 = vector.load %arg5[%c2_78, %c0_79, %c0_80] : memref<4x128x8xf32, #tpu.memory_space<vmem>>, vector<1x128x8xf32>
    %115 = vector.shape_cast %114 : vector<1x128x8xf32> to vector<128x8xf32>
    %116 = vector.broadcast %86 : vector<1x8xf32> to vector<128x8xf32>
    %117 = arith.mulf %115, %116 : vector<128x8xf32>
    %118 = vector.broadcast %89 : vector<1x8xf32> to vector<128x8xf32>
    %119 = arith.addf %117, %118 : vector<128x8xf32>
    %cst_81 = arith.constant 0.000000e+00 : f32
    %120 = vector.broadcast %cst_81 : f32 to vector<128x8xf32>
    %121 = arith.maximumf %119, %120 : vector<128x8xf32>
    %122 = arith.truncf %121 : vector<128x8xf32> to vector<128x8xbf16>
    %c2_82 = arith.constant 2 : index
    %c0_83 = arith.constant 0 : index
    %c0_84 = arith.constant 0 : index
    %123 = vector.load %arg4[%c2_82, %c0_83, %c0_84] : memref<4x128x8xbf16, #tpu.memory_space<vmem>>, vector<1x128x8xbf16>
    %124 = vector.shape_cast %123 : vector<1x128x8xbf16> to vector<128x8xbf16>
    %125 = vector.shape_cast %122 : vector<128x8xbf16> to vector<1x128x8xbf16>
    tpu.vector_store %arg4[%c2_82, %c0_83, %c0_84], %125 {strides = array<i32>} : memref<4x128x8xbf16, #tpu.memory_space<vmem>>, vector<1x128x8xbf16>,
    %c3_85 = arith.constant 3 : index
    %c0_86 = arith.constant 0 : index
    %c0_87 = arith.constant 0 : index
    %126 = vector.load %arg5[%c3_85, %c0_86, %c0_87] : memref<4x128x8xf32, #tpu.memory_space<vmem>>, vector<1x128x8xf32>
    %127 = vector.shape_cast %126 : vector<1x128x8xf32> to vector<128x8xf32>
    %128 = vector.broadcast %86 : vector<1x8xf32> to vector<128x8xf32>
    %129 = arith.mulf %127, %128 : vector<128x8xf32>
    %130 = vector.broadcast %89 : vector<1x8xf32> to vector<128x8xf32>
    %131 = arith.addf %129, %130 : vector<128x8xf32>
    %cst_88 = arith.constant 0.000000e+00 : f32
    %132 = vector.broadcast %cst_88 : f32 to vector<128x8xf32>
    %133 = arith.maximumf %131, %132 : vector<128x8xf32>
    %134 = arith.truncf %133 : vector<128x8xf32> to vector<128x8xbf16>
    %c3_89 = arith.constant 3 : index
    %c0_90 = arith.constant 0 : index
    %c0_91 = arith.constant 0 : index
    %135 = vector.load %arg4[%c3_89, %c0_90, %c0_91] : memref<4x128x8xbf16, #tpu.memory_space<vmem>>, vector<1x128x8xbf16>
    %136 = vector.shape_cast %135 : vector<1x128x8xbf16> to vector<128x8xbf16>
    %137 = vector.shape_cast %134 : vector<128x8xbf16> to vector<1x128x8xbf16>
    tpu.vector_store %arg4[%c3_89, %c0_90, %c0_91], %137 {strides = array<i32>} : memref<4x128x8xbf16, #tpu.memory_space<vmem>>, vector<1x128x8xbf16>,
    return
  }
}

module attributes {stable_mosaic.version = 11 : i64} {
  func.func @_final_tanh_kernel(%arg0: i32, %arg1: memref<4x512x32xbf16, #tpu.memory_space<vmem>>, %arg2: memref<4x8x32xbf16, #tpu.memory_space<vmem>>, %arg3: memref<8x1xf32, #tpu.memory_space<vmem>>, %arg4: memref<4x8x512xf32, #tpu.memory_space<vmem>>) attributes {dimension_semantics = [#tpu.dimension_semantics<parallel>], iteration_bounds = array<i64: 1>, scalar_prefetch = 0 : i64, scratch_operands = 0 : i64, tpu.core_type = #tpu.core_type<tc>, window_params = [{transform_indices = @transform_0, window_bounds = array<i64: 4, 512, 32>}, {pipeline_mode = #tpu.pipeline_mode<synchronous>, transform_indices = @transform_1, window_bounds = array<i64: 4, 8, 32>}, {pipeline_mode = #tpu.pipeline_mode<synchronous>, transform_indices = @transform_2, window_bounds = array<i64: 8, 1>}, {transform_indices = @transform_3, window_bounds = array<i64: 4, 8, 512>}]} {
    %c0 = arith.constant 0 : index
    %c0_0 = arith.constant 0 : index
    %c0_1 = arith.constant 0 : index
    %0 = vector.load %arg2[%c0, %c0_0, %c0_1] : memref<4x8x32xbf16, #tpu.memory_space<vmem>>, vector<1x8x32xbf16>
    %1 = vector.shape_cast %0 : vector<1x8x32xbf16> to vector<8x32xbf16>
    %c0_2 = arith.constant 0 : index
    %c0_3 = arith.constant 0 : index
    %c0_4 = arith.constant 0 : index
    %2 = vector.load %arg1[%c0_2, %c0_3, %c0_4] : memref<4x512x32xbf16, #tpu.memory_space<vmem>>, vector<1x512x32xbf16>
    %3 = vector.shape_cast %2 : vector<1x512x32xbf16> to vector<512x32xbf16>
    %cst = arith.constant dense<0.000000e+00> : vector<8x512xf32>
    %4 = tpu.matmul %1, %3, %cst {dimension_numbers = #tpu.dot_dimension_numbers<[1], [1], [0], [0], [0, 0, 1, 0], [], []>} : vector<8x32xbf16>, vector<512x32xbf16>, vector<8x512xf32> -> vector<8x512xf32>
    %c0_5 = arith.constant 0 : index
    %c0_6 = arith.constant 0 : index
    %5 = vector.load %arg3[%c0_5, %c0_6] : memref<8x1xf32, #tpu.memory_space<vmem>>, vector<8x1xf32>
    %6 = vector.broadcast %5 : vector<8x1xf32> to vector<8x512xf32>
    %7 = arith.addf %4, %6 : vector<8x512xf32>
    %8 = math.tanh %7 : vector<8x512xf32>
    %c0_7 = arith.constant 0 : index
    %c0_8 = arith.constant 0 : index
    %c0_9 = arith.constant 0 : index
    %9 = vector.load %arg4[%c0_7, %c0_8, %c0_9] : memref<4x8x512xf32, #tpu.memory_space<vmem>>, vector<1x8x512xf32>
    %10 = vector.shape_cast %9 : vector<1x8x512xf32> to vector<8x512xf32>
    %11 = vector.shape_cast %8 : vector<8x512xf32> to vector<1x8x512xf32>
    tpu.vector_store %arg4[%c0_7, %c0_8, %c0_9], %11 {strides = array<i32>} : memref<4x8x512xf32, #tpu.memory_space<vmem>>, vector<1x8x512xf32>,
    %c1 = arith.constant 1 : index
    %c0_10 = arith.constant 0 : index
    %c0_11 = arith.constant 0 : index
    %12 = vector.load %arg2[%c1, %c0_10, %c0_11] : memref<4x8x32xbf16, #tpu.memory_space<vmem>>, vector<1x8x32xbf16>
    %13 = vector.shape_cast %12 : vector<1x8x32xbf16> to vector<8x32xbf16>
    %c1_12 = arith.constant 1 : index
    %c0_13 = arith.constant 0 : index
    %c0_14 = arith.constant 0 : index
    %14 = vector.load %arg1[%c1_12, %c0_13, %c0_14] : memref<4x512x32xbf16, #tpu.memory_space<vmem>>, vector<1x512x32xbf16>
    %15 = vector.shape_cast %14 : vector<1x512x32xbf16> to vector<512x32xbf16>
    %cst_15 = arith.constant dense<0.000000e+00> : vector<8x512xf32>
    %16 = tpu.matmul %13, %15, %cst_15 {dimension_numbers = #tpu.dot_dimension_numbers<[1], [1], [0], [0], [0, 0, 1, 0], [], []>} : vector<8x32xbf16>, vector<512x32xbf16>, vector<8x512xf32> -> vector<8x512xf32>
    %c0_16 = arith.constant 0 : index
    %c0_17 = arith.constant 0 : index
    %17 = vector.load %arg3[%c0_16, %c0_17] : memref<8x1xf32, #tpu.memory_space<vmem>>, vector<8x1xf32>
    %18 = vector.broadcast %17 : vector<8x1xf32> to vector<8x512xf32>
    %19 = arith.addf %16, %18 : vector<8x512xf32>
    %20 = math.tanh %19 : vector<8x512xf32>
    %c1_18 = arith.constant 1 : index
    %c0_19 = arith.constant 0 : index
    %c0_20 = arith.constant 0 : index
    %21 = vector.load %arg4[%c1_18, %c0_19, %c0_20] : memref<4x8x512xf32, #tpu.memory_space<vmem>>, vector<1x8x512xf32>
    %22 = vector.shape_cast %21 : vector<1x8x512xf32> to vector<8x512xf32>
    %23 = vector.shape_cast %20 : vector<8x512xf32> to vector<1x8x512xf32>
    tpu.vector_store %arg4[%c1_18, %c0_19, %c0_20], %23 {strides = array<i32>} : memref<4x8x512xf32, #tpu.memory_space<vmem>>, vector<1x8x512xf32>,
    %c2 = arith.constant 2 : index
    %c0_21 = arith.constant 0 : index
    %c0_22 = arith.constant 0 : index
    %24 = vector.load %arg2[%c2, %c0_21, %c0_22] : memref<4x8x32xbf16, #tpu.memory_space<vmem>>, vector<1x8x32xbf16>
    %25 = vector.shape_cast %24 : vector<1x8x32xbf16> to vector<8x32xbf16>
    %c2_23 = arith.constant 2 : index
    %c0_24 = arith.constant 0 : index
    %c0_25 = arith.constant 0 : index
    %26 = vector.load %arg1[%c2_23, %c0_24, %c0_25] : memref<4x512x32xbf16, #tpu.memory_space<vmem>>, vector<1x512x32xbf16>
    %27 = vector.shape_cast %26 : vector<1x512x32xbf16> to vector<512x32xbf16>
    %cst_26 = arith.constant dense<0.000000e+00> : vector<8x512xf32>
    %28 = tpu.matmul %25, %27, %cst_26 {dimension_numbers = #tpu.dot_dimension_numbers<[1], [1], [0], [0], [0, 0, 1, 0], [], []>} : vector<8x32xbf16>, vector<512x32xbf16>, vector<8x512xf32> -> vector<8x512xf32>
    %c0_27 = arith.constant 0 : index
    %c0_28 = arith.constant 0 : index
    %29 = vector.load %arg3[%c0_27, %c0_28] : memref<8x1xf32, #tpu.memory_space<vmem>>, vector<8x1xf32>
    %30 = vector.broadcast %29 : vector<8x1xf32> to vector<8x512xf32>
    %31 = arith.addf %28, %30 : vector<8x512xf32>
    %32 = math.tanh %31 : vector<8x512xf32>
    %c2_29 = arith.constant 2 : index
    %c0_30 = arith.constant 0 : index
    %c0_31 = arith.constant 0 : index
    %33 = vector.load %arg4[%c2_29, %c0_30, %c0_31] : memref<4x8x512xf32, #tpu.memory_space<vmem>>, vector<1x8x512xf32>
    %34 = vector.shape_cast %33 : vector<1x8x512xf32> to vector<8x512xf32>
    %35 = vector.shape_cast %32 : vector<8x512xf32> to vector<1x8x512xf32>
    tpu.vector_store %arg4[%c2_29, %c0_30, %c0_31], %35 {strides = array<i32>} : memref<4x8x512xf32, #tpu.memory_space<vmem>>, vector<1x8x512xf32>,
    %c3 = arith.constant 3 : index
    %c0_32 = arith.constant 0 : index
    %c0_33 = arith.constant 0 : index
    %36 = vector.load %arg2[%c3, %c0_32, %c0_33] : memref<4x8x32xbf16, #tpu.memory_space<vmem>>, vector<1x8x32xbf16>
    %37 = vector.shape_cast %36 : vector<1x8x32xbf16> to vector<8x32xbf16>
    %c3_34 = arith.constant 3 : index
    %c0_35 = arith.constant 0 : index
    %c0_36 = arith.constant 0 : index
    %38 = vector.load %arg1[%c3_34, %c0_35, %c0_36] : memref<4x512x32xbf16, #tpu.memory_space<vmem>>, vector<1x512x32xbf16>
    %39 = vector.shape_cast %38 : vector<1x512x32xbf16> to vector<512x32xbf16>
    %cst_37 = arith.constant dense<0.000000e+00> : vector<8x512xf32>
    %40 = tpu.matmul %37, %39, %cst_37 {dimension_numbers = #tpu.dot_dimension_numbers<[1], [1], [0], [0], [0, 0, 1, 0], [], []>} : vector<8x32xbf16>, vector<512x32xbf16>, vector<8x512xf32> -> vector<8x512xf32>
    %c0_38 = arith.constant 0 : index
    %c0_39 = arith.constant 0 : index
    %41 = vector.load %arg3[%c0_38, %c0_39] : memref<8x1xf32, #tpu.memory_space<vmem>>, vector<8x1xf32>
    %42 = vector.broadcast %41 : vector<8x1xf32> to vector<8x512xf32>
    %43 = arith.addf %40, %42 : vector<8x512xf32>
    %44 = math.tanh %43 : vector<8x512xf32>
    %c3_40 = arith.constant 3 : index
    %c0_41 = arith.constant 0 : index
    %c0_42 = arith.constant 0 : index
    %45 = vector.load %arg4[%c3_40, %c0_41, %c0_42] : memref<4x8x512xf32, #tpu.memory_space<vmem>>, vector<1x8x512xf32>
    %46 = vector.shape_cast %45 : vector<1x8x512xf32> to vector<8x512xf32>
    %47 = vector.shape_cast %44 : vector<8x512xf32> to vector<1x8x512xf32>
    tpu.vector_store %arg4[%c3_40, %c0_41, %c0_42], %47 {strides = array<i32>} : memref<4x8x512xf32, #tpu.memory_space<vmem>>, vector<1x8x512xf32>,
    return
  }
  func.func @transform_0(%arg0: i32) -> (i32, i32, i32) {
    %c0_i32 = arith.constant 0 : i32
    %c0_i32_0 = arith.constant 0 : i32
    %c0_i32_1 = arith.constant 0 : i32
    return %c0_i32, %arg0, %c0_i32_0 : i32, i32, i32
  }
  func.func @transform_1(%arg0: i32) -> (i32, i32, i32) {
    %c0_i32 = arith.constant 0 : i32
    %c0_i32_0 = arith.constant 0 : i32
    %c0_i32_1 = arith.constant 0 : i32
    %c0_i32_2 = arith.constant 0 : i32
    return %c0_i32, %c0_i32_0, %c0_i32_1 : i32, i32, i32
  }
  func.func @transform_2(%arg0: i32) -> (i32, i32) {
    %c0_i32 = arith.constant 0 : i32
    %c0_i32_0 = arith.constant 0 : i32
    %c0_i32_1 = arith.constant 0 : i32
    return %c0_i32, %c0_i32_0 : i32, i32
  }
  func.func @transform_3(%arg0: i32) -> (i32, i32, i32) {
    %c0_i32 = arith.constant 0 : i32
    %c0_i32_0 = arith.constant 0 : i32
    %c0_i32_1 = arith.constant 0 : i32
    return %c0_i32, %c0_i32_0, %arg0 : i32, i32, i32
  }
}

</mosaic_0001>

<bundles_post_ra>
// kernel: conv_generator_forward.5
= control target key start
LH: loop header
LB: loop body
LE: loop exit
PB: predicated region body
PF: predicated region fallthrough
CT: control target
= control target key end

     0   :  { %vm116_vm0 = vcmask 130048   ;;  %vm639_vm4 = vcmask 125952   ;;  %s1343_s1 = inlined_call_operand.vmem [shape: bf16[4,128,16], index: 1, kind: input, shape index: {}]   ;;  %s1344_s0 = inlined_call_operand.vmem [shape: bf16[4,32,128], index: 0, kind: input, shape index: {}]   ;;  %s1345_s2 = inlined_call_operand.vmem [shape: f32[1,16], index: 2, kind: input, shape index: {}]   ;;  %s1346_s3 = inlined_call_operand.vmem [shape: f32[1,16], index: 3, kind: input, shape index: {}]   ;;  %s1347_s4 = inlined_call_operand.vmem [shape: bf16[4,32,16], index: 4, kind: output, shape index: {}]  }
   0x1   :  { %v964_v0 = vld [vmem:[%s1343_s1 + $0x38] sm:$0xff]  ;;  %v963_v4 = vld [vmem:[%s1343_s1 + $0x30] sm:$0xff]  ;;  %v962_v8 = vld [vmem:[%s1343_s1 + $0x28] sm:$0xff] }
   0x2   :  { %v974_v1 = vld [vmem:[%s1343_s1 + $0x78] sm:$0xff]  ;;  %97 = vmatpush.bf16.msra.mxu0 %v964_v0  ;;  %v973_v5 = vld [vmem:[%s1343_s1 + $0x70] sm:$0xff]  ;;  %v972_v9 = vld [vmem:[%s1343_s1 + $0x68] sm:$0xff] }
   0x3   :  { %v984_v2 = vld [vmem:[%s1343_s1 + $0xb8] sm:$0xff]  ;;  %217 = vmatpush.bf16.msra.mxu1 %v974_v1  ;;  %v983_v6 = vld [vmem:[%s1343_s1 + $0xb0] sm:$0xff]  ;;  %v982_v10 = vld [vmem:[%s1343_s1 + $0xa8] sm:$0xff] }
   0x4   :  { %v994_v3 = vld [vmem:[%s1343_s1 + $0xf8] sm:$0xff]  ;;  %337 = vmatpush.bf16.msra.mxu2 %v984_v2  ;;  %v993_v7 = vld [vmem:[%s1343_s1 + $0xf0] sm:$0xff]  ;;  %v992_v11 = vld [vmem:[%s1343_s1 + $0xe8] sm:$0xff] }
   0x5   :  { %457 = vmatpush.bf16.msra.mxu3 %v994_v3  ;;  %v961_v12 = vld [vmem:[%s1343_s1 + $0x20] sm:$0xff]  ;;  %v960_v16 = vld [vmem:[%s1343_s1 + $0x18] sm:$0xff]  ;;  %v959_v20 = vld [vmem:[%s1343_s1 + $0x10] sm:$0xff] }
   0x6   :  { %98 = vmatpush.bf16.msra.mxu0 %v963_v4  ;;  %v971_v13 = vld [vmem:[%s1343_s1 + $0x60] sm:$0xff]  ;;  %v970_v17 = vld [vmem:[%s1343_s1 + $0x58] sm:$0xff]  ;;  %v969_v21 = vld [vmem:[%s1343_s1 + $0x50] sm:$0xff] }
   0x7   :  { %218 = vmatpush.bf16.msra.mxu1 %v973_v5  ;;  %v981_v14 = vld [vmem:[%s1343_s1 + $0xa0] sm:$0xff]  ;;  %v980_v18 = vld [vmem:[%s1343_s1 + $0x98] sm:$0xff]  ;;  %v979_v22 = vld [vmem:[%s1343_s1 + $0x90] sm:$0xff] }
   0x8   :  { %338 = vmatpush.bf16.msra.mxu2 %v983_v6  ;;  %v991_v15 = vld [vmem:[%s1343_s1 + $0xe0] sm:$0xff]  ;;  %v990_v19 = vld [vmem:[%s1343_s1 + $0xd8] sm:$0xff]  ;;  %v989_v23 = vld [vmem:[%s1343_s1 + $0xd0] sm:$0xff] }
   0x9   :  { %458 = vmatpush.bf16.msra.mxu3 %v993_v7  ;;  %v958_v24 = vld [vmem:[%s1343_s1 + $0x8] sm:$0xff]  ;;  %v957_v28 = vld [vmem:[%s1343_s1] sm:$0xff]  ;;  %v965_v33 = vld [vmem:[%s1344_s0 + $0x10] sm:$0xff] }
   0xa   :  { %99 = vmatpush.bf16.msra.mxu0 %v962_v8  ;;  %v968_v25 = vld [vmem:[%s1343_s1 + $0x48] sm:$0xff]  ;;  %v967_v29 = vld [vmem:[%s1343_s1 + $0x40] sm:$0xff]  ;;  %v985_v35 = vld [vmem:[%s1344_s0 + $0x30] sm:$0xff] }
   0xb   :  { %219 = vmatpush.bf16.msra.mxu1 %v972_v9  ;;  %v978_v26 = vld [vmem:[%s1343_s1 + $0x88] sm:$0xff]  ;;  %v977_v30 = vld [vmem:[%s1343_s1 + $0x80] sm:$0xff]  ;;  %v966_v37 = vld [vmem:[%s1344_s0 + $0x18] sm:$0xff] }
   0xc   :  { %339 = vmatpush.bf16.msra.mxu2 %v982_v10  ;;  %v988_v27 = vld [vmem:[%s1343_s1 + $0xc8] sm:$0xff]  ;;  %v987_v31 = vld [vmem:[%s1343_s1 + $0xc0] sm:$0xff]  ;;  %v986_v39 = vld [vmem:[%s1344_s0 + $0x38] sm:$0xff] }
   0xd   :  { %459 = vmatpush.bf16.msra.mxu3 %v992_v11  ;;  %v955_v32 = vld [vmem:[%s1344_s0] sm:$0xff]  ;;  %v956_v36 = vld [vmem:[%s1344_s0 + $0x8] sm:$0xff] }
   0xe   :  { %100 = vmatpush.bf16.msra.mxu0 %v961_v12  ;;  %v975_v34 = vld [vmem:[%s1344_s0 + $0x20] sm:$0xff]  ;;  %v976_v38 = vld [vmem:[%s1344_s0 + $0x28] sm:$0xff] }
   0xf   :  { %220 = vmatpush.bf16.msra.mxu1 %v971_v13 }
  0x10   :  { %340 = vmatpush.bf16.msra.mxu2 %v981_v14 }
  0x11   :  { %460 = vmatpush.bf16.msra.mxu3 %v991_v15 }
  0x12   :  { %101 = vmatpush.bf16.msra.mxu0 %v960_v16 }
  0x13   :  { %221 = vmatpush.bf16.msra.mxu1 %v970_v17 }
  0x14   :  { %341 = vmatpush.bf16.msra.mxu2 %v980_v18 }
  0x15   :  { %461 = vmatpush.bf16.msra.mxu3 %v990_v19 }
  0x16   :  { %102 = vmatpush.bf16.msra.mxu0 %v959_v20 }
  0x17   :  { %222 = vmatpush.bf16.msra.mxu1 %v969_v21 }
  0x18   :  { %342 = vmatpush.bf16.msra.mxu2 %v979_v22 }
  0x19   :  { %462 = vmatpush.bf16.msra.mxu3 %v989_v23 }
  0x1a   :  { %103 = vmatpush.bf16.msra.mxu0 %v958_v24 }
  0x1b   :  { %223 = vmatpush.bf16.msra.mxu1 %v968_v25 }
  0x1c   :  { %343 = vmatpush.bf16.msra.mxu2 %v978_v26 }
  0x1d   :  { %463 = vmatpush.bf16.msra.mxu3 %v988_v27 }
  0x1e   :  { %104 = vmatpush.bf16.msra.mxu0 %v957_v28 }
  0x1f   :  { %224 = vmatpush.bf16.msra.mxu1 %v967_v29 }
  0x20   :  { %344 = vmatpush.bf16.msra.mxu2 %v977_v30 }
  0x21   :  { %464 = vmatpush.bf16.msra.mxu3 %v987_v31  ;;  %105 = vmatmul.bf16.vlgmr.msra.gmra.mxu0 %v955_v32 }
  0x22   :  { %225 = vmatmul.bf16.vlgmr.msra.gmra.mxu1 %v965_v33 }
  0x23   :  { %345 = vmatmul.bf16.vlgmr.msra.gmra.mxu2 %v975_v34 }
  0x24   :  { %465 = vmatmul.bf16.vlgmr.msra.gmra.mxu3 %v985_v35 }
  0x31   :  { %110 = vmatmul.bf16.gmra.mxu0 %v956_v36 }
  0x32   :  { %230 = vmatmul.bf16.gmra.mxu1 %v966_v37 }
  0x33   :  { %350 = vmatmul.bf16.gmra.mxu2 %v976_v38 }
  0x34   :  { %470 = vmatmul.bf16.gmra.mxu3 %v986_v39 }
  0x9e   :  { %v106_v40 = vpop.f32.mrf.mxu0 }
  0x9f   :  { %v226_v41 = vpop.f32.mrf.mxu1  ;;  %117 = vst.msk [vmem:[#allocation2] sm:$0xff] %vm116_vm0, %v106_v40  ;;  %v121_v52 = vsel %vm116_vm0, %v106_v40, 0.0 }
  0xa0   :  { %237 = vst.msk [vmem:[#allocation2 + $0x20] sm:$0xff] %vm116_vm0, %v226_v41  ;;  %v241_v53 = vsel %vm116_vm0, %v226_v41, 0.0 }
  0xa6   :  { %v346_v42 = vpop.f32.mrf.mxu2  ;;  %v108_v44 = vpop.f32.mrf.mxu0 }
  0xa7   :  { %v466_v43 = vpop.f32.mrf.mxu3  ;;  %357 = vst.msk [vmem:[#allocation2 + $0x40] sm:$0xff] %vm116_vm0, %v346_v42  ;;  %v228_v45 = vpop.f32.mrf.mxu1  ;;  %v122_v50 = vsel %vm116_vm0, %v108_v44, 0.0  ;;  %v361_v6 = vsel %vm116_vm0, %v346_v42, 0.0 }
  0xa8   :  { %477 = vst.msk [vmem:[#allocation2 + $0x60] sm:$0xff] %vm116_vm0, %v466_v43  ;;  %v242_v51 = vsel %vm116_vm0, %v228_v45, 0.0  ;;  %v123_v56 = vadd.f32 %v122_v50, %v121_v52  ;;  %v481_v7 = vsel %vm116_vm0, %v466_v43, 0.0 }
  0xa9   :  { %118 = vst.msk [vmem:[#allocation2 + $0x8] sm:$0xff] %vm116_vm0, %v108_v44  ;;  %v243_v57 = vadd.f32 %v242_v51, %v241_v53 }
  0xaa   :  { %238 = vst.msk [vmem:[#allocation2 + $0x28] sm:$0xff] %vm116_vm0, %v228_v45 }
  0xae   :  { %v348_v46 = vpop.f32.mrf.mxu2  ;;  %v111_v48 = vpop.f32.mrf.mxu0 }
  0xaf   :  { %v468_v47 = vpop.f32.mrf.mxu3  ;;  %358 = vst.msk [vmem:[#allocation2 + $0x48] sm:$0xff] %vm116_vm0, %v348_v46  ;;  %v231_v49 = vpop.f32.mrf.mxu1  ;;  %v124_v54 = vsel %vm116_vm0, %v111_v48, 0.0  ;;  %v362_v2 = vsel %vm116_vm0, %v348_v46, 0.0 }
  0xb0   :  { %478 = vst.msk [vmem:[#allocation2 + $0x68] sm:$0xff] %vm116_vm0, %v468_v47  ;;  %v244_v55 = vsel %vm116_vm0, %v231_v49, 0.0  ;;  %v125_v60 = vadd.f32 %v124_v54, %v123_v56  ;;  %v482_v3 = vsel %vm116_vm0, %v468_v47, 0.0  ;;  %v363_v12 = vadd.f32 %v362_v2, %v361_v6  ;;  %v1174_v47 = vld [vmem:[#allocation2] sm:$0xff]  ;;  %v1180_v50 = vld [vmem:[#allocation2 + $0x8] sm:$0xff] }
  0xb1   :  { %119 = vst.msk [vmem:[#allocation2 + $0x10] sm:$0xff] %vm116_vm0, %v111_v48  ;;  %v245_v61 = vadd.f32 %v244_v55, %v243_v57  ;;  %v483_v13 = vadd.f32 %v482_v3, %v481_v7  ;;  %v1176_v48 = vld [vmem:[#allocation2 + $0x20] sm:$0xff]  ;;  %v1186_v53 = vld [vmem:[#allocation2 + $0x28] sm:$0xff] }
  0xb2   :  { %239 = vst.msk [vmem:[#allocation2 + $0x30] sm:$0xff] %vm116_vm0, %v231_v49 }
  0xb6   :  { %v351_v58 = vpop.f32.mrf.mxu2  ;;  %v113_v62 = vpop.f32.mrf.mxu0 }
  0xb7   :  { %v471_v59 = vpop.f32.mrf.mxu3  ;;  %359 = vst.msk [vmem:[#allocation2 + $0x50] sm:$0xff] %vm116_vm0, %v351_v58  ;;  %v233_v63 = vpop.f32.mrf.mxu1  ;;  %v126_v0 = vsel %vm116_vm0, %v113_v62, 0.0  ;;  %v364_v8 = vsel %vm116_vm0, %v351_v58, 0.0 }
  0xb8   :  { %479 = vst.msk [vmem:[#allocation2 + $0x70] sm:$0xff] %vm116_vm0, %v471_v59  ;;  %v246_v1 = vsel %vm116_vm0, %v233_v63, 0.0  ;;  %v127_v4 = vadd.f32 %v126_v0, %v125_v60  ;;  %v484_v9 = vsel %vm116_vm0, %v471_v59, 0.0  ;;  %v365_v16 = vadd.f32 %v364_v8, %v363_v12  ;;  %v1182_v51 = vld [vmem:[#allocation2 + $0x10] sm:$0xff]  ;;  %v1212_v12 = vld [vmem:[#allocation2 + $0x40] sm:$0xff] }
  0xb9   :  { %120 = vst.msk [vmem:[#allocation2 + $0x18] sm:$0xff] %vm116_vm0, %v113_v62  ;;  %v247_v5 = vadd.f32 %v246_v1, %v245_v61  ;;  %v485_v17 = vadd.f32 %v484_v9, %v483_v13  ;;  %v1188_v54 = vld [vmem:[#allocation2 + $0x30] sm:$0xff]  ;;  %v1214_v13 = vld [vmem:[#allocation2 + $0x48] sm:$0xff] }
  0xba   :  { %240 = vst.msk [vmem:[#allocation2 + $0x38] sm:$0xff] %vm116_vm0, %v233_v63  ;;  %v128_v10 = vrot.slane %v127_v4, 4 }
  0xbb   :  { %v248_v11 = vrot.slane %v247_v5, 4 }
  0xbc   :  { %v129_v14 = vadd.f32 %v128_v10, %v127_v4 }
  0xbd   :  { %v249_v15 = vadd.f32 %v248_v11, %v247_v5 }
  0xbe   :  { %v353_v18 = vpop.f32.mrf.mxu2  ;;  %v130_v20 = vrot.slane %v129_v14, 2 }
  0xbf   :  { %v473_v19 = vpop.f32.mrf.mxu3  ;;  %v250_v21 = vrot.slane %v249_v15, 2  ;;  %360 = vst.msk [vmem:[#allocation2 + $0x58] sm:$0xff] %vm116_vm0, %v353_v18  ;;  %v366_v22 = vsel %vm116_vm0, %v353_v18, 0.0  ;;  %v1219_v18 = vld [vmem:[#allocation2 + $0x60] sm:$0xff] }
  0xc0   :  { %v486_v23 = vsel %vm116_vm0, %v473_v19, 0.0  ;;  %v367_v24 = vadd.f32 %v366_v22, %v365_v16  ;;  %480 = vst.msk [vmem:[#allocation2 + $0x78] sm:$0xff] %vm116_vm0, %v473_v19  ;;  %v131_v26 = vadd.f32 %v130_v20, %v129_v14  ;;  %v1184_v52 = vld [vmem:[#allocation2 + $0x18] sm:$0xff]  ;;  %v1221_v19 = vld [vmem:[#allocation2 + $0x50] sm:$0xff] }
  0xc1   :  { %v487_v25 = vadd.f32 %v486_v23, %v485_v17  ;;  %v251_v27 = vadd.f32 %v250_v21, %v249_v15  ;;  %v1190_v55 = vld [vmem:[#allocation2 + $0x38] sm:$0xff] }
  0xc2   :  { %v368_v28 = vrot.slane %v367_v24, 4  ;;  %v132_v30 = vrot.slane %v131_v26, 1 }
  0xc3   :  { %v488_v29 = vrot.slane %v487_v25, 4  ;;  %v252_v31 = vrot.slane %v251_v27, 1 }
  0xc4   :  { %v369_v32 = vadd.f32 %v368_v28, %v367_v24  ;;  %v133_v36 = vadd.f32 %v132_v30, %v131_v26  ;;  %v1238_v30 = vld [vmem:[#allocation2 + $0x70] sm:$0xff] }
  0xc5   :  { %v489_v33 = vadd.f32 %v488_v29, %v487_v25  ;;  %v253_v37 = vadd.f32 %v252_v31, %v251_v27  ;;  %v1230_v25 = vld [vmem:[#allocation2 + $0x68] sm:$0xff] }
  0xc6   :  { %v370_v34 = vrot.slane %v369_v32, 2  ;;  %v1223_v20 = vld [vmem:[#allocation2 + $0x58] sm:$0xff] }
  0xc7   :  { %v490_v35 = vrot.slane %v489_v33, 2  ;;  %v254_v42 = vadd.f32 %v253_v37, %v133_v36 }
  0xc8   :  { %v371_v38 = vadd.f32 %v370_v34, %v369_v32 }
  0xc9   :  { %v491_v39 = vadd.f32 %v490_v35, %v489_v33 }
  0xca   :  { %v372_v40 = vrot.slane %v371_v38, 1 }
  0xcb   :  { %v492_v41 = vrot.slane %v491_v39, 1 }
  0xcc   :  { %v373_v43 = vadd.f32 %v372_v40, %v371_v38  ;;  %v1242_v38 = vld [vmem:[#allocation2 + $0x78] sm:$0xff] }
  0xcd   :  { %v493_v45 = vadd.f32 %v492_v41, %v491_v39 }
  0xce   :  { %v374_v44 = vadd.f32 %v373_v43, %v254_v42 }
  0xd0   :  { %v494_v46 = vadd.f32 %v493_v45, %v374_v44 }
  0xd2   :  { %v1178_v49 = vmul.f32 0.0078125, %v494_v46 }
  0xd4   :  { %v500_v56 = vsub.f32 %v1174_v47, %v1178_v49  ;;  %v501_v57 = vsub.f32 %v1180_v50, %v1178_v49  ;;  %v502_v58 = vsub.f32 %v1182_v51, %v1178_v49  ;;  %v503_v59 = vsub.f32 %v1184_v52, %v1178_v49 }
  0xd5   :  { %v526_v60 = vsub.f32 %v1176_v48, %v1178_v49  ;;  %v527_v61 = vsub.f32 %v1186_v53, %v1178_v49  ;;  %v528_v62 = vsub.f32 %v1188_v54, %v1178_v49  ;;  %v529_v63 = vsub.f32 %v1190_v55, %v1178_v49 }
  0xd6   :  { %v504_v0 = vmul.f32 %v500_v56, %v500_v56  ;;  %v505_v1 = vmul.f32 %v501_v57, %v501_v57  ;;  %v506_v2 = vmul.f32 %v502_v58, %v502_v58  ;;  %v507_v3 = vmul.f32 %v503_v59, %v503_v59 }
  0xd7   :  { %v530_v4 = vmul.f32 %v526_v60, %v526_v60  ;;  %v531_v5 = vmul.f32 %v527_v61, %v527_v61  ;;  %v532_v6 = vmul.f32 %v528_v62, %v528_v62  ;;  %v533_v7 = vmul.f32 %v529_v63, %v529_v63 }
  0xd8   :  { %v508_v8 = vsel %vm116_vm0, %v504_v0, 0.0  ;;  %v509_v9 = vsel %vm116_vm0, %v505_v1, 0.0  ;;  %v511_v10 = vsel %vm116_vm0, %v506_v2, 0.0  ;;  %v513_v11 = vsel %vm116_vm0, %v507_v3, 0.0 }
  0xd9   :  { %v510_v14 = vadd.f32 %v509_v9, %v508_v8  ;;  %v534_v15 = vsel %vm116_vm0, %v530_v4, 0.0  ;;  %v535_v16 = vsel %vm116_vm0, %v531_v5, 0.0  ;;  %v537_v17 = vsel %vm116_vm0, %v532_v6, 0.0 }
  0xda   :  { %v536_v21 = vadd.f32 %v535_v16, %v534_v15  ;;  %v539_v22 = vsel %vm116_vm0, %v533_v7, 0.0  ;;  %v552_v23 = vsub.f32 %v1212_v12, %v1178_v49  ;;  %v553_v24 = vsub.f32 %v1214_v13, %v1178_v49 }
  0xdb   :  { %v512_v26 = vadd.f32 %v511_v10, %v510_v14  ;;  %v554_v27 = vsub.f32 %v1221_v19, %v1178_v49  ;;  %v555_v28 = vsub.f32 %v1223_v20, %v1178_v49  ;;  %v578_v29 = vsub.f32 %v1219_v18, %v1178_v49 }
  0xdc   :  { %v538_v31 = vadd.f32 %v537_v17, %v536_v21  ;;  %v556_v32 = vmul.f32 %v552_v23, %v552_v23  ;;  %v557_v33 = vmul.f32 %v553_v24, %v553_v24  ;;  %v579_v34 = vsub.f32 %v1230_v25, %v1178_v49 }
  0xdd   :  { %v514_v35 = vadd.f32 %v513_v11, %v512_v26  ;;  %v558_v36 = vmul.f32 %v554_v27, %v554_v27  ;;  %v559_v37 = vmul.f32 %v555_v28, %v555_v28  ;;  %v580_v39 = vsub.f32 %v1238_v30, %v1178_v49 }
  0xde   :  { %v540_v40 = vadd.f32 %v539_v22, %v538_v31  ;;  %v560_v41 = vsel %vm116_vm0, %v556_v32, 0.0  ;;  %v561_v42 = vsel %vm116_vm0, %v557_v33, 0.0  ;;  %v581_v43 = vsub.f32 %v1242_v38, %v1178_v49 }
  0xdf   :  { %v515_v44 = vrot.slane %v514_v35, 4  ;;  %v562_v45 = vadd.f32 %v561_v42, %v560_v41  ;;  %v563_v46 = vsel %vm116_vm0, %v558_v36, 0.0  ;;  %v582_v57 = vmul.f32 %v578_v29, %v578_v29 }
  0xe0   :  { %v541_v56 = vrot.slane %v540_v40, 4  ;;  %v583_v58 = vmul.f32 %v579_v34, %v579_v34  ;;  %v584_v59 = vmul.f32 %v580_v39, %v580_v39  ;;  %v565_v62 = vsel %vm116_vm0, %v559_v37, 0.0 }
  0xe1   :  { %v516_v60 = vadd.f32 %v515_v44, %v514_v35  ;;  %v564_v61 = vadd.f32 %v563_v46, %v562_v45  ;;  %v585_v0 = vmul.f32 %v581_v43, %v581_v43  ;;  %v586_v1 = vsel %vm116_vm0, %v582_v57, 0.0  ;;  %v612_v57 = vld [vmem:[%s1345_s2] sm:$0x1] }
  0xe2   :  { %v542_v63 = vadd.f32 %v541_v56, %v540_v40  ;;  %v587_v2 = vsel %vm116_vm0, %v583_v58, 0.0  ;;  %v589_v7 = vsel %vm116_vm0, %v584_v59, 0.0 }
  0xe3   :  { %v517_v3 = vrot.slane %v516_v60, 2  ;;  %v566_v4 = vadd.f32 %v565_v62, %v564_v61  ;;  %v588_v5 = vadd.f32 %v587_v2, %v586_v1  ;;  %v591_v14 = vsel %vm116_vm0, %v585_v0, 0.0 }
  0xe4   :  { %v543_v6 = vrot.slane %v542_v63, 2 }
  0xe5   :  { %v518_v8 = vadd.f32 %v517_v3, %v516_v60  ;;  %v567_v9 = vrot.slane %v566_v4, 4  ;;  %v590_v10 = vadd.f32 %v589_v7, %v588_v5  ;;  %v614_v60 = vld [vmem:[%s1346_s3] sm:$0x1] }
  0xe6   :  { %v544_v11 = vadd.f32 %v543_v6, %v542_v63 }
  0xe7   :  { %v519_v15 = vrot.slane %v518_v8, 1  ;;  %v568_v16 = vadd.f32 %v567_v9, %v566_v4  ;;  %v592_v17 = vadd.f32 %v591_v14, %v590_v10 }
  0xe8   :  { %v545_v21 = vrot.slane %v544_v11, 1 }
  0xe9   :  { %v520_v22 = vadd.f32 %v519_v15, %v518_v8  ;;  %v569_v23 = vrot.slane %v568_v16, 2  ;;  %v593_v24 = vrot.slane %v592_v17, 4 }
  0xea   :  { %v546_v26 = vadd.f32 %v545_v21, %v544_v11 }
  0xeb   :  { %v570_v27 = vadd.f32 %v569_v23, %v568_v16  ;;  %v594_v28 = vadd.f32 %v593_v24, %v592_v17 }
  0xec   :  { %v547_v29 = vadd.f32 %v546_v26, %v520_v22 }
  0xed   :  { %v571_v31 = vrot.slane %v570_v27, 1  ;;  %v595_v32 = vrot.slane %v594_v28, 2 }
  0xef   :  { %v572_v33 = vadd.f32 %v571_v31, %v570_v27  ;;  %v596_v34 = vadd.f32 %v595_v32, %v594_v28 }
  0xf1   :  { %v573_v35 = vadd.f32 %v572_v33, %v547_v29  ;;  %v597_v36 = vrot.slane %v596_v34, 1 }
  0xf3   :  { %v598_v37 = vadd.f32 %v597_v36, %v596_v34 }
  0xf5   :  { %v599_v39 = vadd.f32 %v598_v37, %v573_v35 }
  0xf7   :  { %v600_v40 = vmul.f32 0.0078125, %v599_v39 }
  0xf9   :  { %v601_v41 = vadd.f32 1e-05, %v600_v40 }
  0xfb   :  { %995 = vrsqrt.f32 %v601_v41  ;;  %vm608_vm2 = vweird.f32 %v601_v41 }
 0x101   :  { %v996_v42 = vpop.eup %995 }
 0x102   :  { %v603_v43 = vmul.f32 %v996_v42, %v601_v41  ;;  %vm609_vm1 = vweird.f32 %v996_v42 }
 0x103   :  { %vm610_vm3 = vmor %vm608_vm2, %vm609_vm1 }
 0x104   :  { %v604_v44 = vmul.f32 %v996_v42, %v603_v43 }
 0x106   :  { %v605_v45 = vmul.f32 0.5, %v604_v44 }
 0x108   :  { %v606_v46 = vsub.f32 1.5, %v605_v45 }
 0x10a   :  { %v607_v56 = vmul.f32 %v996_v42, %v606_v46 }
 0x10c   :  { %v611_v58 = vsel %vm610_vm3, %v996_v42, %v607_v56 }
 0x10d   :  { %v613_v59 = vmul.f32 %v612_v57, %v611_v58 }
 0x10f   :  { %v615_v61 = vmul.f32 %v613_v59, %v1178_v49  ;;  %v618_v62 = vperm.slane %v613_v59, 0 }
 0x111   :  { %v616_v63 = vsub.f32 %v614_v60, %v615_v61  ;;  %v620_v0 = vmul.f32 %v618_v62, %v1174_v47  ;;  %v621_v1 = vmul.f32 %v618_v62, %v1180_v50  ;;  %v622_v2 = vmul.f32 %v618_v62, %v1182_v51 }
 0x112   :  { %v623_v3 = vmul.f32 %v618_v62, %v1184_v52  ;;  %v648_v4 = vmul.f32 %v618_v62, %v1176_v48  ;;  %v649_v6 = vmul.f32 %v618_v62, %v1186_v53  ;;  %v650_v7 = vmul.f32 %v618_v62, %v1188_v54 }
 0x113   :  { %v625_v5 = vperm.slane %v616_v63, 0  ;;  %v651_v49 = vmul.f32 %v618_v62, %v1190_v55  ;;  %v673_v8 = vmul.f32 %v618_v62, %v1212_v12  ;;  %v674_v47 = vmul.f32 %v618_v62, %v1214_v13 }
 0x114   :  { %v675_v9 = vmul.f32 %v618_v62, %v1221_v19  ;;  %v676_v50 = vmul.f32 %v618_v62, %v1223_v20  ;;  %v698_v13 = vmul.f32 %v618_v62, %v1219_v18  ;;  %v699_v19 = vmul.f32 %v618_v62, %v1230_v25 }
 0x115   :  { %v627_v51 = vadd.f32 %v625_v5, %v620_v0  ;;  %v628_v10 = vadd.f32 %v625_v5, %v621_v1  ;;  %v629_v52 = vadd.f32 %v625_v5, %v622_v2  ;;  %v630_v11 = vadd.f32 %v625_v5, %v623_v3 }
 0x116   :  { %v652_v48 = vadd.f32 %v648_v4, %v625_v5  ;;  %v653_v14 = vadd.f32 %v649_v6, %v625_v5  ;;  %v654_v15 = vadd.f32 %v650_v7, %v625_v5  ;;  %v655_v53 = vadd.f32 %v651_v49, %v625_v5 }
 0x117   :  { %v631_v16 = vmax.f32 %v627_v51, 0.0  ;;  %v632_v54 = vmax.f32 %v628_v10, 0.0  ;;  %v633_v17 = vmax.f32 %v629_v52, 0.0  ;;  %v634_v55 = vmax.f32 %v630_v11, 0.0 }
 0x118   :  { %v656_v21 = vmax.f32 %v652_v48, 0.0  ;;  %v657_v12 = vmax.f32 %v653_v14, 0.0  ;;  %v658_v24 = vmax.f32 %v654_v15, 0.0  ;;  %v659_v27 = vmax.f32 %v655_v53, 0.0 }
 0x119   :  { %v635_v22 = vpack.c.bf16 %v631_v16, %v631_v16  ;;  %v636_v20 = vpack.c.bf16 %v632_v54, %v632_v54  ;;  %v637_v23 = vpack.c.bf16 %v633_v17, %v633_v17  ;;  %v638_v26 = vpack.c.bf16 %v634_v55, %v634_v55 }
 0x11a   :  { %v660_v28 = vpack.c.bf16 %v656_v21, %v656_v21  ;;  %v661_v29 = vpack.c.bf16 %v657_v12, %v657_v12  ;;  %v677_v31 = vadd.f32 %v673_v8, %v625_v5  ;;  %v678_v32 = vadd.f32 %v674_v47, %v625_v5 }
 0x11b   :  { %640 = vst.msk [vmem:[%s1347_s4] sm:$0xf] %vm639_vm4, %v635_v22  ;;  %v679_v33 = vadd.f32 %v675_v9, %v625_v5  ;;  %v680_v34 = vadd.f32 %v676_v50, %v625_v5  ;;  %v700_v18 = vmul.f32 %v618_v62, %v1238_v30  ;;  %v701_v25 = vmul.f32 %v618_v62, %v1242_v38 }
 0x11c   :  { %641 = vst.msk [vmem:[%s1347_s4 + $0x4] sm:$0xf] %vm639_vm4, %v636_v20  ;;  %v702_v35 = vadd.f32 %v698_v13, %v625_v5  ;;  %v703_v36 = vadd.f32 %v699_v19, %v625_v5  ;;  %v662_v37 = vpack.c.bf16 %v658_v24, %v658_v24  ;;  %v681_v39 = vmax.f32 %v677_v31, 0.0 }
 0x11d   :  { %642 = vst.msk [vmem:[%s1347_s4 + $0x8] sm:$0xf] %vm639_vm4, %v637_v23  ;;  %v682_v40 = vmax.f32 %v678_v32, 0.0  ;;  %v683_v41 = vmax.f32 %v679_v33, 0.0  ;;  %v663_v42 = vpack.c.bf16 %v659_v27, %v659_v27  ;;  %v684_v30 = vmax.f32 %v680_v34, 0.0 }
 0x11e   :  { %643 = vst.msk [vmem:[%s1347_s4 + $0xc] sm:$0xf] %vm639_vm4, %v638_v26  ;;  %v704_v43 = vadd.f32 %v700_v18, %v625_v5  ;;  %v705_v38 = vadd.f32 %v701_v25, %v625_v5  ;;  %v685_v44 = vpack.c.bf16 %v681_v39, %v681_v39  ;;  %v706_v45 = vmax.f32 %v702_v35, 0.0 }
 0x11f   :  { %943 = vst.msk [vmem:[%s1347_s4 + $0x10] sm:$0xf] %vm639_vm4, %v660_v28  ;;  %v686_v46 = vpack.c.bf16 %v682_v40, %v682_v40  ;;  %v707_v56 = vmax.f32 %v703_v36, 0.0  ;;  %v687_v57 = vpack.c.bf16 %v683_v41, %v683_v41  ;;  %v688_v59 = vpack.c.bf16 %v684_v30, %v684_v30 }
 0x120   :  { %944 = vst.msk [vmem:[%s1347_s4 + $0x14] sm:$0xf] %vm639_vm4, %v661_v29  ;;  %v708_v58 = vmax.f32 %v704_v43, 0.0  ;;  %v709_v60 = vmax.f32 %v705_v38, 0.0  ;;  %v710_v61 = vpack.c.bf16 %v706_v45, %v706_v45 }
 0x121   :  { %945 = vst.msk [vmem:[%s1347_s4 + $0x18] sm:$0xf] %vm639_vm4, %v662_v37  ;;  %v711_v62 = vpack.c.bf16 %v707_v56, %v707_v56 }
 0x122   :  { %946 = vst.msk [vmem:[%s1347_s4 + $0x1c] sm:$0xf] %vm639_vm4, %v663_v42  ;;  %v712_v63 = vpack.c.bf16 %v708_v58, %v708_v58  ;;  %v713_v0 = vpack.c.bf16 %v709_v60, %v709_v60 }
 0x123   :  { %947 = vst.msk [vmem:[%s1347_s4 + $0x20] sm:$0xf] %vm639_vm4, %v685_v44 }
 0x124   :  { %948 = vst.msk [vmem:[%s1347_s4 + $0x24] sm:$0xf] %vm639_vm4, %v686_v46 }
 0x125   :  { %949 = vst.msk [vmem:[%s1347_s4 + $0x28] sm:$0xf] %vm639_vm4, %v687_v57 }
 0x126   :  { %950 = vst.msk [vmem:[%s1347_s4 + $0x2c] sm:$0xf] %vm639_vm4, %v688_v59 }
 0x127   :  { %951 = vst.msk [vmem:[%s1347_s4 + $0x30] sm:$0xf] %vm639_vm4, %v710_v61 }
 0x128   :  { %952 = vst.msk [vmem:[%s1347_s4 + $0x34] sm:$0xf] %vm639_vm4, %v711_v62 }
 0x129   :  { %953 = vst.msk [vmem:[%s1347_s4 + $0x38] sm:$0xf] %vm639_vm4, %v712_v63 }
 0x12a   :  { %954 = vst.msk [vmem:[%s1347_s4 + $0x3c] sm:$0xf] %vm639_vm4, %v713_v0 }

// kernel: conv_generator_forward.4
= control target key start
LH: loop header
LB: loop body
LE: loop exit
PB: predicated region body
PF: predicated region fallthrough
CT: control target
= control target key end

     0   :  { %13 = vsyncpa [#allocation4], 0  ;;  %s1825_s0 = inlined_call_operand.vmem [shape: bf16[2,16], index: 0, kind: input, shape index: {}]   ;;  %s1826_s1 = inlined_call_operand.vmem [shape: bf16[2,10], index: 1, kind: input, shape index: {}]   ;;  %s1827_s2 = inlined_call_operand.hbm [shape: bf16[10,8], index: 2, kind: input, shape index: {}]   ;;  %s1828_s3 = inlined_call_operand.hbm [shape: f32[1,8], index: 3, kind: input, shape index: {}]   ;;  %s1829_s4 = inlined_call_operand.hbm [shape: bf16[16,16,32], index: 4, kind: input, shape index: {}]   ;;  %s1830_s5 = inlined_call_operand.hbm [shape: bf16[16,8,32], index: 5, kind: input, shape index: {}]   ;;  %s1831_s6 = inlined_call_operand.vmem [shape: f32[1,32], index: 6, kind: input, shape index: {}]   ;;  %s1832_s7 = inlined_call_operand.vmem [shape: f32[1,32], index: 7, kind: input, shape index: {}]   ;;  %s1833_s8 = inlined_call_operand.vmem [shape: bf16[16,2,32], index: 8, kind: output, shape index: {}]  }
   0x1   :  { %14 = vsyncpa [#allocation6], 0  ;;  %s38_s29 = sshll.u32 %s1828_s3, 4  ;;  %s39_s29 = int_to_ptr.hbm [resolvable:$true] %s38_s29 }
   0x2   :  { %15 = vsyncpa [#allocation9], 0  ;;  %s1495_s30 = smov [#allocation5]   ;;  %s24_s12 = sshll.u32 %s1827_s2, 4  ;;  %s25_s12 = int_to_ptr.hbm [resolvable:$true] %s24_s12 }
   0x3   :  { %s40_s9 = sshll.u32 %s1495_s30, 4  ;;  %s1496_s13 = smov [#allocation3]   ;;  %s41_s9 = int_to_ptr.vmem [resolvable:$true] %s40_s9 }
   0x4   :  { %43 = dma.hbm_to_vmem [thread:$0]  %s39_s29, 16, %s41_s9, [#allocation6]  }
   0x5   :  { %s26_s14 = sshll.u32 %s1496_s13, 4  ;;  %s1497_s15 = smov 64   ;;  %s27_s14 = int_to_ptr.vmem [resolvable:$true] %s26_s14 }
   0x6   :  { %s1498_s16 = smov 4   ;;  %s48_s3 = sshll.u32 %s1829_s4, 4  ;;  %s49_s3 = int_to_ptr.hbm [resolvable:$true] %s48_s3 }
   0x7   :  { %32 = dma.hbm_to_vmem [thread:$0]  %s25_s12, 128, %s27_s14, [#allocation4], %s1497_s15, %s1497_s15, %s1498_s16  }
   0x8   :  { %s1499_s19 = smov [#allocation7]   ;;  %s61_s2 = sshll.u32 %s1830_s5, 4  ;;  %s62_s2 = int_to_ptr.hbm [resolvable:$true] %s61_s2 }
   0x9   :  { %s50_s20 = sshll.u32 %s1499_s19, 4  ;;  %s1500_s23 = smov [#allocation8]   ;;  %s51_s20 = int_to_ptr.vmem [resolvable:$true] %s50_s20 }
   0xa   :  { %56 = dma.hbm_to_vmem [thread:$0]  %s49_s3, 2048, %s51_s20, [#allocation6], %s1497_s15, %s1497_s15, %s1498_s16  }
   0xb   :  { %s63_s24 = sshll.u32 %s1500_s23, 4  ;;  %s64_s24 = int_to_ptr.vmem [resolvable:$true] %s63_s24 }
   0xc   :  { %69 = dma.hbm_to_vmem [thread:$0]  %s62_s2, 1024, %s64_s24, [#allocation9], %s1497_s15, %s1497_s15, %s1498_s16  }
   0xd   :  { %1489 = dma.done.wait [#allocation4], 128  }
   0xe   :  { %1490 = vsyncadd [#allocation4], 4294967168 }
   0xf   :  { %1491 = dma.done.wait [#allocation6], 2064  }
  0x10   :  { %1492 = vsyncadd [#allocation6], 4294965232 }
  0x11   :  { %1493 = dma.done.wait [#allocation9], 1024  }
  0x12   :  { %1494 = vsyncadd [#allocation9], 4294966272  ;;  %v1253_v0 = vld [vmem:[#allocation3] sm:$0xf]  ;;  %v1367_v1 = vld [vmem:[#allocation3] sm:$0x10] }
  0x13   :  { %vm107_vm0 = vcmask 1044480   ;;  %v1254_v2 = vor.u32 %v1367_v1, %v1253_v0  ;;  %v1368_v3 = vld [vmem:[#allocation7] sm:$0xff]  ;;  %v1369_v4 = vld [vmem:[#allocation7 + $0x8] sm:$0xff]  ;;  %v1561_v6 = vld [vmem:[%s1825_s0] sm:$0x1]  ;;  %vm156_vm1 = vcmask 130048  }
  0x14   :  { %167 = vmatpush.bf16.msra.mxu2 %v1368_v3  ;;  %v91_v7 = vld [vmem:[%s1826_s1] sm:$0x1]  ;;  %vm103_vm2 = vcmask 80896   ;;  %v128_v8 = vld [vmem:[#allocation8] sm:$0xf]  ;;  %vm133_vm3 = vcmask 1043456  }
  0x15   :  { %v109_v5 = vsel %vm107_vm0, %v1254_v2, 0  ;;  %v187_v9 = vld [vmem:[#allocation8 + $0x4] sm:$0xf]  ;;  %v135_v10 = vsel %vm133_vm3, %v128_v8, 0  ;;  %v1370_v12 = vld [vmem:[#allocation7 + $0x10] sm:$0xff]  ;;  %v1371_v16 = vld [vmem:[#allocation7 + $0x18] sm:$0xff] }
  0x16   :  { %118 = vmatpush.bf16.msra.mxu0 %v109_v5  ;;  %v189_v11 = vsel %vm133_vm3, %v187_v9, 0  ;;  %144 = vmatpush.bf16.msra.mxu1 %v135_v10  ;;  %v287_v13 = vld [vmem:[#allocation8 + $0xc] sm:$0xf]  ;;  %v237_v15 = vld [vmem:[#allocation8 + $0x8] sm:$0xf]  ;;  %v1372_v17 = vld [vmem:[#allocation7 + $0x20] sm:$0xff] }
  0x17   :  { %1261 = vmatmul.msk.bf16.vlgmr.msra.gmra.mxu2 %vm156_vm1, %v1561_v6  ;;  %198 = vmatpush.bf16.msra.mxu3 %v189_v11  ;;  %v289_v14 = vsel %vm133_vm3, %v287_v13, 0  ;;  %v239_v18 = vsel %vm133_vm3, %v237_v15, 0  ;;  %v1373_v19 = vld [vmem:[#allocation7 + $0x28] sm:$0xff]  ;;  %v1374_v20 = vld [vmem:[#allocation7 + $0x30] sm:$0xff]  ;;  %v1390_v21 = vld [vmem:[#allocation5] ss:$0 sm:$0xff] }
  0x18   :  { %267 = vmatpush.bf16.msrb.mxu2 %v1370_v12  ;;  %v387_v23 = vld [vmem:[#allocation8 + $0x14] sm:$0xf]  ;;  %v337_v24 = vld [vmem:[#allocation8 + $0x10] sm:$0xf]  ;;  %vm129_vm4 = vcmask 64512   ;;  %v1375_v29 = vld [vmem:[#allocation7 + $0x38] sm:$0xff] }
  0x19   :  { %1255 = vmatmul.msk.bf16.vlgmr.msra.gmra.mxu0 %vm103_vm2, %v91_v7  ;;  %v389_v27 = vsel %vm133_vm3, %v387_v23, 0  ;;  %v339_v28 = vsel %vm133_vm3, %v337_v24, 0  ;;  %v1376_v30 = vld [vmem:[#allocation7 + $0x40] sm:$0xff]  ;;  %v487_v32 = vld [vmem:[#allocation8 + $0x1c] sm:$0xf]  ;;  %v1377_v36 = vld [vmem:[#allocation7 + $0x48] sm:$0xff] }
  0x1a   :  { %217 = vmatpush.bf16.msrb.mxu0 %v1369_v4  ;;  %248 = vmatpush.bf16.msrb.mxu1 %v239_v18  ;;  %v437_v33 = vld [vmem:[#allocation8 + $0x18] sm:$0xf]  ;;  %v489_v34 = vsel %vm133_vm3, %v487_v32, 0  ;;  %v1378_v37 = vld [vmem:[#allocation7 + $0x50] sm:$0xff]  ;;  %v587_v38 = vld [vmem:[#allocation8 + $0x24] sm:$0xf] }
  0x1b   :  { %298 = vmatpush.bf16.msrb.mxu3 %v289_v14  ;;  %v439_v35 = vsel %vm133_vm3, %v437_v33, 0  ;;  %v537_v39 = vld [vmem:[#allocation8 + $0x20] sm:$0xf]  ;;  %v589_v40 = vsel %vm133_vm3, %v587_v38, 0  ;;  %v1379_v42 = vld [vmem:[#allocation7 + $0x58] sm:$0xff]  ;;  %v1381_v48 = vld [vmem:[#allocation7 + $0x68] sm:$0xff] }
  0x1c   :  { %367 = vmatpush.bf16.msra.mxu2 %v1372_v17  ;;  %v539_v41 = vsel %vm133_vm3, %v537_v39, 0  ;;  %v1380_v43 = vld [vmem:[#allocation7 + $0x60] sm:$0xff]  ;;  %v687_v44 = vld [vmem:[#allocation8 + $0x2c] sm:$0xf]  ;;  %v637_v45 = vld [vmem:[#allocation8 + $0x28] sm:$0xf] }
  0x1d   :  { %v689_v46 = vsel %vm133_vm3, %v687_v44, 0  ;;  %v639_v47 = vsel %vm133_vm3, %v637_v45, 0  ;;  %v1382_v49 = vld [vmem:[#allocation7 + $0x70] sm:$0xff]  ;;  %v1383_v54 = vld [vmem:[#allocation7 + $0x78] sm:$0xff]  ;;  %vm173_vm5 = vcmask 254976   ;;  %vm1137_vm9 = vcmask 253952  }
  0x1e   :  { %317 = vmatpush.bf16.msra.mxu0 %v1371_v16  ;;  %v787_v50 = vld [vmem:[#allocation8 + $0x34] sm:$0xf]  ;;  %v737_v51 = vld [vmem:[#allocation8 + $0x30] sm:$0xf]  ;;  %v887_v55 = vld [vmem:[#allocation8 + $0x3c] sm:$0xf] }
  0x1f   :  { %v789_v52 = vsel %vm133_vm3, %v787_v50, 0  ;;  %v739_v53 = vsel %vm133_vm3, %v737_v51, 0  ;;  %v837_v56 = vld [vmem:[#allocation8 + $0x38] sm:$0xf]  ;;  %v889_v57 = vsel %vm133_vm3, %v887_v55, 0 }
  0x20   :  { %v839_v58 = vsel %vm133_vm3, %v837_v56, 0 }
  0x27   :  { %1273 = vmatmul.msk.bf16.vlgmr.msrb.gmra.mxu2 %vm156_vm1, %v1561_v6 }
  0x28   :  { %467 = vmatpush.bf16.msrb.mxu2 %v1374_v20 }
  0x29   :  { %1267 = vmatmul.msk.bf16.vlgmr.msrb.gmra.mxu0 %vm156_vm1, %v1561_v6 }
  0x2a   :  { %417 = vmatpush.bf16.msrb.mxu0 %v1373_v19 }
  0x37   :  { %1285 = vmatmul.msk.bf16.vlgmr.msra.gmra.mxu2 %vm156_vm1, %v1561_v6 }
  0x38   :  { %567 = vmatpush.bf16.msra.mxu2 %v1376_v30 }
  0x39   :  { %1279 = vmatmul.msk.bf16.vlgmr.msra.gmra.mxu0 %vm156_vm1, %v1561_v6 }
  0x3a   :  { %517 = vmatpush.bf16.msra.mxu0 %v1375_v29 }
  0x47   :  { %1297 = vmatmul.msk.bf16.vlgmr.msrb.gmra.mxu2 %vm156_vm1, %v1561_v6 }
  0x48   :  { %667 = vmatpush.bf16.msrb.mxu2 %v1378_v37 }
  0x49   :  { %1291 = vmatmul.msk.bf16.vlgmr.msrb.gmra.mxu0 %vm156_vm1, %v1561_v6 }
  0x4a   :  { %617 = vmatpush.bf16.msrb.mxu0 %v1377_v36 }
  0x57   :  { %1309 = vmatmul.msk.bf16.vlgmr.msra.gmra.mxu2 %vm156_vm1, %v1561_v6 }
  0x58   :  { %767 = vmatpush.bf16.msra.mxu2 %v1380_v43 }
  0x59   :  { %1303 = vmatmul.msk.bf16.vlgmr.msra.gmra.mxu0 %vm156_vm1, %v1561_v6 }
  0x5a   :  { %717 = vmatpush.bf16.msra.mxu0 %v1379_v42 }
  0x67   :  { %1321 = vmatmul.msk.bf16.vlgmr.msrb.gmra.mxu2 %vm156_vm1, %v1561_v6 }
  0x68   :  { %867 = vmatpush.bf16.msrb.mxu2 %v1382_v49 }
  0x69   :  { %1315 = vmatmul.msk.bf16.vlgmr.msrb.gmra.mxu0 %vm156_vm1, %v1561_v6 }
  0x6a   :  { %817 = vmatpush.bf16.msrb.mxu0 %v1381_v48 }
  0x77   :  { %1333 = vmatmul.msk.bf16.vlgmr.msra.gmra.mxu2 %vm156_vm1, %v1561_v6 }
  0x79   :  { %1327 = vmatmul.msk.bf16.vlgmr.msra.gmra.mxu0 %vm156_vm1, %v1561_v6 }
  0x7a   :  { %917 = vmatpush.bf16.msra.mxu0 %v1383_v54 }
  0x87   :  { %1345 = vmatmul.msk.bf16.vlgmr.msrb.gmra.mxu2 %vm156_vm1, %v1561_v6 }
  0x89   :  { %1339 = vmatmul.msk.bf16.vlgmr.msrb.gmra.mxu0 %vm156_vm1, %v1561_v6 }
  0x96   :  { %v120_v22 = vpop.f32.mrf.mxu0 }
  0x97   :  { %v121_v25 = vadd.f32 %v1390_v21, %v120_v22 }
  0x99   :  { %v1582_v26 = vpack.c.bf16 %v121_v25, %v121_v25  ;;  %1351 = vmatmul.msk.bf16.vlgmr.msra.gmra.mxu0 %vm156_vm1, %v1561_v6 }
  0x9a   :  { %v169_v59 = vpop.f32.mrf.mxu2 }
  0x9b   :  { %1256 = vmatmul.msk.bf16.vlgmr.msra.gmra.mxu1 %vm129_vm4, %v1582_v26  ;;  %1262 = vmatmul.msk.bf16.vlgmr.msra.gmra.mxu3 %vm129_vm4, %v1582_v26 }
  0x9c   :  { %398 = vmatpush.bf16.msra.mxu3 %v389_v27  ;;  %348 = vmatpush.bf16.msra.mxu1 %v339_v28 }
  0x9e   :  { %v122_v31 = vpop.f32.mrf.mxu0 }
  0xa2   :  { %v171_v61 = vpop.f32.mrf.mxu2 }
  0xa6   :  { %v219_v60 = vpop.f32.mrf.mxu0 }
  0xaa   :  { %v269_v63 = vpop.f32.mrf.mxu2 }
  0xab   :  { %1268 = vmatmul.msk.bf16.vlgmr.msrb.gmra.mxu1 %vm129_vm4, %v1582_v26  ;;  %1274 = vmatmul.msk.bf16.vlgmr.msrb.gmra.mxu3 %vm129_vm4, %v1582_v26 }
  0xac   :  { %498 = vmatpush.bf16.msrb.mxu3 %v489_v34  ;;  %448 = vmatpush.bf16.msrb.mxu1 %v439_v35 }
  0xae   :  { %v221_v62 = vpop.f32.mrf.mxu0 }
  0xb2   :  { %v271_v1 = vpop.f32.mrf.mxu2 }
  0xb6   :  { %v319_v0 = vpop.f32.mrf.mxu0 }
  0xba   :  { %v369_v3 = vpop.f32.mrf.mxu2 }
  0xbb   :  { %1280 = vmatmul.msk.bf16.vlgmr.msra.gmra.mxu1 %vm129_vm4, %v1582_v26  ;;  %1286 = vmatmul.msk.bf16.vlgmr.msra.gmra.mxu3 %vm129_vm4, %v1582_v26 }
  0xbc   :  { %598 = vmatpush.bf16.msra.mxu3 %v589_v40  ;;  %548 = vmatpush.bf16.msra.mxu1 %v539_v41 }
  0xbe   :  { %v321_v2 = vpop.f32.mrf.mxu0 }
  0xc2   :  { %v371_v9 = vpop.f32.mrf.mxu2 }
  0xc6   :  { %v1648_v4 = vpop.f32.mrf.mxu0 }
  0xca   :  { %v1654_v20 = vpop.f32.mrf.mxu2 }
  0xcb   :  { %1292 = vmatmul.msk.bf16.vlgmr.msrb.gmra.mxu1 %vm129_vm4, %v1582_v26  ;;  %1298 = vmatmul.msk.bf16.vlgmr.msrb.gmra.mxu3 %vm129_vm4, %v1582_v26 }
  0xcc   :  { %698 = vmatpush.bf16.msrb.mxu3 %v689_v46  ;;  %648 = vmatpush.bf16.msrb.mxu1 %v639_v47 }
  0xce   :  { %v421_v12 = vpop.f32.mrf.mxu0 }
  0xd2   :  { %v471_v33 = vpop.f32.mrf.mxu2 }
  0xd6   :  { %v1656_v23 = vpop.f32.mrf.mxu0 }
  0xda   :  { %v569_v46 = vpop.f32.mrf.mxu2 }
  0xdb   :  { %1304 = vmatmul.msk.bf16.vlgmr.msra.gmra.mxu1 %vm129_vm4, %v1582_v26  ;;  %1310 = vmatmul.msk.bf16.vlgmr.msra.gmra.mxu3 %vm129_vm4, %v1582_v26 }
  0xdc   :  { %798 = vmatpush.bf16.msra.mxu3 %v789_v52  ;;  %748 = vmatpush.bf16.msra.mxu1 %v739_v53 }
  0xde   :  { %v521_v37 = vpop.f32.mrf.mxu0 }
  0xe6   :  { %v619_v50 = vpop.f32.mrf.mxu0 }
  0xeb   :  { %1316 = vmatmul.msk.bf16.vlgmr.msrb.gmra.mxu1 %vm129_vm4, %v1582_v26  ;;  %1322 = vmatmul.msk.bf16.vlgmr.msrb.gmra.mxu3 %vm129_vm4, %v1582_v26 }
  0xec   :  { %898 = vmatpush.bf16.msrb.mxu3 %v889_v57  ;;  %848 = vmatpush.bf16.msrb.mxu1 %v839_v58 }
  0xfb   :  { %1328 = vmatmul.msk.bf16.vlgmr.msra.gmra.mxu1 %vm129_vm4, %v1582_v26  ;;  %1334 = vmatmul.msk.bf16.vlgmr.msra.gmra.mxu3 %vm129_vm4, %v1582_v26 }
 0x10b   :  { %1340 = vmatmul.msk.bf16.vlgmr.msrb.gmra.mxu1 %vm129_vm4, %v1582_v26  ;;  %1346 = vmatmul.msk.bf16.vlgmr.msrb.gmra.mxu3 %vm129_vm4, %v1582_v26 }
 0x118   :  { %v146_v5 = vpop.f32.mrf.mxu1 }
 0x119   :  { %v170_v6 = vadd.f32 %v169_v59, %v146_v5  ;;  %v571_v59 = vpop.f32.mrf.mxu2 }
 0x11b   :  { %174 = vst.msk [vmem:[#allocation2] sm:$0x3] %vm173_vm5, %v170_v6  ;;  %v175_v7 = vsel %vm173_vm5, %v170_v6, 0.0 }
 0x11c   :  { %v176_v8 = vrot.slane %v175_v7, 4 }
 0x11e   :  { %v177_v10 = vadd.f32 %v176_v8, %v175_v7  ;;  %v200_v11 = vpop.f32.mrf.mxu3 }
 0x11f   :  { %v220_v13 = vadd.f32 %v219_v60, %v200_v11 }
 0x120   :  { %v178_v14 = vrot.slane %v177_v10, 2  ;;  %v148_v15 = vpop.f32.mrf.mxu1 }
 0x121   :  { %224 = vst.msk [vmem:[#allocation2 + $0x2] sm:$0x3] %vm173_vm5, %v220_v13  ;;  %v225_v16 = vsel %vm173_vm5, %v220_v13, 0.0  ;;  %v669_v9 = vpop.f32.mrf.mxu2 }
 0x122   :  { %v226_v17 = vrot.slane %v225_v16, 4  ;;  %v179_v18 = vadd.f32 %v178_v14, %v177_v10 }
 0x124   :  { %v227_v19 = vadd.f32 %v226_v17, %v225_v16  ;;  %v180_v24 = vrot.slane %v179_v18, 1 }
 0x126   :  { %v228_v21 = vrot.slane %v227_v19, 2  ;;  %v202_v22 = vpop.f32.mrf.mxu3  ;;  %v181_v30 = vadd.f32 %v180_v24, %v179_v18 }
 0x128   :  { %v229_v25 = vadd.f32 %v228_v21, %v227_v19  ;;  %v250_v26 = vpop.f32.mrf.mxu1 }
 0x129   :  { %v270_v27 = vadd.f32 %v269_v63, %v250_v26  ;;  %v621_v63 = vpop.f32.mrf.mxu0  ;;  %v671_v19 = vpop.f32.mrf.mxu2 }
 0x12a   :  { %v230_v28 = vrot.slane %v229_v25, 1 }
 0x12b   :  { %274 = vst.msk [vmem:[#allocation2 + $0x4] sm:$0x3] %vm173_vm5, %v270_v27  ;;  %v275_v29 = vsel %vm173_vm5, %v270_v27, 0.0 }
 0x12c   :  { %v231_v31 = vadd.f32 %v230_v28, %v229_v25  ;;  %v276_v32 = vrot.slane %v275_v29, 4 }
 0x12e   :  { %v232_v34 = vadd.f32 %v231_v31, %v181_v30  ;;  %v277_v35 = vadd.f32 %v276_v32, %v275_v29  ;;  %v300_v36 = vpop.f32.mrf.mxu3 }
 0x12f   :  { %v320_v38 = vadd.f32 %v319_v0, %v300_v36 }
 0x130   :  { %v278_v39 = vrot.slane %v277_v35, 2  ;;  %v252_v40 = vpop.f32.mrf.mxu1 }
 0x131   :  { %324 = vst.msk [vmem:[#allocation2 + $0x6] sm:$0x3] %vm173_vm5, %v320_v38  ;;  %v325_v41 = vsel %vm173_vm5, %v320_v38, 0.0  ;;  %v719_v13 = vpop.f32.mrf.mxu0  ;;  %v769_v27 = vpop.f32.mrf.mxu2 }
 0x132   :  { %v279_v42 = vadd.f32 %v278_v39, %v277_v35  ;;  %v326_v43 = vrot.slane %v325_v41, 4 }
 0x134   :  { %v280_v44 = vrot.slane %v279_v42, 1  ;;  %v327_v45 = vadd.f32 %v326_v43, %v325_v41 }
 0x136   :  { %v281_v47 = vadd.f32 %v280_v44, %v279_v42  ;;  %v328_v48 = vrot.slane %v327_v45, 2  ;;  %v302_v49 = vpop.f32.mrf.mxu3 }
 0x138   :  { %v282_v51 = vadd.f32 %v281_v47, %v232_v34  ;;  %v329_v52 = vadd.f32 %v328_v48, %v327_v45  ;;  %v350_v53 = vpop.f32.mrf.mxu1 }
 0x139   :  { %v370_v54 = vadd.f32 %v369_v3, %v350_v53  ;;  %v721_v24 = vpop.f32.mrf.mxu0 }
 0x13a   :  { %v330_v55 = vrot.slane %v329_v52, 1 }
 0x13b   :  { %374 = vst.msk [vmem:[#allocation2 + $0x8] sm:$0x3] %vm173_vm5, %v370_v54  ;;  %v375_v56 = vsel %vm173_vm5, %v370_v54, 0.0 }
 0x13c   :  { %v331_v57 = vadd.f32 %v330_v55, %v329_v52  ;;  %v376_v58 = vrot.slane %v375_v56, 4 }
 0x13e   :  { %v332_v60 = vadd.f32 %v331_v57, %v282_v51  ;;  %v377_v61 = vadd.f32 %v376_v58, %v375_v56  ;;  %v400_v62 = vpop.f32.mrf.mxu3 }
 0x13f   :  { %v420_v0 = vadd.f32 %v1648_v4, %v400_v62 }
 0x140   :  { %v378_v1 = vrot.slane %v377_v61, 2  ;;  %v352_v2 = vpop.f32.mrf.mxu1 }
 0x141   :  { %424 = vst.msk [vmem:[#allocation2 + $0xa] sm:$0x3] %vm173_vm5, %v420_v0  ;;  %v425_v3 = vsel %vm173_vm5, %v420_v0, 0.0  ;;  %v819_v29 = vpop.f32.mrf.mxu0 }
 0x142   :  { %v379_v5 = vadd.f32 %v378_v1, %v377_v61  ;;  %v426_v6 = vrot.slane %v425_v3, 4 }
 0x144   :  { %v380_v7 = vrot.slane %v379_v5, 1  ;;  %v427_v8 = vadd.f32 %v426_v6, %v425_v3 }
 0x146   :  { %v381_v10 = vadd.f32 %v380_v7, %v379_v5  ;;  %v428_v11 = vrot.slane %v427_v8, 2  ;;  %v402_v12 = vpop.f32.mrf.mxu3 }
 0x148   :  { %v382_v14 = vadd.f32 %v381_v10, %v332_v60  ;;  %v429_v15 = vadd.f32 %v428_v11, %v427_v8  ;;  %v450_v16 = vpop.f32.mrf.mxu1 }
 0x149   :  { %v470_v4 = vadd.f32 %v1654_v20, %v450_v16  ;;  %v771_v20 = vpop.f32.mrf.mxu2  ;;  %v821_v33 = vpop.f32.mrf.mxu0 }
 0x14a   :  { %v430_v17 = vrot.slane %v429_v15, 1 }
 0x14b   :  { %474 = vst.msk [vmem:[#allocation2 + $0xc] sm:$0x3] %vm173_vm5, %v470_v4  ;;  %v475_v44 = vsel %vm173_vm5, %v470_v4, 0.0 }
 0x14c   :  { %v431_v18 = vadd.f32 %v430_v17, %v429_v15  ;;  %v476_v47 = vrot.slane %v475_v44, 4 }
 0x14e   :  { %v1669_v21 = vadd.f32 %v431_v18, %v382_v14  ;;  %v500_v22 = vpop.f32.mrf.mxu3  ;;  %v477_v52 = vadd.f32 %v476_v47, %v475_v44 }
 0x14f   :  { %v520_v25 = vadd.f32 %v1656_v23, %v500_v22 }
 0x150   :  { %v452_v26 = vpop.f32.mrf.mxu1  ;;  %v478_v59 = vrot.slane %v477_v52, 2 }
 0x151   :  { %524 = vst.msk [vmem:[#allocation2 + $0xe] sm:$0x3] %vm173_vm5, %v520_v25  ;;  %v1675_v36 = vpop.f32.mrf.mxu2  ;;  %v1677_v37 = vpop.f32.mrf.mxu0 }
 0x152   :  { %v479_v5 = vadd.f32 %v478_v59, %v477_v52 }
 0x154   :  { %v480_v16 = vrot.slane %v479_v5, 1 }
 0x156   :  { %v502_v28 = vpop.f32.mrf.mxu3 }
 0x158   :  { %v550_v30 = vpop.f32.mrf.mxu1 }
 0x159   :  { %v570_v31 = vadd.f32 %v569_v46, %v550_v30  ;;  %v871_v40 = vpop.f32.mrf.mxu2  ;;  %v921_v42 = vpop.f32.mrf.mxu0  ;;  %v525_v46 = vsel %vm173_vm5, %v520_v25, 0.0 }
 0x15a   :  { %v526_v49 = vrot.slane %v525_v46, 4 }
 0x15b   :  { %574 = vst.msk [vmem:[#allocation2 + $0x10] sm:$0x3] %vm173_vm5, %v570_v31  ;;  %v575_v48 = vsel %vm173_vm5, %v570_v31, 0.0 }
 0x15c   :  { %v576_v53 = vrot.slane %v575_v48, 4  ;;  %v527_v55 = vadd.f32 %v526_v49, %v525_v46 }
 0x15e   :  { %v600_v32 = vpop.f32.mrf.mxu3  ;;  %v577_v60 = vadd.f32 %v576_v53, %v575_v48  ;;  %v528_v63 = vrot.slane %v527_v55, 2 }
 0x15f   :  { %v620_v34 = vadd.f32 %v619_v50, %v600_v32 }
 0x160   :  { %v552_v35 = vpop.f32.mrf.mxu1  ;;  %v578_v6 = vrot.slane %v577_v60, 2  ;;  %v529_v11 = vadd.f32 %v528_v63, %v527_v55 }
 0x161   :  { %624 = vst.msk [vmem:[#allocation2 + $0x12] sm:$0x3] %vm173_vm5, %v620_v34  ;;  %v625_v50 = vsel %vm173_vm5, %v620_v34, 0.0 }
 0x162   :  { %v626_v56 = vrot.slane %v625_v50, 4  ;;  %v579_v4 = vadd.f32 %v578_v6, %v577_v60  ;;  %v530_v19 = vrot.slane %v529_v11, 1 }
 0x164   :  { %v627_v0 = vadd.f32 %v626_v56, %v625_v50  ;;  %v580_v28 = vrot.slane %v579_v4, 1  ;;  %v531_v20 = vadd.f32 %v530_v19, %v529_v11  ;;  %v1698_v11 = vld [vmem:[#allocation2] sm:$0x3] }
 0x166   :  { %v602_v23 = vpop.f32.mrf.mxu3  ;;  %v628_v12 = vrot.slane %v627_v0, 2 }
 0x168   :  { %v650_v38 = vpop.f32.mrf.mxu1  ;;  %v629_v22 = vadd.f32 %v628_v12, %v627_v0  ;;  %v945_v12 = vld [vmem:[#allocation2 + $0x2] sm:$0x3] }
 0x169   :  { %v670_v39 = vadd.f32 %v669_v9, %v650_v38  ;;  %v581_v38 = vadd.f32 %v580_v28, %v579_v4  ;;  %v989_v4 = vld [vmem:[#allocation2 + $0xa] sm:$0x3] }
 0x16a   :  { %v630_v32 = vrot.slane %v629_v22, 1 }
 0x16b   :  { %674 = vst.msk [vmem:[#allocation2 + $0x14] sm:$0x3] %vm173_vm5, %v670_v39  ;;  %v675_v57 = vsel %vm173_vm5, %v670_v39, 0.0 }
 0x16c   :  { %v676_v62 = vrot.slane %v675_v57, 4  ;;  %v631_v44 = vadd.f32 %v630_v32, %v629_v22 }
 0x16e   :  { %v700_v41 = vpop.f32.mrf.mxu3  ;;  %v677_v8 = vadd.f32 %v676_v62, %v675_v57 }
 0x16f   :  { %v720_v43 = vadd.f32 %v719_v13, %v700_v41 }
 0x170   :  { %v652_v45 = vpop.f32.mrf.mxu1  ;;  %v678_v17 = vrot.slane %v677_v8, 2 }
 0x171   :  { %724 = vst.msk [vmem:[#allocation2 + $0x16] sm:$0x3] %vm173_vm5, %v720_v43  ;;  %v725_v61 = vsel %vm173_vm5, %v720_v43, 0.0 }
 0x172   :  { %v726_v2 = vrot.slane %v725_v61, 4 }
 0x174   :  { %v727_v14 = vadd.f32 %v726_v2, %v725_v61 }
 0x176   :  { %v702_v51 = vpop.f32.mrf.mxu3  ;;  %v728_v24 = vrot.slane %v727_v14, 2 }
 0x178   :  { %v750_v54 = vpop.f32.mrf.mxu1  ;;  %v729_v34 = vadd.f32 %v728_v24, %v727_v14  ;;  %v956_v14 = vld [vmem:[#allocation2 + $0x4] sm:$0x3] }
 0x179   :  { %v770_v58 = vadd.f32 %v769_v27, %v750_v54  ;;  %v481_v27 = vadd.f32 %v480_v16, %v479_v5  ;;  %v978_v16 = vld [vmem:[#allocation2 + $0x8] sm:$0x3] }
 0x17a   :  { %v730_v45 = vrot.slane %v729_v34, 1 }
 0x17b   :  { %774 = vst.msk [vmem:[#allocation2 + $0x18] sm:$0x3] %vm173_vm5, %v770_v58  ;;  %v775_v1 = vsel %vm173_vm5, %v770_v58, 0.0  ;;  %v482_v23 = vadd.f32 %v481_v27, %v1669_v21 }
 0x17c   :  { %v776_v9 = vrot.slane %v775_v1, 4  ;;  %v731_v55 = vadd.f32 %v730_v45, %v729_v34 }
 0x17d   :  { %v532_v43 = vadd.f32 %v531_v20, %v482_v23 }
 0x17e   :  { %v800_v3 = vpop.f32.mrf.mxu3  ;;  %v777_v18 = vadd.f32 %v776_v9, %v775_v1 }
 0x17f   :  { %v820_v7 = vadd.f32 %v819_v29, %v800_v3  ;;  %v679_v29 = vadd.f32 %v678_v17, %v677_v8  ;;  %v582_v49 = vadd.f32 %v581_v38, %v532_v43  ;;  %v1000_v17 = vld [vmem:[#allocation2 + $0xc] sm:$0x3] }
 0x180   :  { %v752_v10 = vpop.f32.mrf.mxu1  ;;  %v778_v30 = vrot.slane %v777_v18, 2 }
 0x181   :  { %824 = vst.msk [vmem:[#allocation2 + $0x1a] sm:$0x3] %vm173_vm5, %v820_v7  ;;  %v825_v13 = vsel %vm173_vm5, %v820_v7, 0.0  ;;  %v680_v40 = vrot.slane %v679_v29, 1  ;;  %v632_v53 = vadd.f32 %v631_v44, %v582_v49 }
 0x182   :  { %v826_v15 = vrot.slane %v825_v13, 4  ;;  %v779_v41 = vadd.f32 %v778_v30, %v777_v18  ;;  %v1011_v18 = vld [vmem:[#allocation2 + $0xe] sm:$0x3] }
 0x183   :  { %v681_v50 = vadd.f32 %v680_v40, %v679_v29 }
 0x184   :  { %v827_v25 = vadd.f32 %v826_v15, %v825_v13  ;;  %v780_v51 = vrot.slane %v779_v41, 1  ;;  %v967_v15 = vld [vmem:[#allocation2 + $0x6] sm:$0x3] }
 0x185   :  { %v682_v59 = vadd.f32 %v681_v50, %v632_v53 }
 0x186   :  { %v802_v26 = vpop.f32.mrf.mxu3  ;;  %v828_v35 = vrot.slane %v827_v25, 2  ;;  %v781_v60 = vadd.f32 %v780_v51, %v779_v41 }
 0x187   :  { %v732_v63 = vadd.f32 %v731_v55, %v682_v59 }
 0x188   :  { %v850_v31 = vpop.f32.mrf.mxu1  ;;  %v829_v46 = vadd.f32 %v828_v35, %v827_v25 }
 0x189   :  { %v870_v33 = vadd.f32 %v1675_v36, %v850_v31  ;;  %v782_v2 = vadd.f32 %v781_v60, %v732_v63 }
 0x18a   :  { %v830_v56 = vrot.slane %v829_v46, 1 }
 0x18b   :  { %874 = vst.msk [vmem:[#allocation2 + $0x1c] sm:$0x3] %vm173_vm5, %v870_v33  ;;  %v875_v39 = vsel %vm173_vm5, %v870_v33, 0.0 }
 0x18c   :  { %v876_v42 = vrot.slane %v875_v39, 4  ;;  %v831_v0 = vadd.f32 %v830_v56, %v829_v46 }
 0x18e   :  { %v877_v47 = vadd.f32 %v876_v42, %v875_v39  ;;  %v900_v48 = vpop.f32.mrf.mxu3  ;;  %v832_v6 = vadd.f32 %v831_v0, %v782_v2 }
 0x18f   :  { %v920_v36 = vadd.f32 %v1677_v37, %v900_v48 }
 0x190   :  { %v878_v21 = vrot.slane %v877_v47, 2  ;;  %v852_v52 = vpop.f32.mrf.mxu1 }
 0x191   :  { %924 = vst.msk [vmem:[#allocation2 + $0x1e] sm:$0x3] %vm173_vm5, %v920_v36  ;;  %v925_v54 = vsel %vm173_vm5, %v920_v36, 0.0 }
 0x192   :  { %v879_v57 = vadd.f32 %v878_v21, %v877_v47  ;;  %v926_v58 = vrot.slane %v925_v54, 4 }
 0x194   :  { %v880_v61 = vrot.slane %v879_v57, 1  ;;  %v927_v62 = vadd.f32 %v926_v58, %v925_v54 }
 0x196   :  { %v928_v37 = vrot.slane %v927_v62, 2  ;;  %v902_v1 = vpop.f32.mrf.mxu3  ;;  %v881_v3 = vadd.f32 %v880_v61, %v879_v57 }
 0x198   :  { %v929_v5 = vadd.f32 %v928_v37, %v927_v62  ;;  %v882_v8 = vadd.f32 %v881_v3, %v832_v6 }
 0x19a   :  { %v930_v7 = vrot.slane %v929_v5, 1 }
 0x19c   :  { %v931_v9 = vadd.f32 %v930_v7, %v929_v5 }
 0x19e   :  { %v932_v10 = vadd.f32 %v931_v9, %v882_v8 }
 0x1a0   :  { %v1700_v13 = vmul.f32 0.03125, %v932_v10 }
 0x1a2   :  { %v935_v19 = vsub.f32 %v1698_v11, %v1700_v13  ;;  %v946_v22 = vsub.f32 %v945_v12, %v1700_v13  ;;  %v957_v24 = vsub.f32 %v956_v14, %v1700_v13  ;;  %v968_v25 = vsub.f32 %v967_v15, %v1700_v13 }
 0x1a3   :  { %v979_v26 = vsub.f32 %v978_v16, %v1700_v13  ;;  %v990_v27 = vsub.f32 %v989_v4, %v1700_v13  ;;  %v1001_v28 = vsub.f32 %v1000_v17, %v1700_v13  ;;  %v1012_v29 = vsub.f32 %v1011_v18, %v1700_v13  ;;  %v1022_v17 = vld [vmem:[#allocation2 + $0x10] sm:$0x3]  ;;  %v1033_v18 = vld [vmem:[#allocation2 + $0x12] sm:$0x3] }
 0x1a4   :  { %v936_v30 = vmul.f32 %v935_v19, %v935_v19  ;;  %v947_v31 = vmul.f32 %v946_v22, %v946_v22  ;;  %v958_v20 = vmul.f32 %v957_v24, %v957_v24  ;;  %v969_v32 = vmul.f32 %v968_v25, %v968_v25 }
 0x1a5   :  { %v980_v33 = vmul.f32 %v979_v26, %v979_v26  ;;  %v991_v34 = vmul.f32 %v990_v27, %v990_v27  ;;  %v1002_v35 = vmul.f32 %v1001_v28, %v1001_v28  ;;  %v1013_v23 = vmul.f32 %v1012_v29, %v1012_v29  ;;  %v1044_v26 = vld [vmem:[#allocation2 + $0x14] sm:$0x3] }
 0x1a6   :  { %v937_v38 = vsel %vm173_vm5, %v936_v30, 0.0  ;;  %v948_v39 = vsel %vm173_vm5, %v947_v31, 0.0  ;;  %v959_v40 = vsel %vm173_vm5, %v958_v20, 0.0  ;;  %v970_v41 = vsel %vm173_vm5, %v969_v32, 0.0 }
 0x1a7   :  { %v938_v42 = vrot.slane %v937_v38, 4  ;;  %v949_v43 = vrot.slane %v948_v39, 4  ;;  %v960_v44 = vrot.slane %v959_v40, 4  ;;  %v971_v45 = vrot.slane %v970_v41, 4 }
 0x1a8   :  { %v981_v46 = vsel %vm173_vm5, %v980_v33, 0.0  ;;  %v992_v47 = vsel %vm173_vm5, %v991_v34, 0.0  ;;  %v1003_v48 = vsel %vm173_vm5, %v1002_v35, 0.0  ;;  %v1014_v49 = vsel %vm173_vm5, %v1013_v23, 0.0  ;;  %v1055_v34 = vld [vmem:[#allocation2 + $0x16] sm:$0x3] }
 0x1a9   :  { %v939_v36 = vadd.f32 %v938_v42, %v937_v38  ;;  %v950_v50 = vadd.f32 %v949_v43, %v948_v39  ;;  %v961_v51 = vadd.f32 %v960_v44, %v959_v40  ;;  %v972_v21 = vadd.f32 %v971_v45, %v970_v41  ;;  %v1066_v40 = vld [vmem:[#allocation2 + $0x18] sm:$0x3]  ;;  %v1077_v41 = vld [vmem:[#allocation2 + $0x1a] sm:$0x3]  ;;  %v1088_v42 = vld [vmem:[#allocation2 + $0x1c] sm:$0x3] }
 0x1aa   :  { %v982_v52 = vrot.slane %v981_v46, 4  ;;  %v993_v53 = vrot.slane %v992_v47, 4  ;;  %v1004_v54 = vrot.slane %v1003_v48, 4  ;;  %v1015_v55 = vrot.slane %v1014_v49, 4 }
 0x1ab   :  { %v940_v56 = vrot.slane %v939_v36, 2  ;;  %v951_v57 = vrot.slane %v950_v50, 2  ;;  %v962_v58 = vrot.slane %v961_v51, 2  ;;  %v973_v59 = vrot.slane %v972_v21, 2 }
 0x1ac   :  { %v983_v60 = vadd.f32 %v982_v52, %v981_v46  ;;  %v994_v61 = vadd.f32 %v993_v53, %v992_v47  ;;  %v1005_v62 = vadd.f32 %v1004_v54, %v1003_v48  ;;  %v1016_v63 = vadd.f32 %v1015_v55, %v1014_v49 }
 0x1ad   :  { %v941_v0 = vadd.f32 %v940_v56, %v939_v36  ;;  %v952_v37 = vadd.f32 %v951_v57, %v950_v50  ;;  %v963_v1 = vadd.f32 %v962_v58, %v961_v51  ;;  %v974_v2 = vadd.f32 %v973_v59, %v972_v21 }
 0x1ae   :  { %v984_v3 = vrot.slane %v983_v60, 2  ;;  %v995_v5 = vrot.slane %v994_v61, 2  ;;  %v1006_v6 = vrot.slane %v1005_v62, 2  ;;  %v1017_v7 = vrot.slane %v1016_v63, 2 }
 0x1af   :  { %v942_v8 = vrot.slane %v941_v0, 1  ;;  %v953_v9 = vrot.slane %v952_v37, 1  ;;  %v964_v10 = vrot.slane %v963_v1, 1  ;;  %v975_v12 = vrot.slane %v974_v2, 1 }
 0x1b0   :  { %v985_v14 = vadd.f32 %v984_v3, %v983_v60  ;;  %v996_v15 = vadd.f32 %v995_v5, %v994_v61  ;;  %v1007_v16 = vadd.f32 %v1006_v6, %v1005_v62  ;;  %v1018_v4 = vadd.f32 %v1017_v7, %v1016_v63 }
 0x1b1   :  { %v943_v19 = vadd.f32 %v942_v8, %v941_v0  ;;  %v954_v22 = vadd.f32 %v953_v9, %v952_v37  ;;  %v965_v24 = vadd.f32 %v964_v10, %v963_v1  ;;  %v976_v25 = vadd.f32 %v975_v12, %v974_v2 }
 0x1b2   :  { %v986_v27 = vrot.slane %v985_v14, 1  ;;  %v997_v28 = vrot.slane %v996_v15, 1  ;;  %v1008_v29 = vrot.slane %v1007_v16, 1  ;;  %v1019_v30 = vrot.slane %v1018_v4, 1 }
 0x1b3   :  { %v955_v31 = vadd.f32 %v954_v22, %v943_v19  ;;  %v1023_v20 = vsub.f32 %v1022_v17, %v1700_v13  ;;  %v1034_v32 = vsub.f32 %v1033_v18, %v1700_v13  ;;  %v1045_v33 = vsub.f32 %v1044_v26, %v1700_v13 }
 0x1b4   :  { %v987_v35 = vadd.f32 %v986_v27, %v985_v14  ;;  %v998_v23 = vadd.f32 %v997_v28, %v996_v15  ;;  %v1009_v38 = vadd.f32 %v1008_v29, %v1007_v16  ;;  %v1020_v39 = vadd.f32 %v1019_v30, %v1018_v4  ;;  %v1099_v29 = vld [vmem:[#allocation2 + $0x1e] sm:$0x3] }
 0x1b5   :  { %v966_v43 = vadd.f32 %v965_v24, %v955_v31  ;;  %v1024_v44 = vmul.f32 %v1023_v20, %v1023_v20  ;;  %v1035_v45 = vmul.f32 %v1034_v32, %v1034_v32  ;;  %v1046_v46 = vmul.f32 %v1045_v33, %v1045_v33 }
 0x1b6   :  { %v1056_v47 = vsub.f32 %v1055_v34, %v1700_v13  ;;  %v1067_v48 = vsub.f32 %v1066_v40, %v1700_v13  ;;  %v1078_v49 = vsub.f32 %v1077_v41, %v1700_v13  ;;  %v1089_v36 = vsub.f32 %v1088_v42, %v1700_v13 }
 0x1b7   :  { %v977_v50 = vadd.f32 %v976_v25, %v966_v43  ;;  %v1025_v51 = vsel %vm173_vm5, %v1024_v44, 0.0  ;;  %v1036_v21 = vsel %vm173_vm5, %v1035_v45, 0.0  ;;  %v1047_v52 = vsel %vm173_vm5, %v1046_v46, 0.0 }
 0x1b8   :  { %v1026_v53 = vrot.slane %v1025_v51, 4  ;;  %v1037_v54 = vrot.slane %v1036_v21, 4  ;;  %v1048_v55 = vrot.slane %v1047_v52, 4  ;;  %v1057_v56 = vmul.f32 %v1056_v47, %v1056_v47 }
 0x1b9   :  { %v988_v57 = vadd.f32 %v987_v35, %v977_v50  ;;  %v1068_v58 = vmul.f32 %v1067_v48, %v1067_v48  ;;  %v1079_v59 = vmul.f32 %v1078_v49, %v1078_v49  ;;  %v1090_v60 = vmul.f32 %v1089_v36, %v1089_v36 }
 0x1ba   :  { %v1027_v61 = vadd.f32 %v1026_v53, %v1025_v51  ;;  %v1038_v62 = vadd.f32 %v1037_v54, %v1036_v21  ;;  %v1049_v63 = vadd.f32 %v1048_v55, %v1047_v52  ;;  %v1058_v0 = vsel %vm173_vm5, %v1057_v56, 0.0 }
 0x1bb   :  { %v999_v37 = vadd.f32 %v998_v23, %v988_v57  ;;  %v1059_v1 = vrot.slane %v1058_v0, 4  ;;  %v1069_v2 = vsel %vm173_vm5, %v1068_v58, 0.0  ;;  %v1080_v3 = vsel %vm173_vm5, %v1079_v59, 0.0 }
 0x1bc   :  { %v1028_v5 = vrot.slane %v1027_v61, 2  ;;  %v1039_v6 = vrot.slane %v1038_v62, 2  ;;  %v1050_v7 = vrot.slane %v1049_v63, 2  ;;  %v1070_v8 = vrot.slane %v1069_v2, 4 }
 0x1bd   :  { %v1010_v9 = vadd.f32 %v1009_v38, %v999_v37  ;;  %v1060_v10 = vadd.f32 %v1059_v1, %v1058_v0  ;;  %v1081_v12 = vrot.slane %v1080_v3, 4  ;;  %v1091_v14 = vsel %vm173_vm5, %v1090_v60, 0.0 }
 0x1be   :  { %v1029_v15 = vadd.f32 %v1028_v5, %v1027_v61  ;;  %v1040_v16 = vadd.f32 %v1039_v6, %v1038_v62  ;;  %v1051_v4 = vadd.f32 %v1050_v7, %v1049_v63  ;;  %v1071_v17 = vadd.f32 %v1070_v8, %v1069_v2  ;;  %v1122_v7 = vld [vmem:[%s1831_s6] sm:$0x1] }
 0x1bf   :  { %v1021_v18 = vadd.f32 %v1020_v39, %v1010_v9  ;;  %v1061_v19 = vrot.slane %v1060_v10, 2  ;;  %v1082_v22 = vadd.f32 %v1081_v12, %v1080_v3  ;;  %v1092_v24 = vrot.slane %v1091_v14, 4  ;;  %v1139_v12 = vld [vmem:[#allocation2 + $0x2] sm:$0x3] }
 0x1c0   :  { %v1030_v25 = vrot.slane %v1029_v15, 1  ;;  %v1041_v26 = vrot.slane %v1040_v16, 1  ;;  %v1052_v27 = vrot.slane %v1051_v4, 1  ;;  %v1072_v28 = vrot.slane %v1071_v17, 2 }
 0x1c1   :  { %v1062_v30 = vadd.f32 %v1061_v19, %v1060_v10  ;;  %v1083_v31 = vrot.slane %v1082_v22, 2  ;;  %v1093_v20 = vadd.f32 %v1092_v24, %v1091_v14  ;;  %v1100_v32 = vsub.f32 %v1099_v29, %v1700_v13  ;;  %v1124_v10 = vld [vmem:[%s1832_s7] sm:$0x1]  ;;  %v1174_v19 = vld [vmem:[#allocation2 + $0xc] sm:$0x3] }
 0x1c2   :  { %v1031_v33 = vadd.f32 %v1030_v25, %v1029_v15  ;;  %v1073_v34 = vadd.f32 %v1072_v28, %v1071_v17  ;;  %v1042_v40 = vadd.f32 %v1041_v26, %v1040_v16  ;;  %v1053_v42 = vadd.f32 %v1052_v27, %v1051_v4  ;;  %v1146_v16 = vld [vmem:[#allocation2 + $0x4] sm:$0x3]  ;;  %v1153_v4 = vld [vmem:[#allocation2 + $0x6] sm:$0x3]  ;;  %v1160_v17 = vld [vmem:[#allocation2 + $0x8] sm:$0x3] }
 0x1c3   :  { %v1094_v35 = vrot.slane %v1093_v20, 2  ;;  %v1101_v23 = vmul.f32 %v1100_v32, %v1100_v32  ;;  %v1063_v39 = vrot.slane %v1062_v30, 1  ;;  %v1084_v41 = vadd.f32 %v1083_v31, %v1082_v22  ;;  %v1181_v25 = vld [vmem:[#allocation2 + $0xe] sm:$0x3]  ;;  %v1188_v26 = vld [vmem:[#allocation2 + $0x10] sm:$0x3] }
 0x1c4   :  { %v1032_v38 = vadd.f32 %v1031_v33, %v1021_v18  ;;  %v1074_v45 = vrot.slane %v1073_v34, 1  ;;  %v1167_v18 = vld [vmem:[#allocation2 + $0xa] sm:$0x3]  ;;  %v1195_v27 = vld [vmem:[#allocation2 + $0x12] sm:$0x3] }
 0x1c5   :  { %v1102_v43 = vsel %vm173_vm5, %v1101_v23, 0.0  ;;  %v1095_v46 = vadd.f32 %v1094_v35, %v1093_v20  ;;  %v1064_v49 = vadd.f32 %v1063_v39, %v1062_v30  ;;  %v1085_v36 = vrot.slane %v1084_v41, 1  ;;  %v1202_v31 = vld [vmem:[#allocation2 + $0x14] sm:$0x3]  ;;  %v1209_v20 = vld [vmem:[#allocation2 + $0x16] sm:$0x3] }
 0x1c6   :  { %v1043_v44 = vadd.f32 %v1042_v40, %v1032_v38  ;;  %v1103_v47 = vrot.slane %v1102_v43, 4  ;;  %v1075_v21 = vadd.f32 %v1074_v45, %v1073_v34 }
 0x1c7   :  { %v1096_v52 = vrot.slane %v1095_v46, 1  ;;  %v1086_v55 = vadd.f32 %v1085_v36, %v1084_v41 }
 0x1c8   :  { %v1054_v48 = vadd.f32 %v1053_v42, %v1043_v44  ;;  %v1104_v50 = vadd.f32 %v1103_v47, %v1102_v43  ;;  %v1216_v44 = vld [vmem:[#allocation2 + $0x18] sm:$0x3] }
 0x1c9   :  { %v1097_v58 = vadd.f32 %v1096_v52, %v1095_v46 }
 0x1ca   :  { %v1065_v51 = vadd.f32 %v1064_v49, %v1054_v48  ;;  %v1105_v53 = vrot.slane %v1104_v50, 2  ;;  %v1223_v49 = vld [vmem:[#allocation2 + $0x1a] sm:$0x3] }
 0x1cc   :  { %v1076_v54 = vadd.f32 %v1075_v21, %v1065_v51  ;;  %v1106_v56 = vadd.f32 %v1105_v53, %v1104_v50 }
 0x1ce   :  { %v1087_v57 = vadd.f32 %v1086_v55, %v1076_v54  ;;  %v1107_v59 = vrot.slane %v1106_v56, 1 }
 0x1d0   :  { %v1098_v60 = vadd.f32 %v1097_v58, %v1087_v57  ;;  %v1108_v61 = vadd.f32 %v1107_v59, %v1106_v56 }
 0x1d2   :  { %v1109_v62 = vadd.f32 %v1108_v61, %v1098_v60 }
 0x1d4   :  { %v1110_v63 = vmul.f32 0.03125, %v1109_v62 }
 0x1d6   :  { %v1111_v0 = vadd.f32 1e-05, %v1110_v63 }
 0x1d8   :  { %1391 = vrsqrt.f32 %v1111_v0  ;;  %vm1118_vm7 = vweird.f32 %v1111_v0 }
 0x1de   :  { %v1392_v37 = vpop.eup %1391 }
 0x1df   :  { %v1113_v1 = vmul.f32 %v1392_v37, %v1111_v0  ;;  %vm1119_vm6 = vweird.f32 %v1392_v37  ;;  %v1230_v0 = vld [vmem:[#allocation2 + $0x1c] sm:$0x3] }
 0x1e0   :  { %vm1120_vm8 = vmor %vm1118_vm7, %vm1119_vm6 }
 0x1e1   :  { %v1114_v2 = vmul.f32 %v1392_v37, %v1113_v1 }
 0x1e3   :  { %v1115_v3 = vmul.f32 0.5, %v1114_v2 }
 0x1e5   :  { %v1116_v5 = vsub.f32 1.5, %v1115_v3 }
 0x1e7   :  { %v1117_v6 = vmul.f32 %v1392_v37, %v1116_v5  ;;  %v1237_v5 = vld [vmem:[#allocation2 + $0x1e] sm:$0x3] }
 0x1e9   :  { %v1121_v8 = vsel %vm1120_vm8, %v1392_v37, %v1117_v6 }
 0x1ea   :  { %v1123_v9 = vmul.f32 %v1122_v7, %v1121_v8 }
 0x1ec   :  { %v1125_v14 = vmul.f32 %v1123_v9, %v1700_v13  ;;  %v1742_v15 = vperm.slane %v1123_v9, 0 }
 0x1ee   :  { %v1126_v22 = vsub.f32 %v1124_v10, %v1125_v14  ;;  %v1130_v24 = vmul.f32 %v1742_v15, %v1698_v11  ;;  %v1140_v28 = vmul.f32 %v1139_v12, %v1742_v15  ;;  %v1147_v29 = vmul.f32 %v1146_v16, %v1742_v15 }
 0x1ef   :  { %v1154_v13 = vmul.f32 %v1153_v4, %v1742_v15  ;;  %v1161_v30 = vmul.f32 %v1160_v17, %v1742_v15  ;;  %v1168_v33 = vmul.f32 %v1167_v18, %v1742_v15  ;;  %v1175_v34 = vmul.f32 %v1174_v19, %v1742_v15 }
 0x1f0   :  { %v1132_v32 = vperm.slane %v1126_v22, 0  ;;  %v1182_v11 = vmul.f32 %v1181_v25, %v1742_v15  ;;  %v1189_v35 = vmul.f32 %v1188_v26, %v1742_v15  ;;  %v1196_v23 = vmul.f32 %v1195_v27, %v1742_v15 }
 0x1f1   :  { %v1203_v38 = vmul.f32 %v1202_v31, %v1742_v15  ;;  %v1210_v40 = vmul.f32 %v1209_v20, %v1742_v15  ;;  %v1217_v54 = vmul.f32 %v1216_v44, %v1742_v15  ;;  %v1224_v55 = vmul.f32 %v1223_v49, %v1742_v15 }
 0x1f2   :  { %v1134_v39 = vadd.f32 %v1132_v32, %v1130_v24  ;;  %v1141_v41 = vadd.f32 %v1140_v28, %v1132_v32  ;;  %v1148_v42 = vadd.f32 %v1147_v29, %v1132_v32  ;;  %v1155_v43 = vadd.f32 %v1154_v13, %v1132_v32 }
 0x1f3   :  { %v1162_v45 = vadd.f32 %v1161_v30, %v1132_v32  ;;  %v1169_v46 = vadd.f32 %v1168_v33, %v1132_v32  ;;  %v1176_v47 = vadd.f32 %v1175_v34, %v1132_v32  ;;  %v1183_v48 = vadd.f32 %v1182_v11, %v1132_v32 }
 0x1f4   :  { %v1135_v36 = vmax.f32 %v1134_v39, 0.0  ;;  %v1142_v50 = vmax.f32 %v1141_v41, 0.0  ;;  %v1149_v51 = vmax.f32 %v1148_v42, 0.0  ;;  %v1156_v21 = vmax.f32 %v1155_v43, 0.0 }
 0x1f5   :  { %v1163_v52 = vmax.f32 %v1162_v45, 0.0  ;;  %v1170_v53 = vmax.f32 %v1169_v46, 0.0  ;;  %v1177_v59 = vmax.f32 %v1176_v47, 0.0  ;;  %v1184_v63 = vmax.f32 %v1183_v48, 0.0 }
 0x1f6   :  { %v1136_v56 = vpack.c.bf16 %v1135_v36, %v1135_v36  ;;  %v1143_v57 = vpack.c.bf16 %v1142_v50, %v1142_v50  ;;  %v1150_v58 = vpack.c.bf16 %v1149_v51, %v1149_v51  ;;  %v1157_v60 = vpack.c.bf16 %v1156_v21, %v1156_v21 }
 0x1f7   :  { %v1164_v61 = vpack.c.bf16 %v1163_v52, %v1163_v52  ;;  %v1171_v62 = vpack.c.bf16 %v1170_v53, %v1170_v53  ;;  %v1190_v37 = vadd.f32 %v1189_v35, %v1132_v32  ;;  %v1197_v1 = vadd.f32 %v1196_v23, %v1132_v32 }
 0x1f8   :  { %1138 = vst.msk [vmem:[%s1833_s8] sm:$0x1] %vm1137_vm9, %v1136_v56  ;;  %v1204_v2 = vadd.f32 %v1203_v38, %v1132_v32  ;;  %v1211_v3 = vadd.f32 %v1210_v40, %v1132_v32  ;;  %v1218_v6 = vadd.f32 %v1217_v54, %v1132_v32  ;;  %v1225_v7 = vadd.f32 %v1224_v55, %v1132_v32 }
 0x1f9   :  { %1352 = vst.msk [vmem:[%s1833_s8 + $0x1] sm:$0x1] %vm1137_vm9, %v1143_v57  ;;  %v1231_v8 = vmul.f32 %v1230_v0, %v1742_v15  ;;  %v1238_v9 = vmul.f32 %v1237_v5, %v1742_v15  ;;  %v1178_v10 = vpack.c.bf16 %v1177_v59, %v1177_v59  ;;  %v1191_v12 = vmax.f32 %v1190_v37, 0.0 }
 0x1fa   :  { %1353 = vst.msk [vmem:[%s1833_s8 + $0x2] sm:$0x1] %vm1137_vm9, %v1150_v58  ;;  %v1198_v14 = vmax.f32 %v1197_v1, 0.0  ;;  %v1205_v16 = vmax.f32 %v1204_v2, 0.0  ;;  %v1185_v4 = vpack.c.bf16 %v1184_v63, %v1184_v63  ;;  %v1212_v17 = vmax.f32 %v1211_v3, 0.0 }
 0x1fb   :  { %1354 = vst.msk [vmem:[%s1833_s8 + $0x3] sm:$0x1] %vm1137_vm9, %v1157_v60  ;;  %v1232_v18 = vadd.f32 %v1231_v8, %v1132_v32  ;;  %v1239_v19 = vadd.f32 %v1238_v9, %v1132_v32  ;;  %v1192_v15 = vpack.c.bf16 %v1191_v12, %v1191_v12  ;;  %v1219_v22 = vmax.f32 %v1218_v6, 0.0 }
 0x1fc   :  { %1355 = vst.msk [vmem:[%s1833_s8 + $0x4] sm:$0x1] %vm1137_vm9, %v1164_v61  ;;  %v1199_v24 = vpack.c.bf16 %v1198_v14, %v1198_v14  ;;  %v1226_v25 = vmax.f32 %v1225_v7, 0.0  ;;  %v1206_v26 = vpack.c.bf16 %v1205_v16, %v1205_v16  ;;  %v1213_v28 = vpack.c.bf16 %v1212_v17, %v1212_v17 }
 0x1fd   :  { %1356 = vst.msk [vmem:[%s1833_s8 + $0x5] sm:$0x1] %vm1137_vm9, %v1171_v62  ;;  %v1233_v27 = vmax.f32 %v1232_v18, 0.0  ;;  %v1240_v29 = vmax.f32 %v1239_v19, 0.0  ;;  %v1220_v13 = vpack.c.bf16 %v1219_v22, %v1219_v22 }
 0x1fe   :  { %1357 = vst.msk [vmem:[%s1833_s8 + $0x6] sm:$0x1] %vm1137_vm9, %v1178_v10  ;;  %v1227_v30 = vpack.c.bf16 %v1226_v25, %v1226_v25 }
 0x1ff   :  { %1358 = vst.msk [vmem:[%s1833_s8 + $0x7] sm:$0x1] %vm1137_vm9, %v1185_v4  ;;  %v1234_v31 = vpack.c.bf16 %v1233_v27, %v1233_v27  ;;  %v1241_v20 = vpack.c.bf16 %v1240_v29, %v1240_v29 }
 0x200   :  { %1359 = vst.msk [vmem:[%s1833_s8 + $0x8] sm:$0x1] %vm1137_vm9, %v1192_v15 }
 0x201   :  { %1360 = vst.msk [vmem:[%s1833_s8 + $0x9] sm:$0x1] %vm1137_vm9, %v1199_v24 }
 0x202   :  { %1361 = vst.msk [vmem:[%s1833_s8 + $0xa] sm:$0x1] %vm1137_vm9, %v1206_v26 }
 0x203   :  { %1362 = vst.msk [vmem:[%s1833_s8 + $0xb] sm:$0x1] %vm1137_vm9, %v1213_v28 }
 0x204   :  { %1363 = vst.msk [vmem:[%s1833_s8 + $0xc] sm:$0x1] %vm1137_vm9, %v1220_v13 }
 0x205   :  { %1364 = vst.msk [vmem:[%s1833_s8 + $0xd] sm:$0x1] %vm1137_vm9, %v1227_v30 }
 0x206   :  { %1365 = vst.msk [vmem:[%s1833_s8 + $0xe] sm:$0x1] %vm1137_vm9, %v1234_v31 }
 0x207   :  { %1366 = vst.msk [vmem:[%s1833_s8 + $0xf] sm:$0x1] %vm1137_vm9, %v1241_v20 }
 0x208   :  { %1248 = vsyncpa [#allocation4], 1 }
 0x209   :  { %1249 = vsyncpa [#allocation6], 1 }
 0x20a   :  { %1250 = vsyncpa [#allocation9], 1 }

// kernel: conv_generator_forward.6
= control target key start
LH: loop header
LB: loop body
LE: loop exit
PB: predicated region body
PF: predicated region fallthrough
CT: control target
= control target key end

     0   :  { %vm106_vm0 = vcmask 523264   ;;  %vm180_vm1 = vcmask 64512   ;;  %vm1321_vm5 = vcmask 60416   ;;  %s3161_s1 = inlined_call_operand.vmem [shape: bf16[4,64,8], index: 1, kind: input, shape index: {}]   ;;  %s3162_s0 = inlined_call_operand.vmem [shape: bf16[4,128,64], index: 0, kind: input, shape index: {}]   ;;  %s3163_s2 = inlined_call_operand.vmem [shape: f32[1,8], index: 2, kind: input, shape index: {}]   ;;  %s3164_s3 = inlined_call_operand.vmem [shape: f32[1,8], index: 3, kind: input, shape index: {}]   ;;  %s3165_s4 = inlined_call_operand.vmem [shape: bf16[4,128,8], index: 4, kind: output, shape index: {}]  }
   0x1   :  { %v1988_v0 = vld [vmem:[%s3161_s1 + $0x18] sm:$0xff]  ;;  %v1987_v4 = vld [vmem:[%s3161_s1 + $0x10] sm:$0xff]  ;;  %v1986_v8 = vld [vmem:[%s3161_s1 + $0x8] sm:$0xff] }
   0x2   :  { %v2000_v1 = vld [vmem:[%s3161_s1 + $0x38] sm:$0xff]  ;;  %135 = vmatpush.bf16.msra.mxu0 %v1988_v0  ;;  %v1999_v5 = vld [vmem:[%s3161_s1 + $0x30] sm:$0xff]  ;;  %v1998_v9 = vld [vmem:[%s3161_s1 + $0x28] sm:$0xff] }
   0x3   :  { %v2012_v2 = vld [vmem:[%s3161_s1 + $0x58] sm:$0xff]  ;;  %353 = vmatpush.bf16.msra.mxu1 %v2000_v1  ;;  %v2011_v6 = vld [vmem:[%s3161_s1 + $0x50] sm:$0xff]  ;;  %v2010_v10 = vld [vmem:[%s3161_s1 + $0x48] sm:$0xff] }
   0x4   :  { %v2024_v3 = vld [vmem:[%s3161_s1 + $0x78] sm:$0xff]  ;;  %571 = vmatpush.bf16.msra.mxu2 %v2012_v2  ;;  %v2023_v7 = vld [vmem:[%s3161_s1 + $0x70] sm:$0xff]  ;;  %v2022_v11 = vld [vmem:[%s3161_s1 + $0x68] sm:$0xff] }
   0x5   :  { %789 = vmatpush.bf16.msra.mxu3 %v2024_v3  ;;  %v1985_v12 = vld [vmem:[%s3161_s1] sm:$0xff]  ;;  %v1978_v20 = vld [vmem:[%s3162_s0 + $0x8] sm:$0xff]  ;;  %v1979_v24 = vld [vmem:[%s3162_s0 + $0x10] sm:$0xff] }
   0x6   :  { %136 = vmatpush.bf16.msra.mxu0 %v1987_v4  ;;  %v1997_v13 = vld [vmem:[%s3161_s1 + $0x20] sm:$0xff]  ;;  %v1990_v21 = vld [vmem:[%s3162_s0 + $0x48] sm:$0xff]  ;;  %v1991_v25 = vld [vmem:[%s3162_s0 + $0x50] sm:$0xff] }
   0x7   :  { %354 = vmatpush.bf16.msra.mxu1 %v1999_v5  ;;  %v2009_v14 = vld [vmem:[%s3161_s1 + $0x40] sm:$0xff]  ;;  %v2002_v22 = vld [vmem:[%s3162_s0 + $0x88] sm:$0xff]  ;;  %v2003_v26 = vld [vmem:[%s3162_s0 + $0x90] sm:$0xff] }
   0x8   :  { %572 = vmatpush.bf16.msra.mxu2 %v2011_v6  ;;  %v2021_v15 = vld [vmem:[%s3161_s1 + $0x60] sm:$0xff]  ;;  %v2014_v23 = vld [vmem:[%s3162_s0 + $0xc8] sm:$0xff]  ;;  %v2015_v27 = vld [vmem:[%s3162_s0 + $0xd0] sm:$0xff] }
   0x9   :  { %790 = vmatpush.bf16.msra.mxu3 %v2023_v7  ;;  %v1977_v16 = vld [vmem:[%s3162_s0] sm:$0xff]  ;;  %v1980_v28 = vld [vmem:[%s3162_s0 + $0x18] sm:$0xff]  ;;  %v1982_v36 = vld [vmem:[%s3162_s0 + $0x28] sm:$0xff] }
   0xa   :  { %137 = vmatpush.bf16.msra.mxu0 %v1986_v8  ;;  %v1989_v17 = vld [vmem:[%s3162_s0 + $0x40] sm:$0xff]  ;;  %v1992_v29 = vld [vmem:[%s3162_s0 + $0x58] sm:$0xff]  ;;  %v1994_v37 = vld [vmem:[%s3162_s0 + $0x68] sm:$0xff] }
   0xb   :  { %355 = vmatpush.bf16.msra.mxu1 %v1998_v9  ;;  %v2001_v18 = vld [vmem:[%s3162_s0 + $0x80] sm:$0xff]  ;;  %v2004_v30 = vld [vmem:[%s3162_s0 + $0x98] sm:$0xff]  ;;  %v2006_v38 = vld [vmem:[%s3162_s0 + $0xa8] sm:$0xff] }
   0xc   :  { %573 = vmatpush.bf16.msra.mxu2 %v2010_v10  ;;  %v2013_v19 = vld [vmem:[%s3162_s0 + $0xc0] sm:$0xff]  ;;  %v2016_v31 = vld [vmem:[%s3162_s0 + $0xd8] sm:$0xff]  ;;  %v2018_v39 = vld [vmem:[%s3162_s0 + $0xe8] sm:$0xff] }
   0xd   :  { %791 = vmatpush.bf16.msra.mxu3 %v2022_v11  ;;  %v1981_v32 = vld [vmem:[%s3162_s0 + $0x20] sm:$0xff]  ;;  %v1983_v40 = vld [vmem:[%s3162_s0 + $0x30] sm:$0xff]  ;;  %v1984_v44 = vld [vmem:[%s3162_s0 + $0x38] sm:$0xff] }
   0xe   :  { %138 = vmatpush.bf16.msra.mxu0 %v1985_v12  ;;  %v1993_v33 = vld [vmem:[%s3162_s0 + $0x60] sm:$0xff]  ;;  %v1995_v41 = vld [vmem:[%s3162_s0 + $0x70] sm:$0xff]  ;;  %v1996_v45 = vld [vmem:[%s3162_s0 + $0x78] sm:$0xff] }
   0xf   :  { %356 = vmatpush.bf16.msra.mxu1 %v1997_v13  ;;  %v2005_v34 = vld [vmem:[%s3162_s0 + $0xa0] sm:$0xff]  ;;  %v2007_v42 = vld [vmem:[%s3162_s0 + $0xb0] sm:$0xff]  ;;  %v2008_v46 = vld [vmem:[%s3162_s0 + $0xb8] sm:$0xff] }
  0x10   :  { %574 = vmatpush.bf16.msra.mxu2 %v2009_v14  ;;  %v2017_v35 = vld [vmem:[%s3162_s0 + $0xe0] sm:$0xff]  ;;  %v2019_v43 = vld [vmem:[%s3162_s0 + $0xf0] sm:$0xff]  ;;  %v2020_v47 = vld [vmem:[%s3162_s0 + $0xf8] sm:$0xff] }
  0x11   :  { %792 = vmatpush.bf16.msra.mxu3 %v2021_v15  ;;  %1681 = vmatmul.msk.bf16.vlgmr.msra.gmra.mxu0 %vm106_vm0, %v1977_v16 }
  0x12   :  { %1761 = vmatmul.msk.bf16.vlgmr.msra.gmra.mxu1 %vm106_vm0, %v1989_v17 }
  0x13   :  { %1841 = vmatmul.msk.bf16.vlgmr.msra.gmra.mxu2 %vm106_vm0, %v2001_v18 }
  0x14   :  { %1921 = vmatmul.msk.bf16.vlgmr.msra.gmra.mxu3 %vm106_vm0, %v2013_v19 }
  0x21   :  { %1682 = vmatmul.msk.bf16.gmra.mxu0 %vm106_vm0, %v1978_v20 }
  0x22   :  { %1762 = vmatmul.msk.bf16.gmra.mxu1 %vm106_vm0, %v1990_v21 }
  0x23   :  { %1842 = vmatmul.msk.bf16.gmra.mxu2 %vm106_vm0, %v2002_v22 }
  0x24   :  { %1922 = vmatmul.msk.bf16.gmra.mxu3 %vm106_vm0, %v2014_v23 }
  0x31   :  { %1683 = vmatmul.msk.bf16.gmra.mxu0 %vm106_vm0, %v1979_v24 }
  0x32   :  { %1763 = vmatmul.msk.bf16.gmra.mxu1 %vm106_vm0, %v1991_v25 }
  0x33   :  { %1843 = vmatmul.msk.bf16.gmra.mxu2 %vm106_vm0, %v2003_v26 }
  0x34   :  { %1923 = vmatmul.msk.bf16.gmra.mxu3 %vm106_vm0, %v2015_v27 }
  0x41   :  { %1684 = vmatmul.msk.bf16.gmra.mxu0 %vm106_vm0, %v1980_v28 }
  0x42   :  { %1764 = vmatmul.msk.bf16.gmra.mxu1 %vm106_vm0, %v1992_v29 }
  0x43   :  { %1844 = vmatmul.msk.bf16.gmra.mxu2 %vm106_vm0, %v2004_v30 }
  0x44   :  { %1924 = vmatmul.msk.bf16.gmra.mxu3 %vm106_vm0, %v2016_v31 }
  0x51   :  { %1685 = vmatmul.msk.bf16.gmra.mxu0 %vm106_vm0, %v1981_v32 }
  0x52   :  { %1765 = vmatmul.msk.bf16.gmra.mxu1 %vm106_vm0, %v1993_v33 }
  0x53   :  { %1845 = vmatmul.msk.bf16.gmra.mxu2 %vm106_vm0, %v2005_v34 }
  0x54   :  { %1925 = vmatmul.msk.bf16.gmra.mxu3 %vm106_vm0, %v2017_v35 }
  0x61   :  { %1686 = vmatmul.msk.bf16.gmra.mxu0 %vm106_vm0, %v1982_v36 }
  0x62   :  { %1766 = vmatmul.msk.bf16.gmra.mxu1 %vm106_vm0, %v1994_v37 }
  0x63   :  { %1846 = vmatmul.msk.bf16.gmra.mxu2 %vm106_vm0, %v2006_v38 }
  0x64   :  { %1926 = vmatmul.msk.bf16.gmra.mxu3 %vm106_vm0, %v2018_v39 }
  0x71   :  { %1687 = vmatmul.msk.bf16.gmra.mxu0 %vm106_vm0, %v1983_v40 }
  0x72   :  { %1767 = vmatmul.msk.bf16.gmra.mxu1 %vm106_vm0, %v1995_v41 }
  0x73   :  { %1847 = vmatmul.msk.bf16.gmra.mxu2 %vm106_vm0, %v2007_v42 }
  0x74   :  { %1927 = vmatmul.msk.bf16.gmra.mxu3 %vm106_vm0, %v2019_v43 }
  0x81   :  { %1688 = vmatmul.msk.bf16.gmra.mxu0 %vm106_vm0, %v1984_v44 }
  0x82   :  { %1768 = vmatmul.msk.bf16.gmra.mxu1 %vm106_vm0, %v1996_v45 }
  0x83   :  { %1848 = vmatmul.msk.bf16.gmra.mxu2 %vm106_vm0, %v2008_v46 }
  0x84   :  { %1928 = vmatmul.msk.bf16.gmra.mxu3 %vm106_vm0, %v2020_v47 }
  0x8e   :  { %v140_v48 = vpop.f32.mrf.mxu0 }
  0x8f   :  { %v358_v49 = vpop.f32.mrf.mxu1  ;;  %181 = vst.msk [vmem:[#allocation2] sm:$0xff] %vm180_vm1, %v140_v48  ;;  %v197_v54 = vsel %vm180_vm1, %v140_v48, 0.0 }
  0x90   :  { %399 = vst.msk [vmem:[#allocation2 + $0x80] sm:$0xff] %vm180_vm1, %v358_v49  ;;  %v415_v55 = vsel %vm180_vm1, %v358_v49, 0.0 }
  0x96   :  { %v576_v50 = vpop.f32.mrf.mxu2  ;;  %v142_v52 = vpop.f32.mrf.mxu0 }
  0x97   :  { %v794_v51 = vpop.f32.mrf.mxu3  ;;  %617 = vst.msk [vmem:[#allocation2 + $0x100] sm:$0xff] %vm180_vm1, %v576_v50  ;;  %v360_v53 = vpop.f32.mrf.mxu1  ;;  %v198_v56 = vsel %vm180_vm1, %v142_v52, 0.0  ;;  %v633_v62 = vsel %vm180_vm1, %v576_v50, 0.0 }
  0x98   :  { %835 = vst.msk [vmem:[#allocation2 + $0x180] sm:$0xff] %vm180_vm1, %v794_v51  ;;  %v416_v57 = vsel %vm180_vm1, %v360_v53, 0.0  ;;  %v199_v58 = vadd.f32 %v198_v56, %v197_v54  ;;  %v851_v63 = vsel %vm180_vm1, %v794_v51, 0.0 }
  0x99   :  { %182 = vst.msk [vmem:[#allocation2 + $0x8] sm:$0xff] %vm180_vm1, %v142_v52  ;;  %v417_v59 = vadd.f32 %v416_v57, %v415_v55 }
  0x9a   :  { %400 = vst.msk [vmem:[#allocation2 + $0x88] sm:$0xff] %vm180_vm1, %v360_v53 }
  0x9e   :  { %v578_v60 = vpop.f32.mrf.mxu2  ;;  %v145_v2 = vpop.f32.mrf.mxu0 }
  0x9f   :  { %v796_v61 = vpop.f32.mrf.mxu3  ;;  %618 = vst.msk [vmem:[#allocation2 + $0x108] sm:$0xff] %vm180_vm1, %v578_v60  ;;  %v634_v0 = vsel %vm180_vm1, %v578_v60, 0.0  ;;  %v363_v3 = vpop.f32.mrf.mxu1  ;;  %v200_v6 = vsel %vm180_vm1, %v145_v2, 0.0 }
  0xa0   :  { %v852_v1 = vsel %vm180_vm1, %v796_v61, 0.0  ;;  %v635_v4 = vadd.f32 %v634_v0, %v633_v62  ;;  %836 = vst.msk [vmem:[#allocation2 + $0x188] sm:$0xff] %vm180_vm1, %v796_v61  ;;  %v418_v7 = vsel %vm180_vm1, %v363_v3, 0.0  ;;  %v201_v8 = vadd.f32 %v200_v6, %v199_v58 }
  0xa1   :  { %v853_v5 = vadd.f32 %v852_v1, %v851_v63  ;;  %183 = vst.msk [vmem:[#allocation2 + $0x10] sm:$0xff] %vm180_vm1, %v145_v2  ;;  %v419_v9 = vadd.f32 %v418_v7, %v417_v59 }
  0xa2   :  { %401 = vst.msk [vmem:[#allocation2 + $0x90] sm:$0xff] %vm180_vm1, %v363_v3 }
  0xa6   :  { %v581_v10 = vpop.f32.mrf.mxu2  ;;  %v147_v14 = vpop.f32.mrf.mxu0 }
  0xa7   :  { %v799_v11 = vpop.f32.mrf.mxu3  ;;  %619 = vst.msk [vmem:[#allocation2 + $0x110] sm:$0xff] %vm180_vm1, %v581_v10  ;;  %v636_v12 = vsel %vm180_vm1, %v581_v10, 0.0  ;;  %v365_v15 = vpop.f32.mrf.mxu1  ;;  %v202_v18 = vsel %vm180_vm1, %v147_v14, 0.0 }
  0xa8   :  { %v854_v13 = vsel %vm180_vm1, %v799_v11, 0.0  ;;  %v637_v16 = vadd.f32 %v636_v12, %v635_v4  ;;  %837 = vst.msk [vmem:[#allocation2 + $0x190] sm:$0xff] %vm180_vm1, %v799_v11  ;;  %v420_v19 = vsel %vm180_vm1, %v365_v15, 0.0  ;;  %v203_v20 = vadd.f32 %v202_v18, %v201_v8 }
  0xa9   :  { %v855_v17 = vadd.f32 %v854_v13, %v853_v5  ;;  %184 = vst.msk [vmem:[#allocation2 + $0x18] sm:$0xff] %vm180_vm1, %v147_v14  ;;  %v421_v21 = vadd.f32 %v420_v19, %v419_v9 }
  0xaa   :  { %402 = vst.msk [vmem:[#allocation2 + $0x98] sm:$0xff] %vm180_vm1, %v365_v15 }
  0xae   :  { %v583_v22 = vpop.f32.mrf.mxu2  ;;  %v150_v26 = vpop.f32.mrf.mxu0 }
  0xaf   :  { %v801_v23 = vpop.f32.mrf.mxu3  ;;  %620 = vst.msk [vmem:[#allocation2 + $0x118] sm:$0xff] %vm180_vm1, %v583_v22  ;;  %v638_v24 = vsel %vm180_vm1, %v583_v22, 0.0  ;;  %v368_v27 = vpop.f32.mrf.mxu1  ;;  %v204_v30 = vsel %vm180_vm1, %v150_v26, 0.0 }
  0xb0   :  { %v856_v25 = vsel %vm180_vm1, %v801_v23, 0.0  ;;  %v639_v28 = vadd.f32 %v638_v24, %v637_v16  ;;  %838 = vst.msk [vmem:[#allocation2 + $0x198] sm:$0xff] %vm180_vm1, %v801_v23  ;;  %v422_v31 = vsel %vm180_vm1, %v368_v27, 0.0  ;;  %v205_v32 = vadd.f32 %v204_v30, %v203_v20 }
  0xb1   :  { %v857_v29 = vadd.f32 %v856_v25, %v855_v17  ;;  %185 = vst.msk [vmem:[#allocation2 + $0x20] sm:$0xff] %vm180_vm1, %v150_v26  ;;  %v423_v33 = vadd.f32 %v422_v31, %v421_v21 }
  0xb2   :  { %403 = vst.msk [vmem:[#allocation2 + $0xa0] sm:$0xff] %vm180_vm1, %v368_v27 }
  0xb6   :  { %v586_v34 = vpop.f32.mrf.mxu2  ;;  %v152_v38 = vpop.f32.mrf.mxu0 }
  0xb7   :  { %v804_v35 = vpop.f32.mrf.mxu3  ;;  %621 = vst.msk [vmem:[#allocation2 + $0x120] sm:$0xff] %vm180_vm1, %v586_v34  ;;  %v640_v36 = vsel %vm180_vm1, %v586_v34, 0.0  ;;  %v370_v39 = vpop.f32.mrf.mxu1  ;;  %v206_v42 = vsel %vm180_vm1, %v152_v38, 0.0 }
  0xb8   :  { %v858_v37 = vsel %vm180_vm1, %v804_v35, 0.0  ;;  %v641_v40 = vadd.f32 %v640_v36, %v639_v28  ;;  %839 = vst.msk [vmem:[#allocation2 + $0x1a0] sm:$0xff] %vm180_vm1, %v804_v35  ;;  %v424_v43 = vsel %vm180_vm1, %v370_v39, 0.0  ;;  %v207_v44 = vadd.f32 %v206_v42, %v205_v32 }
  0xb9   :  { %v859_v41 = vadd.f32 %v858_v37, %v857_v29  ;;  %186 = vst.msk [vmem:[#allocation2 + $0x28] sm:$0xff] %vm180_vm1, %v152_v38  ;;  %v425_v45 = vadd.f32 %v424_v43, %v423_v33 }
  0xba   :  { %404 = vst.msk [vmem:[#allocation2 + $0xa8] sm:$0xff] %vm180_vm1, %v370_v39 }
  0xbe   :  { %v588_v46 = vpop.f32.mrf.mxu2  ;;  %v155_v50 = vpop.f32.mrf.mxu0 }
  0xbf   :  { %v806_v47 = vpop.f32.mrf.mxu3  ;;  %622 = vst.msk [vmem:[#allocation2 + $0x128] sm:$0xff] %vm180_vm1, %v588_v46  ;;  %v642_v48 = vsel %vm180_vm1, %v588_v46, 0.0  ;;  %v373_v51 = vpop.f32.mrf.mxu1  ;;  %v208_v54 = vsel %vm180_vm1, %v155_v50, 0.0 }
  0xc0   :  { %v860_v49 = vsel %vm180_vm1, %v806_v47, 0.0  ;;  %v643_v52 = vadd.f32 %v642_v48, %v641_v40  ;;  %840 = vst.msk [vmem:[#allocation2 + $0x1a8] sm:$0xff] %vm180_vm1, %v806_v47  ;;  %v426_v55 = vsel %vm180_vm1, %v373_v51, 0.0  ;;  %v209_v56 = vadd.f32 %v208_v54, %v207_v44 }
  0xc1   :  { %v861_v53 = vadd.f32 %v860_v49, %v859_v41  ;;  %187 = vst.msk [vmem:[#allocation2 + $0x30] sm:$0xff] %vm180_vm1, %v155_v50  ;;  %v427_v57 = vadd.f32 %v426_v55, %v425_v45 }
  0xc2   :  { %405 = vst.msk [vmem:[#allocation2 + $0xb0] sm:$0xff] %vm180_vm1, %v373_v51 }
  0xc6   :  { %v591_v58 = vpop.f32.mrf.mxu2  ;;  %v157_v62 = vpop.f32.mrf.mxu0 }
  0xc7   :  { %v809_v59 = vpop.f32.mrf.mxu3  ;;  %623 = vst.msk [vmem:[#allocation2 + $0x130] sm:$0xff] %vm180_vm1, %v591_v58  ;;  %v644_v60 = vsel %vm180_vm1, %v591_v58, 0.0  ;;  %v375_v63 = vpop.f32.mrf.mxu1  ;;  %v210_v2 = vsel %vm180_vm1, %v157_v62, 0.0 }
  0xc8   :  { %v862_v61 = vsel %vm180_vm1, %v809_v59, 0.0  ;;  %v645_v0 = vadd.f32 %v644_v60, %v643_v52  ;;  %841 = vst.msk [vmem:[#allocation2 + $0x1b0] sm:$0xff] %vm180_vm1, %v809_v59  ;;  %v428_v3 = vsel %vm180_vm1, %v375_v63, 0.0  ;;  %v211_v4 = vadd.f32 %v210_v2, %v209_v56 }
  0xc9   :  { %v863_v1 = vadd.f32 %v862_v61, %v861_v53  ;;  %188 = vst.msk [vmem:[#allocation2 + $0x38] sm:$0xff] %vm180_vm1, %v157_v62  ;;  %v429_v5 = vadd.f32 %v428_v3, %v427_v57 }
  0xca   :  { %406 = vst.msk [vmem:[#allocation2 + $0xb8] sm:$0xff] %vm180_vm1, %v375_v63 }
  0xce   :  { %v593_v6 = vpop.f32.mrf.mxu2  ;;  %v160_v10 = vpop.f32.mrf.mxu0 }
  0xcf   :  { %v811_v7 = vpop.f32.mrf.mxu3  ;;  %624 = vst.msk [vmem:[#allocation2 + $0x138] sm:$0xff] %vm180_vm1, %v593_v6  ;;  %v646_v8 = vsel %vm180_vm1, %v593_v6, 0.0  ;;  %v378_v11 = vpop.f32.mrf.mxu1  ;;  %v212_v14 = vsel %vm180_vm1, %v160_v10, 0.0 }
  0xd0   :  { %v864_v9 = vsel %vm180_vm1, %v811_v7, 0.0  ;;  %v647_v12 = vadd.f32 %v646_v8, %v645_v0  ;;  %842 = vst.msk [vmem:[#allocation2 + $0x1b8] sm:$0xff] %vm180_vm1, %v811_v7  ;;  %v430_v15 = vsel %vm180_vm1, %v378_v11, 0.0  ;;  %v213_v16 = vadd.f32 %v212_v14, %v211_v4 }
  0xd1   :  { %v865_v13 = vadd.f32 %v864_v9, %v863_v1  ;;  %189 = vst.msk [vmem:[#allocation2 + $0x40] sm:$0xff] %vm180_vm1, %v160_v10  ;;  %v431_v17 = vadd.f32 %v430_v15, %v429_v5 }
  0xd2   :  { %407 = vst.msk [vmem:[#allocation2 + $0xc0] sm:$0xff] %vm180_vm1, %v378_v11 }
  0xd6   :  { %v596_v18 = vpop.f32.mrf.mxu2  ;;  %v162_v22 = vpop.f32.mrf.mxu0 }
  0xd7   :  { %v814_v19 = vpop.f32.mrf.mxu3  ;;  %625 = vst.msk [vmem:[#allocation2 + $0x140] sm:$0xff] %vm180_vm1, %v596_v18  ;;  %v648_v20 = vsel %vm180_vm1, %v596_v18, 0.0  ;;  %v380_v23 = vpop.f32.mrf.mxu1  ;;  %v214_v26 = vsel %vm180_vm1, %v162_v22, 0.0 }
  0xd8   :  { %v866_v21 = vsel %vm180_vm1, %v814_v19, 0.0  ;;  %v649_v24 = vadd.f32 %v648_v20, %v647_v12  ;;  %843 = vst.msk [vmem:[#allocation2 + $0x1c0] sm:$0xff] %vm180_vm1, %v814_v19  ;;  %v432_v27 = vsel %vm180_vm1, %v380_v23, 0.0  ;;  %v215_v28 = vadd.f32 %v214_v26, %v213_v16 }
  0xd9   :  { %v867_v25 = vadd.f32 %v866_v21, %v865_v13  ;;  %190 = vst.msk [vmem:[#allocation2 + $0x48] sm:$0xff] %vm180_vm1, %v162_v22  ;;  %v433_v29 = vadd.f32 %v432_v27, %v431_v17 }
  0xda   :  { %408 = vst.msk [vmem:[#allocation2 + $0xc8] sm:$0xff] %vm180_vm1, %v380_v23 }
  0xde   :  { %v598_v30 = vpop.f32.mrf.mxu2  ;;  %v165_v34 = vpop.f32.mrf.mxu0 }
  0xdf   :  { %v816_v31 = vpop.f32.mrf.mxu3  ;;  %626 = vst.msk [vmem:[#allocation2 + $0x148] sm:$0xff] %vm180_vm1, %v598_v30  ;;  %v650_v32 = vsel %vm180_vm1, %v598_v30, 0.0  ;;  %v383_v35 = vpop.f32.mrf.mxu1  ;;  %v216_v38 = vsel %vm180_vm1, %v165_v34, 0.0 }
  0xe0   :  { %v868_v33 = vsel %vm180_vm1, %v816_v31, 0.0  ;;  %v651_v36 = vadd.f32 %v650_v32, %v649_v24  ;;  %844 = vst.msk [vmem:[#allocation2 + $0x1c8] sm:$0xff] %vm180_vm1, %v816_v31  ;;  %v434_v39 = vsel %vm180_vm1, %v383_v35, 0.0  ;;  %v217_v40 = vadd.f32 %v216_v38, %v215_v28 }
  0xe1   :  { %v869_v37 = vadd.f32 %v868_v33, %v867_v25  ;;  %191 = vst.msk [vmem:[#allocation2 + $0x50] sm:$0xff] %vm180_vm1, %v165_v34  ;;  %v435_v41 = vadd.f32 %v434_v39, %v433_v29 }
  0xe2   :  { %409 = vst.msk [vmem:[#allocation2 + $0xd0] sm:$0xff] %vm180_vm1, %v383_v35 }
  0xe6   :  { %v601_v42 = vpop.f32.mrf.mxu2  ;;  %v167_v46 = vpop.f32.mrf.mxu0 }
  0xe7   :  { %v819_v43 = vpop.f32.mrf.mxu3  ;;  %627 = vst.msk [vmem:[#allocation2 + $0x150] sm:$0xff] %vm180_vm1, %v601_v42  ;;  %v652_v44 = vsel %vm180_vm1, %v601_v42, 0.0  ;;  %v385_v47 = vpop.f32.mrf.mxu1  ;;  %v218_v50 = vsel %vm180_vm1, %v167_v46, 0.0 }
  0xe8   :  { %v870_v45 = vsel %vm180_vm1, %v819_v43, 0.0  ;;  %v653_v48 = vadd.f32 %v652_v44, %v651_v36  ;;  %845 = vst.msk [vmem:[#allocation2 + $0x1d0] sm:$0xff] %vm180_vm1, %v819_v43  ;;  %v436_v51 = vsel %vm180_vm1, %v385_v47, 0.0  ;;  %v219_v52 = vadd.f32 %v218_v50, %v217_v40 }
  0xe9   :  { %v871_v49 = vadd.f32 %v870_v45, %v869_v37  ;;  %192 = vst.msk [vmem:[#allocation2 + $0x58] sm:$0xff] %vm180_vm1, %v167_v46  ;;  %v437_v53 = vadd.f32 %v436_v51, %v435_v41 }
  0xea   :  { %410 = vst.msk [vmem:[#allocation2 + $0xd8] sm:$0xff] %vm180_vm1, %v385_v47 }
  0xee   :  { %v603_v54 = vpop.f32.mrf.mxu2  ;;  %v170_v58 = vpop.f32.mrf.mxu0 }
  0xef   :  { %v821_v55 = vpop.f32.mrf.mxu3  ;;  %628 = vst.msk [vmem:[#allocation2 + $0x158] sm:$0xff] %vm180_vm1, %v603_v54  ;;  %v654_v56 = vsel %vm180_vm1, %v603_v54, 0.0  ;;  %v388_v59 = vpop.f32.mrf.mxu1  ;;  %v220_v62 = vsel %vm180_vm1, %v170_v58, 0.0 }
  0xf0   :  { %v872_v57 = vsel %vm180_vm1, %v821_v55, 0.0  ;;  %v655_v60 = vadd.f32 %v654_v56, %v653_v48  ;;  %846 = vst.msk [vmem:[#allocation2 + $0x1d8] sm:$0xff] %vm180_vm1, %v821_v55  ;;  %v438_v63 = vsel %vm180_vm1, %v388_v59, 0.0  ;;  %v221_v0 = vadd.f32 %v220_v62, %v219_v52 }
  0xf1   :  { %v873_v61 = vadd.f32 %v872_v57, %v871_v49  ;;  %193 = vst.msk [vmem:[#allocation2 + $0x60] sm:$0xff] %vm180_vm1, %v170_v58  ;;  %v439_v1 = vadd.f32 %v438_v63, %v437_v53 }
  0xf2   :  { %411 = vst.msk [vmem:[#allocation2 + $0xe0] sm:$0xff] %vm180_vm1, %v388_v59 }
  0xf6   :  { %v606_v2 = vpop.f32.mrf.mxu2  ;;  %v172_v6 = vpop.f32.mrf.mxu0 }
  0xf7   :  { %v824_v3 = vpop.f32.mrf.mxu3  ;;  %629 = vst.msk [vmem:[#allocation2 + $0x160] sm:$0xff] %vm180_vm1, %v606_v2  ;;  %v656_v4 = vsel %vm180_vm1, %v606_v2, 0.0  ;;  %v390_v7 = vpop.f32.mrf.mxu1  ;;  %v222_v10 = vsel %vm180_vm1, %v172_v6, 0.0 }
  0xf8   :  { %v874_v5 = vsel %vm180_vm1, %v824_v3, 0.0  ;;  %v657_v8 = vadd.f32 %v656_v4, %v655_v60  ;;  %847 = vst.msk [vmem:[#allocation2 + $0x1e0] sm:$0xff] %vm180_vm1, %v824_v3  ;;  %v440_v11 = vsel %vm180_vm1, %v390_v7, 0.0  ;;  %v223_v12 = vadd.f32 %v222_v10, %v221_v0 }
  0xf9   :  { %v875_v9 = vadd.f32 %v874_v5, %v873_v61  ;;  %194 = vst.msk [vmem:[#allocation2 + $0x68] sm:$0xff] %vm180_vm1, %v172_v6  ;;  %v441_v13 = vadd.f32 %v440_v11, %v439_v1 }
  0xfa   :  { %412 = vst.msk [vmem:[#allocation2 + $0xe8] sm:$0xff] %vm180_vm1, %v390_v7 }
  0xfe   :  { %v608_v14 = vpop.f32.mrf.mxu2  ;;  %v175_v18 = vpop.f32.mrf.mxu0 }
  0xff   :  { %v826_v15 = vpop.f32.mrf.mxu3  ;;  %630 = vst.msk [vmem:[#allocation2 + $0x168] sm:$0xff] %vm180_vm1, %v608_v14  ;;  %v658_v16 = vsel %vm180_vm1, %v608_v14, 0.0  ;;  %v393_v19 = vpop.f32.mrf.mxu1  ;;  %v224_v22 = vsel %vm180_vm1, %v175_v18, 0.0  ;;  %v2370_v14 = vld [vmem:[#allocation2 + $0x18] sm:$0xff] }
 0x100   :  { %v876_v17 = vsel %vm180_vm1, %v826_v15, 0.0  ;;  %v659_v20 = vadd.f32 %v658_v16, %v657_v8  ;;  %848 = vst.msk [vmem:[#allocation2 + $0x1e8] sm:$0xff] %vm180_vm1, %v826_v15  ;;  %v225_v23 = vadd.f32 %v224_v22, %v223_v12  ;;  %v442_v24 = vsel %vm180_vm1, %v393_v19, 0.0  ;;  %v2358_v8 = vld [vmem:[#allocation2] sm:$0xff]  ;;  %v2366_v12 = vld [vmem:[#allocation2 + $0x10] sm:$0xff] }
 0x101   :  { %v877_v21 = vadd.f32 %v876_v17, %v875_v9  ;;  %195 = vst.msk [vmem:[#allocation2 + $0x70] sm:$0xff] %vm180_vm1, %v175_v18  ;;  %v443_v27 = vadd.f32 %v442_v24, %v441_v13  ;;  %v2360_v9 = vld [vmem:[#allocation2 + $0x8] sm:$0xff] }
 0x102   :  { %413 = vst.msk [vmem:[#allocation2 + $0xf0] sm:$0xff] %vm180_vm1, %v393_v19  ;;  %v2374_v19 = vld [vmem:[#allocation2 + $0x20] sm:$0xff] }
 0x106   :  { %v611_v25 = vpop.f32.mrf.mxu2  ;;  %v177_v28 = vpop.f32.mrf.mxu0 }
 0x107   :  { %v829_v26 = vpop.f32.mrf.mxu3  ;;  %631 = vst.msk [vmem:[#allocation2 + $0x170] sm:$0xff] %vm180_vm1, %v611_v25  ;;  %v395_v29 = vpop.f32.mrf.mxu1  ;;  %v226_v30 = vsel %vm180_vm1, %v177_v28, 0.0  ;;  %v660_v34 = vsel %vm180_vm1, %v611_v25, 0.0 }
 0x108   :  { %849 = vst.msk [vmem:[#allocation2 + $0x1f0] sm:$0xff] %vm180_vm1, %v829_v26  ;;  %v444_v31 = vsel %vm180_vm1, %v395_v29, 0.0  ;;  %v227_v32 = vadd.f32 %v226_v30, %v225_v23  ;;  %v878_v35 = vsel %vm180_vm1, %v829_v26, 0.0  ;;  %v661_v40 = vadd.f32 %v660_v34, %v659_v20  ;;  %v2381_v26 = vld [vmem:[#allocation2 + $0x28] sm:$0xff] }
 0x109   :  { %196 = vst.msk [vmem:[#allocation2 + $0x78] sm:$0xff] %vm180_vm1, %v177_v28  ;;  %v445_v33 = vadd.f32 %v444_v31, %v443_v27  ;;  %v879_v41 = vadd.f32 %v878_v35, %v877_v21  ;;  %v2383_v28 = vld [vmem:[#allocation2 + $0x80] sm:$0xff] }
 0x10a   :  { %414 = vst.msk [vmem:[#allocation2 + $0xf8] sm:$0xff] %vm180_vm1, %v395_v29  ;;  %v228_v36 = vrot.slane %v227_v32, 4 }
 0x10b   :  { %v446_v37 = vrot.slane %v445_v33, 4 }
 0x10c   :  { %v229_v38 = vadd.f32 %v228_v36, %v227_v32  ;;  %v2388_v32 = vld [vmem:[#allocation2 + $0x88] sm:$0xff]  ;;  %v2394_v36 = vld [vmem:[#allocation2 + $0x90] sm:$0xff] }
 0x10d   :  { %v447_v39 = vadd.f32 %v446_v37, %v445_v33  ;;  %v2396_v37 = vld [vmem:[#allocation2 + $0x30] sm:$0xff] }
 0x10e   :  { %v613_v42 = vpop.f32.mrf.mxu2  ;;  %v230_v44 = vrot.slane %v229_v38, 2 }
 0x10f   :  { %v831_v43 = vpop.f32.mrf.mxu3  ;;  %v448_v45 = vrot.slane %v447_v39, 2  ;;  %632 = vst.msk [vmem:[#allocation2 + $0x178] sm:$0xff] %vm180_vm1, %v613_v42  ;;  %v662_v46 = vsel %vm180_vm1, %v613_v42, 0.0 }
 0x110   :  { %v880_v47 = vsel %vm180_vm1, %v831_v43, 0.0  ;;  %v663_v48 = vadd.f32 %v662_v46, %v661_v40  ;;  %850 = vst.msk [vmem:[#allocation2 + $0x1f8] sm:$0xff] %vm180_vm1, %v831_v43  ;;  %v231_v50 = vadd.f32 %v230_v44, %v229_v38  ;;  %v2398_v38 = vld [vmem:[#allocation2 + $0x98] sm:$0xff]  ;;  %v2407_v44 = vld [vmem:[#allocation2 + $0x40] sm:$0xff] }
 0x111   :  { %v881_v49 = vadd.f32 %v880_v47, %v879_v41  ;;  %v449_v51 = vadd.f32 %v448_v45, %v447_v39  ;;  %v2405_v43 = vld [vmem:[#allocation2 + $0x38] sm:$0xff]  ;;  %v2409_v45 = vld [vmem:[#allocation2 + $0x48] sm:$0xff] }
 0x112   :  { %v664_v52 = vrot.slane %v663_v48, 4  ;;  %v232_v54 = vrot.slane %v231_v50, 1 }
 0x113   :  { %v882_v53 = vrot.slane %v881_v49, 4  ;;  %v450_v55 = vrot.slane %v449_v51, 1 }
 0x114   :  { %v665_v56 = vadd.f32 %v664_v52, %v663_v48  ;;  %v233_v58 = vadd.f32 %v232_v54, %v231_v50  ;;  %v2411_v48 = vld [vmem:[#allocation2 + $0x50] sm:$0xff]  ;;  %v2415_v50 = vld [vmem:[#allocation2 + $0x60] sm:$0xff] }
 0x115   :  { %v883_v57 = vadd.f32 %v882_v53, %v881_v49  ;;  %v451_v59 = vadd.f32 %v450_v55, %v449_v51  ;;  %v2413_v49 = vld [vmem:[#allocation2 + $0x58] sm:$0xff]  ;;  %v2423_v55 = vld [vmem:[#allocation2 + $0xa0] sm:$0xff] }
 0x116   :  { %v666_v60 = vrot.slane %v665_v56, 2 }
 0x117   :  { %v884_v61 = vrot.slane %v883_v57, 2  ;;  %v452_v62 = vadd.f32 %v451_v59, %v233_v58 }
 0x118   :  { %v667_v63 = vadd.f32 %v666_v60, %v665_v56  ;;  %v2433_v60 = vld [vmem:[#allocation2 + $0x68] sm:$0xff] }
 0x119   :  { %v885_v0 = vadd.f32 %v884_v61, %v883_v57  ;;  %v2435_v61 = vld [vmem:[#allocation2 + $0x70] sm:$0xff] }
 0x11a   :  { %v668_v1 = vrot.slane %v667_v63, 1 }
 0x11b   :  { %v886_v2 = vrot.slane %v885_v0, 1 }
 0x11c   :  { %v669_v3 = vadd.f32 %v668_v1, %v667_v63 }
 0x11d   :  { %v887_v5 = vadd.f32 %v886_v2, %v885_v0  ;;  %v2440_v2 = vld [vmem:[#allocation2 + $0xa8] sm:$0xff] }
 0x11e   :  { %v670_v4 = vadd.f32 %v669_v3, %v452_v62  ;;  %v2442_v3 = vld [vmem:[#allocation2 + $0x78] sm:$0xff] }
 0x120   :  { %v888_v6 = vadd.f32 %v887_v5, %v670_v4 }
 0x122   :  { %v2356_v7 = vmul.f32 0.001953125, %v888_v6 }
 0x124   :  { %v906_v10 = vsub.f32 %v2358_v8, %v2356_v7  ;;  %v907_v11 = vsub.f32 %v2360_v9, %v2356_v7  ;;  %v908_v13 = vsub.f32 %v2366_v12, %v2356_v7  ;;  %v909_v15 = vsub.f32 %v2370_v14, %v2356_v7 }
 0x125   :  { %v910_v20 = vsub.f32 %v2374_v19, %v2356_v7  ;;  %v911_v29 = vsub.f32 %v2381_v26, %v2356_v7  ;;  %v992_v34 = vsub.f32 %v2383_v28, %v2356_v7  ;;  %v993_v35 = vsub.f32 %v2388_v32, %v2356_v7 }
 0x126   :  { %v922_v16 = vmul.f32 %v906_v10, %v906_v10  ;;  %v923_v17 = vmul.f32 %v907_v11, %v907_v11  ;;  %v924_v18 = vmul.f32 %v908_v13, %v908_v13  ;;  %v925_v21 = vmul.f32 %v909_v15, %v909_v15 }
 0x127   :  { %v926_v30 = vmul.f32 %v910_v20, %v910_v20  ;;  %v912_v39 = vsub.f32 %v2396_v37, %v2356_v7  ;;  %v927_v40 = vmul.f32 %v911_v29, %v911_v29  ;;  %v994_v42 = vsub.f32 %v2394_v36, %v2356_v7  ;;  %v2460_v29 = vld [vmem:[#allocation2 + $0xb8] sm:$0xff] }
 0x128   :  { %v938_v22 = vsel %vm180_vm1, %v922_v16, 0.0  ;;  %v939_v23 = vsel %vm180_vm1, %v923_v17, 0.0  ;;  %v941_v25 = vsel %vm180_vm1, %v924_v18, 0.0  ;;  %v943_v31 = vsel %vm180_vm1, %v925_v21, 0.0  ;;  %v2454_v17 = vld [vmem:[#allocation2 + $0xb0] sm:$0xff] }
 0x129   :  { %v940_v24 = vadd.f32 %v939_v23, %v938_v22  ;;  %v945_v41 = vsel %vm180_vm1, %v926_v30, 0.0  ;;  %v1008_v47 = vmul.f32 %v992_v34, %v992_v34  ;;  %v913_v51 = vsub.f32 %v2405_v43, %v2356_v7 }
 0x12a   :  { %v914_v52 = vsub.f32 %v2407_v44, %v2356_v7  ;;  %v995_v53 = vsub.f32 %v2398_v38, %v2356_v7  ;;  %v1009_v54 = vmul.f32 %v993_v35, %v993_v35  ;;  %v915_v56 = vsub.f32 %v2409_v45, %v2356_v7 }
 0x12b   :  { %v942_v27 = vadd.f32 %v941_v25, %v940_v24  ;;  %v916_v57 = vsub.f32 %v2411_v48, %v2356_v7  ;;  %v917_v58 = vsub.f32 %v2413_v49, %v2356_v7  ;;  %v918_v59 = vsub.f32 %v2415_v50, %v2356_v7 }
 0x12c   :  { %v928_v62 = vmul.f32 %v912_v39, %v912_v39  ;;  %v947_v63 = vsel %vm180_vm1, %v927_v40, 0.0  ;;  %v996_v0 = vsub.f32 %v2423_v55, %v2356_v7  ;;  %v1010_v1 = vmul.f32 %v994_v42, %v994_v42  ;;  %v2465_v42 = vld [vmem:[#allocation2 + $0xc0] sm:$0xff] }
 0x12d   :  { %v944_v33 = vadd.f32 %v943_v31, %v942_v27  ;;  %v919_v4 = vsub.f32 %v2433_v60, %v2356_v7  ;;  %v920_v5 = vsub.f32 %v2435_v61, %v2356_v7  ;;  %v1024_v10 = vsel %vm180_vm1, %v1008_v47, 0.0 }
 0x12e   :  { %v921_v11 = vsub.f32 %v2442_v3, %v2356_v7  ;;  %v997_v13 = vsub.f32 %v2440_v2, %v2356_v7  ;;  %v1011_v15 = vmul.f32 %v995_v53, %v995_v53  ;;  %v1025_v16 = vsel %vm180_vm1, %v1009_v54, 0.0  ;;  %v2469_v53 = vld [vmem:[#allocation2 + $0x100] sm:$0xff] }
 0x12f   :  { %v946_v46 = vadd.f32 %v945_v41, %v944_v33  ;;  %v929_v18 = vmul.f32 %v913_v51, %v913_v51  ;;  %v930_v20 = vmul.f32 %v914_v52, %v914_v52  ;;  %v931_v21 = vmul.f32 %v915_v56, %v915_v56  ;;  %3195 = vst [vmem:[#allocation3_spill] sm:$0xff] %v2469_v53 }
 0x130   :  { %v1026_v22 = vadd.f32 %v1025_v16, %v1024_v10  ;;  %v949_v23 = vsel %vm180_vm1, %v928_v62, 0.0  ;;  %v998_v24 = vsub.f32 %v2454_v17, %v2356_v7  ;;  %v1012_v25 = vmul.f32 %v996_v0, %v996_v0  ;;  %v2477_v62 = vld [vmem:[#allocation2 + $0xc8] sm:$0xff] }
 0x131   :  { %v948_v6 = vadd.f32 %v947_v63, %v946_v46  ;;  %v1027_v27 = vsel %vm180_vm1, %v1010_v1, 0.0  ;;  %v932_v30 = vmul.f32 %v916_v57, %v916_v57  ;;  %v933_v31 = vmul.f32 %v917_v58, %v917_v58 }
 0x132   :  { %v1028_v34 = vadd.f32 %v1027_v27, %v1026_v22  ;;  %v934_v35 = vmul.f32 %v918_v59, %v918_v59  ;;  %v999_v39 = vsub.f32 %v2460_v29, %v2356_v7  ;;  %v1013_v40 = vmul.f32 %v997_v13, %v997_v13  ;;  %v2475_v59 = vld [vmem:[#allocation2 + $0x108] sm:$0xff]  ;;  %v2487_v13 = vld [vmem:[#allocation2 + $0x110] sm:$0xff] }
 0x133   :  { %v950_v33 = vadd.f32 %v949_v23, %v948_v6  ;;  %v1029_v41 = vsel %vm180_vm1, %v1011_v15, 0.0  ;;  %v935_v46 = vmul.f32 %v919_v4, %v919_v4  ;;  %v936_v47 = vmul.f32 %v920_v5, %v920_v5  ;;  %3196 = vst [vmem:[#allocation4_spill] sm:$0xff] %v2475_v59  ;;  %v2494_v22 = vld [vmem:[#allocation2 + $0xd0] sm:$0xff] }
 0x134   :  { %v2467_v51 = vmul.f32 %v921_v11, %v921_v11  ;;  %v1030_v52 = vadd.f32 %v1029_v41, %v1028_v34  ;;  %v951_v54 = vsel %vm180_vm1, %v929_v18, 0.0  ;;  %v1000_v56 = vsub.f32 %v2465_v42, %v2356_v7  ;;  %3197 = vst [vmem:[#allocation5_spill] sm:$0xff] %v2487_v13 }
 0x135   :  { %v1014_v57 = vmul.f32 %v998_v24, %v998_v24  ;;  %v1031_v58 = vsel %vm180_vm1, %v1012_v25, 0.0  ;;  %v952_v63 = vadd.f32 %v951_v54, %v950_v33  ;;  %v953_v0 = vsel %vm180_vm1, %v930_v20, 0.0  ;;  %v2502_v33 = vld [vmem:[#allocation2 + $0x118] sm:$0xff]  ;;  %v2511_v54 = vld [vmem:[#allocation2 + $0x120] sm:$0xff] }
 0x136   :  { %v1032_v1 = vadd.f32 %v1031_v58, %v1030_v52  ;;  %v1078_v4 = vsub.f32 %v2469_v53, %v2356_v7  ;;  %v1001_v5 = vsub.f32 %v2477_v62, %v2356_v7  ;;  %v1015_v6 = vmul.f32 %v999_v39, %v999_v39  ;;  %3198 = vst [vmem:[#allocation6_spill] sm:$0xff] %v2502_v33  ;;  %v2506_v39 = vld [vmem:[#allocation2 + $0xd8] sm:$0xff] }
 0x137   :  { %v1033_v10 = vsel %vm180_vm1, %v1013_v40, 0.0  ;;  %v1079_v11 = vsub.f32 %v2475_v59, %v2356_v7  ;;  %v955_v15 = vsel %vm180_vm1, %v931_v21, 0.0  ;;  %v957_v16 = vsel %vm180_vm1, %v932_v30, 0.0  ;;  %3199 = vst [vmem:[#allocation7_spill] sm:$0xff] %v2511_v54 }
 0x138   :  { %v2492_v18 = vsel %vm180_vm1, %v933_v31, 0.0  ;;  %v1034_v20 = vadd.f32 %v1033_v10, %v1032_v1  ;;  %v2497_v23 = vsel %vm180_vm1, %v934_v35, 0.0  ;;  %v1016_v24 = vmul.f32 %v1000_v56, %v1000_v56  ;;  %v2513_v56 = vld [vmem:[#allocation2 + $0xe0] sm:$0xff]  ;;  %v2528_v10 = vld [vmem:[#allocation2 + $0x128] sm:$0xff] }
 0x139   :  { %v1035_v25 = vsel %vm180_vm1, %v1014_v57, 0.0  ;;  %v1080_v27 = vsub.f32 %v2487_v13, %v2356_v7  ;;  %v954_v21 = vadd.f32 %v953_v0, %v952_v63  ;;  %v1002_v30 = vsub.f32 %v2494_v22, %v2356_v7  ;;  %3200 = vst [vmem:[#allocation8_spill] sm:$0xff] %v2513_v56  ;;  %v2541_v13 = vld [vmem:[#allocation2 + $0xf8] sm:$0xff] }
 0x13a   :  { %v1036_v31 = vadd.f32 %v1035_v25, %v1034_v20  ;;  %v1094_v34 = vmul.f32 %v1078_v4, %v1078_v4  ;;  %v1017_v40 = vmul.f32 %v1001_v5, %v1001_v5  ;;  %v1037_v35 = vsel %vm180_vm1, %v1015_v6, 0.0  ;;  %3201 = vst [vmem:[#allocation9_spill] sm:$0xff] %v2528_v10  ;;  %v2531_v25 = vld [vmem:[#allocation2 + $0xe8] sm:$0xff] }
 0x13b   :  { %v1081_v41 = vsub.f32 %v2502_v33, %v2356_v7  ;;  %v1095_v52 = vmul.f32 %v1079_v11, %v1079_v11  ;;  %v2516_v57 = vsel %vm180_vm1, %v935_v46, 0.0  ;;  %v2519_v58 = vsel %vm180_vm1, %v936_v47, 0.0  ;;  %3202 = vst [vmem:[#allocation10_spill] sm:$0xff] %v2531_v25  ;;  %v2533_v33 = vld [vmem:[#allocation2 + $0xf0] sm:$0xff] }
 0x13c   :  { %v1003_v63 = vsub.f32 %v2506_v39, %v2356_v7  ;;  %v1038_v0 = vadd.f32 %v1037_v35, %v1036_v31  ;;  %v1004_v1 = vsub.f32 %v2513_v56, %v2356_v7  ;;  %v1039_v4 = vsel %vm180_vm1, %v1016_v24, 0.0  ;;  %3204 = vst [vmem:[#allocation12_spill] sm:$0xff] %v2541_v13 }
 0x13d   :  { %v1082_v5 = vsub.f32 %v2511_v54, %v2356_v7  ;;  %v1096_v6 = vmul.f32 %v1080_v27, %v1080_v27  ;;  %v956_v46 = vadd.f32 %v955_v15, %v954_v21  ;;  %v1018_v11 = vmul.f32 %v1002_v30, %v1002_v30  ;;  %v2539_v27 = vld [vmem:[#allocation2 + $0x130] sm:$0xff] }
 0x13e   :  { %v1040_v20 = vadd.f32 %v1039_v4, %v1038_v0  ;;  %v1110_v47 = vsel %vm180_vm1, %v1094_v34, 0.0  ;;  %v1041_v31 = vsel %vm180_vm1, %v1017_v40, 0.0  ;;  %v1083_v24 = vsub.f32 %v2528_v10, %v2356_v7  ;;  %3203 = vst [vmem:[#allocation11_spill] sm:$0xff] %v2539_v27  ;;  %v2552_v4 = vld [vmem:[#allocation2 + $0x138] sm:$0xff] }
 0x13f   :  { %v1097_v35 = vmul.f32 %v1081_v41, %v1081_v41  ;;  %v1111_v54 = vsel %vm180_vm1, %v1095_v52, 0.0  ;;  %v1005_v15 = vsub.f32 %v2531_v25, %v2356_v7  ;;  %v1006_v21 = vsub.f32 %v2533_v33, %v2356_v7  ;;  %3205 = vst [vmem:[#allocation13_spill] sm:$0xff] %v2552_v4 }
 0x140   :  { %v1042_v30 = vadd.f32 %v1041_v31, %v1040_v20  ;;  %v1112_v34 = vadd.f32 %v1111_v54, %v1110_v47  ;;  %v1007_v40 = vsub.f32 %v2541_v13, %v2356_v7  ;;  %v1084_v41 = vsub.f32 %v2539_v27, %v2356_v7  ;;  %v2558_v31 = vld [vmem:[#allocation2 + $0x140] sm:$0xff] }
 0x141   :  { %v1098_v0 = vmul.f32 %v1082_v5, %v1082_v5  ;;  %v1113_v52 = vsel %vm180_vm1, %v1096_v6, 0.0  ;;  %v958_v10 = vadd.f32 %v957_v16, %v956_v46  ;;  %v1019_v59 = vmul.f32 %v1003_v63, %v1003_v63  ;;  %3206 = vst [vmem:[#allocation14_spill] sm:$0xff] %v2558_v31 }
 0x142   :  { %v1020_v53 = vmul.f32 %v1004_v1, %v1004_v1  ;;  %v1114_v25 = vadd.f32 %v1113_v52, %v1112_v34  ;;  %v1043_v56 = vsel %vm180_vm1, %v1018_v11, 0.0  ;;  %v1085_v54 = vsub.f32 %v2552_v4, %v2356_v7  ;;  %v2567_v34 = vld [vmem:[#allocation2 + $0x148] sm:$0xff]  ;;  %v2573_v4 = vld [vmem:[#allocation2 + $0x180] sm:$0xff] }
 0x143   :  { %v1099_v20 = vmul.f32 %v1083_v24, %v1083_v24  ;;  %v1115_v47 = vsel %vm180_vm1, %v1097_v35, 0.0  ;;  %v2562_v5 = vsel %vm180_vm1, %v2467_v51, 0.0  ;;  %v1021_v6 = vmul.f32 %v1005_v15, %v1005_v15  ;;  %3207 = vst [vmem:[#allocation15_spill] sm:$0xff] %v2567_v34 }
 0x144   :  { %v1044_v27 = vadd.f32 %v1043_v56, %v1042_v30  ;;  %v1116_v16 = vadd.f32 %v1115_v47, %v1114_v25  ;;  %v1022_v63 = vmul.f32 %v1006_v21, %v1006_v21  ;;  %v1086_v1 = vsub.f32 %v2558_v31, %v2356_v7  ;;  %3208 = vst [vmem:[#allocation16_spill] sm:$0xff] %v2573_v4  ;;  %v2579_v30 = vld [vmem:[#allocation2 + $0x188] sm:$0xff] }
 0x145   :  { %v1100_v46 = vmul.f32 %v1084_v41, %v1084_v41  ;;  %v1117_v11 = vsel %vm180_vm1, %v1098_v0, 0.0  ;;  %v960_v24 = vadd.f32 %v2492_v18, %v958_v10  ;;  %v2570_v35 = vmul.f32 %v1007_v40, %v1007_v40  ;;  %3209 = vst [vmem:[#allocation17_spill] sm:$0xff] %v2579_v30  ;;  %v2581_v41 = vld [vmem:[#allocation2 + $0x150] sm:$0xff]  ;;  %v2586_v0 = vld [vmem:[#allocation2 + $0x158] sm:$0xff] }
 0x146   :  { %v1045_v52 = vsel %vm180_vm1, %v1019_v59, 0.0  ;;  %v1118_v51 = vadd.f32 %v1117_v11, %v1116_v16  ;;  %v1047_v56 = vsel %vm180_vm1, %v1020_v53, 0.0  ;;  %v1087_v25 = vsub.f32 %v2567_v34, %v2356_v7  ;;  %3210 = vst [vmem:[#allocation18_spill] sm:$0xff] %v2581_v41  ;;  %v2593_v16 = vld [vmem:[#allocation2 + $0x190] sm:$0xff] }
 0x147   :  { %v1101_v15 = vmul.f32 %v1085_v54, %v1085_v54  ;;  %v1119_v21 = vsel %vm180_vm1, %v1099_v20, 0.0  ;;  %v1046_v18 = vadd.f32 %v1045_v52, %v1044_v27  ;;  %v1049_v10 = vsel %vm180_vm1, %v1021_v6, 0.0  ;;  %3211 = vst [vmem:[#allocation19_spill] sm:$0xff] %v2586_v0  ;;  %v2595_v27 = vld [vmem:[#allocation2 + $0x160] sm:$0xff] }
 0x148   :  { %v1120_v40 = vadd.f32 %v1119_v21, %v1118_v51  ;;  %v1164_v59 = vsub.f32 %v2573_v4, %v2356_v7  ;;  %v1088_v53 = vsub.f32 %v2581_v41, %v2356_v7  ;;  %v1102_v47 = vmul.f32 %v1086_v1, %v1086_v1  ;;  %3212 = vst [vmem:[#allocation20_spill] sm:$0xff] %v2593_v16  ;;  %v2601_v21 = vld [vmem:[#allocation2 + $0x168] sm:$0xff]  ;;  %v2608_v41 = vld [vmem:[#allocation2 + $0x198] sm:$0xff] }
 0x149   :  { %v1121_v54 = vsel %vm180_vm1, %v1100_v46, 0.0  ;;  %v1165_v20 = vsub.f32 %v2579_v30, %v2356_v7  ;;  %3213 = vst [vmem:[#allocation21_spill] sm:$0xff] %v2595_v27  ;;  %v962_v6 = vadd.f32 %v2497_v23, %v960_v24  ;;  %v1051_v11 = vsel %vm180_vm1, %v1022_v63, 0.0 }
 0x14a   :  { %v1089_v52 = vsub.f32 %v2586_v0, %v2356_v7  ;;  %v1122_v51 = vadd.f32 %v1121_v54, %v1120_v40  ;;  %3214 = vst [vmem:[#allocation22_spill] sm:$0xff] %v2601_v21  ;;  %v1090_v1 = vsub.f32 %v2595_v27, %v2356_v7  ;;  %v1103_v46 = vmul.f32 %v1087_v25, %v1087_v25  ;;  %v2612_v40 = vld [vmem:[#allocation2 + $0x170] sm:$0xff]  ;;  %v2614_v54 = vld [vmem:[#allocation2 + $0x178] sm:$0xff] }
 0x14b   :  { %v1123_v30 = vsel %vm180_vm1, %v1101_v15, 0.0  ;;  %v1166_v4 = vsub.f32 %v2593_v16, %v2356_v7  ;;  %3215 = vst [vmem:[#allocation23_spill] sm:$0xff] %v2608_v41  ;;  %v1048_v23 = vadd.f32 %v1047_v56, %v1046_v18  ;;  %v1091_v63 = vsub.f32 %v2601_v21, %v2356_v7  ;;  %v2619_v16 = vld [vmem:[#allocation2 + $0x1a0] sm:$0xff] }
 0x14c   :  { %v1124_v24 = vadd.f32 %v1123_v30, %v1122_v51  ;;  %v1180_v0 = vmul.f32 %v1164_v59, %v1164_v59  ;;  %3216 = vst [vmem:[#allocation24_spill] sm:$0xff] %v2612_v40  ;;  %v1104_v34 = vmul.f32 %v1088_v53, %v1088_v53  ;;  %v1125_v25 = vsel %vm180_vm1, %v1102_v47, 0.0 }
 0x14d   :  { %3217 = vst [vmem:[#allocation25_spill] sm:$0xff] %v2614_v54  ;;  %v1167_v15 = vsub.f32 %v2608_v41, %v2356_v7  ;;  %v1181_v27 = vmul.f32 %v1165_v20, %v1165_v20  ;;  %v964_v56 = vadd.f32 %v2516_v57, %v962_v6  ;;  %v1092_v18 = vsub.f32 %v2612_v40, %v2356_v7  ;;  %v2629_v41 = vld [vmem:[#allocation2 + $0x1a8] sm:$0xff] }
 0x14e   :  { %3218 = vst [vmem:[#allocation26_spill] sm:$0xff] %v2619_v16  ;;  %v1093_v30 = vsub.f32 %v2614_v54, %v2356_v7  ;;  %v1126_v59 = vadd.f32 %v1125_v25, %v1124_v24  ;;  %v1105_v51 = vmul.f32 %v1089_v52, %v1089_v52  ;;  %v1127_v53 = vsel %vm180_vm1, %v1103_v46, 0.0  ;;  %v2636_v46 = vld [vmem:[#allocation2 + $0x1b0] sm:$0xff] }
 0x14f   :  { %v1168_v47 = vsub.f32 %v2619_v16, %v2356_v7  ;;  %v1182_v21 = vmul.f32 %v1166_v4, %v1166_v4  ;;  %3219 = vst [vmem:[#allocation27_spill] sm:$0xff] %v2629_v41  ;;  %v1050_v20 = vadd.f32 %v1049_v10, %v1048_v23  ;;  %v1106_v31 = vmul.f32 %v1090_v1, %v1090_v1  ;;  %v2643_v23 = vld [vmem:[#allocation2 + $0x1b8] sm:$0xff] }
 0x150   :  { %v1128_v13 = vadd.f32 %v1127_v53, %v1126_v59  ;;  %v1196_v57 = vsel %vm180_vm1, %v1180_v0, 0.0  ;;  %v1129_v6 = vsel %vm180_vm1, %v1104_v34, 0.0  ;;  %v1169_v54 = vsub.f32 %v2629_v41, %v2356_v7 }
 0x151   :  { %v1183_v24 = vmul.f32 %v1167_v15, %v1167_v15  ;;  %v1197_v52 = vsel %vm180_vm1, %v1181_v27, 0.0  ;;  %v966_v25 = vadd.f32 %v2519_v58, %v964_v56  ;;  %v1107_v4 = vmul.f32 %v1091_v63, %v1091_v63  ;;  %v2649_v56 = vld [vmem:[#allocation2 + $0x1c0] sm:$0xff] }
 0x152   :  { %v1130_v16 = vadd.f32 %v1129_v6, %v1128_v13  ;;  %v1198_v40 = vadd.f32 %v1197_v52, %v1196_v57  ;;  %v1131_v10 = vsel %vm180_vm1, %v1105_v51, 0.0  ;;  %v1170_v0 = vsub.f32 %v2636_v46, %v2356_v7 }
 0x153   :  { %v1184_v1 = vmul.f32 %v1168_v47, %v1168_v47  ;;  %v1199_v34 = vsel %vm180_vm1, %v1182_v21, 0.0  ;;  %v1052_v15 = vadd.f32 %v1051_v11, %v1050_v20  ;;  %v1108_v59 = vmul.f32 %v1092_v18, %v1092_v18 }
 0x154   :  { %v1132_v27 = vadd.f32 %v1131_v10, %v1130_v16  ;;  %v1200_v53 = vadd.f32 %v1199_v34, %v1198_v40  ;;  %v1133_v41 = vsel %vm180_vm1, %v1106_v31, 0.0  ;;  %v1171_v13 = vsub.f32 %v2643_v23, %v2356_v7  ;;  %v2669_v34 = vld [vmem:[#allocation2 + $0x1d8] sm:$0xff] }
 0x155   :  { %v1185_v58 = vmul.f32 %v1169_v54, %v1169_v54  ;;  %v1201_v63 = vsel %vm180_vm1, %v1183_v24, 0.0  ;;  %v968_v51 = vadd.f32 %v2562_v5, %v966_v25  ;;  %v1053_v21 = vsel %vm180_vm1, %v2570_v35, 0.0  ;;  %v2658_v54 = vld [vmem:[#allocation2 + $0x1c8] sm:$0xff]  ;;  %v2664_v25 = vld [vmem:[#allocation2 + $0x1d0] sm:$0xff]  ;;  %3220 = vst [vmem:[#allocation28_spill] sm:$0xff] %v2669_v34 }
 0x156   :  { %v1134_v47 = vadd.f32 %v1133_v41, %v1132_v27  ;;  %v1202_v11 = vadd.f32 %v1201_v63, %v1200_v53  ;;  %v1135_v16 = vsel %vm180_vm1, %v1107_v4, 0.0  ;;  %v1172_v31 = vsub.f32 %v2649_v56, %v2356_v7 }
 0x157   :  { %v1186_v40 = vmul.f32 %v1170_v0, %v1170_v0  ;;  %v1203_v18 = vsel %vm180_vm1, %v1184_v1, 0.0  ;;  %v1054_v20 = vadd.f32 %v1053_v21, %v1052_v15  ;;  %v1109_v57 = vmul.f32 %v1093_v30, %v1093_v30  ;;  %v2675_v21 = vld [vmem:[#allocation2 + $0x1e0] sm:$0xff] }
 0x158   :  { %v1136_v6 = vadd.f32 %v1135_v16, %v1134_v47  ;;  %v1204_v24 = vadd.f32 %v1203_v18, %v1202_v11  ;;  %v1137_v5 = vsel %vm180_vm1, %v1108_v59, 0.0  ;;  %v1173_v35 = vsub.f32 %v2658_v54, %v2356_v7  ;;  %3221 = vst [vmem:[#allocation29_spill] sm:$0xff] %v2675_v21  ;;  %v2680_v18 = vld [vmem:[#allocation2 + $0x1e8] sm:$0xff] }
 0x159   :  { %v1187_v41 = vmul.f32 %v1171_v13, %v1171_v13  ;;  %v1205_v52 = vsel %vm180_vm1, %v1185_v58, 0.0  ;;  %v1174_v0 = vsub.f32 %v2664_v25, %v2356_v7  ;;  %v1188_v1 = vmul.f32 %v1172_v31, %v1172_v31  ;;  %3222 = vst [vmem:[#allocation30_spill] sm:$0xff] %v2680_v18 }
 0x15a   :  { %v1138_v4 = vadd.f32 %v1137_v5, %v1136_v6  ;;  %v1206_v10 = vadd.f32 %v1205_v52, %v1204_v24  ;;  %v1207_v30 = vsel %vm180_vm1, %v1186_v40, 0.0  ;;  %v969_v15 = vrot.slane %v968_v51, 4  ;;  %v2685_v52 = vld [vmem:[#allocation2 + $0x1f0] sm:$0xff] }
 0x15b   :  { %v1055_v59 = vrot.slane %v1054_v20, 4  ;;  %v1139_v53 = vsel %vm180_vm1, %v1109_v57, 0.0  ;;  %v1175_v13 = vsub.f32 %v2669_v34, %v2356_v7  ;;  %v1189_v58 = vmul.f32 %v1173_v35, %v1173_v35  ;;  %3223 = vst [vmem:[#allocation31_spill] sm:$0xff] %v2685_v52 }
 0x15c   :  { %v1208_v27 = vadd.f32 %v1207_v30, %v1206_v10  ;;  %v1209_v63 = vsel %vm180_vm1, %v1187_v41, 0.0  ;;  %v1140_v47 = vadd.f32 %v1139_v53, %v1138_v4  ;;  %v1176_v16 = vsub.f32 %v2675_v21, %v2356_v7 }
 0x15d   :  { %v1190_v31 = vmul.f32 %v1174_v0, %v1174_v0  ;;  %v1211_v40 = vsel %vm180_vm1, %v1188_v1, 0.0  ;;  %v970_v6 = vadd.f32 %v969_v15, %v968_v51  ;;  %v1056_v57 = vadd.f32 %v1055_v59, %v1054_v20  ;;  %v2690_v20 = vld [vmem:[#allocation2 + $0x1f8] sm:$0xff] }
 0x15e   :  { %v1210_v11 = vadd.f32 %v1209_v63, %v1208_v27  ;;  %v1177_v5 = vsub.f32 %v2680_v18, %v2356_v7  ;;  %v1191_v35 = vmul.f32 %v1175_v13, %v1175_v13  ;;  %v1213_v41 = vsel %vm180_vm1, %v1189_v58, 0.0 }
 0x15f   :  { %v1141_v4 = vrot.slane %v1140_v47, 4  ;;  %v1178_v0 = vsub.f32 %v2685_v52, %v2356_v7  ;;  %v1192_v30 = vmul.f32 %v1176_v16, %v1176_v16  ;;  %v1215_v1 = vsel %vm180_vm1, %v1190_v31, 0.0 }
 0x160   :  { %v1212_v24 = vadd.f32 %v1211_v40, %v1210_v11  ;;  %v971_v27 = vrot.slane %v970_v6, 2  ;;  %v1057_v51 = vrot.slane %v1056_v57, 2  ;;  %v1179_v59 = vsub.f32 %v2690_v20, %v2356_v7 }
 0x161   :  { %v1193_v53 = vmul.f32 %v1177_v5, %v1177_v5  ;;  %v1217_v13 = vsel %vm180_vm1, %v1191_v35, 0.0  ;;  %v1142_v58 = vadd.f32 %v1141_v4, %v1140_v47  ;;  %v1194_v11 = vmul.f32 %v1178_v0, %v1178_v0 }
 0x162   :  { %v1214_v10 = vadd.f32 %v1213_v41, %v1212_v24  ;;  %v1219_v40 = vsel %vm180_vm1, %v1192_v30, 0.0  ;;  %v972_v24 = vadd.f32 %v971_v27, %v970_v6  ;;  %v1058_v16 = vadd.f32 %v1057_v51, %v1056_v57 }
 0x163   :  { %v1195_v31 = vmul.f32 %v1179_v59, %v1179_v59  ;;  %v1221_v52 = vsel %vm180_vm1, %v1193_v53, 0.0  ;;  %v1143_v18 = vrot.slane %v1142_v58, 2 }
 0x164   :  { %v1216_v15 = vadd.f32 %v1215_v1, %v1214_v10  ;;  %v1223_v10 = vsel %vm180_vm1, %v1194_v11, 0.0  ;;  %v973_v1 = vrot.slane %v972_v24, 1  ;;  %v1059_v34 = vrot.slane %v1058_v16, 1 }
 0x165   :  { %v1225_v35 = vsel %vm180_vm1, %v1195_v31, 0.0  ;;  %v1144_v47 = vadd.f32 %v1143_v18, %v1142_v58 }
 0x166   :  { %v1218_v63 = vadd.f32 %v1217_v13, %v1216_v15  ;;  %v974_v0 = vadd.f32 %v973_v1, %v972_v24  ;;  %v1060_v15 = vadd.f32 %v1059_v34, %v1058_v16  ;;  %v1246_v16 = vld [vmem:[%s3163_s2] sm:$0x1] }
 0x167   :  { %v1145_v6 = vrot.slane %v1144_v47, 1 }
 0x168   :  { %v1220_v41 = vadd.f32 %v1219_v40, %v1218_v63  ;;  %v1061_v27 = vadd.f32 %v1060_v15, %v974_v0 }
 0x169   :  { %v1146_v59 = vadd.f32 %v1145_v6, %v1144_v47 }
 0x16a   :  { %v1222_v21 = vadd.f32 %v1221_v52, %v1220_v41 }
 0x16b   :  { %v1147_v13 = vadd.f32 %v1146_v59, %v1061_v27 }
 0x16c   :  { %v1224_v5 = vadd.f32 %v1223_v10, %v1222_v21 }
 0x16e   :  { %v1226_v4 = vadd.f32 %v1225_v35, %v1224_v5  ;;  %v1248_v5 = vld [vmem:[%s3164_s3] sm:$0x1] }
 0x170   :  { %v1227_v30 = vrot.slane %v1226_v4, 4 }
 0x172   :  { %v1228_v57 = vadd.f32 %v1227_v30, %v1226_v4 }
 0x174   :  { %v1229_v51 = vrot.slane %v1228_v57, 2 }
 0x176   :  { %v1230_v53 = vadd.f32 %v1229_v51, %v1228_v57 }
 0x178   :  { %v1231_v52 = vrot.slane %v1230_v53, 1 }
 0x17a   :  { %v1232_v63 = vadd.f32 %v1231_v52, %v1230_v53 }
 0x17c   :  { %v1233_v11 = vadd.f32 %v1232_v63, %v1147_v13 }
 0x17e   :  { %v1234_v40 = vmul.f32 0.001953125, %v1233_v11 }
 0x180   :  { %v1235_v41 = vadd.f32 1e-05, %v1234_v40 }
 0x182   :  { %2025 = vrsqrt.f32 %v1235_v41  ;;  %vm1242_vm3 = vweird.f32 %v1235_v41 }
 0x188   :  { %v2026_v21 = vpop.eup %2025 }
 0x189   :  { %v1237_v31 = vmul.f32 %v2026_v21, %v1235_v41  ;;  %vm1243_vm2 = vweird.f32 %v2026_v21 }
 0x18a   :  { %vm1244_vm4 = vmor %vm1242_vm3, %vm1243_vm2 }
 0x18b   :  { %v1238_v18 = vmul.f32 %v2026_v21, %v1237_v31 }
 0x18d   :  { %v1239_v58 = vmul.f32 0.5, %v1238_v18 }
 0x18f   :  { %v1240_v24 = vsub.f32 1.5, %v1239_v58 }
 0x191   :  { %v1241_v34 = vmul.f32 %v2026_v21, %v1240_v24 }
 0x193   :  { %v1245_v10 = vsel %vm1244_vm4, %v2026_v21, %v1241_v34 }
 0x194   :  { %v1247_v1 = vmul.f32 %v1246_v16, %v1245_v10 }
 0x196   :  { %v1249_v35 = vmul.f32 %v1247_v1, %v2356_v7  ;;  %v2706_v4 = vperm.slane %v1247_v1, 0 }
 0x198   :  { %v1250_v47 = vsub.f32 %v1248_v5, %v1249_v35  ;;  %v1254_v0 = vmul.f32 %v2706_v4, %v2358_v8  ;;  %v1255_v15 = vmul.f32 %v2706_v4, %v2360_v9  ;;  %v1256_v30 = vmul.f32 %v2706_v4, %v2366_v12 }
 0x199   :  { %v1257_v57 = vmul.f32 %v2706_v4, %v2370_v14  ;;  %v1258_v7 = vmul.f32 %v2706_v4, %v2374_v19  ;;  %v1259_v27 = vmul.f32 %v2706_v4, %v2381_v26  ;;  %v1260_v12 = vmul.f32 %v2706_v4, %v2396_v37 }
 0x19a   :  { %v2714_v6 = vperm.slane %v1250_v47, 0  ;;  %v1261_v59 = vmul.f32 %v2706_v4, %v2405_v43  ;;  %v1262_v14 = vmul.f32 %v2706_v4, %v2407_v44  ;;  %v1263_v26 = vmul.f32 %v2706_v4, %v2409_v45 }
 0x19b   :  { %v1264_v53 = vmul.f32 %v2706_v4, %v2411_v48  ;;  %v1265_v13 = vmul.f32 %v2706_v4, %v2413_v49  ;;  %v1266_v37 = vmul.f32 %v2706_v4, %v2415_v50  ;;  %v1267_v43 = vmul.f32 %v2706_v4, %v2433_v60 }
 0x19c   :  { %v1273_v8 = vadd.f32 %v2714_v6, %v1254_v0  ;;  %v1274_v51 = vadd.f32 %v2714_v6, %v1255_v15  ;;  %v1275_v9 = vadd.f32 %v2714_v6, %v1256_v30  ;;  %v1276_v19 = vadd.f32 %v2714_v6, %v1257_v57 }
 0x19d   :  { %v1277_v52 = vadd.f32 %v2714_v6, %v1258_v7  ;;  %v1268_v44 = vmul.f32 %v2706_v4, %v2435_v61  ;;  %v1278_v63 = vadd.f32 %v2714_v6, %v1259_v27  ;;  %v1279_v45 = vadd.f32 %v2714_v6, %v1260_v12 }
 0x19e   :  { %v1289_v11 = vmax.f32 %v1273_v8, 0.0  ;;  %v1290_v48 = vmax.f32 %v1274_v51, 0.0  ;;  %v1291_v40 = vmax.f32 %v1275_v9, 0.0  ;;  %v1269_v49 = vmul.f32 %v2706_v4, %v2442_v3 }
 0x19f   :  { %v1280_v41 = vadd.f32 %v2714_v6, %v1261_v59  ;;  %v1281_v50 = vadd.f32 %v2714_v6, %v1262_v14  ;;  %v1292_v21 = vmax.f32 %v1276_v19, 0.0  ;;  %v1282_v60 = vadd.f32 %v2714_v6, %v1263_v26 }
 0x1a0   :  { %v1283_v31 = vadd.f32 %v2714_v6, %v1264_v53  ;;  %v1284_v61 = vadd.f32 %v2714_v6, %v1265_v13  ;;  %v1293_v18 = vmax.f32 %v1277_v52, 0.0  ;;  %v1285_v58 = vadd.f32 %v2714_v6, %v1266_v37 }
 0x1a1   :  { %v1286_v24 = vadd.f32 %v2714_v6, %v1267_v43  ;;  %v1287_v34 = vadd.f32 %v2714_v6, %v1268_v44  ;;  %v1294_v16 = vmax.f32 %v1278_v63, 0.0  ;;  %v1295_v3 = vmax.f32 %v1279_v45, 0.0 }
 0x1a2   :  { %v1305_v10 = vpack.c.bf16 %v1289_v11, %v1289_v11  ;;  %v1306_v1 = vpack.c.bf16 %v1290_v48, %v1290_v48  ;;  %v1307_v5 = vpack.c.bf16 %v1291_v40, %v1291_v40  ;;  %v1288_v35 = vadd.f32 %v2714_v6, %v1269_v49 }
 0x1a3   :  { %v1296_v47 = vmax.f32 %v1280_v41, 0.0  ;;  %v1308_v0 = vpack.c.bf16 %v1292_v21, %v1292_v21  ;;  %v1297_v15 = vmax.f32 %v1281_v50, 0.0  ;;  %v1309_v30 = vpack.c.bf16 %v1293_v18, %v1293_v18 }
 0x1a4   :  { %1322 = vst.msk [vmem:[%s3165_s4] sm:$0xf] %vm1321_vm5, %v1305_v10  ;;  %v1354_v57 = vmul.f32 %v2706_v4, %v2383_v28  ;;  %v1355_v7 = vmul.f32 %v2706_v4, %v2388_v32  ;;  %v1298_v27 = vmax.f32 %v1282_v60, 0.0  ;;  %v1299_v8 = vmax.f32 %v1283_v31, 0.0 }
 0x1a5   :  { %v1300_v51 = vmax.f32 %v1284_v61, 0.0  ;;  %v1310_v9 = vpack.c.bf16 %v1294_v16, %v1294_v16  ;;  %1323 = vst.msk [vmem:[%s3165_s4 + $0x4] sm:$0xf] %vm1321_vm5, %v1306_v1  ;;  %v1301_v12 = vmax.f32 %v1285_v58, 0.0  ;;  %v1302_v59 = vmax.f32 %v1286_v24, 0.0  ;;  %v3225_v58 = vld [vmem:[#allocation10_spill] sm:$0xff] }
 0x1a6   :  { %v1303_v14 = vmax.f32 %v1287_v34, 0.0  ;;  %v1311_v19 = vpack.c.bf16 %v1295_v3, %v1295_v3  ;;  %1324 = vst.msk [vmem:[%s3165_s4 + $0x8] sm:$0xf] %vm1321_vm5, %v1307_v5  ;;  %v1304_v28 = vmax.f32 %v1288_v35, 0.0  ;;  %v1312_v32 = vpack.c.bf16 %v1296_v47, %v1296_v47  ;;  %v3226_v16 = vld [vmem:[#allocation12_spill] sm:$0xff] }
 0x1a7   :  { %1325 = vst.msk [vmem:[%s3165_s4 + $0xc] sm:$0xf] %vm1321_vm5, %v1308_v0  ;;  %v1356_v26 = vmul.f32 %v2706_v4, %v2394_v36  ;;  %v1357_v53 = vmul.f32 %v2706_v4, %v2398_v38  ;;  %v1313_v13 = vpack.c.bf16 %v1297_v15, %v1297_v15  ;;  %v1358_v52 = vmul.f32 %v2706_v4, %v2423_v55 }
 0x1a8   :  { %1326 = vst.msk [vmem:[%s3165_s4 + $0x10] sm:$0xf] %vm1321_vm5, %v1309_v30  ;;  %v1359_v37 = vmul.f32 %v2706_v4, %v2440_v2  ;;  %v1370_v43 = vadd.f32 %v1354_v57, %v2714_v6  ;;  %v1314_v44 = vpack.c.bf16 %v1298_v27, %v1298_v27  ;;  %v1315_v63 = vpack.c.bf16 %v1299_v8, %v1299_v8 }
 0x1a9   :  { %v1316_v36 = vpack.c.bf16 %v1300_v51, %v1300_v51  ;;  %1327 = vst.msk [vmem:[%s3165_s4 + $0x14] sm:$0xf] %vm1321_vm5, %v1310_v9  ;;  %v1371_v38 = vadd.f32 %v1355_v7, %v2714_v6  ;;  %v1317_v45 = vpack.c.bf16 %v1301_v12, %v1301_v12  ;;  %v1318_v11 = vpack.c.bf16 %v1302_v59, %v1302_v59 }
 0x1aa   :  { %v1319_v48 = vpack.c.bf16 %v1303_v14, %v1303_v14  ;;  %1328 = vst.msk [vmem:[%s3165_s4 + $0x18] sm:$0xf] %vm1321_vm5, %v1311_v19  ;;  %v1372_v55 = vadd.f32 %v1356_v26, %v2714_v6  ;;  %v1320_v2 = vpack.c.bf16 %v1304_v28, %v1304_v28  ;;  %v1360_v40 = vmul.f32 %v2706_v4, %v2454_v17 }
 0x1ab   :  { %1329 = vst.msk [vmem:[%s3165_s4 + $0x1c] sm:$0xf] %vm1321_vm5, %v1312_v32  ;;  %v1361_v49 = vmul.f32 %v2706_v4, %v2460_v29  ;;  %v1373_v41 = vadd.f32 %v1357_v53, %v2714_v6  ;;  %v1362_v50 = vmul.f32 %v2706_v4, %v2465_v42  ;;  %v1363_v21 = vmul.f32 %v2706_v4, %v2477_v62  ;;  %v3224_v62 = vld [vmem:[#allocation8_spill] sm:$0xff] }
 0x1ac   :  { %1330 = vst.msk [vmem:[%s3165_s4 + $0x20] sm:$0xf] %vm1321_vm5, %v1313_v13  ;;  %v1374_v60 = vadd.f32 %v1358_v52, %v2714_v6  ;;  %v1386_v31 = vmax.f32 %v1370_v43, 0.0  ;;  %v1364_v17 = vmul.f32 %v2706_v4, %v2494_v22  ;;  %v1365_v29 = vmul.f32 %v2706_v4, %v2506_v39 }
 0x1ad   :  { %1331 = vst.msk [vmem:[%s3165_s4 + $0x24] sm:$0xf] %vm1321_vm5, %v1314_v44  ;;  %v1375_v61 = vadd.f32 %v1359_v37, %v2714_v6  ;;  %v1387_v42 = vmax.f32 %v1371_v38, 0.0  ;;  %v1366_v18 = vmul.f32 %v2706_v4, %v3224_v62  ;;  %v1367_v24 = vmul.f32 %v2706_v4, %v3225_v58  ;;  %v3227_v44 = vld [vmem:[#allocation3_spill] sm:$0xff] }
 0x1ae   :  { %1332 = vst.msk [vmem:[%s3165_s4 + $0x28] sm:$0xf] %vm1321_vm5, %v1315_v63  ;;  %v1376_v34 = vadd.f32 %v1360_v40, %v2714_v6  ;;  %v1388_v22 = vmax.f32 %v1372_v55, 0.0  ;;  %v1368_v39 = vmul.f32 %v2706_v4, %v2533_v33  ;;  %v1369_v3 = vmul.f32 %v2706_v4, %v3226_v16  ;;  %v3229_v40 = vld [vmem:[#allocation5_spill] sm:$0xff]  ;;  %v3233_v16 = vld [vmem:[#allocation11_spill] sm:$0xff] }
 0x1af   :  { %1333 = vst.msk [vmem:[%s3165_s4 + $0x2c] sm:$0xf] %vm1321_vm5, %v1316_v36  ;;  %v1377_v10 = vadd.f32 %v1361_v49, %v2714_v6  ;;  %v1389_v1 = vmax.f32 %v1373_v41, 0.0  ;;  %v1378_v5 = vadd.f32 %v1362_v50, %v2714_v6  ;;  %v1379_v35 = vadd.f32 %v1363_v21, %v2714_v6 }
 0x1b0   :  { %1334 = vst.msk [vmem:[%s3165_s4 + $0x30] sm:$0xf] %vm1321_vm5, %v1317_v45  ;;  %v1390_v47 = vmax.f32 %v1374_v60, 0.0  ;;  %v1402_v0 = vpack.c.bf16 %v1386_v31, %v1386_v31  ;;  %v1380_v33 = vadd.f32 %v1364_v17, %v2714_v6  ;;  %v1381_v15 = vadd.f32 %v1365_v29, %v2714_v6  ;;  %v3230_v60 = vld [vmem:[#allocation6_spill] sm:$0xff] }
 0x1b1   :  { %1335 = vst.msk [vmem:[%s3165_s4 + $0x34] sm:$0xf] %vm1321_vm5, %v1318_v11  ;;  %v1391_v30 = vmax.f32 %v1375_v61, 0.0  ;;  %v1403_v57 = vpack.c.bf16 %v1387_v42, %v1387_v42  ;;  %v1382_v7 = vadd.f32 %v1366_v18, %v2714_v6  ;;  %v1383_v27 = vadd.f32 %v1367_v24, %v2714_v6  ;;  %v3228_v11 = vld [vmem:[#allocation4_spill] sm:$0xff]  ;;  %v3231_v42 = vld [vmem:[#allocation7_spill] sm:$0xff] }
 0x1b2   :  { %1336 = vst.msk [vmem:[%s3165_s4 + $0x38] sm:$0xf] %vm1321_vm5, %v1319_v48  ;;  %v1392_v8 = vmax.f32 %v1376_v34, 0.0  ;;  %v1404_v51 = vpack.c.bf16 %v1388_v22, %v1388_v22  ;;  %v1384_v9 = vadd.f32 %v1368_v39, %v2714_v6  ;;  %v1385_v12 = vadd.f32 %v1369_v3, %v2714_v6  ;;  %v3232_v34 = vld [vmem:[#allocation9_spill] sm:$0xff] }
 0x1b3   :  { %1337 = vst.msk [vmem:[%s3165_s4 + $0x3c] sm:$0xf] %vm1321_vm5, %v1320_v2  ;;  %v1393_v59 = vmax.f32 %v1377_v10, 0.0  ;;  %v1405_v14 = vpack.c.bf16 %v1389_v1, %v1389_v1  ;;  %v1394_v19 = vmax.f32 %v1378_v5, 0.0  ;;  %v1395_v28 = vmax.f32 %v1379_v35, 0.0  ;;  %v3234_v10 = vld [vmem:[#allocation13_spill] sm:$0xff] }
 0x1b4   :  { %v1406_v32 = vpack.c.bf16 %v1390_v47, %v1390_v47  ;;  %1929 = vst.msk [vmem:[%s3165_s4 + $0x40] sm:$0xf] %vm1321_vm5, %v1402_v0  ;;  %v1396_v26 = vmax.f32 %v1380_v33, 0.0  ;;  %v1397_v53 = vmax.f32 %v1381_v15, 0.0  ;;  %v1407_v13 = vpack.c.bf16 %v1391_v30, %v1391_v30  ;;  %v3235_v47 = vld [vmem:[#allocation14_spill] sm:$0xff]  ;;  %v3236_v33 = vld [vmem:[#allocation15_spill] sm:$0xff] }
 0x1b5   :  { %1930 = vst.msk [vmem:[%s3165_s4 + $0x44] sm:$0xf] %vm1321_vm5, %v1403_v57  ;;  %v1398_v52 = vmax.f32 %v1382_v7, 0.0  ;;  %v1399_v37 = vmax.f32 %v1383_v27, 0.0  ;;  %v1408_v43 = vpack.c.bf16 %v1392_v8, %v1392_v8  ;;  %v1451_v63 = vmul.f32 %v2706_v4, %v3227_v44  ;;  %v3237_v7 = vld [vmem:[#allocation18_spill] sm:$0xff]  ;;  %v3238_v8 = vld [vmem:[#allocation19_spill] sm:$0xff] }
 0x1b6   :  { %1931 = vst.msk [vmem:[%s3165_s4 + $0x48] sm:$0xf] %vm1321_vm5, %v1404_v51  ;;  %v1400_v36 = vmax.f32 %v1384_v9, 0.0  ;;  %v1401_v38 = vmax.f32 %v1385_v12, 0.0  ;;  %v1409_v45 = vpack.c.bf16 %v1393_v59, %v1393_v59  ;;  %v1452_v48 = vmul.f32 %v2706_v4, %v3228_v11  ;;  %v3239_v59 = vld [vmem:[#allocation21_spill] sm:$0xff] }
 0x1b7   :  { %1932 = vst.msk [vmem:[%s3165_s4 + $0x4c] sm:$0xf] %vm1321_vm5, %v1405_v14  ;;  %v1410_v55 = vpack.c.bf16 %v1394_v19, %v1394_v19  ;;  %v1411_v2 = vpack.c.bf16 %v1395_v28, %v1395_v28  ;;  %v1453_v49 = vmul.f32 %v2706_v4, %v3229_v40  ;;  %v1467_v41 = vadd.f32 %v1451_v63, %v2714_v6  ;;  %v3240_v19 = vld [vmem:[#allocation22_spill] sm:$0xff]  ;;  %v3242_v44 = vld [vmem:[#allocation25_spill] sm:$0xff] }
 0x1b8   :  { %1933 = vst.msk [vmem:[%s3165_s4 + $0x50] sm:$0xf] %vm1321_vm5, %v1406_v32  ;;  %v1412_v50 = vpack.c.bf16 %v1396_v26, %v1396_v26  ;;  %v1413_v21 = vpack.c.bf16 %v1397_v53, %v1397_v53  ;;  %v1454_v31 = vmul.f32 %v2706_v4, %v3230_v60  ;;  %v1468_v17 = vadd.f32 %v1452_v48, %v2714_v6  ;;  %v3241_v53 = vld [vmem:[#allocation24_spill] sm:$0xff] }
 0x1b9   :  { %1934 = vst.msk [vmem:[%s3165_s4 + $0x54] sm:$0xf] %vm1321_vm5, %v1407_v13  ;;  %v1414_v29 = vpack.c.bf16 %v1398_v52, %v1398_v52  ;;  %v1415_v61 = vpack.c.bf16 %v1399_v37, %v1399_v37  ;;  %v1455_v62 = vmul.f32 %v2706_v4, %v3231_v42  ;;  %v1469_v18 = vadd.f32 %v1453_v49, %v2714_v6 }
 0x1ba   :  { %1935 = vst.msk [vmem:[%s3165_s4 + $0x58] sm:$0xf] %vm1321_vm5, %v1408_v43  ;;  %v1416_v58 = vpack.c.bf16 %v1400_v36, %v1400_v36  ;;  %v1417_v24 = vpack.c.bf16 %v1401_v38, %v1401_v38  ;;  %v1456_v22 = vmul.f32 %v2706_v4, %v3232_v34  ;;  %v1470_v39 = vadd.f32 %v1454_v31, %v2714_v6 }
 0x1bb   :  { %1936 = vst.msk [vmem:[%s3165_s4 + $0x5c] sm:$0xf] %vm1321_vm5, %v1409_v45  ;;  %v1457_v3 = vmul.f32 %v2706_v4, %v3233_v16  ;;  %v1458_v1 = vmul.f32 %v2706_v4, %v3234_v10  ;;  %v1471_v5 = vadd.f32 %v1455_v62, %v2714_v6  ;;  %v1483_v35 = vmax.f32 %v1467_v41, 0.0  ;;  %v3244_v16 = vld [vmem:[#allocation17_spill] sm:$0xff] }
 0x1bc   :  { %1937 = vst.msk [vmem:[%s3165_s4 + $0x60] sm:$0xf] %vm1321_vm5, %v1410_v55  ;;  %v1459_v0 = vmul.f32 %v2706_v4, %v3235_v47  ;;  %v1460_v15 = vmul.f32 %v2706_v4, %v3236_v33  ;;  %v1472_v30 = vadd.f32 %v1456_v22, %v2714_v6  ;;  %v1484_v57 = vmax.f32 %v1468_v17, 0.0 }
 0x1bd   :  { %1938 = vst.msk [vmem:[%s3165_s4 + $0x64] sm:$0xf] %vm1321_vm5, %v1411_v2  ;;  %v1461_v27 = vmul.f32 %v2706_v4, %v3237_v7  ;;  %v1462_v51 = vmul.f32 %v2706_v4, %v3238_v8  ;;  %v1473_v9 = vadd.f32 %v1457_v3, %v2714_v6  ;;  %v1485_v12 = vmax.f32 %v1469_v18, 0.0 }
 0x1be   :  { %1939 = vst.msk [vmem:[%s3165_s4 + $0x68] sm:$0xf] %vm1321_vm5, %v1412_v50  ;;  %v1463_v14 = vmul.f32 %v2706_v4, %v3239_v59  ;;  %v1464_v28 = vmul.f32 %v2706_v4, %v3240_v19  ;;  %v1474_v32 = vadd.f32 %v1458_v1, %v2714_v6  ;;  %v1486_v26 = vmax.f32 %v1470_v39, 0.0 }
 0x1bf   :  { %1940 = vst.msk [vmem:[%s3165_s4 + $0x6c] sm:$0xf] %vm1321_vm5, %v1413_v21  ;;  %v1465_v13 = vmul.f32 %v2706_v4, %v3241_v53  ;;  %v1475_v52 = vadd.f32 %v1459_v0, %v2714_v6  ;;  %v1487_v37 = vmax.f32 %v1471_v5, 0.0  ;;  %v1499_v43 = vpack.c.bf16 %v1483_v35, %v1483_v35  ;;  %v3245_v5 = vld [vmem:[#allocation20_spill] sm:$0xff] }
 0x1c0   :  { %1941 = vst.msk [vmem:[%s3165_s4 + $0x70] sm:$0xf] %vm1321_vm5, %v1414_v29  ;;  %v1466_v63 = vmul.f32 %v2706_v4, %v3242_v44  ;;  %v1476_v36 = vadd.f32 %v1460_v15, %v2714_v6  ;;  %v1488_v38 = vmax.f32 %v1472_v30, 0.0  ;;  %v1500_v45 = vpack.c.bf16 %v1484_v57, %v1484_v57  ;;  %v3246_v15 = vld [vmem:[#allocation23_spill] sm:$0xff] }
 0x1c1   :  { %1942 = vst.msk [vmem:[%s3165_s4 + $0x74] sm:$0xf] %vm1321_vm5, %v1415_v61  ;;  %v1477_v11 = vadd.f32 %v1461_v27, %v2714_v6  ;;  %v1478_v48 = vadd.f32 %v1462_v51, %v2714_v6  ;;  %v1489_v55 = vmax.f32 %v1473_v9, 0.0  ;;  %v1501_v2 = vpack.c.bf16 %v1485_v12, %v1485_v12  ;;  %v3247_v27 = vld [vmem:[#allocation26_spill] sm:$0xff] }
 0x1c2   :  { %1943 = vst.msk [vmem:[%s3165_s4 + $0x78] sm:$0xf] %vm1321_vm5, %v1416_v58  ;;  %v1479_v40 = vadd.f32 %v1463_v14, %v2714_v6  ;;  %v1480_v49 = vadd.f32 %v1464_v28, %v2714_v6  ;;  %v1490_v41 = vmax.f32 %v1474_v32, 0.0  ;;  %v1502_v50 = vpack.c.bf16 %v1486_v26, %v1486_v26  ;;  %v3243_v58 = vld [vmem:[#allocation16_spill] sm:$0xff]  ;;  %v3248_v14 = vld [vmem:[#allocation27_spill] sm:$0xff] }
 0x1c3   :  { %1944 = vst.msk [vmem:[%s3165_s4 + $0x7c] sm:$0xf] %vm1321_vm5, %v1417_v24  ;;  %v1481_v21 = vadd.f32 %v1465_v13, %v2714_v6  ;;  %v1491_v60 = vmax.f32 %v1475_v52, 0.0  ;;  %v1503_v31 = vpack.c.bf16 %v1487_v37, %v1487_v37  ;;  %v1482_v17 = vadd.f32 %v1466_v63, %v2714_v6 }
 0x1c4   :  { %1945 = vst.msk [vmem:[%s3165_s4 + $0x80] sm:$0xf] %vm1321_vm5, %v1499_v43  ;;  %v1492_v29 = vmax.f32 %v1476_v36, 0.0  ;;  %v1504_v61 = vpack.c.bf16 %v1488_v38, %v1488_v38  ;;  %v1493_v42 = vmax.f32 %v1477_v11, 0.0  ;;  %v1494_v62 = vmax.f32 %v1478_v48, 0.0 }
 0x1c5   :  { %1946 = vst.msk [vmem:[%s3165_s4 + $0x84] sm:$0xf] %vm1321_vm5, %v1500_v45  ;;  %v1505_v18 = vpack.c.bf16 %v1489_v55, %v1489_v55  ;;  %v1548_v24 = vmul.f32 %v2706_v4, %v3243_v58  ;;  %v1495_v34 = vmax.f32 %v1479_v40, 0.0  ;;  %v1496_v22 = vmax.f32 %v1480_v49, 0.0  ;;  %v3252_v58 = vld [vmem:[#allocation31_spill] sm:$0xff] }
 0x1c6   :  { %1947 = vst.msk [vmem:[%s3165_s4 + $0x88] sm:$0xf] %vm1321_vm5, %v1501_v2  ;;  %v1506_v39 = vpack.c.bf16 %v1490_v41, %v1490_v41  ;;  %v1549_v3 = vmul.f32 %v2706_v4, %v3244_v16  ;;  %v1497_v10 = vmax.f32 %v1481_v21, 0.0  ;;  %v1507_v1 = vpack.c.bf16 %v1491_v60, %v1491_v60 }
 0x1c7   :  { %1948 = vst.msk [vmem:[%s3165_s4 + $0x8c] sm:$0xf] %vm1321_vm5, %v1502_v50  ;;  %v1550_v35 = vmul.f32 %v2706_v4, %v3245_v5  ;;  %v1564_v47 = vadd.f32 %v1548_v24, %v2714_v6  ;;  %v1498_v0 = vmax.f32 %v1482_v17, 0.0  ;;  %v1508_v33 = vpack.c.bf16 %v1492_v29, %v1492_v29  ;;  %v3251_v29 = vld [vmem:[#allocation30_spill] sm:$0xff] }
 0x1c8   :  { %1949 = vst.msk [vmem:[%s3165_s4 + $0x90] sm:$0xf] %vm1321_vm5, %v1503_v31  ;;  %v1551_v30 = vmul.f32 %v2706_v4, %v3246_v15  ;;  %v1565_v57 = vadd.f32 %v1549_v3, %v2714_v6  ;;  %v1509_v7 = vpack.c.bf16 %v1493_v42, %v1493_v42  ;;  %v1552_v8 = vmul.f32 %v2706_v4, %v3247_v27 }
 0x1c9   :  { %1950 = vst.msk [vmem:[%s3165_s4 + $0x94] sm:$0xf] %vm1321_vm5, %v1504_v61  ;;  %v1563_v51 = vmul.f32 %v2706_v4, %v2690_v20  ;;  %v1566_v9 = vadd.f32 %v1550_v35, %v2714_v6  ;;  %v1510_v12 = vpack.c.bf16 %v1494_v62, %v1494_v62  ;;  %v1511_v59 = vpack.c.bf16 %v1495_v34, %v1495_v34 }
 0x1ca   :  { %1951 = vst.msk [vmem:[%s3165_s4 + $0x98] sm:$0xf] %vm1321_vm5, %v1505_v18  ;;  %v1553_v19 = vmul.f32 %v2706_v4, %v3248_v14  ;;  %v1567_v28 = vadd.f32 %v1551_v30, %v2714_v6  ;;  %v1554_v20 = vmul.f32 %v2706_v4, %v2636_v46  ;;  %v1568_v32 = vadd.f32 %v1552_v8, %v2714_v6 }
 0x1cb   :  { %1952 = vst.msk [vmem:[%s3165_s4 + $0x9c] sm:$0xf] %vm1321_vm5, %v1506_v39  ;;  %v3040_v26 = vadd.f32 %v1563_v51, %v2714_v6  ;;  %v1580_v53 = vmax.f32 %v1564_v47, 0.0  ;;  %v1512_v13 = vpack.c.bf16 %v1496_v22, %v1496_v22  ;;  %v1555_v52 = vmul.f32 %v2706_v4, %v2643_v23 }
 0x1cc   :  { %1953 = vst.msk [vmem:[%s3165_s4 + $0xa0] sm:$0xf] %vm1321_vm5, %v1507_v1  ;;  %v1569_v37 = vadd.f32 %v1553_v19, %v2714_v6  ;;  %v1581_v43 = vmax.f32 %v1565_v57, 0.0  ;;  %v1513_v44 = vpack.c.bf16 %v1497_v10, %v1497_v10  ;;  %v1556_v46 = vmul.f32 %v2706_v4, %v2649_v56 }
 0x1cd   :  { %1954 = vst.msk [vmem:[%s3165_s4 + $0xa4] sm:$0xf] %vm1321_vm5, %v1508_v33  ;;  %v1570_v63 = vadd.f32 %v1554_v20, %v2714_v6  ;;  %v1582_v36 = vmax.f32 %v1566_v9, 0.0  ;;  %v1514_v38 = vpack.c.bf16 %v1498_v0, %v1498_v0  ;;  %v1557_v23 = vmul.f32 %v2706_v4, %v2658_v54  ;;  %v3249_v54 = vld [vmem:[#allocation28_spill] sm:$0xff] }
 0x1ce   :  { %1955 = vst.msk [vmem:[%s3165_s4 + $0xa8] sm:$0xf] %vm1321_vm5, %v1509_v7  ;;  %v1571_v45 = vadd.f32 %v1555_v52, %v2714_v6  ;;  %v1583_v11 = vmax.f32 %v1567_v28, 0.0  ;;  %v1558_v56 = vmul.f32 %v2706_v4, %v2664_v25  ;;  %v1572_v48 = vadd.f32 %v1556_v46, %v2714_v6  ;;  %v3250_v25 = vld [vmem:[#allocation29_spill] sm:$0xff] }
 0x1cf   :  { %1956 = vst.msk [vmem:[%s3165_s4 + $0xac] sm:$0xf] %vm1321_vm5, %v1510_v12  ;;  %v1584_v55 = vmax.f32 %v1568_v32, 0.0  ;;  %v1596_v2 = vpack.c.bf16 %v1580_v53, %v1580_v53  ;;  %v1559_v40 = vmul.f32 %v2706_v4, %v3249_v54  ;;  %v1573_v49 = vadd.f32 %v1557_v23, %v2714_v6 }
 0x1d0   :  { %1957 = vst.msk [vmem:[%s3165_s4 + $0xb0] sm:$0xf] %vm1321_vm5, %v1511_v59  ;;  %v1585_v41 = vmax.f32 %v1569_v37, 0.0  ;;  %v1597_v50 = vpack.c.bf16 %v1581_v43, %v1581_v43  ;;  %v1560_v21 = vmul.f32 %v2706_v4, %v3250_v25  ;;  %v1574_v60 = vadd.f32 %v1558_v56, %v2714_v6 }
 0x1d1   :  { %1958 = vst.msk [vmem:[%s3165_s4 + $0xb4] sm:$0xf] %vm1321_vm5, %v1512_v13  ;;  %v1586_v31 = vmax.f32 %v1570_v63, 0.0  ;;  %v1598_v17 = vpack.c.bf16 %v1582_v36, %v1582_v36  ;;  %v1561_v61 = vmul.f32 %v2706_v4, %v3251_v29  ;;  %v1575_v42 = vadd.f32 %v1559_v40, %v2714_v6 }
 0x1d2   :  { %1959 = vst.msk [vmem:[%s3165_s4 + $0xb8] sm:$0xf] %vm1321_vm5, %v1513_v44  ;;  %v1587_v62 = vmax.f32 %v1571_v45, 0.0  ;;  %v1599_v18 = vpack.c.bf16 %v1583_v11, %v1583_v11  ;;  %v1562_v24 = vmul.f32 %v2706_v4, %v3252_v58  ;;  %v1576_v34 = vadd.f32 %v1560_v21, %v2714_v6 }
 0x1d3   :  { %1960 = vst.msk [vmem:[%s3165_s4 + $0xbc] sm:$0xf] %vm1321_vm5, %v1514_v38  ;;  %v1588_v22 = vmax.f32 %v1572_v48, 0.0  ;;  %v1600_v39 = vpack.c.bf16 %v1584_v55, %v1584_v55  ;;  %v1577_v16 = vadd.f32 %v1561_v61, %v2714_v6  ;;  %v1589_v3 = vmax.f32 %v1573_v49, 0.0 }
 0x1d4   :  { %1961 = vst.msk [vmem:[%s3165_s4 + $0xc0] sm:$0xf] %vm1321_vm5, %v1596_v2  ;;  %v1601_v10 = vpack.c.bf16 %v1585_v41, %v1585_v41  ;;  %v1578_v4 = vadd.f32 %v1562_v24, %v2714_v6  ;;  %v1590_v1 = vmax.f32 %v1574_v60, 0.0  ;;  %v1602_v5 = vpack.c.bf16 %v1586_v31, %v1586_v31 }
 0x1d5   :  { %1962 = vst.msk [vmem:[%s3165_s4 + $0xc4] sm:$0xf] %vm1321_vm5, %v1597_v50  ;;  %v1591_v35 = vmax.f32 %v1575_v42, 0.0  ;;  %v1603_v47 = vpack.c.bf16 %v1587_v62, %v1587_v62  ;;  %v1592_v0 = vmax.f32 %v1576_v34, 0.0  ;;  %v1604_v33 = vpack.c.bf16 %v1588_v22, %v1588_v22 }
 0x1d6   :  { %1963 = vst.msk [vmem:[%s3165_s4 + $0xc8] sm:$0xf] %vm1321_vm5, %v1598_v17  ;;  %v1593_v6 = vmax.f32 %v1577_v16, 0.0  ;;  %v1605_v15 = vpack.c.bf16 %v1589_v3, %v1589_v3  ;;  %v1594_v30 = vmax.f32 %v1578_v4, 0.0  ;;  %v1606_v57 = vpack.c.bf16 %v1590_v1, %v1590_v1 }
 0x1d7   :  { %1964 = vst.msk [vmem:[%s3165_s4 + $0xcc] sm:$0xf] %vm1321_vm5, %v1599_v18  ;;  %v1595_v7 = vmax.f32 %v3040_v26, 0.0  ;;  %v1607_v27 = vpack.c.bf16 %v1591_v35, %v1591_v35  ;;  %v1608_v8 = vpack.c.bf16 %v1592_v0, %v1592_v0 }
 0x1d8   :  { %1965 = vst.msk [vmem:[%s3165_s4 + $0xd0] sm:$0xf] %vm1321_vm5, %v1600_v39  ;;  %v1609_v51 = vpack.c.bf16 %v1593_v6, %v1593_v6  ;;  %v1610_v9 = vpack.c.bf16 %v1594_v30, %v1594_v30 }
 0x1d9   :  { %1966 = vst.msk [vmem:[%s3165_s4 + $0xd4] sm:$0xf] %vm1321_vm5, %v1601_v10  ;;  %v1611_v12 = vpack.c.bf16 %v1595_v7, %v1595_v7 }
 0x1da   :  { %1967 = vst.msk [vmem:[%s3165_s4 + $0xd8] sm:$0xf] %vm1321_vm5, %v1602_v5 }
 0x1db   :  { %1968 = vst.msk [vmem:[%s3165_s4 + $0xdc] sm:$0xf] %vm1321_vm5, %v1603_v47 }
 0x1dc   :  { %1969 = vst.msk [vmem:[%s3165_s4 + $0xe0] sm:$0xf] %vm1321_vm5, %v1604_v33 }
 0x1dd   :  { %1970 = vst.msk [vmem:[%s3165_s4 + $0xe4] sm:$0xf] %vm1321_vm5, %v1605_v15 }
 0x1de   :  { %1971 = vst.msk [vmem:[%s3165_s4 + $0xe8] sm:$0xf] %vm1321_vm5, %v1606_v57 }
 0x1df   :  { %1972 = vst.msk [vmem:[%s3165_s4 + $0xec] sm:$0xf] %vm1321_vm5, %v1607_v27 }
 0x1e0   :  { %1973 = vst.msk [vmem:[%s3165_s4 + $0xf0] sm:$0xf] %vm1321_vm5, %v1608_v8 }
 0x1e1   :  { %1974 = vst.msk [vmem:[%s3165_s4 + $0xf4] sm:$0xf] %vm1321_vm5, %v1609_v51 }
 0x1e2   :  { %1975 = vst.msk [vmem:[%s3165_s4 + $0xf8] sm:$0xf] %vm1321_vm5, %v1610_v9 }
 0x1e3   :  { %1976 = vst.msk [vmem:[%s3165_s4 + $0xfc] sm:$0xf] %vm1321_vm5, %v1611_v12 }

// kernel: conv_generator_forward.7
= control target key start
LH: loop header
LB: loop body
LE: loop exit
PB: predicated region body
PF: predicated region fallthrough
CT: control target
= control target key end

     0   :  { %vm245_vm0 = vcmask 261120   ;;  %s3098_s0 = inlined_call_operand.vmem [shape: bf16[4,512,32], index: 0, kind: input, shape index: {}]   ;;  %s3099_s1 = inlined_call_operand.vmem [shape: bf16[4,8,32], index: 1, kind: input, shape index: {}]   ;;  %s3100_s2 = inlined_call_operand.vmem [shape: f32[8,1], index: 2, kind: input, shape index: {}]   ;;  %s3101_s3 = inlined_call_operand.vmem [shape: f32[4,8,512], index: 3, kind: output, shape index: {}]  }
   0x1   :  { %v2330_v0 = vld [vmem:[%s3098_s0 + $0x38] sm:$0xff]  ;;  %v2329_v8 = vld [vmem:[%s3098_s0 + $0x30] sm:$0xff]  ;;  %v2328_v16 = vld [vmem:[%s3098_s0 + $0x28] sm:$0xff] }
   0x2   :  { %v2338_v1 = vld [vmem:[%s3098_s0 + $0x78] sm:$0xff]  ;;  %v271_v4 = vsel %vm245_vm0, %v2330_v0, 0  ;;  %v2337_v9 = vld [vmem:[%s3098_s0 + $0x70] sm:$0xff]  ;;  %v268_v12 = vsel %vm245_vm0, %v2329_v8, 0  ;;  %v2336_v17 = vld [vmem:[%s3098_s0 + $0x68] sm:$0xff]  ;;  %v265_v20 = vsel %vm245_vm0, %v2328_v16, 0 }
   0x3   :  { %v2346_v2 = vld [vmem:[%s3098_s0 + $0xb8] sm:$0xff]  ;;  %v295_v5 = vsel %vm245_vm0, %v2338_v1, 0  ;;  %345 = vmatpush.bf16.xpose.msra.mxu0 %v271_v4  ;;  %v2345_v10 = vld [vmem:[%s3098_s0 + $0xb0] sm:$0xff]  ;;  %v292_v13 = vsel %vm245_vm0, %v2337_v9, 0  ;;  %v2344_v18 = vld [vmem:[%s3098_s0 + $0xa8] sm:$0xff]  ;;  %v289_v21 = vsel %vm245_vm0, %v2336_v17, 0 }
   0x4   :  { %v2354_v3 = vld [vmem:[%s3098_s0 + $0xf8] sm:$0xff]  ;;  %v319_v6 = vsel %vm245_vm0, %v2346_v2, 0  ;;  %358 = vmatpush.bf16.xpose.msra.mxu1 %v295_v5  ;;  %v2353_v11 = vld [vmem:[%s3098_s0 + $0xf0] sm:$0xff]  ;;  %v316_v14 = vsel %vm245_vm0, %v2345_v10, 0  ;;  %v2352_v19 = vld [vmem:[%s3098_s0 + $0xe8] sm:$0xff]  ;;  %v313_v22 = vsel %vm245_vm0, %v2344_v18, 0 }
   0x5   :  { %v343_v7 = vsel %vm245_vm0, %v2354_v3, 0  ;;  %371 = vmatpush.bf16.xpose.msra.mxu2 %v319_v6  ;;  %v340_v15 = vsel %vm245_vm0, %v2353_v11, 0  ;;  %v337_v23 = vsel %vm245_vm0, %v2352_v19, 0  ;;  %v2327_v24 = vld [vmem:[%s3098_s0 + $0x20] sm:$0xff]  ;;  %v2326_v32 = vld [vmem:[%s3098_s0 + $0x18] sm:$0xff]  ;;  %v2325_v40 = vld [vmem:[%s3098_s0 + $0x10] sm:$0xff] }
   0x6   :  { %384 = vmatpush.bf16.xpose.msra.mxu3 %v343_v7  ;;  %v2335_v25 = vld [vmem:[%s3098_s0 + $0x60] sm:$0xff]  ;;  %v262_v28 = vsel %vm245_vm0, %v2327_v24, 0  ;;  %v2334_v33 = vld [vmem:[%s3098_s0 + $0x58] sm:$0xff]  ;;  %v259_v36 = vsel %vm245_vm0, %v2326_v32, 0  ;;  %v2333_v41 = vld [vmem:[%s3098_s0 + $0x50] sm:$0xff]  ;;  %v256_v44 = vsel %vm245_vm0, %v2325_v40, 0 }
   0x7   :  { %v2343_v26 = vld [vmem:[%s3098_s0 + $0xa0] sm:$0xff]  ;;  %v286_v29 = vsel %vm245_vm0, %v2335_v25, 0  ;;  %v2342_v34 = vld [vmem:[%s3098_s0 + $0x98] sm:$0xff]  ;;  %v283_v37 = vsel %vm245_vm0, %v2334_v33, 0  ;;  %v2341_v42 = vld [vmem:[%s3098_s0 + $0x90] sm:$0xff]  ;;  %v280_v45 = vsel %vm245_vm0, %v2333_v41, 0 }
   0x8   :  { %v2351_v27 = vld [vmem:[%s3098_s0 + $0xe0] sm:$0xff]  ;;  %v310_v30 = vsel %vm245_vm0, %v2343_v26, 0  ;;  %v2350_v35 = vld [vmem:[%s3098_s0 + $0xd8] sm:$0xff]  ;;  %v307_v38 = vsel %vm245_vm0, %v2342_v34, 0  ;;  %v2349_v43 = vld [vmem:[%s3098_s0 + $0xd0] sm:$0xff]  ;;  %v304_v46 = vsel %vm245_vm0, %v2341_v42, 0 }
   0x9   :  { %v334_v31 = vsel %vm245_vm0, %v2351_v27, 0  ;;  %v331_v39 = vsel %vm245_vm0, %v2350_v35, 0  ;;  %v328_v47 = vsel %vm245_vm0, %v2349_v43, 0  ;;  %v2324_v48 = vld [vmem:[%s3098_s0 + $0x8] sm:$0xff]  ;;  %v2323_v56 = vld [vmem:[%s3098_s0] sm:$0xff]  ;;  %v2362_v60 = vld [vmem:[%s3098_s0 + $0x138] sm:$0xff] }
   0xa   :  { %v2332_v49 = vld [vmem:[%s3098_s0 + $0x48] sm:$0xff]  ;;  %v253_v52 = vsel %vm245_vm0, %v2324_v48, 0  ;;  %v2331_v57 = vld [vmem:[%s3098_s0 + $0x40] sm:$0xff]  ;;  %v2370_v61 = vld [vmem:[%s3098_s0 + $0x178] sm:$0xff]  ;;  %v250_v0 = vsel %vm245_vm0, %v2323_v56, 0  ;;  %v663_v4 = vsel %vm245_vm0, %v2362_v60, 0 }
   0xb   :  { %346 = vmatpush.bf16.xpose.msra.mxu0 %v268_v12  ;;  %v2340_v50 = vld [vmem:[%s3098_s0 + $0x88] sm:$0xff]  ;;  %v277_v53 = vsel %vm245_vm0, %v2332_v49, 0  ;;  %v2339_v58 = vld [vmem:[%s3098_s0 + $0x80] sm:$0xff]  ;;  %v2378_v62 = vld [vmem:[%s3098_s0 + $0x1b8] sm:$0xff]  ;;  %v274_v1 = vsel %vm245_vm0, %v2331_v57, 0  ;;  %v687_v5 = vsel %vm245_vm0, %v2370_v61, 0 }
   0xc   :  { %359 = vmatpush.bf16.xpose.msra.mxu1 %v292_v13  ;;  %v2348_v51 = vld [vmem:[%s3098_s0 + $0xc8] sm:$0xff]  ;;  %v301_v54 = vsel %vm245_vm0, %v2340_v50, 0  ;;  %v2347_v59 = vld [vmem:[%s3098_s0 + $0xc0] sm:$0xff]  ;;  %v2386_v63 = vld [vmem:[%s3098_s0 + $0x1f8] sm:$0xff]  ;;  %v298_v2 = vsel %vm245_vm0, %v2339_v58, 0  ;;  %v711_v6 = vsel %vm245_vm0, %v2378_v62, 0 }
   0xd   :  { %372 = vmatpush.bf16.xpose.msra.mxu2 %v316_v14  ;;  %v325_v55 = vsel %vm245_vm0, %v2348_v51, 0  ;;  %v322_v3 = vsel %vm245_vm0, %v2347_v59, 0  ;;  %v735_v7 = vsel %vm245_vm0, %v2386_v63, 0  ;;  %v2361_v8 = vld [vmem:[%s3098_s0 + $0x130] sm:$0xff]  ;;  %v2360_v16 = vld [vmem:[%s3098_s0 + $0x128] sm:$0xff]  ;;  %v2359_v24 = vld [vmem:[%s3098_s0 + $0x120] sm:$0xff] }
   0xe   :  { %385 = vmatpush.bf16.xpose.msra.mxu3 %v340_v15  ;;  %v2369_v9 = vld [vmem:[%s3098_s0 + $0x170] sm:$0xff]  ;;  %v660_v12 = vsel %vm245_vm0, %v2361_v8, 0  ;;  %v2368_v17 = vld [vmem:[%s3098_s0 + $0x168] sm:$0xff]  ;;  %v2367_v25 = vld [vmem:[%s3098_s0 + $0x160] sm:$0xff] }
   0xf   :  { %v2377_v10 = vld [vmem:[%s3098_s0 + $0x1b0] sm:$0xff]  ;;  %v684_v13 = vsel %vm245_vm0, %v2369_v9, 0  ;;  %v2376_v18 = vld [vmem:[%s3098_s0 + $0x1a8] sm:$0xff]  ;;  %v14_v26 = vld [vmem:[%s3099_s1] sm:$0xf] }
  0x10   :  { %v2385_v11 = vld [vmem:[%s3098_s0 + $0x1f0] sm:$0xff]  ;;  %v708_v14 = vsel %vm245_vm0, %v2377_v10, 0  ;;  %v2384_v19 = vld [vmem:[%s3098_s0 + $0x1e8] sm:$0xff]  ;;  %v2375_v27 = vld [vmem:[%s3098_s0 + $0x1a0] sm:$0xff] }
  0x11   :  { %v732_v15 = vsel %vm245_vm0, %v2385_v11, 0  ;;  %v2358_v33 = vld [vmem:[%s3098_s0 + $0x118] sm:$0xff]  ;;  %v2357_v41 = vld [vmem:[%s3098_s0 + $0x110] sm:$0xff]  ;;  %v2356_v50 = vld [vmem:[%s3098_s0 + $0x108] sm:$0xff] }
  0x12   :  { %v2366_v34 = vld [vmem:[%s3098_s0 + $0x158] sm:$0xff]  ;;  %v2365_v42 = vld [vmem:[%s3098_s0 + $0x150] sm:$0xff]  ;;  %v2364_v51 = vld [vmem:[%s3098_s0 + $0x148] sm:$0xff] }
  0x13   :  { %347 = vmatpush.bf16.xpose.msra.mxu0 %v265_v20  ;;  %v657_v20 = vsel %vm245_vm0, %v2360_v16, 0  ;;  %v2374_v35 = vld [vmem:[%s3098_s0 + $0x198] sm:$0xff]  ;;  %v2373_v43 = vld [vmem:[%s3098_s0 + $0x190] sm:$0xff]  ;;  %v669_v56 = vsel %vm245_vm0, %v2364_v51, 0  ;;  %v2355_v59 = vld [vmem:[%s3098_s0 + $0x100] sm:$0xff] }
  0x14   :  { %360 = vmatpush.bf16.xpose.msra.mxu1 %v289_v21  ;;  %v681_v21 = vsel %vm245_vm0, %v2368_v17, 0  ;;  %v696_v48 = vsel %vm245_vm0, %v2373_v43, 0  ;;  %v2363_v60 = vld [vmem:[%s3098_s0 + $0x140] sm:$0xff]  ;;  %v2394_v63 = vld [vmem:[%s3098_s0 + $0x238] sm:$0xff]  ;;  %v2393_v11 = vld [vmem:[%s3098_s0 + $0x230] sm:$0xff] }
  0x15   :  { %373 = vmatpush.bf16.xpose.msra.mxu2 %v313_v22  ;;  %v705_v22 = vsel %vm245_vm0, %v2376_v18, 0  ;;  %v2371_v61 = vld [vmem:[%s3098_s0 + $0x180] sm:$0xff] }
  0x16   :  { %386 = vmatpush.bf16.xpose.msra.mxu3 %v337_v23  ;;  %v729_v23 = vsel %vm245_vm0, %v2384_v19, 0  ;;  %v2379_v62 = vld [vmem:[%s3098_s0 + $0x1c0] sm:$0xff]  ;;  %v2392_v19 = vld [vmem:[%s3098_s0 + $0x228] sm:$0xff] }
  0x1b   :  { %348 = vmatpush.bf16.xpose.msra.mxu0 %v262_v28  ;;  %v2383_v28 = vld [vmem:[%s3098_s0 + $0x1e0] sm:$0xff] }
  0x1c   :  { %361 = vmatpush.bf16.xpose.msra.mxu1 %v286_v29  ;;  %v654_v29 = vsel %vm245_vm0, %v2359_v24, 0  ;;  %v726_v32 = vsel %vm245_vm0, %v2383_v28, 0  ;;  %v2399_v28 = vld [vmem:[%s3098_s0 + $0x260] sm:$0xff] }
  0x1d   :  { %374 = vmatpush.bf16.xpose.msra.mxu2 %v310_v30  ;;  %v678_v30 = vsel %vm245_vm0, %v2367_v25, 0 }
  0x1e   :  { %387 = vmatpush.bf16.xpose.msra.mxu3 %v334_v31  ;;  %v702_v31 = vsel %vm245_vm0, %v2375_v27, 0  ;;  %v2391_v27 = vld [vmem:[%s3098_s0 + $0x220] sm:$0xff] }
  0x23   :  { %349 = vmatpush.bf16.xpose.msra.mxu0 %v259_v36  ;;  %v2382_v36 = vld [vmem:[%s3098_s0 + $0x1d8] sm:$0xff] }
  0x24   :  { %362 = vmatpush.bf16.xpose.msra.mxu1 %v283_v37  ;;  %v651_v37 = vsel %vm245_vm0, %v2358_v33, 0  ;;  %v723_v40 = vsel %vm245_vm0, %v2382_v36, 0  ;;  %v1071_v33 = vsel %vm245_vm0, %v2399_v28, 0  ;;  %v2390_v36 = vld [vmem:[%s3098_s0 + $0x218] sm:$0xff] }
  0x25   :  { %375 = vmatpush.bf16.xpose.msra.mxu2 %v307_v38  ;;  %v675_v38 = vsel %vm245_vm0, %v2366_v34, 0 }
  0x26   :  { %388 = vmatpush.bf16.xpose.msra.mxu3 %v331_v39  ;;  %v699_v39 = vsel %vm245_vm0, %v2374_v35, 0 }
  0x2b   :  { %350 = vmatpush.bf16.xpose.msra.mxu0 %v256_v44  ;;  %v2381_v44 = vld [vmem:[%s3098_s0 + $0x1d0] sm:$0xff] }
  0x2c   :  { %363 = vmatpush.bf16.xpose.msra.mxu1 %v280_v45  ;;  %v2486_v45 = vmov 0   ;;  %v720_v49 = vsel %vm245_vm0, %v2381_v44, 0  ;;  %v2389_v44 = vld [vmem:[%s3098_s0 + $0x210] sm:$0xff] }
  0x2d   :  { %376 = vmatpush.bf16.xpose.msra.mxu2 %v304_v46  ;;  %2452 = vset.pattern.permute.xlu0 %v2486_v45  ;;  %v648_v46 = vsel %vm245_vm0, %v2357_v41, 0 }
  0x2e   :  { %389 = vmatpush.bf16.xpose.msra.mxu3 %v328_v47  ;;  %2453 = vset.pattern.permute.xlu1 %v2486_v45  ;;  %v672_v47 = vsel %vm245_vm0, %v2365_v42, 0  ;;  %v2397_v45 = vld [vmem:[%s3098_s0 + $0x250] sm:$0xff] }
  0x33   :  { %351 = vmatpush.bf16.xpose.msra.mxu0 %v253_v52  ;;  %v2372_v52 = vld [vmem:[%s3098_s0 + $0x188] sm:$0xff] }
  0x34   :  { %364 = vmatpush.bf16.xpose.msra.mxu1 %v277_v53  ;;  %v2380_v53 = vld [vmem:[%s3098_s0 + $0x1c8] sm:$0xff]  ;;  %v693_v57 = vsel %vm245_vm0, %v2372_v52, 0 }
  0x35   :  { %377 = vmatpush.bf16.xpose.msra.mxu2 %v301_v54  ;;  %v79_v54 = vld [vmem:[%s3100_s2] sm:$0xff]  ;;  %v717_v58 = vsel %vm245_vm0, %v2380_v53, 0  ;;  %v2388_v52 = vld [vmem:[%s3098_s0 + $0x208] sm:$0xff] }
  0x36   :  { %390 = vmatpush.bf16.xpose.msra.mxu3 %v325_v55  ;;  %82 = vperm.xlu0 %2452, %v79_v54   ;;  %v645_v55 = vsel %vm245_vm0, %v2356_v50, 0  ;;  %v2396_v53 = vld [vmem:[%s3098_s0 + $0x248] sm:$0xff] }
  0x37   :  { %868 = vperm.xlu1 %2453, %v79_v54  }
  0x3b   :  { %352 = vmatpush.bf16.xpose.msra.mxu0 %v250_v0  ;;  %v2402_v0 = vld [vmem:[%s3098_s0 + $0x278] sm:$0xff] }
  0x3c   :  { %365 = vmatpush.bf16.xpose.msra.mxu1 %v274_v1  ;;  %v2410_v1 = vld [vmem:[%s3098_s0 + $0x2b8] sm:$0xff]  ;;  %v1080_v8 = vsel %vm245_vm0, %v2402_v0, 0 }
  0x3d   :  { %378 = vmatpush.bf16.xpose.msra.mxu2 %v298_v2  ;;  %v2418_v2 = vld [vmem:[%s3098_s0 + $0x2f8] sm:$0xff]  ;;  %v1104_v9 = vsel %vm245_vm0, %v2410_v1, 0 }
  0x3e   :  { %391 = vmatpush.bf16.xpose.msra.mxu3 %v322_v3  ;;  %475 = vperm.xlu0 %2452, %v79_v54   ;;  %v642_v3 = vsel %vm245_vm0, %v2355_v59, 0  ;;  %v1128_v10 = vsel %vm245_vm0, %v2418_v2, 0  ;;  %v2426_v0 = vld [vmem:[%s3098_s0 + $0x338] sm:$0xff] }
  0x3f   :  { %1261 = vperm.xlu1 %2453, %v79_v54   ;;  %v2404_v54 = vld [vmem:[%s3098_s0 + $0x288] sm:$0xff]  ;;  %v2434_v1 = vld [vmem:[%s3098_s0 + $0x378] sm:$0xff] }
  0x40   :  { %v2442_v2 = vld [vmem:[%s3098_s0 + $0x3b8] sm:$0xff] }
  0x42   :  { %1716 = vmatmul.msk.bf16.vlgmr.msra.gmra.mxu0 %vm245_vm0, %v14_v26 }
  0x43   :  { %737 = vmatpush.bf16.xpose.msrb.mxu0 %v663_v4  ;;  %1717 = vmatmul.msk.bf16.vlgmr.msra.gmra.mxu1 %vm245_vm0, %v14_v26  ;;  %v666_v4 = vsel %vm245_vm0, %v2363_v60, 0  ;;  %v2387_v60 = vld [vmem:[%s3098_s0 + $0x200] sm:$0xff] }
  0x44   :  { %750 = vmatpush.bf16.xpose.msrb.mxu1 %v687_v5  ;;  %1718 = vmatmul.msk.bf16.vlgmr.msra.gmra.mxu2 %vm245_vm0, %v14_v26  ;;  %v690_v5 = vsel %vm245_vm0, %v2371_v61, 0  ;;  %v2395_v61 = vld [vmem:[%s3098_s0 + $0x240] sm:$0xff] }
  0x45   :  { %763 = vmatpush.bf16.xpose.msrb.mxu2 %v711_v6  ;;  %1719 = vmatmul.msk.bf16.vlgmr.msra.gmra.mxu3 %vm245_vm0, %v14_v26  ;;  %v714_v6 = vsel %vm245_vm0, %v2379_v62, 0  ;;  %v2403_v62 = vld [vmem:[%s3098_s0 + $0x280] sm:$0xff] }
  0x46   :  { %776 = vmatpush.bf16.xpose.msrb.mxu3 %v735_v7  ;;  %v1056_v7 = vsel %vm245_vm0, %v2394_v63, 0  ;;  %v2411_v63 = vld [vmem:[%s3098_s0 + $0x2c0] sm:$0xff] }
  0x4b   :  { %738 = vmatpush.bf16.xpose.msrb.mxu0 %v660_v12  ;;  %v2401_v12 = vld [vmem:[%s3098_s0 + $0x270] sm:$0xff] }
  0x4c   :  { %751 = vmatpush.bf16.xpose.msrb.mxu1 %v684_v13  ;;  %v2409_v13 = vld [vmem:[%s3098_s0 + $0x2b0] sm:$0xff]  ;;  %v1077_v16 = vsel %vm245_vm0, %v2401_v12, 0 }
  0x4d   :  { %764 = vmatpush.bf16.xpose.msrb.mxu2 %v708_v14  ;;  %v2417_v14 = vld [vmem:[%s3098_s0 + $0x2f0] sm:$0xff]  ;;  %v1101_v17 = vsel %vm245_vm0, %v2409_v13, 0 }
  0x4e   :  { %777 = vmatpush.bf16.xpose.msrb.mxu3 %v732_v15  ;;  %v1053_v15 = vsel %vm245_vm0, %v2393_v11, 0  ;;  %v1125_v18 = vsel %vm245_vm0, %v2417_v14, 0  ;;  %v2425_v12 = vld [vmem:[%s3098_s0 + $0x330] sm:$0xff] }
  0x4f   :  { %v2433_v13 = vld [vmem:[%s3098_s0 + $0x370] sm:$0xff] }
  0x50   :  { %v2441_v14 = vld [vmem:[%s3098_s0 + $0x3b0] sm:$0xff] }
  0x53   :  { %739 = vmatpush.bf16.xpose.msrb.mxu0 %v657_v20  ;;  %v2400_v20 = vld [vmem:[%s3098_s0 + $0x268] sm:$0xff] }
  0x54   :  { %752 = vmatpush.bf16.xpose.msrb.mxu1 %v681_v21  ;;  %v2408_v21 = vld [vmem:[%s3098_s0 + $0x2a8] sm:$0xff]  ;;  %v1074_v24 = vsel %vm245_vm0, %v2400_v20, 0 }
  0x55   :  { %765 = vmatpush.bf16.xpose.msrb.mxu2 %v705_v22  ;;  %v2416_v22 = vld [vmem:[%s3098_s0 + $0x2e8] sm:$0xff]  ;;  %v1098_v25 = vsel %vm245_vm0, %v2408_v21, 0 }
  0x56   :  { %778 = vmatpush.bf16.xpose.msrb.mxu3 %v729_v23  ;;  %v1050_v23 = vsel %vm245_vm0, %v2392_v19, 0  ;;  %v1122_v26 = vsel %vm245_vm0, %v2416_v22, 0  ;;  %v1494_v19 = vsel %vm245_vm0, %v2441_v14, 0  ;;  %v2424_v21 = vld [vmem:[%s3098_s0 + $0x328] sm:$0xff] }
  0x57   :  { %v2432_v22 = vld [vmem:[%s3098_s0 + $0x368] sm:$0xff] }
  0x5b   :  { %740 = vmatpush.bf16.xpose.msrb.mxu0 %v654_v29  ;;  %v1720_v29 = vld [vmem:[%s3099_s1 + $0x4] sm:$0xf] }
  0x5c   :  { %753 = vmatpush.bf16.xpose.msrb.mxu1 %v678_v30  ;;  %v2407_v30 = vld [vmem:[%s3098_s0 + $0x2a0] sm:$0xff] }
  0x5d   :  { %766 = vmatpush.bf16.xpose.msrb.mxu2 %v702_v31  ;;  %v2415_v31 = vld [vmem:[%s3098_s0 + $0x2e0] sm:$0xff]  ;;  %v1095_v34 = vsel %vm245_vm0, %v2407_v30, 0 }
  0x5e   :  { %779 = vmatpush.bf16.xpose.msrb.mxu3 %v726_v32  ;;  %v1047_v32 = vsel %vm245_vm0, %v2391_v27, 0  ;;  %v1119_v35 = vsel %vm245_vm0, %v2415_v31, 0  ;;  %v2431_v30 = vld [vmem:[%s3098_s0 + $0x360] sm:$0xff] }
  0x5f   :  { %v2439_v31 = vld [vmem:[%s3098_s0 + $0x3a0] sm:$0xff] }
  0x63   :  { %741 = vmatpush.bf16.xpose.msrb.mxu0 %v651_v37  ;;  %v2398_v37 = vld [vmem:[%s3098_s0 + $0x258] sm:$0xff] }
  0x64   :  { %754 = vmatpush.bf16.xpose.msrb.mxu1 %v675_v38  ;;  %v2406_v38 = vld [vmem:[%s3098_s0 + $0x298] sm:$0xff]  ;;  %v1068_v41 = vsel %vm245_vm0, %v2398_v37, 0 }
  0x65   :  { %767 = vmatpush.bf16.xpose.msrb.mxu2 %v699_v39  ;;  %v2414_v39 = vld [vmem:[%s3098_s0 + $0x2d8] sm:$0xff]  ;;  %v1092_v42 = vsel %vm245_vm0, %v2406_v38, 0 }
  0x66   :  { %780 = vmatpush.bf16.xpose.msrb.mxu3 %v723_v40  ;;  %v1044_v40 = vsel %vm245_vm0, %v2390_v36, 0  ;;  %v1116_v43 = vsel %vm245_vm0, %v2414_v39, 0  ;;  %v2422_v37 = vld [vmem:[%s3098_s0 + $0x318] sm:$0xff] }
  0x67   :  { %v2430_v38 = vld [vmem:[%s3098_s0 + $0x358] sm:$0xff] }
  0x68   :  { %v2438_v39 = vld [vmem:[%s3098_s0 + $0x398] sm:$0xff] }
  0x6b   :  { %742 = vmatpush.bf16.xpose.msrb.mxu0 %v648_v46  ;;  %v2405_v46 = vld [vmem:[%s3098_s0 + $0x290] sm:$0xff] }
  0x6c   :  { %755 = vmatpush.bf16.xpose.msrb.mxu1 %v672_v47  ;;  %v2413_v47 = vld [vmem:[%s3098_s0 + $0x2d0] sm:$0xff]  ;;  %v1089_v50 = vsel %vm245_vm0, %v2405_v46, 0 }
  0x6d   :  { %768 = vmatpush.bf16.xpose.msrb.mxu2 %v696_v48  ;;  %v1041_v48 = vsel %vm245_vm0, %v2389_v44, 0  ;;  %v1113_v51 = vsel %vm245_vm0, %v2413_v47, 0  ;;  %v2421_v47 = vld [vmem:[%s3098_s0 + $0x310] sm:$0xff] }
  0x6e   :  { %781 = vmatpush.bf16.xpose.msrb.mxu3 %v720_v49  ;;  %v1065_v49 = vsel %vm245_vm0, %v2397_v45, 0 }
  0x73   :  { %743 = vmatpush.bf16.xpose.msrb.mxu0 %v645_v55  ;;  %v2412_v55 = vld [vmem:[%s3098_s0 + $0x2c8] sm:$0xff] }
  0x74   :  { %756 = vmatpush.bf16.xpose.msrb.mxu1 %v669_v56  ;;  %v1038_v56 = vsel %vm245_vm0, %v2388_v52, 0  ;;  %v1110_v59 = vsel %vm245_vm0, %v2412_v55, 0  ;;  %v2445_v52 = vld [vmem:[%s3098_s0 + $0x3d0] sm:$0xff] }
  0x75   :  { %769 = vmatpush.bf16.xpose.msrb.mxu2 %v693_v57  ;;  %v1062_v57 = vsel %vm245_vm0, %v2396_v53, 0  ;;  %v1434_v53 = vsel %vm245_vm0, %v2421_v47, 0 }
  0x76   :  { %782 = vmatpush.bf16.xpose.msrb.mxu3 %v717_v58  ;;  %v1086_v58 = vsel %vm245_vm0, %v2404_v54, 0 }
  0x7b   :  { %744 = vmatpush.bf16.xpose.msrb.mxu0 %v642_v3  ;;  %v2450_v3 = vld [vmem:[%s3098_s0 + $0x3f8] sm:$0xff] }
  0x7c   :  { %757 = vmatpush.bf16.xpose.msrb.mxu1 %v666_v4  ;;  %v1035_v4 = vsel %vm245_vm0, %v2387_v60, 0  ;;  %v1521_v11 = vsel %vm245_vm0, %v2450_v3, 0  ;;  %v2428_v60 = vld [vmem:[%s3098_s0 + $0x348] sm:$0xff] }
  0x7d   :  { %770 = vmatpush.bf16.xpose.msrb.mxu2 %v690_v5  ;;  %v1059_v5 = vsel %vm245_vm0, %v2395_v61, 0 }
  0x7e   :  { %783 = vmatpush.bf16.xpose.msrb.mxu3 %v714_v6  ;;  %v1083_v6 = vsel %vm245_vm0, %v2403_v62, 0 }
  0x82   :  { %1913 = vmatmul.msk.bf16.vlgmr.msrb.gmra.mxu0 %vm245_vm0, %v1720_v29 }
  0x83   :  { %1130 = vmatpush.bf16.xpose.msra.mxu0 %v1056_v7  ;;  %1914 = vmatmul.msk.bf16.vlgmr.msrb.gmra.mxu1 %vm245_vm0, %v1720_v29  ;;  %v1107_v7 = vsel %vm245_vm0, %v2411_v63, 0  ;;  %v2436_v63 = vld [vmem:[%s3098_s0 + $0x388] sm:$0xff] }
  0x84   :  { %1143 = vmatpush.bf16.xpose.msra.mxu1 %v1080_v8  ;;  %1915 = vmatmul.msk.bf16.vlgmr.msrb.gmra.mxu2 %vm245_vm0, %v1720_v29  ;;  %v1449_v8 = vsel %vm245_vm0, %v2426_v0, 0  ;;  %v2444_v0 = vld [vmem:[%s3098_s0 + $0x3c8] sm:$0xff] }
  0x85   :  { %1156 = vmatpush.bf16.xpose.msra.mxu2 %v1104_v9  ;;  %1916 = vmatmul.msk.bf16.vlgmr.msrb.gmra.mxu3 %vm245_vm0, %v1720_v29  ;;  %v1473_v9 = vsel %vm245_vm0, %v2434_v1, 0  ;;  %v2423_v29 = vld [vmem:[%s3098_s0 + $0x320] sm:$0xff] }
  0x86   :  { %1169 = vmatpush.bf16.xpose.msra.mxu3 %v1128_v10  ;;  %v1497_v10 = vsel %vm245_vm0, %v2442_v2, 0 }
  0x8b   :  { %1131 = vmatpush.bf16.xpose.msra.mxu0 %v1053_v15  ;;  %v2449_v15 = vld [vmem:[%s3098_s0 + $0x3f0] sm:$0xff] }
  0x8c   :  { %1144 = vmatpush.bf16.xpose.msra.mxu1 %v1077_v16  ;;  %v1921_v16 = vld [vmem:[%s3099_s1 + $0x8] sm:$0xf]  ;;  %v1518_v20 = vsel %vm245_vm0, %v2449_v15, 0 }
  0x8d   :  { %1157 = vmatpush.bf16.xpose.msra.mxu2 %v1101_v17  ;;  %v1446_v17 = vsel %vm245_vm0, %v2425_v12, 0  ;;  %v2435_v12 = vld [vmem:[%s3098_s0 + $0x380] sm:$0xff] }
  0x8e   :  { %1170 = vmatpush.bf16.xpose.msra.mxu3 %v1125_v18  ;;  %v1470_v18 = vsel %vm245_vm0, %v2433_v13, 0  ;;  %v2443_v13 = vld [vmem:[%s3098_s0 + $0x3c0] sm:$0xff] }
  0x93   :  { %1132 = vmatpush.bf16.xpose.msra.mxu0 %v1050_v23  ;;  %v2440_v23 = vld [vmem:[%s3098_s0 + $0x3a8] sm:$0xff] }
  0x94   :  { %1145 = vmatpush.bf16.xpose.msra.mxu1 %v1074_v24  ;;  %v2448_v24 = vld [vmem:[%s3098_s0 + $0x3e8] sm:$0xff]  ;;  %v1491_v27 = vsel %vm245_vm0, %v2440_v23, 0 }
  0x95   :  { %1158 = vmatpush.bf16.xpose.msra.mxu2 %v1098_v25  ;;  %v1443_v25 = vsel %vm245_vm0, %v2424_v21, 0  ;;  %v1515_v28 = vsel %vm245_vm0, %v2448_v24, 0  ;;  %v1500_v21 = vsel %vm245_vm0, %v2443_v13, 0 }
  0x96   :  { %1171 = vmatpush.bf16.xpose.msra.mxu3 %v1122_v26  ;;  %v1467_v26 = vsel %vm245_vm0, %v2432_v22, 0  ;;  %v2122_v22 = vld [vmem:[%s3099_s1 + $0xc] sm:$0xf] }
  0x9b   :  { %1133 = vmatpush.bf16.xpose.msra.mxu0 %v1047_v32  ;;  %v2447_v32 = vld [vmem:[%s3098_s0 + $0x3e0] sm:$0xff] }
  0x9c   :  { %1146 = vmatpush.bf16.xpose.msra.mxu1 %v1071_v33  ;;  %v1440_v33 = vsel %vm245_vm0, %v2423_v29, 0  ;;  %v1512_v36 = vsel %vm245_vm0, %v2447_v32, 0 }
  0x9d   :  { %1159 = vmatpush.bf16.xpose.msra.mxu2 %v1095_v34  ;;  %v1464_v34 = vsel %vm245_vm0, %v2431_v30, 0 }
  0x9e   :  { %1172 = vmatpush.bf16.xpose.msra.mxu3 %v1119_v35  ;;  %v1488_v35 = vsel %vm245_vm0, %v2439_v31, 0 }
  0xa3   :  { %1134 = vmatpush.bf16.xpose.msra.mxu0 %v1044_v40  ;;  %v2446_v40 = vld [vmem:[%s3098_s0 + $0x3d8] sm:$0xff] }
  0xa4   :  { %1147 = vmatpush.bf16.xpose.msra.mxu1 %v1068_v41  ;;  %v1437_v41 = vsel %vm245_vm0, %v2422_v37, 0  ;;  %v1509_v44 = vsel %vm245_vm0, %v2446_v40, 0 }
  0xa5   :  { %1160 = vmatpush.bf16.xpose.msra.mxu2 %v1092_v42  ;;  %v1461_v42 = vsel %vm245_vm0, %v2430_v38, 0 }
  0xa6   :  { %1173 = vmatpush.bf16.xpose.msra.mxu3 %v1116_v43  ;;  %v1485_v43 = vsel %vm245_vm0, %v2438_v39, 0 }
  0xa8   :  { %v83_v1 = vpop.permute.xlu0 %82 }
  0xa9   :  { %v869_v40 = vpop.permute.xlu1 %868 }
  0xab   :  { %1135 = vmatpush.bf16.xpose.msra.mxu0 %v1041_v48  ;;  %v2429_v48 = vld [vmem:[%s3098_s0 + $0x350] sm:$0xff] }
  0xac   :  { %1148 = vmatpush.bf16.xpose.msra.mxu1 %v1065_v49  ;;  %v1458_v54 = vsel %vm245_vm0, %v2429_v48, 0 }
  0xad   :  { %1161 = vmatpush.bf16.xpose.msra.mxu2 %v1089_v50 }
  0xae   :  { %1174 = vmatpush.bf16.xpose.msra.mxu3 %v1113_v51  ;;  %v2437_v51 = vld [vmem:[%s3098_s0 + $0x390] sm:$0xff] }
  0xaf   :  { %v1482_v55 = vsel %vm245_vm0, %v2437_v51, 0 }
  0xb0   :  { %v476_v23 = vpop.permute.xlu0 %475 }
  0xb3   :  { %1136 = vmatpush.bf16.xpose.msra.mxu0 %v1038_v56  ;;  %v1506_v56 = vsel %vm245_vm0, %v2445_v52, 0 }
  0xb4   :  { %1149 = vmatpush.bf16.xpose.msra.mxu1 %v1062_v57 }
  0xb5   :  { %1162 = vmatpush.bf16.xpose.msra.mxu2 %v1086_v58 }
  0xb6   :  { %1175 = vmatpush.bf16.xpose.msra.mxu3 %v1110_v59  ;;  %v2420_v59 = vld [vmem:[%s3098_s0 + $0x308] sm:$0xff] }
  0xbb   :  { %1137 = vmatpush.bf16.xpose.msra.mxu0 %v1035_v4 }
  0xbc   :  { %1150 = vmatpush.bf16.xpose.msra.mxu1 %v1059_v5 }
  0xbd   :  { %1163 = vmatpush.bf16.xpose.msra.mxu2 %v1083_v6  ;;  %v1431_v6 = vsel %vm245_vm0, %v2420_v59, 0 }
  0xbe   :  { %1176 = vmatpush.bf16.xpose.msra.mxu3 %v1107_v7  ;;  %v1455_v7 = vsel %vm245_vm0, %v2428_v60, 0 }
  0xbf   :  { %v354_v45 = vpop.f32.mrf.mxu0 }
  0xc0   :  { %v367_v46 = vpop.f32.mrf.mxu1  ;;  %v355_v2 = vadd.f32 %v354_v45, %v83_v1 }
  0xc1   :  { %v368_v3 = vadd.f32 %v367_v46, %v83_v1 }
  0xc2   :  { %2114 = vmatmul.msk.bf16.vlgmr.msra.gmra.mxu0 %vm245_vm0, %v1921_v16  ;;  %2454 = vtanh.f32 %v355_v2 }
  0xc3   :  { %1523 = vmatpush.bf16.xpose.msrb.mxu0 %v1449_v8  ;;  %2115 = vmatmul.msk.bf16.vlgmr.msra.gmra.mxu1 %vm245_vm0, %v1921_v16  ;;  %v1479_v8 = vsel %vm245_vm0, %v2436_v63, 0  ;;  %2456 = vtanh.f32 %v368_v3 }
  0xc4   :  { %1536 = vmatpush.bf16.xpose.msrb.mxu1 %v1473_v9  ;;  %2116 = vmatmul.msk.bf16.vlgmr.msra.gmra.mxu2 %vm245_vm0, %v1921_v16  ;;  %v1503_v9 = vsel %vm245_vm0, %v2444_v0, 0 }
  0xc5   :  { %1549 = vmatpush.bf16.xpose.msrb.mxu2 %v1497_v10  ;;  %2117 = vmatmul.msk.bf16.vlgmr.msra.gmra.mxu3 %vm245_vm0, %v1921_v16  ;;  %v2419_v10 = vld [vmem:[%s3098_s0 + $0x300] sm:$0xff] }
  0xc6   :  { %1562 = vmatpush.bf16.xpose.msrb.mxu3 %v1521_v11  ;;  %v2427_v11 = vld [vmem:[%s3098_s0 + $0x340] sm:$0xff] }
  0xc7   :  { %v380_v49 = vpop.f32.mrf.mxu2  ;;  %v356_v57 = vpop.f32.mrf.mxu0 }
  0xc8   :  { %v393_v50 = vpop.f32.mrf.mxu3  ;;  %v369_v58 = vpop.f32.mrf.mxu1  ;;  %v381_v4 = vadd.f32 %v380_v49, %v83_v1 }
  0xc9   :  { %v394_v5 = vadd.f32 %v393_v50, %v83_v1  ;;  %v2455_v14 = vpop.eup %2454  ;;  %v1262_v57 = vpop.permute.xlu1 %1261 }
  0xca   :  { %2458 = vtanh.f32 %v381_v4  ;;  %v2457_v15 = vpop.eup %2456  ;;  %401 = vst [vmem:[%s3101_s3] sm:$0xff] %v2455_v14 }
  0xcb   :  { %1524 = vmatpush.bf16.xpose.msrb.mxu0 %v1446_v17  ;;  %2460 = vtanh.f32 %v394_v5  ;;  %v1428_v17 = vsel %vm245_vm0, %v2419_v10, 0  ;;  %402 = vst [vmem:[%s3101_s3 + $0x8] sm:$0xff] %v2457_v15 }
  0xcc   :  { %1537 = vmatpush.bf16.xpose.msrb.mxu1 %v1470_v18  ;;  %v1452_v18 = vsel %vm245_vm0, %v2427_v11, 0 }
  0xcd   :  { %1550 = vmatpush.bf16.xpose.msrb.mxu2 %v1494_v19 }
  0xce   :  { %1563 = vmatpush.bf16.xpose.msrb.mxu3 %v1518_v20  ;;  %v1476_v20 = vsel %vm245_vm0, %v2435_v12, 0 }
  0xcf   :  { %v382_v61 = vpop.f32.mrf.mxu2 }
  0xd0   :  { %v395_v62 = vpop.f32.mrf.mxu3  ;;  %v2459_v16 = vpop.eup %2458 }
  0xd1   :  { %v2461_v19 = vpop.eup %2460  ;;  %403 = vst [vmem:[%s3101_s3 + $0x10] sm:$0xff] %v2459_v16 }
  0xd2   :  { %404 = vst [vmem:[%s3101_s3 + $0x18] sm:$0xff] %v2461_v19 }
  0xd3   :  { %1525 = vmatpush.bf16.xpose.msrb.mxu0 %v1443_v25 }
  0xd4   :  { %1538 = vmatpush.bf16.xpose.msrb.mxu1 %v1467_v26 }
  0xd5   :  { %1551 = vmatpush.bf16.xpose.msrb.mxu2 %v1491_v27 }
  0xd6   :  { %1564 = vmatpush.bf16.xpose.msrb.mxu3 %v1515_v28 }
  0xdb   :  { %1526 = vmatpush.bf16.xpose.msrb.mxu0 %v1440_v33 }
  0xdc   :  { %1539 = vmatpush.bf16.xpose.msrb.mxu1 %v1464_v34 }
  0xdd   :  { %1552 = vmatpush.bf16.xpose.msrb.mxu2 %v1488_v35 }
  0xde   :  { %1565 = vmatpush.bf16.xpose.msrb.mxu3 %v1512_v36 }
  0xe3   :  { %1527 = vmatpush.bf16.xpose.msrb.mxu0 %v1437_v41 }
  0xe4   :  { %1540 = vmatpush.bf16.xpose.msrb.mxu1 %v1461_v42 }
  0xe5   :  { %1553 = vmatpush.bf16.xpose.msrb.mxu2 %v1485_v43 }
  0xe6   :  { %1566 = vmatpush.bf16.xpose.msrb.mxu3 %v1509_v44 }
  0xeb   :  { %1528 = vmatpush.bf16.xpose.msrb.mxu0 %v1434_v53 }
  0xec   :  { %1541 = vmatpush.bf16.xpose.msrb.mxu1 %v1458_v54 }
  0xed   :  { %1554 = vmatpush.bf16.xpose.msrb.mxu2 %v1482_v55 }
  0xee   :  { %1567 = vmatpush.bf16.xpose.msrb.mxu3 %v1506_v56 }
  0xf3   :  { %1529 = vmatpush.bf16.xpose.msrb.mxu0 %v1431_v6 }
  0xf4   :  { %1542 = vmatpush.bf16.xpose.msrb.mxu1 %v1455_v7 }
  0xf5   :  { %1555 = vmatpush.bf16.xpose.msrb.mxu2 %v1479_v8 }
  0xf6   :  { %1568 = vmatpush.bf16.xpose.msrb.mxu3 %v1503_v9 }
  0xfb   :  { %1530 = vmatpush.bf16.xpose.msrb.mxu0 %v1428_v17 }
  0xfc   :  { %1543 = vmatpush.bf16.xpose.msrb.mxu1 %v1452_v18 }
  0xfd   :  { %1556 = vmatpush.bf16.xpose.msrb.mxu2 %v1476_v20 }
  0xfe   :  { %1569 = vmatpush.bf16.xpose.msrb.mxu3 %v1500_v21 }
  0xff   :  { %v746_v24 = vpop.f32.mrf.mxu0 }
 0x100   :  { %v759_v25 = vpop.f32.mrf.mxu1  ;;  %v747_v26 = vadd.f32 %v746_v24, %v476_v23 }
 0x101   :  { %v760_v27 = vadd.f32 %v759_v25, %v476_v23 }
 0x102   :  { %2315 = vmatmul.msk.bf16.vlgmr.msrb.gmra.mxu0 %vm245_vm0, %v2122_v22  ;;  %2462 = vtanh.f32 %v747_v26 }
 0x103   :  { %2316 = vmatmul.msk.bf16.vlgmr.msrb.gmra.mxu1 %vm245_vm0, %v2122_v22  ;;  %2464 = vtanh.f32 %v760_v27 }
 0x104   :  { %2317 = vmatmul.msk.bf16.vlgmr.msrb.gmra.mxu2 %vm245_vm0, %v2122_v22 }
 0x105   :  { %2318 = vmatmul.msk.bf16.vlgmr.msrb.gmra.mxu3 %vm245_vm0, %v2122_v22 }
 0x107   :  { %v772_v28 = vpop.f32.mrf.mxu2  ;;  %v748_v32 = vpop.f32.mrf.mxu0 }
 0x108   :  { %v785_v29 = vpop.f32.mrf.mxu3  ;;  %v773_v30 = vadd.f32 %v772_v28, %v476_v23  ;;  %v761_v33 = vpop.f32.mrf.mxu1 }
 0x109   :  { %v786_v31 = vadd.f32 %v785_v29, %v476_v23  ;;  %v2463_v34 = vpop.eup %2462 }
 0x10a   :  { %2466 = vtanh.f32 %v773_v30  ;;  %v2465_v35 = vpop.eup %2464  ;;  %1917 = vst [vmem:[%s3101_s3 + $0x20] sm:$0xff] %v2463_v34 }
 0x10b   :  { %2468 = vtanh.f32 %v786_v31  ;;  %1918 = vst [vmem:[%s3101_s3 + $0x28] sm:$0xff] %v2465_v35 }
 0x10f   :  { %v774_v36 = vpop.f32.mrf.mxu2 }
 0x110   :  { %v787_v37 = vpop.f32.mrf.mxu3  ;;  %v2467_v38 = vpop.eup %2466 }
 0x111   :  { %v2469_v39 = vpop.eup %2468  ;;  %1919 = vst [vmem:[%s3101_s3 + $0x30] sm:$0xff] %v2467_v38 }
 0x112   :  { %1920 = vst [vmem:[%s3101_s3 + $0x38] sm:$0xff] %v2469_v39 }
 0x13f   :  { %v1139_v41 = vpop.f32.mrf.mxu0 }
 0x140   :  { %v1152_v42 = vpop.f32.mrf.mxu1  ;;  %v1140_v43 = vadd.f32 %v1139_v41, %v869_v40 }
 0x141   :  { %v1153_v44 = vadd.f32 %v1152_v42, %v869_v40 }
 0x142   :  { %2470 = vtanh.f32 %v1140_v43 }
 0x143   :  { %2472 = vtanh.f32 %v1153_v44 }
 0x147   :  { %v1165_v45 = vpop.f32.mrf.mxu2  ;;  %v1141_v49 = vpop.f32.mrf.mxu0 }
 0x148   :  { %v1178_v46 = vpop.f32.mrf.mxu3  ;;  %v1166_v47 = vadd.f32 %v1165_v45, %v869_v40  ;;  %v1154_v50 = vpop.f32.mrf.mxu1 }
 0x149   :  { %v1179_v48 = vadd.f32 %v1178_v46, %v869_v40  ;;  %v2471_v51 = vpop.eup %2470 }
 0x14a   :  { %v2473_v52 = vpop.eup %2472  ;;  %2474 = vtanh.f32 %v1166_v47  ;;  %2118 = vst [vmem:[%s3101_s3 + $0x40] sm:$0xff] %v2471_v51 }
 0x14b   :  { %2476 = vtanh.f32 %v1179_v48  ;;  %2119 = vst [vmem:[%s3101_s3 + $0x48] sm:$0xff] %v2473_v52 }
 0x14f   :  { %v1167_v53 = vpop.f32.mrf.mxu2 }
 0x150   :  { %v1180_v54 = vpop.f32.mrf.mxu3  ;;  %v2475_v55 = vpop.eup %2474 }
 0x151   :  { %v2477_v56 = vpop.eup %2476  ;;  %2120 = vst [vmem:[%s3101_s3 + $0x50] sm:$0xff] %v2475_v55 }
 0x152   :  { %2121 = vst [vmem:[%s3101_s3 + $0x58] sm:$0xff] %v2477_v56 }
 0x17f   :  { %v1532_v58 = vpop.f32.mrf.mxu0 }
 0x180   :  { %v1545_v59 = vpop.f32.mrf.mxu1  ;;  %v1533_v60 = vadd.f32 %v1532_v58, %v1262_v57 }
 0x181   :  { %v1546_v61 = vadd.f32 %v1545_v59, %v1262_v57 }
 0x182   :  { %2478 = vtanh.f32 %v1533_v60 }
 0x183   :  { %2480 = vtanh.f32 %v1546_v61 }
 0x187   :  { %v1558_v62 = vpop.f32.mrf.mxu2  ;;  %v1534_v2 = vpop.f32.mrf.mxu0 }
 0x188   :  { %v1571_v63 = vpop.f32.mrf.mxu3  ;;  %v1559_v0 = vadd.f32 %v1558_v62, %v1262_v57  ;;  %v1547_v3 = vpop.f32.mrf.mxu1 }
 0x189   :  { %v1572_v1 = vadd.f32 %v1571_v63, %v1262_v57  ;;  %v2479_v4 = vpop.eup %2478 }
 0x18a   :  { %v2481_v5 = vpop.eup %2480  ;;  %2319 = vst [vmem:[%s3101_s3 + $0x60] sm:$0xff] %v2479_v4  ;;  %2482 = vtanh.f32 %v1559_v0 }
 0x18b   :  { %2320 = vst [vmem:[%s3101_s3 + $0x68] sm:$0xff] %v2481_v5  ;;  %2484 = vtanh.f32 %v1572_v1 }
 0x18f   :  { %v1560_v6 = vpop.f32.mrf.mxu2 }
 0x190   :  { %v1573_v7 = vpop.f32.mrf.mxu3  ;;  %v2483_v8 = vpop.eup %2482 }
 0x191   :  { %v2485_v9 = vpop.eup %2484  ;;  %2321 = vst [vmem:[%s3101_s3 + $0x70] sm:$0xff] %v2483_v8 }
 0x192   :  { %2322 = vst [vmem:[%s3101_s3 + $0x78] sm:$0xff] %v2485_v9 }

</bundles_post_ra>
